<compile_context>
chip_gen: v6e
topology: v6e:2x2x1
jax: 0.10.0
libtpu: 0.0.40
codegen_flags: <defaults>
</compile_context>

<pallas_src>
import functools

import jax
import jax.numpy as jnp
from jax.experimental import pallas as pl
from jax.experimental.pallas import tpu as pltpu


def _round_up(x, m):
    return (x + m - 1) // m * m


def _vmem_limit_bytes():
    # Generation-aware scoped-VMEM limit: 3/4 of physical, capped at 96 MiB
    # (=> 48 MiB on v7x's 64 MiB parts, 96 MiB on v5e/v6e's 128 MiB parts).
    try:
        cap = int(pltpu.get_tpu_info().vmem_capacity_bytes)
        return min(cap * 3 // 4, 96 * 1024 * 1024)
    except Exception:
        return 48 * 1024 * 1024


_VMEM_LIMIT = _vmem_limit_bytes()


# --------------------------------------------------------------------------
# Pallas kernels
# --------------------------------------------------------------------------
def _conv_tap_kernel(*refs, t_h, wo_pad, m_out, m_chunk, leaky, add_bias):
    """Fused conv-as-tap-sum.

    x_ref : (1, Mres, K)   bf16 — whole per-sample activation slab (resident).
             Flat layout: row h of the (padded-width) image starts at h*wo_pad.
    w_ref : (t_h, K, tn)   bf16 — one (K, tn) weight matrix per kernel-row tap.
    b_ref : (1, tn)        f32  — optional bias (only for non-normalized blocks).
    o_ref : (1, m_out, tn) bf16/f32.

    out[m] = sum_dh  x[m + dh*wo_pad] @ w[dh]   (+ bias) (+ LeakyReLU)
    All slice offsets are static (taps unrolled in Python), so only plain
    static slices / 2-D MXU dots are emitted.
    """
    if add_bias:
        x_ref, w_ref, b_ref, o_ref = refs
    else:
        x_ref, w_ref, o_ref = refs
        b_ref = None

    xv = x_ref[...][0]          # (Mres, K) bf16 value
    wv = w_ref[...]             # (t_h, K, tn) bf16 value
    tn = wv.shape[2]

    def compute(m0, mlen):
        acc = jnp.zeros((mlen, tn), jnp.float32)
        for dh in range(t_h):                      # 2 taps (stride-2) or 4 (stride-1)
            s = m0 + dh * wo_pad                   # static offset
            acc = acc + jnp.dot(
                xv[s:s + mlen], wv[dh], preferred_element_type=jnp.float32
            )
        if add_bias:
            acc = acc + b_ref[...]                 # (1, tn) broadcast, f32 epilogue
        if leaky:
            acc = jnp.where(acc >= 0, acc, 0.2 * acc)
        return acc.astype(o_ref.dtype)

    if m_chunk >= m_out:
        # Single chunk: one full lane-dense store.
        o_ref[...] = compute(0, m_out)[None]
    else:
        # Static chunking over output rows bounds the f32 accumulator size for
        # large images; offsets/lengths stay compile-time constants.
        for m0 in range(0, m_out, m_chunk):
            mlen = min(m_chunk, m_out - m0)
            o_ref[0, m0:m0 + mlen, :] = compute(m0, mlen)


def _instnorm_lrelu_kernel(x_ref, o_ref):
    """InstanceNorm2d (affine=False, eps=1e-5) + LeakyReLU(0.2).

    Block (1, HW, 128) bf16; stats in f32, single pass (sum & sum-of-squares),
    no materialized (x - mean) temp before the variance.
    """
    x = x_ref[...].astype(jnp.float32)
    inv_n = 1.0 / x.shape[1]
    s1 = jnp.sum(x, axis=1, keepdims=True)
    s2 = jnp.sum(x * x, axis=1, keepdims=True)
    mean = s1 * inv_n
    var = jnp.maximum(s2 * inv_n - mean * mean, 0.0)   # biased var (PyTorch IN)
    y = (x - mean) * jax.lax.rsqrt(var + 1e-5)
    o_ref[...] = jnp.where(y >= 0, y, 0.2 * y).astype(o_ref.dtype)


# --------------------------------------------------------------------------
# Pallas wrappers
# --------------------------------------------------------------------------
def pallas_conv_taps(x3, w3, b, *, t_h, wo_pad, ho, leaky, add_bias, out_dtype):
    """Grid (batch, Cout tiles); the tap reduction is fully inside the kernel."""
    N, mres, K = x3.shape
    _, _, coutp = w3.shape
    m_out = ho * wo_pad
    tn = min(coutp, 256)
    m_chunk = m_out if m_out <= 4096 else 4096

    kernel = functools.partial(
        _conv_tap_kernel, t_h=t_h, wo_pad=wo_pad, m_out=m_out,
        m_chunk=m_chunk, leaky=leaky, add_bias=add_bias)

    in_specs = [
        # Whole per-sample slab; index depends only on n -> DMA'd once per sample.
        pl.BlockSpec((1, mres, K), lambda n, j: (n, 0, 0)),
        pl.BlockSpec((t_h, K, tn), lambda n, j: (0, 0, j)),
    ]
    operands = [x3, w3]
    if add_bias:
        in_specs.append(pl.BlockSpec((1, tn), lambda n, j: (0, j)))
        operands.append(b)

    return pl.pallas_call(
        kernel,
        out_shape=jax.ShapeDtypeStruct((N, m_out, coutp), out_dtype),
        grid=(N, coutp // tn),
        in_specs=in_specs,
        out_specs=pl.BlockSpec((1, m_out, tn), lambda n, j: (n, 0, j)),
        compiler_params=pltpu.CompilerParams(
            dimension_semantics=("parallel", "parallel"),
            vmem_limit_bytes=_VMEM_LIMIT,
        ),
    )(*operands)


def pallas_instnorm_lrelu(y):
    """InstanceNorm + LeakyReLU, bf16 in/out, tiled over (sample, 128-ch slab)."""
    N, HW, C = y.shape
    assert C % 128 == 0
    # TODO(synk): two-pass HW-chunked variant (stats kernel + normalize kernel)
    # for very large HW (>16384) to bound the per-block VMEM on v7x.
    return pl.pallas_call(
        _instnorm_lrelu_kernel,
        out_shape=jax.ShapeDtypeStruct((N, HW, C), y.dtype),
        grid=(N, C // 128),
        in_specs=[pl.BlockSpec((1, HW, 128), lambda n, c: (n, 0, c))],
        out_specs=pl.BlockSpec((1, HW, 128), lambda n, c: (n, 0, c)),
        compiler_params=pltpu.CompilerParams(
            dimension_semantics=("parallel", "parallel"),
            vmem_limit_bytes=_VMEM_LIMIT,
        ),
    )(y)


# --------------------------------------------------------------------------
# Conv lowering glue (plain JAX, bf16, ~t_w x input materialized — no im2col)
# --------------------------------------------------------------------------
def _conv_block(x_nhwc, w_hwio, b, *, stride, pad_h, pad_w, leaky, norm,
                final=False):
    """Conv2d(k=4, stride, pad) [+ InstanceNorm] [+ LeakyReLU(0.2)] in NHWC."""
    N, H, W, Cin = x_nhwc.shape
    _, _, _, cout = w_hwio.shape

    x = x_nhwc.astype(jnp.bfloat16)
    xp = jnp.pad(x, ((0, 0), pad_h, pad_w, (0, 0)))
    Hp, Wp = xp.shape[1], xp.shape[2]

    if stride == 2:
        # Space-to-depth by 2: k=4,s=2 conv  ==  k=2,s=1 conv over 4*Cin channels.
        assert Hp % 2 == 0 and Wp % 2 == 0
        t = 2
        hb, wb, cg = Hp // 2, Wp // 2, 4 * Cin
        xb = xp.reshape(N, hb, 2, wb, 2, Cin).transpose(0, 1, 3, 2, 4, 5)
        xb = xb.reshape(N, hb, wb, cg)
        # w[kh,kw,c,o] -> wb[dh,dw,(2p+q)*Cin+c,o] with kh=2dh+p, kw=2dw+q
        wb_ = w_hwio.reshape(2, 2, 2, 2, Cin, cout).transpose(0, 2, 1, 3, 4, 5)
        wb_ = wb_.reshape(2, 2, cg, cout)
    else:
        t = 4
        hb, wb, cg = Hp, Wp, Cin
        xb = xp
        wb_ = w_hwio                                   # (4, 4, Cin, Cout)

    ho = hb - t + 1
    wo = wb - t + 1

    # Fold the kernel-COLUMN taps into the channel (lane) axis: x3[..., dw*cg+c]
    # = xb[..., ow+dw, c].  Only the 2-4 kernel-ROW taps remain; they are
    # reduced inside the Pallas kernel by shifted slices of the resident slab.
    x3 = jnp.concatenate([xb[:, :, dw:dw + wo, :] for dw in range(t)], axis=-1)
    k0 = t * cg
    wo_pad = _round_up(wo, 16)            # lane-row pitch multiple of 16 (bf16)
    k0p = _round_up(k0, 128)
    coutp = _round_up(cout, 128)

    x3 = jnp.pad(x3, ((0, 0), (0, 0), (0, wo_pad - wo), (0, k0p - k0)))
    x3 = x3.reshape(N, hb * wo_pad, k0p)

    w3 = wb_.reshape(t, k0, cout).astype(jnp.bfloat16)
    w3 = jnp.pad(w3, ((0, 0), (0, k0p - k0), (0, coutp - cout)))

    add_bias = not norm     # bias is exactly cancelled by affine-less InstanceNorm
    bp = None
    if add_bias:
        bp = jnp.pad(b.astype(jnp.float32), (0, coutp - cout)).reshape(1, coutp)

    out_dtype = jnp.float32 if final else jnp.bfloat16
    y = pallas_conv_taps(
        x3, w3, bp, t_h=t, wo_pad=wo_pad, ho=ho,
        leaky=(leaky and not norm), add_bias=add_bias, out_dtype=out_dtype)

    # Drop padded width columns / padded output channels (no-op at 128/256-sized
    # images where wo is already a multiple of 16).
    y = y.reshape(N, ho, wo_pad, coutp)[:, :, :wo, :cout]

    if norm:
        y = pallas_instnorm_lrelu(y.reshape(N, ho * wo, cout))
        y = y.reshape(N, ho, wo, cout)
    return y


# --------------------------------------------------------------------------
# Discriminator
# --------------------------------------------------------------------------
def init_discriminator_params(key, in_channels):
    """Deterministic synthetic weights; HWIO conv layout (4,4,Cin,Cout)."""
    dims = [(in_channels, 64), (64, 128), (128, 256), (256, 512), (512, 1)]
    params = {}
    for i, (cin, cout) in enumerate(dims, start=1):
        key, kw_, kb_ = jax.random.split(key, 3)
        params[f"w{i}"] = 0.02 * jax.random.normal(kw_, (4, 4, cin, cout), jnp.float32)
        params[f"b{i}"] = 0.01 * jax.random.normal(kb_, (cout,), jnp.float32)
    return params


def discriminator_forward(img_nchw, params):
    """PatchGAN discriminator. Input NCHW -> output NCHW (N, 1, H//16, W//16)."""
    x = jnp.transpose(img_nchw, (0, 2, 3, 1)).astype(jnp.float32)   # NHWC

    # block 1: Conv(C->64, k4, s2, p1) + LeakyReLU(0.2)        (no norm)
    x = _conv_block(x, params["w1"], params["b1"], stride=2,
                    pad_h=(1, 1), pad_w=(1, 1), leaky=True, norm=False)
    # block 2: Conv(64->128) + InstanceNorm + LeakyReLU
    x = _conv_block(x, params["w2"], params["b2"], stride=2,
                    pad_h=(1, 1), pad_w=(1, 1), leaky=True, norm=True)
    # block 3: Conv(128->256) + InstanceNorm + LeakyReLU
    x = _conv_block(x, params["w3"], params["b3"], stride=2,
                    pad_h=(1, 1), pad_w=(1, 1), leaky=True, norm=True)
    # block 4: Conv(256->512) + InstanceNorm + LeakyReLU
    x = _conv_block(x, params["w4"], params["b4"], stride=2,
                    pad_h=(1, 1), pad_w=(1, 1), leaky=True, norm=True)
    # ZeroPad2d((1,0,1,0)) then Conv(512->1, k4, s1, p1): total pad (2,1)/(2,1)
    # (Cout=1 is lane-padded to 128 inside the wrapper; absolute waste is tiny.)
    x = _conv_block(x, params["w5"], params["b5"], stride=1,
                    pad_h=(2, 1), pad_w=(2, 1), leaky=False, norm=False,
                    final=True)

    return jnp.transpose(x, (0, 3, 1, 2))               # back to NCHW


# --------------------------------------------------------------------------
if __name__ == "__main__":
    key = jax.random.PRNGKey(0)
    k_img, k_par = jax.random.split(key)

    # Small, divisible-by-16 spatial size consistent with the module.
    N, C, H, W = 2, 3, 32, 32
    img = jax.random.normal(k_img, (N, C, H, W), jnp.float32)
    params = init_discriminator_params(k_par, C)

    fwd = jax.jit(discriminator_forward)
    out = fwd(img, params)
    out = jax.block_until_ready(out)

    expected_shape = (N, 1, H // 2 ** 4, W // 2 ** 4)
    assert out.shape == expected_shape, (out.shape, expected_shape)
    assert bool(jnp.all(jnp.isfinite(out)))

    print("KERNEL_OK")
</pallas_src>

<mosaic_0001>
module attributes {stable_mosaic.version = 11 : i64} {
  func.func @_conv_tap_kernel(%arg0: i32, %arg1: i32, %arg2: memref<1x272x128xbf16, #tpu.memory_space<vmem>>, %arg3: memref<2x128x128xbf16, #tpu.memory_space<vmem>>, %arg4: memref<1x128xf32, #tpu.memory_space<vmem>>, %arg5: memref<1x256x128xbf16, #tpu.memory_space<vmem>>) attributes {dimension_semantics = [#tpu.dimension_semantics<parallel>, #tpu.dimension_semantics<parallel>], iteration_bounds = array<i64: 2, 1>, scalar_prefetch = 0 : i64, scratch_operands = 0 : i64, tpu.core_type = #tpu.core_type<tc>, window_params = [{transform_indices = @transform_0, window_bounds = array<i64: 1, 272, 128>}, {transform_indices = @transform_1, window_bounds = array<i64: 2, 128, 128>}, {transform_indices = @transform_2, window_bounds = array<i64: 1, 128>}, {transform_indices = @transform_3, window_bounds = array<i64: 1, 256, 128>}]} {
    %c0 = arith.constant 0 : index
    %c0_0 = arith.constant 0 : index
    %c0_1 = arith.constant 0 : index
    %0 = vector.load %arg2[%c0, %c0_0, %c0_1] : memref<1x272x128xbf16, #tpu.memory_space<vmem>>, vector<1x272x128xbf16>
    %1 = vector.shape_cast %0 : vector<1x272x128xbf16> to vector<272x128xbf16>
    %c0_2 = arith.constant 0 : index
    %c0_3 = arith.constant 0 : index
    %c0_4 = arith.constant 0 : index
    %2 = vector.load %arg3[%c0_2, %c0_3, %c0_4] : memref<2x128x128xbf16, #tpu.memory_space<vmem>>, vector<2x128x128xbf16>
    %cst = arith.constant 0.000000e+00 : f32
    %3 = vector.broadcast %cst : f32 to vector<256x128xf32>
    %4 = vector.extract_strided_slice %1 {offsets = [0, 0], sizes = [256, 128], strides = [1, 1]} : vector<272x128xbf16> to vector<256x128xbf16>
    %5 = vector.extract_strided_slice %2 {offsets = [0, 0, 0], sizes = [1, 128, 128], strides = [1, 1, 1]} : vector<2x128x128xbf16> to vector<1x128x128xbf16>
    %6 = vector.shape_cast %5 : vector<1x128x128xbf16> to vector<128x128xbf16>
    %cst_5 = arith.constant dense<0.000000e+00> : vector<256x128xf32>
    %7 = tpu.matmul %4, %6, %cst_5 {dimension_numbers = #tpu.dot_dimension_numbers<[1], [0], [0], [1], [0, 0, 1, 1], [], []>} : vector<256x128xbf16>, vector<128x128xbf16>, vector<256x128xf32> -> vector<256x128xf32>
    %8 = arith.addf %3, %7 : vector<256x128xf32>
    %9 = vector.extract_strided_slice %1 {offsets = [16, 0], sizes = [256, 128], strides = [1, 1]} : vector<272x128xbf16> to vector<256x128xbf16>
    %10 = vector.extract_strided_slice %2 {offsets = [1, 0, 0], sizes = [1, 128, 128], strides = [1, 1, 1]} : vector<2x128x128xbf16> to vector<1x128x128xbf16>
    %11 = vector.shape_cast %10 : vector<1x128x128xbf16> to vector<128x128xbf16>
    %cst_6 = arith.constant dense<0.000000e+00> : vector<256x128xf32>
    %12 = tpu.matmul %9, %11, %cst_6 {dimension_numbers = #tpu.dot_dimension_numbers<[1], [0], [0], [1], [0, 0, 1, 1], [], []>} : vector<256x128xbf16>, vector<128x128xbf16>, vector<256x128xf32> -> vector<256x128xf32>
    %13 = arith.addf %8, %12 : vector<256x128xf32>
    %c0_7 = arith.constant 0 : index
    %c0_8 = arith.constant 0 : index
    %14 = vector.load %arg4[%c0_7, %c0_8] : memref<1x128xf32, #tpu.memory_space<vmem>>, vector<1x128xf32>
    %15 = vector.broadcast %14 : vector<1x128xf32> to vector<256x128xf32>
    %16 = arith.addf %13, %15 : vector<256x128xf32>
    %cst_9 = arith.constant 0.000000e+00 : f32
    %17 = vector.broadcast %cst_9 : f32 to vector<256x128xf32>
    %18 = arith.cmpf oge, %16, %17 : vector<256x128xf32>
    %cst_10 = arith.constant 2.000000e-01 : f32
    %19 = vector.broadcast %cst_10 : f32 to vector<256x128xf32>
    %20 = arith.mulf %19, %16 : vector<256x128xf32>
    %21 = arith.select %18, %16, %20 : vector<256x128xi1>, vector<256x128xf32>
    %22 = arith.truncf %21 : vector<256x128xf32> to vector<256x128xbf16>
    %23 = vector.shape_cast %22 : vector<256x128xbf16> to vector<1x256x128xbf16>
    %c0_11 = arith.constant 0 : index
    %c0_12 = arith.constant 0 : index
    %c0_13 = arith.constant 0 : index
    %24 = vector.load %arg5[%c0_11, %c0_12, %c0_13] : memref<1x256x128xbf16, #tpu.memory_space<vmem>>, vector<1x256x128xbf16>
    tpu.vector_store %arg5[%c0_11, %c0_12, %c0_13], %23 {strides = array<i32>} : memref<1x256x128xbf16, #tpu.memory_space<vmem>>, vector<1x256x128xbf16>,
    return
  }
  func.func @transform_0(%arg0: i32, %arg1: i32) -> (i32, i32, i32) {
    %c0_i32 = arith.constant 0 : i32
    %c0_i32_0 = arith.constant 0 : i32
    %c0_i32_1 = arith.constant 0 : i32
    return %arg0, %c0_i32, %c0_i32_0 : i32, i32, i32
  }
  func.func @transform_1(%arg0: i32, %arg1: i32) -> (i32, i32, i32) {
    %c0_i32 = arith.constant 0 : i32
    %c0_i32_0 = arith.constant 0 : i32
    %c0_i32_1 = arith.constant 0 : i32
    return %c0_i32, %c0_i32_0, %arg1 : i32, i32, i32
  }
  func.func @transform_2(%arg0: i32, %arg1: i32) -> (i32, i32) {
    %c0_i32 = arith.constant 0 : i32
    %c0_i32_0 = arith.constant 0 : i32
    return %c0_i32, %arg1 : i32, i32
  }
  func.func @transform_3(%arg0: i32, %arg1: i32) -> (i32, i32, i32) {
    %c0_i32 = arith.constant 0 : i32
    %c0_i32_0 = arith.constant 0 : i32
    return %arg0, %c0_i32, %arg1 : i32, i32, i32
  }
}

module attributes {stable_mosaic.version = 11 : i64} {
  func.func @_conv_tap_kernel(%arg0: i32, %arg1: i32, %arg2: memref<1x144x512xbf16, #tpu.memory_space<vmem>>, %arg3: memref<2x512x128xbf16, #tpu.memory_space<vmem>>, %arg4: memref<1x128x128xbf16, #tpu.memory_space<vmem>>) attributes {dimension_semantics = [#tpu.dimension_semantics<parallel>, #tpu.dimension_semantics<parallel>], iteration_bounds = array<i64: 2, 1>, scalar_prefetch = 0 : i64, scratch_operands = 0 : i64, tpu.core_type = #tpu.core_type<tc>, window_params = [{transform_indices = @transform_0, window_bounds = array<i64: 1, 144, 512>}, {transform_indices = @transform_1, window_bounds = array<i64: 2, 512, 128>}, {transform_indices = @transform_2, window_bounds = array<i64: 1, 128, 128>}]} {
    %c0 = arith.constant 0 : index
    %c0_0 = arith.constant 0 : index
    %c0_1 = arith.constant 0 : index
    %0 = vector.load %arg2[%c0, %c0_0, %c0_1] : memref<1x144x512xbf16, #tpu.memory_space<vmem>>, vector<1x144x512xbf16>
    %1 = vector.shape_cast %0 : vector<1x144x512xbf16> to vector<144x512xbf16>
    %c0_2 = arith.constant 0 : index
    %c0_3 = arith.constant 0 : index
    %c0_4 = arith.constant 0 : index
    %2 = vector.load %arg3[%c0_2, %c0_3, %c0_4] : memref<2x512x128xbf16, #tpu.memory_space<vmem>>, vector<2x512x128xbf16>
    %cst = arith.constant 0.000000e+00 : f32
    %3 = vector.broadcast %cst : f32 to vector<128x128xf32>
    %4 = vector.extract_strided_slice %1 {offsets = [0, 0], sizes = [128, 512], strides = [1, 1]} : vector<144x512xbf16> to vector<128x512xbf16>
    %5 = vector.extract_strided_slice %2 {offsets = [0, 0, 0], sizes = [1, 512, 128], strides = [1, 1, 1]} : vector<2x512x128xbf16> to vector<1x512x128xbf16>
    %6 = vector.shape_cast %5 : vector<1x512x128xbf16> to vector<512x128xbf16>
    %cst_5 = arith.constant dense<0.000000e+00> : vector<128x128xf32>
    %7 = tpu.matmul %4, %6, %cst_5 {dimension_numbers = #tpu.dot_dimension_numbers<[1], [0], [0], [1], [0, 0, 1, 1], [], []>} : vector<128x512xbf16>, vector<512x128xbf16>, vector<128x128xf32> -> vector<128x128xf32>
    %8 = arith.addf %3, %7 : vector<128x128xf32>
    %9 = vector.extract_strided_slice %1 {offsets = [16, 0], sizes = [128, 512], strides = [1, 1]} : vector<144x512xbf16> to vector<128x512xbf16>
    %10 = vector.extract_strided_slice %2 {offsets = [1, 0, 0], sizes = [1, 512, 128], strides = [1, 1, 1]} : vector<2x512x128xbf16> to vector<1x512x128xbf16>
    %11 = vector.shape_cast %10 : vector<1x512x128xbf16> to vector<512x128xbf16>
    %cst_6 = arith.constant dense<0.000000e+00> : vector<128x128xf32>
    %12 = tpu.matmul %9, %11, %cst_6 {dimension_numbers = #tpu.dot_dimension_numbers<[1], [0], [0], [1], [0, 0, 1, 1], [], []>} : vector<128x512xbf16>, vector<512x128xbf16>, vector<128x128xf32> -> vector<128x128xf32>
    %13 = arith.addf %8, %12 : vector<128x128xf32>
    %14 = arith.truncf %13 : vector<128x128xf32> to vector<128x128xbf16>
    %15 = vector.shape_cast %14 : vector<128x128xbf16> to vector<1x128x128xbf16>
    %c0_7 = arith.constant 0 : index
    %c0_8 = arith.constant 0 : index
    %c0_9 = arith.constant 0 : index
    %16 = vector.load %arg4[%c0_7, %c0_8, %c0_9] : memref<1x128x128xbf16, #tpu.memory_space<vmem>>, vector<1x128x128xbf16>
    tpu.vector_store %arg4[%c0_7, %c0_8, %c0_9], %15 {strides = array<i32>} : memref<1x128x128xbf16, #tpu.memory_space<vmem>>, vector<1x128x128xbf16>,
    return
  }
  func.func @transform_0(%arg0: i32, %arg1: i32) -> (i32, i32, i32) {
    %c0_i32 = arith.constant 0 : i32
    %c0_i32_0 = arith.constant 0 : i32
    %c0_i32_1 = arith.constant 0 : i32
    return %arg0, %c0_i32, %c0_i32_0 : i32, i32, i32
  }
  func.func @transform_1(%arg0: i32, %arg1: i32) -> (i32, i32, i32) {
    %c0_i32 = arith.constant 0 : i32
    %c0_i32_0 = arith.constant 0 : i32
    %c0_i32_1 = arith.constant 0 : i32
    return %c0_i32, %c0_i32_0, %arg1 : i32, i32, i32
  }
  func.func @transform_2(%arg0: i32, %arg1: i32) -> (i32, i32, i32) {
    %c0_i32 = arith.constant 0 : i32
    %c0_i32_0 = arith.constant 0 : i32
    return %arg0, %c0_i32, %arg1 : i32, i32, i32
  }
}

module attributes {stable_mosaic.version = 11 : i64} {
  func.func @_instnorm_lrelu_kernel(%arg0: i32, %arg1: i32, %arg2: memref<1x64x128xbf16, #tpu.memory_space<vmem>>, %arg3: memref<1x64x128xbf16, #tpu.memory_space<vmem>>) attributes {dimension_semantics = [#tpu.dimension_semantics<parallel>, #tpu.dimension_semantics<parallel>], iteration_bounds = array<i64: 2, 1>, scalar_prefetch = 0 : i64, scratch_operands = 0 : i64, tpu.core_type = #tpu.core_type<tc>, window_params = [{transform_indices = @transform_0, window_bounds = array<i64: 1, 64, 128>}, {transform_indices = @transform_1, window_bounds = array<i64: 1, 64, 128>}]} {
    %c0 = arith.constant 0 : index
    %c0_0 = arith.constant 0 : index
    %c0_1 = arith.constant 0 : index
    %0 = vector.load %arg2[%c0, %c0_0, %c0_1] : memref<1x64x128xbf16, #tpu.memory_space<vmem>>, vector<1x64x128xbf16>
    %1 = arith.extf %0 : vector<1x64x128xbf16> to vector<1x64x128xf32>
    %cst = arith.constant dense<0.000000e+00> : vector<1x128xf32>
    %2 = vector.multi_reduction <add>, %1, %cst [1] : vector<1x64x128xf32> to vector<1x128xf32>
    %3 = vector.shape_cast %2 : vector<1x128xf32> to vector<1x1x128xf32>
    %4 = arith.mulf %1, %1 : vector<1x64x128xf32>
    %cst_2 = arith.constant dense<0.000000e+00> : vector<1x128xf32>
    %5 = vector.multi_reduction <add>, %4, %cst_2 [1] : vector<1x64x128xf32> to vector<1x128xf32>
    %6 = vector.shape_cast %5 : vector<1x128xf32> to vector<1x1x128xf32>
    %cst_3 = arith.constant 1.562500e-02 : f32
    %7 = vector.broadcast %cst_3 : f32 to vector<1x1x128xf32>
    %8 = arith.mulf %3, %7 : vector<1x1x128xf32>
    %cst_4 = arith.constant 1.562500e-02 : f32
    %9 = vector.broadcast %cst_4 : f32 to vector<1x1x128xf32>
    %10 = arith.mulf %6, %9 : vector<1x1x128xf32>
    %11 = arith.mulf %8, %8 : vector<1x1x128xf32>
    %12 = arith.subf %10, %11 : vector<1x1x128xf32>
    %cst_5 = arith.constant 0.000000e+00 : f32
    %13 = vector.broadcast %cst_5 : f32 to vector<1x1x128xf32>
    %14 = arith.maximumf %12, %13 : vector<1x1x128xf32>
    %15 = vector.broadcast %8 : vector<1x1x128xf32> to vector<1x64x128xf32>
    %16 = arith.subf %1, %15 : vector<1x64x128xf32>
    %cst_6 = arith.constant 9.99999974E-6 : f32
    %17 = vector.broadcast %cst_6 : f32 to vector<1x1x128xf32>
    %18 = arith.addf %14, %17 : vector<1x1x128xf32>
    %19 = math.rsqrt %18 : vector<1x1x128xf32>
    %20 = vector.broadcast %19 : vector<1x1x128xf32> to vector<1x64x128xf32>
    %21 = arith.mulf %16, %20 : vector<1x64x128xf32>
    %cst_7 = arith.constant 0.000000e+00 : f32
    %22 = vector.broadcast %cst_7 : f32 to vector<1x64x128xf32>
    %23 = arith.cmpf oge, %21, %22 : vector<1x64x128xf32>
    %cst_8 = arith.constant 2.000000e-01 : f32
    %24 = vector.broadcast %cst_8 : f32 to vector<1x64x128xf32>
    %25 = arith.mulf %24, %21 : vector<1x64x128xf32>
    %26 = arith.select %23, %21, %25 : vector<1x64x128xi1>, vector<1x64x128xf32>
    %27 = arith.truncf %26 : vector<1x64x128xf32> to vector<1x64x128xbf16>
    %c0_9 = arith.constant 0 : index
    %c0_10 = arith.constant 0 : index
    %c0_11 = arith.constant 0 : index
    %28 = vector.load %arg3[%c0_9, %c0_10, %c0_11] : memref<1x64x128xbf16, #tpu.memory_space<vmem>>, vector<1x64x128xbf16>
    tpu.vector_store %arg3[%c0_9, %c0_10, %c0_11], %27 {strides = array<i32>} : memref<1x64x128xbf16, #tpu.memory_space<vmem>>, vector<1x64x128xbf16>,
    return
  }
  func.func @transform_0(%arg0: i32, %arg1: i32) -> (i32, i32, i32) {
    %c0_i32 = arith.constant 0 : i32
    %c0_i32_0 = arith.constant 0 : i32
    return %arg0, %c0_i32, %arg1 : i32, i32, i32
  }
  func.func @transform_1(%arg0: i32, %arg1: i32) -> (i32, i32, i32) {
    %c0_i32 = arith.constant 0 : i32
    %c0_i32_0 = arith.constant 0 : i32
    return %arg0, %c0_i32, %arg1 : i32, i32, i32
  }
}

module attributes {stable_mosaic.version = 11 : i64} {
  func.func @_conv_tap_kernel(%arg0: i32, %arg1: i32, %arg2: memref<1x80x1024xbf16, #tpu.memory_space<vmem>>, %arg3: memref<2x1024x256xbf16, #tpu.memory_space<vmem>>, %arg4: memref<1x64x256xbf16, #tpu.memory_space<vmem>>) attributes {dimension_semantics = [#tpu.dimension_semantics<parallel>, #tpu.dimension_semantics<parallel>], iteration_bounds = array<i64: 2, 1>, scalar_prefetch = 0 : i64, scratch_operands = 0 : i64, tpu.core_type = #tpu.core_type<tc>, window_params = [{transform_indices = @transform_0, window_bounds = array<i64: 1, 80, 1024>}, {transform_indices = @transform_1, window_bounds = array<i64: 2, 1024, 256>}, {transform_indices = @transform_2, window_bounds = array<i64: 1, 64, 256>}]} {
    %c0 = arith.constant 0 : index
    %c0_0 = arith.constant 0 : index
    %c0_1 = arith.constant 0 : index
    %0 = vector.load %arg2[%c0, %c0_0, %c0_1] : memref<1x80x1024xbf16, #tpu.memory_space<vmem>>, vector<1x80x1024xbf16>
    %1 = vector.shape_cast %0 : vector<1x80x1024xbf16> to vector<80x1024xbf16>
    %c0_2 = arith.constant 0 : index
    %c0_3 = arith.constant 0 : index
    %c0_4 = arith.constant 0 : index
    %2 = vector.load %arg3[%c0_2, %c0_3, %c0_4] : memref<2x1024x256xbf16, #tpu.memory_space<vmem>>, vector<2x1024x256xbf16>
    %cst = arith.constant 0.000000e+00 : f32
    %3 = vector.broadcast %cst : f32 to vector<64x256xf32>
    %4 = vector.extract_strided_slice %1 {offsets = [0, 0], sizes = [64, 1024], strides = [1, 1]} : vector<80x1024xbf16> to vector<64x1024xbf16>
    %5 = vector.extract_strided_slice %2 {offsets = [0, 0, 0], sizes = [1, 1024, 256], strides = [1, 1, 1]} : vector<2x1024x256xbf16> to vector<1x1024x256xbf16>
    %6 = vector.shape_cast %5 : vector<1x1024x256xbf16> to vector<1024x256xbf16>
    %cst_5 = arith.constant dense<0.000000e+00> : vector<64x256xf32>
    %7 = tpu.matmul %4, %6, %cst_5 {dimension_numbers = #tpu.dot_dimension_numbers<[1], [0], [0], [1], [0, 0, 1, 1], [], []>} : vector<64x1024xbf16>, vector<1024x256xbf16>, vector<64x256xf32> -> vector<64x256xf32>
    %8 = arith.addf %3, %7 : vector<64x256xf32>
    %9 = vector.extract_strided_slice %1 {offsets = [16, 0], sizes = [64, 1024], strides = [1, 1]} : vector<80x1024xbf16> to vector<64x1024xbf16>
    %10 = vector.extract_strided_slice %2 {offsets = [1, 0, 0], sizes = [1, 1024, 256], strides = [1, 1, 1]} : vector<2x1024x256xbf16> to vector<1x1024x256xbf16>
    %11 = vector.shape_cast %10 : vector<1x1024x256xbf16> to vector<1024x256xbf16>
    %cst_6 = arith.constant dense<0.000000e+00> : vector<64x256xf32>
    %12 = tpu.matmul %9, %11, %cst_6 {dimension_numbers = #tpu.dot_dimension_numbers<[1], [0], [0], [1], [0, 0, 1, 1], [], []>} : vector<64x1024xbf16>, vector<1024x256xbf16>, vector<64x256xf32> -> vector<64x256xf32>
    %13 = arith.addf %8, %12 : vector<64x256xf32>
    %14 = arith.truncf %13 : vector<64x256xf32> to vector<64x256xbf16>
    %15 = vector.shape_cast %14 : vector<64x256xbf16> to vector<1x64x256xbf16>
    %c0_7 = arith.constant 0 : index
    %c0_8 = arith.constant 0 : index
    %c0_9 = arith.constant 0 : index
    %16 = vector.load %arg4[%c0_7, %c0_8, %c0_9] : memref<1x64x256xbf16, #tpu.memory_space<vmem>>, vector<1x64x256xbf16>
    tpu.vector_store %arg4[%c0_7, %c0_8, %c0_9], %15 {strides = array<i32>} : memref<1x64x256xbf16, #tpu.memory_space<vmem>>, vector<1x64x256xbf16>,
    return
  }
  func.func @transform_0(%arg0: i32, %arg1: i32) -> (i32, i32, i32) {
    %c0_i32 = arith.constant 0 : i32
    %c0_i32_0 = arith.constant 0 : i32
    %c0_i32_1 = arith.constant 0 : i32
    return %arg0, %c0_i32, %c0_i32_0 : i32, i32, i32
  }
  func.func @transform_1(%arg0: i32, %arg1: i32) -> (i32, i32, i32) {
    %c0_i32 = arith.constant 0 : i32
    %c0_i32_0 = arith.constant 0 : i32
    %c0_i32_1 = arith.constant 0 : i32
    return %c0_i32, %c0_i32_0, %arg1 : i32, i32, i32
  }
  func.func @transform_2(%arg0: i32, %arg1: i32) -> (i32, i32, i32) {
    %c0_i32 = arith.constant 0 : i32
    %c0_i32_0 = arith.constant 0 : i32
    return %arg0, %c0_i32, %arg1 : i32, i32, i32
  }
}

module attributes {stable_mosaic.version = 11 : i64} {
  func.func @_instnorm_lrelu_kernel(%arg0: i32, %arg1: i32, %arg2: memref<1x16x128xbf16, #tpu.memory_space<vmem>>, %arg3: memref<1x16x128xbf16, #tpu.memory_space<vmem>>) attributes {dimension_semantics = [#tpu.dimension_semantics<parallel>, #tpu.dimension_semantics<parallel>], iteration_bounds = array<i64: 2, 2>, scalar_prefetch = 0 : i64, scratch_operands = 0 : i64, tpu.core_type = #tpu.core_type<tc>, window_params = [{transform_indices = @transform_0, window_bounds = array<i64: 1, 16, 128>}, {transform_indices = @transform_1, window_bounds = array<i64: 1, 16, 128>}]} {
    %c0 = arith.constant 0 : index
    %c0_0 = arith.constant 0 : index
    %c0_1 = arith.constant 0 : index
    %0 = vector.load %arg2[%c0, %c0_0, %c0_1] : memref<1x16x128xbf16, #tpu.memory_space<vmem>>, vector<1x16x128xbf16>
    %1 = arith.extf %0 : vector<1x16x128xbf16> to vector<1x16x128xf32>
    %cst = arith.constant dense<0.000000e+00> : vector<1x128xf32>
    %2 = vector.multi_reduction <add>, %1, %cst [1] : vector<1x16x128xf32> to vector<1x128xf32>
    %3 = vector.shape_cast %2 : vector<1x128xf32> to vector<1x1x128xf32>
    %4 = arith.mulf %1, %1 : vector<1x16x128xf32>
    %cst_2 = arith.constant dense<0.000000e+00> : vector<1x128xf32>
    %5 = vector.multi_reduction <add>, %4, %cst_2 [1] : vector<1x16x128xf32> to vector<1x128xf32>
    %6 = vector.shape_cast %5 : vector<1x128xf32> to vector<1x1x128xf32>
    %cst_3 = arith.constant 6.250000e-02 : f32
    %7 = vector.broadcast %cst_3 : f32 to vector<1x1x128xf32>
    %8 = arith.mulf %3, %7 : vector<1x1x128xf32>
    %cst_4 = arith.constant 6.250000e-02 : f32
    %9 = vector.broadcast %cst_4 : f32 to vector<1x1x128xf32>
    %10 = arith.mulf %6, %9 : vector<1x1x128xf32>
    %11 = arith.mulf %8, %8 : vector<1x1x128xf32>
    %12 = arith.subf %10, %11 : vector<1x1x128xf32>
    %cst_5 = arith.constant 0.000000e+00 : f32
    %13 = vector.broadcast %cst_5 : f32 to vector<1x1x128xf32>
    %14 = arith.maximumf %12, %13 : vector<1x1x128xf32>
    %15 = vector.broadcast %8 : vector<1x1x128xf32> to vector<1x16x128xf32>
    %16 = arith.subf %1, %15 : vector<1x16x128xf32>
    %cst_6 = arith.constant 9.99999974E-6 : f32
    %17 = vector.broadcast %cst_6 : f32 to vector<1x1x128xf32>
    %18 = arith.addf %14, %17 : vector<1x1x128xf32>
    %19 = math.rsqrt %18 : vector<1x1x128xf32>
    %20 = vector.broadcast %19 : vector<1x1x128xf32> to vector<1x16x128xf32>
    %21 = arith.mulf %16, %20 : vector<1x16x128xf32>
    %cst_7 = arith.constant 0.000000e+00 : f32
    %22 = vector.broadcast %cst_7 : f32 to vector<1x16x128xf32>
    %23 = arith.cmpf oge, %21, %22 : vector<1x16x128xf32>
    %cst_8 = arith.constant 2.000000e-01 : f32
    %24 = vector.broadcast %cst_8 : f32 to vector<1x16x128xf32>
    %25 = arith.mulf %24, %21 : vector<1x16x128xf32>
    %26 = arith.select %23, %21, %25 : vector<1x16x128xi1>, vector<1x16x128xf32>
    %27 = arith.truncf %26 : vector<1x16x128xf32> to vector<1x16x128xbf16>
    %c0_9 = arith.constant 0 : index
    %c0_10 = arith.constant 0 : index
    %c0_11 = arith.constant 0 : index
    %28 = vector.load %arg3[%c0_9, %c0_10, %c0_11] : memref<1x16x128xbf16, #tpu.memory_space<vmem>>, vector<1x16x128xbf16>
    tpu.vector_store %arg3[%c0_9, %c0_10, %c0_11], %27 {strides = array<i32>} : memref<1x16x128xbf16, #tpu.memory_space<vmem>>, vector<1x16x128xbf16>,
    return
  }
  func.func @transform_0(%arg0: i32, %arg1: i32) -> (i32, i32, i32) {
    %c0_i32 = arith.constant 0 : i32
    %c0_i32_0 = arith.constant 0 : i32
    return %arg0, %c0_i32, %arg1 : i32, i32, i32
  }
  func.func @transform_1(%arg0: i32, %arg1: i32) -> (i32, i32, i32) {
    %c0_i32 = arith.constant 0 : i32
    %c0_i32_0 = arith.constant 0 : i32
    return %arg0, %c0_i32, %arg1 : i32, i32, i32
  }
}

module attributes {stable_mosaic.version = 11 : i64} {
  func.func @_conv_tap_kernel(%arg0: i32, %arg1: i32, %arg2: memref<1x48x2048xbf16, #tpu.memory_space<vmem>>, %arg3: memref<2x2048x256xbf16, #tpu.memory_space<vmem>>, %arg4: memref<1x32x256xbf16, #tpu.memory_space<vmem>>) attributes {dimension_semantics = [#tpu.dimension_semantics<parallel>, #tpu.dimension_semantics<parallel>], iteration_bounds = array<i64: 2, 2>, scalar_prefetch = 0 : i64, scratch_operands = 0 : i64, tpu.core_type = #tpu.core_type<tc>, window_params = [{transform_indices = @transform_0, window_bounds = array<i64: 1, 48, 2048>}, {transform_indices = @transform_1, window_bounds = array<i64: 2, 2048, 256>}, {transform_indices = @transform_2, window_bounds = array<i64: 1, 32, 256>}]} {
    %c0 = arith.constant 0 : index
    %c0_0 = arith.constant 0 : index
    %c0_1 = arith.constant 0 : index
    %0 = vector.load %arg2[%c0, %c0_0, %c0_1] : memref<1x48x2048xbf16, #tpu.memory_space<vmem>>, vector<1x48x2048xbf16>
    %1 = vector.shape_cast %0 : vector<1x48x2048xbf16> to vector<48x2048xbf16>
    %c0_2 = arith.constant 0 : index
    %c0_3 = arith.constant 0 : index
    %c0_4 = arith.constant 0 : index
    %2 = vector.load %arg3[%c0_2, %c0_3, %c0_4] : memref<2x2048x256xbf16, #tpu.memory_space<vmem>>, vector<2x2048x256xbf16>
    %cst = arith.constant 0.000000e+00 : f32
    %3 = vector.broadcast %cst : f32 to vector<32x256xf32>
    %4 = vector.extract_strided_slice %1 {offsets = [0, 0], sizes = [32, 2048], strides = [1, 1]} : vector<48x2048xbf16> to vector<32x2048xbf16>
    %5 = vector.extract_strided_slice %2 {offsets = [0, 0, 0], sizes = [1, 2048, 256], strides = [1, 1, 1]} : vector<2x2048x256xbf16> to vector<1x2048x256xbf16>
    %6 = vector.shape_cast %5 : vector<1x2048x256xbf16> to vector<2048x256xbf16>
    %cst_5 = arith.constant dense<0.000000e+00> : vector<32x256xf32>
    %7 = tpu.matmul %4, %6, %cst_5 {dimension_numbers = #tpu.dot_dimension_numbers<[1], [0], [0], [1], [0, 0, 1, 1], [], []>} : vector<32x2048xbf16>, vector<2048x256xbf16>, vector<32x256xf32> -> vector<32x256xf32>
    %8 = arith.addf %3, %7 : vector<32x256xf32>
    %9 = vector.extract_strided_slice %1 {offsets = [16, 0], sizes = [32, 2048], strides = [1, 1]} : vector<48x2048xbf16> to vector<32x2048xbf16>
    %10 = vector.extract_strided_slice %2 {offsets = [1, 0, 0], sizes = [1, 2048, 256], strides = [1, 1, 1]} : vector<2x2048x256xbf16> to vector<1x2048x256xbf16>
    %11 = vector.shape_cast %10 : vector<1x2048x256xbf16> to vector<2048x256xbf16>
    %cst_6 = arith.constant dense<0.000000e+00> : vector<32x256xf32>
    %12 = tpu.matmul %9, %11, %cst_6 {dimension_numbers = #tpu.dot_dimension_numbers<[1], [0], [0], [1], [0, 0, 1, 1], [], []>} : vector<32x2048xbf16>, vector<2048x256xbf16>, vector<32x256xf32> -> vector<32x256xf32>
    %13 = arith.addf %8, %12 : vector<32x256xf32>
    %14 = arith.truncf %13 : vector<32x256xf32> to vector<32x256xbf16>
    %15 = vector.shape_cast %14 : vector<32x256xbf16> to vector<1x32x256xbf16>
    %c0_7 = arith.constant 0 : index
    %c0_8 = arith.constant 0 : index
    %c0_9 = arith.constant 0 : index
    %16 = vector.load %arg4[%c0_7, %c0_8, %c0_9] : memref<1x32x256xbf16, #tpu.memory_space<vmem>>, vector<1x32x256xbf16>
    tpu.vector_store %arg4[%c0_7, %c0_8, %c0_9], %15 {strides = array<i32>} : memref<1x32x256xbf16, #tpu.memory_space<vmem>>, vector<1x32x256xbf16>,
    return
  }
  func.func @transform_0(%arg0: i32, %arg1: i32) -> (i32, i32, i32) {
    %c0_i32 = arith.constant 0 : i32
    %c0_i32_0 = arith.constant 0 : i32
    %c0_i32_1 = arith.constant 0 : i32
    return %arg0, %c0_i32, %c0_i32_0 : i32, i32, i32
  }
  func.func @transform_1(%arg0: i32, %arg1: i32) -> (i32, i32, i32) {
    %c0_i32 = arith.constant 0 : i32
    %c0_i32_0 = arith.constant 0 : i32
    %c0_i32_1 = arith.constant 0 : i32
    return %c0_i32, %c0_i32_0, %arg1 : i32, i32, i32
  }
  func.func @transform_2(%arg0: i32, %arg1: i32) -> (i32, i32, i32) {
    %c0_i32 = arith.constant 0 : i32
    %c0_i32_0 = arith.constant 0 : i32
    return %arg0, %c0_i32, %arg1 : i32, i32, i32
  }
}

module attributes {stable_mosaic.version = 11 : i64} {
  func.func @_instnorm_lrelu_kernel(%arg0: i32, %arg1: i32, %arg2: memref<1x4x128xbf16, #tpu.memory_space<vmem>>, %arg3: memref<1x4x128xbf16, #tpu.memory_space<vmem>>) attributes {dimension_semantics = [#tpu.dimension_semantics<parallel>, #tpu.dimension_semantics<parallel>], iteration_bounds = array<i64: 2, 4>, scalar_prefetch = 0 : i64, scratch_operands = 0 : i64, tpu.core_type = #tpu.core_type<tc>, window_params = [{transform_indices = @transform_0, window_bounds = array<i64: 1, 4, 128>}, {transform_indices = @transform_1, window_bounds = array<i64: 1, 4, 128>}]} {
    %c0 = arith.constant 0 : index
    %c0_0 = arith.constant 0 : index
    %c0_1 = arith.constant 0 : index
    %0 = vector.load %arg2[%c0, %c0_0, %c0_1] : memref<1x4x128xbf16, #tpu.memory_space<vmem>>, vector<1x4x128xbf16>
    %1 = arith.extf %0 : vector<1x4x128xbf16> to vector<1x4x128xf32>
    %cst = arith.constant dense<0.000000e+00> : vector<1x128xf32>
    %2 = vector.multi_reduction <add>, %1, %cst [1] : vector<1x4x128xf32> to vector<1x128xf32>
    %3 = vector.shape_cast %2 : vector<1x128xf32> to vector<1x1x128xf32>
    %4 = arith.mulf %1, %1 : vector<1x4x128xf32>
    %cst_2 = arith.constant dense<0.000000e+00> : vector<1x128xf32>
    %5 = vector.multi_reduction <add>, %4, %cst_2 [1] : vector<1x4x128xf32> to vector<1x128xf32>
    %6 = vector.shape_cast %5 : vector<1x128xf32> to vector<1x1x128xf32>
    %cst_3 = arith.constant 2.500000e-01 : f32
    %7 = vector.broadcast %cst_3 : f32 to vector<1x1x128xf32>
    %8 = arith.mulf %3, %7 : vector<1x1x128xf32>
    %cst_4 = arith.constant 2.500000e-01 : f32
    %9 = vector.broadcast %cst_4 : f32 to vector<1x1x128xf32>
    %10 = arith.mulf %6, %9 : vector<1x1x128xf32>
    %11 = arith.mulf %8, %8 : vector<1x1x128xf32>
    %12 = arith.subf %10, %11 : vector<1x1x128xf32>
    %cst_5 = arith.constant 0.000000e+00 : f32
    %13 = vector.broadcast %cst_5 : f32 to vector<1x1x128xf32>
    %14 = arith.maximumf %12, %13 : vector<1x1x128xf32>
    %15 = vector.broadcast %8 : vector<1x1x128xf32> to vector<1x4x128xf32>
    %16 = arith.subf %1, %15 : vector<1x4x128xf32>
    %cst_6 = arith.constant 9.99999974E-6 : f32
    %17 = vector.broadcast %cst_6 : f32 to vector<1x1x128xf32>
    %18 = arith.addf %14, %17 : vector<1x1x128xf32>
    %19 = math.rsqrt %18 : vector<1x1x128xf32>
    %20 = vector.broadcast %19 : vector<1x1x128xf32> to vector<1x4x128xf32>
    %21 = arith.mulf %16, %20 : vector<1x4x128xf32>
    %cst_7 = arith.constant 0.000000e+00 : f32
    %22 = vector.broadcast %cst_7 : f32 to vector<1x4x128xf32>
    %23 = arith.cmpf oge, %21, %22 : vector<1x4x128xf32>
    %cst_8 = arith.constant 2.000000e-01 : f32
    %24 = vector.broadcast %cst_8 : f32 to vector<1x4x128xf32>
    %25 = arith.mulf %24, %21 : vector<1x4x128xf32>
    %26 = arith.select %23, %21, %25 : vector<1x4x128xi1>, vector<1x4x128xf32>
    %27 = arith.truncf %26 : vector<1x4x128xf32> to vector<1x4x128xbf16>
    %c0_9 = arith.constant 0 : index
    %c0_10 = arith.constant 0 : index
    %c0_11 = arith.constant 0 : index
    %28 = vector.load %arg3[%c0_9, %c0_10, %c0_11] : memref<1x4x128xbf16, #tpu.memory_space<vmem>>, vector<1x4x128xbf16>
    tpu.vector_store %arg3[%c0_9, %c0_10, %c0_11], %27 {strides = array<i32>} : memref<1x4x128xbf16, #tpu.memory_space<vmem>>, vector<1x4x128xbf16>,
    return
  }
  func.func @transform_0(%arg0: i32, %arg1: i32) -> (i32, i32, i32) {
    %c0_i32 = arith.constant 0 : i32
    %c0_i32_0 = arith.constant 0 : i32
    return %arg0, %c0_i32, %arg1 : i32, i32, i32
  }
  func.func @transform_1(%arg0: i32, %arg1: i32) -> (i32, i32, i32) {
    %c0_i32 = arith.constant 0 : i32
    %c0_i32_0 = arith.constant 0 : i32
    return %arg0, %c0_i32, %arg1 : i32, i32, i32
  }
}

module attributes {stable_mosaic.version = 11 : i64} {
  func.func @_conv_tap_kernel(%arg0: i32, %arg1: i32, %arg2: memref<1x80x2048xbf16, #tpu.memory_space<vmem>>, %arg3: memref<4x2048x128xbf16, #tpu.memory_space<vmem>>, %arg4: memref<1x128xf32, #tpu.memory_space<vmem>>, %arg5: memref<1x32x128xf32, #tpu.memory_space<vmem>>) attributes {dimension_semantics = [#tpu.dimension_semantics<parallel>, #tpu.dimension_semantics<parallel>], iteration_bounds = array<i64: 2, 1>, scalar_prefetch = 0 : i64, scratch_operands = 0 : i64, tpu.core_type = #tpu.core_type<tc>, window_params = [{transform_indices = @transform_0, window_bounds = array<i64: 1, 80, 2048>}, {transform_indices = @transform_1, window_bounds = array<i64: 4, 2048, 128>}, {transform_indices = @transform_2, window_bounds = array<i64: 1, 128>}, {transform_indices = @transform_3, window_bounds = array<i64: 1, 32, 128>}]} {
    %c0 = arith.constant 0 : index
    %c0_0 = arith.constant 0 : index
    %c0_1 = arith.constant 0 : index
    %0 = vector.load %arg2[%c0, %c0_0, %c0_1] : memref<1x80x2048xbf16, #tpu.memory_space<vmem>>, vector<1x80x2048xbf16>
    %1 = vector.shape_cast %0 : vector<1x80x2048xbf16> to vector<80x2048xbf16>
    %c0_2 = arith.constant 0 : index
    %c0_3 = arith.constant 0 : index
    %c0_4 = arith.constant 0 : index
    %2 = vector.load %arg3[%c0_2, %c0_3, %c0_4] : memref<4x2048x128xbf16, #tpu.memory_space<vmem>>, vector<4x2048x128xbf16>
    %cst = arith.constant 0.000000e+00 : f32
    %3 = vector.broadcast %cst : f32 to vector<32x128xf32>
    %4 = vector.extract_strided_slice %1 {offsets = [0, 0], sizes = [32, 2048], strides = [1, 1]} : vector<80x2048xbf16> to vector<32x2048xbf16>
    %5 = vector.extract_strided_slice %2 {offsets = [0, 0, 0], sizes = [1, 2048, 128], strides = [1, 1, 1]} : vector<4x2048x128xbf16> to vector<1x2048x128xbf16>
    %6 = vector.shape_cast %5 : vector<1x2048x128xbf16> to vector<2048x128xbf16>
    %cst_5 = arith.constant dense<0.000000e+00> : vector<32x128xf32>
    %7 = tpu.matmul %4, %6, %cst_5 {dimension_numbers = #tpu.dot_dimension_numbers<[1], [0], [0], [1], [0, 0, 1, 1], [], []>} : vector<32x2048xbf16>, vector<2048x128xbf16>, vector<32x128xf32> -> vector<32x128xf32>
    %8 = arith.addf %3, %7 : vector<32x128xf32>
    %9 = vector.extract_strided_slice %1 {offsets = [16, 0], sizes = [32, 2048], strides = [1, 1]} : vector<80x2048xbf16> to vector<32x2048xbf16>
    %10 = vector.extract_strided_slice %2 {offsets = [1, 0, 0], sizes = [1, 2048, 128], strides = [1, 1, 1]} : vector<4x2048x128xbf16> to vector<1x2048x128xbf16>
    %11 = vector.shape_cast %10 : vector<1x2048x128xbf16> to vector<2048x128xbf16>
    %cst_6 = arith.constant dense<0.000000e+00> : vector<32x128xf32>
    %12 = tpu.matmul %9, %11, %cst_6 {dimension_numbers = #tpu.dot_dimension_numbers<[1], [0], [0], [1], [0, 0, 1, 1], [], []>} : vector<32x2048xbf16>, vector<2048x128xbf16>, vector<32x128xf32> -> vector<32x128xf32>
    %13 = arith.addf %8, %12 : vector<32x128xf32>
    %14 = vector.extract_strided_slice %1 {offsets = [32, 0], sizes = [32, 2048], strides = [1, 1]} : vector<80x2048xbf16> to vector<32x2048xbf16>
    %15 = vector.extract_strided_slice %2 {offsets = [2, 0, 0], sizes = [1, 2048, 128], strides = [1, 1, 1]} : vector<4x2048x128xbf16> to vector<1x2048x128xbf16>
    %16 = vector.shape_cast %15 : vector<1x2048x128xbf16> to vector<2048x128xbf16>
    %cst_7 = arith.constant dense<0.000000e+00> : vector<32x128xf32>
    %17 = tpu.matmul %14, %16, %cst_7 {dimension_numbers = #tpu.dot_dimension_numbers<[1], [0], [0], [1], [0, 0, 1, 1], [], []>} : vector<32x2048xbf16>, vector<2048x128xbf16>, vector<32x128xf32> -> vector<32x128xf32>
    %18 = arith.addf %13, %17 : vector<32x128xf32>
    %19 = vector.extract_strided_slice %1 {offsets = [48, 0], sizes = [32, 2048], strides = [1, 1]} : vector<80x2048xbf16> to vector<32x2048xbf16>
    %20 = vector.extract_strided_slice %2 {offsets = [3, 0, 0], sizes = [1, 2048, 128], strides = [1, 1, 1]} : vector<4x2048x128xbf16> to vector<1x2048x128xbf16>
    %21 = vector.shape_cast %20 : vector<1x2048x128xbf16> to vector<2048x128xbf16>
    %cst_8 = arith.constant dense<0.000000e+00> : vector<32x128xf32>
    %22 = tpu.matmul %19, %21, %cst_8 {dimension_numbers = #tpu.dot_dimension_numbers<[1], [0], [0], [1], [0, 0, 1, 1], [], []>} : vector<32x2048xbf16>, vector<2048x128xbf16>, vector<32x128xf32> -> vector<32x128xf32>
    %23 = arith.addf %18, %22 : vector<32x128xf32>
    %c0_9 = arith.constant 0 : index
    %c0_10 = arith.constant 0 : index
    %24 = vector.load %arg4[%c0_9, %c0_10] : memref<1x128xf32, #tpu.memory_space<vmem>>, vector<1x128xf32>
    %25 = vector.broadcast %24 : vector<1x128xf32> to vector<32x128xf32>
    %26 = arith.addf %23, %25 : vector<32x128xf32>
    %27 = vector.shape_cast %26 : vector<32x128xf32> to vector<1x32x128xf32>
    %c0_11 = arith.constant 0 : index
    %c0_12 = arith.constant 0 : index
    %c0_13 = arith.constant 0 : index
    %28 = vector.load %arg5[%c0_11, %c0_12, %c0_13] : memref<1x32x128xf32, #tpu.memory_space<vmem>>, vector<1x32x128xf32>
    tpu.vector_store %arg5[%c0_11, %c0_12, %c0_13], %27 {strides = array<i32>} : memref<1x32x128xf32, #tpu.memory_space<vmem>>, vector<1x32x128xf32>,
    return
  }
  func.func @transform_0(%arg0: i32, %arg1: i32) -> (i32, i32, i32) {
    %c0_i32 = arith.constant 0 : i32
    %c0_i32_0 = arith.constant 0 : i32
    %c0_i32_1 = arith.constant 0 : i32
    return %arg0, %c0_i32, %c0_i32_0 : i32, i32, i32
  }
  func.func @transform_1(%arg0: i32, %arg1: i32) -> (i32, i32, i32) {
    %c0_i32 = arith.constant 0 : i32
    %c0_i32_0 = arith.constant 0 : i32
    %c0_i32_1 = arith.constant 0 : i32
    return %c0_i32, %c0_i32_0, %arg1 : i32, i32, i32
  }
  func.func @transform_2(%arg0: i32, %arg1: i32) -> (i32, i32) {
    %c0_i32 = arith.constant 0 : i32
    %c0_i32_0 = arith.constant 0 : i32
    return %c0_i32, %arg1 : i32, i32
  }
  func.func @transform_3(%arg0: i32, %arg1: i32) -> (i32, i32, i32) {
    %c0_i32 = arith.constant 0 : i32
    %c0_i32_0 = arith.constant 0 : i32
    return %arg0, %c0_i32, %arg1 : i32, i32, i32
  }
}

</mosaic_0001>

<bundles_post_ra>
// kernel: discriminator_forward.8
= control target key start
LH: loop header
LB: loop body
LE: loop exit
PB: predicated region body
PF: predicated region fallthrough
CT: control target
= control target key end

     0   :  { %s1661_s12 = smov 0   ;;  %s1663_s13 = smov 0   ;;  %s1820_s0 = inlined_call_operand.vmem [shape: bf16[2,272,128], index: 0, kind: input, shape index: {}]   ;;  %s1821_s1 = inlined_call_operand.vmem [shape: bf16[2,128,128], index: 1, kind: input, shape index: {}]   ;;  %s1822_s2 = inlined_call_operand.vmem [shape: f32[1,128], index: 2, kind: input, shape index: {}]   ;;  %s1823_s3 = inlined_call_operand.vmem [shape: bf16[2,256,128], index: 3, kind: output, shape index: {}]  }
   0x1   :  { %s1665_s14 = smov 0  }
   0x2 LB: > { %s25_s15 = sadd.s32 1, %s1635_s13  ;;  %p1215_p0 = scmp.ge.s32.totalorder %s1639_s14, 1  ;;  %s1639_s14 = sphi %s1665_s14, %s13_s14   ;;  %s1635_s13 = sphi %s1663_s13, %s1825_s13   ;;  %s1631_s12 = sphi %s1661_s12, %s1824_s12  }
   0x3   : > { %p27_p1 = scmp.ge.s32.totalorder %s25_s15, 2  ;;  %p168_p2 = scmp.lt.s32.totalorder %s1639_s14, 3 }
   0x5   : > { %s1827_s15 = smov (%p27_p1, %s25_s15), 0  ;;  %p169_p3 = pnand %p1215_p0, %p168_p2 }
   0x6   : > { %p202_p4 = scmp.lt.s32.totalorder (!%p169_p3), %s1631_s12, 1 }
   0x7   : > { %172 = sbr.rel (%p169_p3) target bundleno = 311 (0x137), region = 32 }
   0xc   : > { %v1584_v0 = vld [vmem:[%s1821_s1 + $0x78] sm:$0xff]   ;;  %v1586_v2 = vld [vmem:[%s1821_s1 + $0x70] sm:$0xff]   ;;  %v1588_v4 = vld [vmem:[%s1821_s1 + $0x68] sm:$0xff]   ;;  %s1829_s12 = smov (!%p202_p4, %s1631_s12), 1 }
   0xd   : > { %v1585_v1 = vld [vmem:[%s1821_s1 + $0x38] sm:$0xff]   ;;  %1463 = vmatprep.subr.bf16.mxu0 %v1584_v0  ;;  %v1587_v3 = vld [vmem:[%s1821_s1 + $0x30] sm:$0xff]   ;;  %v1589_v5 = vld [vmem:[%s1821_s1 + $0x28] sm:$0xff]   ;;  %s1559_s5 = smul.u32 136, %s1829_s12  ;;  %s1287_s4 = sshll.u32 %s1829_s12, 7 }
   0xe   : > { %1511 = vmatprep.subr.bf16.mxu1 %v1585_v1  ;;  %1464 = vmatpush3.bf16.msra.mxu0 %v1584_v0  ;;  %v1590_v6 = vld [vmem:[%s1821_s1 + $0x60] sm:$0xff]   ;;  %v1592_v8 = vld [vmem:[%s1821_s1 + $0x58] sm:$0xff]   ;;  %v1594_v10 = vld [vmem:[%s1821_s1 + $0x50] sm:$0xff]   ;;  %s1765_s7 = scalar_lea.vmem %s1823_s3, %s1287_s4 }
   0xf   : > { %1512 = vmatpush3.bf16.msra.mxu1 %v1585_v1  ;;  %1465 = vmatprep.subr.bf16.mxu0 %v1586_v2  ;;  %v1591_v7 = vld [vmem:[%s1821_s1 + $0x20] sm:$0xff]   ;;  %v1593_v9 = vld [vmem:[%s1821_s1 + $0x18] sm:$0xff]   ;;  %s1715_s16 = scalar_lea.vmem %s1820_s0, %s1559_s5  ;;  %v1595_v11 = vld [vmem:[%s1821_s1 + $0x10] sm:$0xff]  }
  0x10   : > { %1513 = vmatprep.subr.bf16.mxu1 %v1587_v3  ;;  %v1600_v12 = vld [vmem:[%s1715_s16 + $0x8] sm:$0xff]   ;;  %v1601_v13 = vld [vmem:[%s1715_s16] sm:$0xff]   ;;  %v1602_v18 = vld [vmem:[%s1715_s16 + $0x10] sm:$0xff]  }
  0x11   : > { %1479 = vmatprep.mubr.bf16.mxu0 %v1600_v12  ;;  %1527 = vmatprep.mubr.bf16.mxu1 %v1601_v13  ;;  %v1596_v14 = vld [vmem:[%s1821_s1 + $0x48] sm:$0xff]   ;;  %v1598_v16 = vld [vmem:[%s1821_s1 + $0x40] sm:$0xff]   ;;  %v1603_v19 = vld [vmem:[%s1715_s16 + $0x18] sm:$0xff]  }
  0x12   : > { %1466 = vmatpush3.bf16.msra.mxu0 %v1586_v2  ;;  %v1597_v15 = vld [vmem:[%s1821_s1 + $0x8] sm:$0xff]   ;;  %v1599_v17 = vld [vmem:[%s1821_s1] sm:$0xff]   ;;  %v1606_v22 = vld [vmem:[%s1715_s16 + $0x30] sm:$0xff]  }
  0x13   : > { %1514 = vmatpush3.bf16.msra.mxu1 %v1587_v3  ;;  %1467 = vmatprep.subr.bf16.mxu0 %v1588_v4  ;;  %v1604_v20 = vld [vmem:[%s1715_s16 + $0x20] sm:$0xff]   ;;  %v1605_v21 = vld [vmem:[%s1715_s16 + $0x28] sm:$0xff]   ;;  %v1607_v23 = vld [vmem:[%s1715_s16 + $0x38] sm:$0xff]  }
  0x14   : > { %1515 = vmatprep.subr.bf16.mxu1 %v1589_v5  ;;  %v1608_v24 = vld [vmem:[%s1715_s16 + $0x40] sm:$0xff]   ;;  %v1609_v25 = vld [vmem:[%s1715_s16 + $0x48] sm:$0xff]   ;;  %v1610_v26 = vld [vmem:[%s1715_s16 + $0x50] sm:$0xff]  }
  0x15   : > { %v1611_v27 = vld [vmem:[%s1715_s16 + $0x58] sm:$0xff]   ;;  %v1612_v28 = vld [vmem:[%s1715_s16 + $0x60] sm:$0xff]   ;;  %v1613_v29 = vld [vmem:[%s1715_s16 + $0x68] sm:$0xff]  }
  0x16   : > { %1468 = vmatpush3.bf16.msra.mxu0 %v1588_v4  ;;  %v1614_v30 = vld [vmem:[%s1715_s16 + $0x70] sm:$0xff]   ;;  %v1615_v31 = vld [vmem:[%s1715_s16 + $0x78] sm:$0xff]   ;;  %v1616_v32 = vld [vmem:[%s1715_s16 + $0x80] sm:$0xff]  }
  0x17   : > { %1516 = vmatpush3.bf16.msra.mxu1 %v1589_v5  ;;  %1469 = vmatprep.subr.bf16.mxu0 %v1590_v6  ;;  %v1755_v35 = vld [vmem:[%s1822_s2] ss:$0 sm:$0xff] }
  0x18   : > { %1517 = vmatprep.subr.bf16.mxu1 %v1591_v7 }
  0x1a   : > { %1470 = vmatpush3.bf16.msra.mxu0 %v1590_v6 }
  0x1b   : > { %1518 = vmatpush3.bf16.msra.mxu1 %v1591_v7  ;;  %1471 = vmatprep.subr.bf16.mxu0 %v1592_v8 }
  0x1c   : > { %1519 = vmatprep.subr.bf16.mxu1 %v1593_v9 }
  0x1e   : > { %1472 = vmatpush3.bf16.msra.mxu0 %v1592_v8 }
  0x1f   : > { %1520 = vmatpush3.bf16.msra.mxu1 %v1593_v9  ;;  %1473 = vmatprep.subr.bf16.mxu0 %v1594_v10 }
  0x20   : > { %1521 = vmatprep.subr.bf16.mxu1 %v1595_v11 }
  0x22   : > { %1474 = vmatpush3.bf16.msra.mxu0 %v1594_v10 }
  0x23   : > { %1522 = vmatpush3.bf16.msra.mxu1 %v1595_v11  ;;  %1475 = vmatprep.subr.bf16.mxu0 %v1596_v14 }
  0x24   : > { %1523 = vmatprep.subr.bf16.mxu1 %v1597_v15 }
  0x26   : > { %1476 = vmatpush3.bf16.msra.mxu0 %v1596_v14 }
  0x27   : > { %1524 = vmatpush3.bf16.msra.mxu1 %v1597_v15  ;;  %1477 = vmatprep.subr.bf16.mxu0 %v1598_v16 }
  0x28   : > { %1525 = vmatprep.subr.bf16.mxu1 %v1599_v17 }
  0x2a   : > { %1478 = vmatpush3.bf16.msra.mxu0 %v1598_v16 }
  0x2b   : > { %1526 = vmatpush3.bf16.msra.mxu1 %v1599_v17 }
  0x2d   : > { %1480 = vmatmul.mubr.bf16.vlgmr.msra.gmra.mxu0 %v1602_v18 }
  0x2e   : > { %1528 = vmatmul.mubr.bf16.vlgmr.msra.gmra.mxu1 %v1600_v12  ;;  %1483 = vmatprep.mubr.bf16.mxu0 %v1603_v19 }
  0x2f   : > { %1531 = vmatprep.mubr.bf16.mxu1 %v1602_v18 }
  0x35   : > { %1484 = vmatmul.mubr.bf16.gmra.mxu0 %v1604_v20 }
  0x36   : > { %1532 = vmatmul.mubr.bf16.gmra.mxu1 %v1603_v19  ;;  %1487 = vmatprep.mubr.bf16.mxu0 %v1605_v21 }
  0x37   : > { %1535 = vmatprep.mubr.bf16.mxu1 %v1604_v20 }
  0x3d   : > { %1488 = vmatmul.mubr.bf16.gmra.mxu0 %v1606_v22 }
  0x3e   : > { %1536 = vmatmul.mubr.bf16.gmra.mxu1 %v1605_v21  ;;  %1491 = vmatprep.mubr.bf16.mxu0 %v1607_v23 }
  0x3f   : > { %1539 = vmatprep.mubr.bf16.mxu1 %v1606_v22 }
  0x45   : > { %1492 = vmatmul.mubr.bf16.gmra.mxu0 %v1608_v24 }
  0x46   : > { %1540 = vmatmul.mubr.bf16.gmra.mxu1 %v1607_v23  ;;  %1495 = vmatprep.mubr.bf16.mxu0 %v1609_v25 }
  0x47   : > { %1543 = vmatprep.mubr.bf16.mxu1 %v1608_v24 }
  0x4d   : > { %1496 = vmatmul.mubr.bf16.gmra.mxu0 %v1610_v26 }
  0x4e   : > { %1544 = vmatmul.mubr.bf16.gmra.mxu1 %v1609_v25  ;;  %1499 = vmatprep.mubr.bf16.mxu0 %v1611_v27 }
  0x4f   : > { %1547 = vmatprep.mubr.bf16.mxu1 %v1610_v26 }
  0x55   : > { %1500 = vmatmul.mubr.bf16.gmra.mxu0 %v1612_v28 }
  0x56   : > { %1548 = vmatmul.mubr.bf16.gmra.mxu1 %v1611_v27  ;;  %1503 = vmatprep.mubr.bf16.mxu0 %v1613_v29 }
  0x57   : > { %1551 = vmatprep.mubr.bf16.mxu1 %v1612_v28 }
  0x5d   : > { %1504 = vmatmul.mubr.bf16.gmra.mxu0 %v1614_v30 }
  0x5e   : > { %1552 = vmatmul.mubr.bf16.gmra.mxu1 %v1613_v29  ;;  %1507 = vmatprep.mubr.bf16.mxu0 %v1615_v31 }
  0x5f   : > { %1555 = vmatprep.mubr.bf16.mxu1 %v1614_v30 }
  0x65   : > { %1508 = vmatmul.mubr.bf16.gmra.mxu0 %v1616_v32 }
  0x66   : > { %1556 = vmatmul.mubr.bf16.gmra.mxu1 %v1615_v31 }
  0xed   : > { %v1481_v33 = vpop.f32.mrf.mxu0 }
  0xee   : > { %v1529_v34 = vpop.f32.mrf.mxu1 }
  0xef   : > { %v691_v36 = vadd.f32 %v1529_v34, %v1481_v33  ;;  %v467_v37 = vpop.f32.mrf.mxu0 }
  0xf0   : > { %v682_v38 = vpop.f32.mrf.mxu1 }
  0xf1   : > { %v818_v39 = vadd.f32 %v1755_v35, %v691_v36  ;;  %v683_v40 = vadd.f32 %v682_v38, %v467_v37  ;;  %v1482_v41 = vpop.f32.mrf.mxu0 }
  0xf2   : > { %v1530_v42 = vpop.f32.mrf.mxu1 }
  0xf3   : > { %v694_v43 = vadd.f32 %v1530_v42, %v1482_v41  ;;  %v470_v44 = vpop.f32.mrf.mxu0  ;;  %v816_v45 = vadd.f32 %v1755_v35, %v683_v40  ;;  %v882_v47 = vmul.f32 0.2, %v818_v39  ;;  %vm850_vm0 = vcmp.ge.f32.partialorder %v818_v39, 0.0 }
  0xf4   : > { %v685_v46 = vpop.f32.mrf.mxu1 }
  0xf5   : > { %v819_v48 = vadd.f32 %v1755_v35, %v694_v43  ;;  %v1485_v49 = vpop.f32.mrf.mxu0  ;;  %v686_v50 = vadd.f32 %v685_v46, %v470_v44  ;;  %v880_v55 = vmul.f32 0.2, %v816_v45  ;;  %v914_v58 = vsel %vm850_vm0, %v818_v39, %v882_v47 }
  0xf6   : > { %v1533_v51 = vpop.f32.mrf.mxu1  ;;  %vm848_vm2 = vcmp.ge.f32.partialorder %v816_v45, 0.0 }
  0xf7   : > { %vm851_vm1 = vcmp.ge.f32.partialorder %v819_v48, 0.0  ;;  %v883_v52 = vmul.f32 0.2, %v819_v48  ;;  %v707_v53 = vadd.f32 %v1533_v51, %v1485_v49  ;;  %v483_v54 = vpop.f32.mrf.mxu0  ;;  %v817_v56 = vadd.f32 %v1755_v35, %v686_v50 }
  0xf8   : > { %v698_v57 = vpop.f32.mrf.mxu1  ;;  %v912_v4 = vsel %vm848_vm2, %v816_v45, %v880_v55 }
  0xf9   : > { %v915_v59 = vsel %vm851_vm1, %v819_v48, %v883_v52  ;;  %v699_v60 = vadd.f32 %v698_v57, %v483_v54  ;;  %v1486_v61 = vpop.f32.mrf.mxu0  ;;  %vm849_vm3 = vcmp.ge.f32.partialorder %v817_v56, 0.0  ;;  %v881_v63 = vmul.f32 0.2, %v817_v56 }
  0xfa   : > { %v1328_v62 = vpack.c.bf16 %v915_v59, %v914_v58  ;;  %v822_v0 = vadd.f32 %v1755_v35, %v707_v53  ;;  %v1534_v1 = vpop.f32.mrf.mxu1 }
  0xfb   : > { %v710_v2 = vadd.f32 %v1534_v1, %v1486_v61  ;;  %v486_v3 = vpop.f32.mrf.mxu0  ;;  %v913_v5 = vsel %vm849_vm3, %v817_v56, %v881_v63  ;;  %v820_v6 = vadd.f32 %v1755_v35, %v699_v60 }
  0xfc   : > { %1400 = vst [vmem:[%s1765_s7 + $0x8] sm:$0xff] %v1328_v62   ;;  %v701_v7 = vpop.f32.mrf.mxu1  ;;  %v1323_v8 = vpack.c.bf16 %v913_v5, %v912_v4  ;;  %v886_v10 = vmul.f32 0.2, %v822_v0  ;;  %vm854_vm4 = vcmp.ge.f32.partialorder %v822_v0, 0.0 }
  0xfd   : > { %v1489_v9 = vpop.f32.mrf.mxu0  ;;  %v823_v11 = vadd.f32 %v1755_v35, %v710_v2  ;;  %v702_v12 = vadd.f32 %v701_v7, %v486_v3  ;;  %v884_v16 = vmul.f32 0.2, %v820_v6  ;;  %vm852_vm6 = vcmp.ge.f32.partialorder %v820_v6, 0.0 }
  0xfe   : > { %v1537_v13 = vpop.f32.mrf.mxu1  ;;  %1324 = vst [vmem:[%s1765_s7] sm:$0xff] %v1323_v8   ;;  %v918_v23 = vsel %vm854_vm4, %v822_v0, %v886_v10 }
  0xff   : > { %v723_v14 = vadd.f32 %v1537_v13, %v1489_v9  ;;  %v499_v15 = vpop.f32.mrf.mxu0  ;;  %vm855_vm5 = vcmp.ge.f32.partialorder %v823_v11, 0.0  ;;  %v887_v17 = vmul.f32 0.2, %v823_v11  ;;  %v821_v18 = vadd.f32 %v1755_v35, %v702_v12 }
 0x100   : > { %v714_v19 = vpop.f32.mrf.mxu1  ;;  %v916_v29 = vsel %vm852_vm6, %v820_v6, %v884_v16 }
 0x101   : > { %v826_v20 = vadd.f32 %v1755_v35, %v723_v14  ;;  %v715_v21 = vadd.f32 %v714_v19, %v499_v15  ;;  %v1490_v22 = vpop.f32.mrf.mxu0  ;;  %v919_v24 = vsel %vm855_vm5, %v823_v11, %v887_v17  ;;  %vm853_vm7 = vcmp.ge.f32.partialorder %v821_v18, 0.0 }
 0x102   : > { %v885_v25 = vmul.f32 0.2, %v821_v18  ;;  %v1538_v26 = vpop.f32.mrf.mxu1  ;;  %v1338_v27 = vpack.c.bf16 %v919_v24, %v918_v23 }
 0x103   : > { %v502_v28 = vpop.f32.mrf.mxu0  ;;  %v824_v31 = vadd.f32 %v1755_v35, %v715_v21  ;;  %v726_v32 = vadd.f32 %v1538_v26, %v1490_v22  ;;  %v890_v36 = vmul.f32 0.2, %v826_v20  ;;  %vm858_vm8 = vcmp.ge.f32.partialorder %v826_v20, 0.0 }
 0x104   : > { %v917_v30 = vsel %vm853_vm7, %v821_v18, %v885_v25  ;;  %v717_v33 = vpop.f32.mrf.mxu1  ;;  %1402 = vst [vmem:[%s1765_s7 + $0x18] sm:$0xff] %v1338_v27  }
 0x105   : > { %v1333_v34 = vpack.c.bf16 %v917_v30, %v916_v29  ;;  %v1493_v37 = vpop.f32.mrf.mxu0  ;;  %v827_v38 = vadd.f32 %v1755_v35, %v726_v32  ;;  %v718_v39 = vadd.f32 %v717_v33, %v502_v28  ;;  %v888_v43 = vmul.f32 0.2, %v824_v31 }
 0x106   : > { %v1541_v40 = vpop.f32.mrf.mxu1  ;;  %v922_v47 = vsel %vm858_vm8, %v826_v20, %v890_v36  ;;  %vm856_vm10 = vcmp.ge.f32.partialorder %v824_v31, 0.0 }
 0x107   : > { %1401 = vst [vmem:[%s1765_s7 + $0x10] sm:$0xff] %v1333_v34   ;;  %v739_v41 = vadd.f32 %v1541_v40, %v1493_v37  ;;  %v515_v42 = vpop.f32.mrf.mxu0  ;;  %vm859_vm9 = vcmp.ge.f32.partialorder %v827_v38, 0.0  ;;  %v891_v44 = vmul.f32 0.2, %v827_v38  ;;  %v825_v45 = vadd.f32 %v1755_v35, %v718_v39 }
 0x108   : > { %v730_v46 = vpop.f32.mrf.mxu1  ;;  %v920_v56 = vsel %vm856_vm10, %v824_v31, %v888_v43 }
 0x109   : > { %v731_v48 = vadd.f32 %v730_v46, %v515_v42  ;;  %v1494_v49 = vpop.f32.mrf.mxu0  ;;  %v923_v50 = vsel %vm859_vm9, %v827_v38, %v891_v44  ;;  %vm857_vm11 = vcmp.ge.f32.partialorder %v825_v45, 0.0  ;;  %v889_v51 = vmul.f32 0.2, %v825_v45 }
 0x10a   : > { %v830_v52 = vadd.f32 %v1755_v35, %v739_v41  ;;  %v1542_v53 = vpop.f32.mrf.mxu1  ;;  %v1348_v54 = vpack.c.bf16 %v923_v50, %v922_v47 }
 0x10b   : > { %v518_v55 = vpop.f32.mrf.mxu0  ;;  %v921_v57 = vsel %vm857_vm11, %v825_v45, %v889_v51  ;;  %v828_v58 = vadd.f32 %v1755_v35, %v731_v48  ;;  %v742_v59 = vadd.f32 %v1542_v53, %v1494_v49 }
 0x10c   : > { %v733_v60 = vpop.f32.mrf.mxu1  ;;  %1404 = vst [vmem:[%s1765_s7 + $0x28] sm:$0xff] %v1348_v54   ;;  %v1343_v61 = vpack.c.bf16 %v921_v57, %v920_v56  ;;  %v894_v63 = vmul.f32 0.2, %v830_v52  ;;  %vm862_vm12 = vcmp.ge.f32.partialorder %v830_v52, 0.0 }
 0x10d   : > { %v1497_v62 = vpop.f32.mrf.mxu0  ;;  %v831_v0 = vadd.f32 %v1755_v35, %v742_v59  ;;  %v734_v1 = vadd.f32 %v733_v60, %v518_v55  ;;  %v892_v5 = vmul.f32 0.2, %v828_v58  ;;  %vm860_vm14 = vcmp.ge.f32.partialorder %v828_v58, 0.0 }
 0x10e   : > { %v1545_v2 = vpop.f32.mrf.mxu1  ;;  %1403 = vst [vmem:[%s1765_s7 + $0x20] sm:$0xff] %v1343_v61   ;;  %v926_v12 = vsel %vm862_vm12, %v830_v52, %v894_v63 }
 0x10f   : > { %v755_v3 = vadd.f32 %v1545_v2, %v1497_v62  ;;  %v531_v4 = vpop.f32.mrf.mxu0  ;;  %vm863_vm13 = vcmp.ge.f32.partialorder %v831_v0, 0.0  ;;  %v895_v6 = vmul.f32 0.2, %v831_v0  ;;  %v829_v7 = vadd.f32 %v1755_v35, %v734_v1 }
 0x110   : > { %v746_v8 = vpop.f32.mrf.mxu1  ;;  %v924_v18 = vsel %vm860_vm14, %v828_v58, %v892_v5 }
 0x111   : > { %v834_v9 = vadd.f32 %v1755_v35, %v755_v3  ;;  %v747_v10 = vadd.f32 %v746_v8, %v531_v4  ;;  %v1498_v11 = vpop.f32.mrf.mxu0  ;;  %v927_v13 = vsel %vm863_vm13, %v831_v0, %v895_v6  ;;  %vm861_vm15 = vcmp.ge.f32.partialorder %v829_v7, 0.0 }
 0x112   : > { %v893_v14 = vmul.f32 0.2, %v829_v7  ;;  %v1546_v15 = vpop.f32.mrf.mxu1  ;;  %v1358_v16 = vpack.c.bf16 %v927_v13, %v926_v12 }
 0x113   : > { %v534_v17 = vpop.f32.mrf.mxu0  ;;  %v832_v20 = vadd.f32 %v1755_v35, %v747_v10  ;;  %v758_v21 = vadd.f32 %v1546_v15, %v1498_v11  ;;  %v898_v24 = vmul.f32 0.2, %v834_v9  ;;  %vm866_vm0 = vcmp.ge.f32.partialorder %v834_v9, 0.0 }
 0x114   : > { %v925_v19 = vsel %vm861_vm15, %v829_v7, %v893_v14  ;;  %v749_v22 = vpop.f32.mrf.mxu1  ;;  %1406 = vst [vmem:[%s1765_s7 + $0x38] sm:$0xff] %v1358_v16  }
 0x115   : > { %v1353_v23 = vpack.c.bf16 %v925_v19, %v924_v18  ;;  %v1501_v25 = vpop.f32.mrf.mxu0  ;;  %v835_v26 = vadd.f32 %v1755_v35, %v758_v21  ;;  %v750_v27 = vadd.f32 %v749_v22, %v534_v17  ;;  %v896_v31 = vmul.f32 0.2, %v832_v20 }
 0x116   : > { %v1549_v28 = vpop.f32.mrf.mxu1  ;;  %v930_v36 = vsel %vm866_vm0, %v834_v9, %v898_v24  ;;  %vm864_vm2 = vcmp.ge.f32.partialorder %v832_v20, 0.0 }
 0x117   : > { %1405 = vst [vmem:[%s1765_s7 + $0x30] sm:$0xff] %v1353_v23   ;;  %v771_v29 = vadd.f32 %v1549_v28, %v1501_v25  ;;  %v547_v30 = vpop.f32.mrf.mxu0  ;;  %vm867_vm1 = vcmp.ge.f32.partialorder %v835_v26, 0.0  ;;  %v899_v32 = vmul.f32 0.2, %v835_v26  ;;  %v833_v33 = vadd.f32 %v1755_v35, %v750_v27 }
 0x118   : > { %v762_v34 = vpop.f32.mrf.mxu1  ;;  %v928_v45 = vsel %vm864_vm2, %v832_v20, %v896_v31 }
 0x119   : > { %v763_v37 = vadd.f32 %v762_v34, %v547_v30  ;;  %v1502_v38 = vpop.f32.mrf.mxu0  ;;  %v931_v39 = vsel %vm867_vm1, %v835_v26, %v899_v32  ;;  %vm865_vm3 = vcmp.ge.f32.partialorder %v833_v33, 0.0  ;;  %v897_v40 = vmul.f32 0.2, %v833_v33 }
 0x11a   : > { %v838_v41 = vadd.f32 %v1755_v35, %v771_v29  ;;  %v1550_v42 = vpop.f32.mrf.mxu1  ;;  %v1368_v43 = vpack.c.bf16 %v931_v39, %v930_v36 }
 0x11b   : > { %v550_v44 = vpop.f32.mrf.mxu0  ;;  %v929_v46 = vsel %vm865_vm3, %v833_v33, %v897_v40  ;;  %v836_v47 = vadd.f32 %v1755_v35, %v763_v37  ;;  %v774_v48 = vadd.f32 %v1550_v42, %v1502_v38 }
 0x11c   : > { %v765_v49 = vpop.f32.mrf.mxu1  ;;  %1408 = vst [vmem:[%s1765_s7 + $0x48] sm:$0xff] %v1368_v43   ;;  %v1363_v50 = vpack.c.bf16 %v929_v46, %v928_v45  ;;  %v902_v52 = vmul.f32 0.2, %v838_v41  ;;  %vm870_vm4 = vcmp.ge.f32.partialorder %v838_v41, 0.0 }
 0x11d   : > { %v1505_v51 = vpop.f32.mrf.mxu0  ;;  %v839_v53 = vadd.f32 %v1755_v35, %v774_v48  ;;  %v766_v54 = vadd.f32 %v765_v49, %v550_v44  ;;  %v900_v58 = vmul.f32 0.2, %v836_v47  ;;  %vm868_vm6 = vcmp.ge.f32.partialorder %v836_v47, 0.0 }
 0x11e   : > { %v1553_v55 = vpop.f32.mrf.mxu1  ;;  %1407 = vst [vmem:[%s1765_s7 + $0x40] sm:$0xff] %v1363_v50   ;;  %v934_v1 = vsel %vm870_vm4, %v838_v41, %v902_v52 }
 0x11f   : > { %v787_v56 = vadd.f32 %v1553_v55, %v1505_v51  ;;  %v563_v57 = vpop.f32.mrf.mxu0  ;;  %vm871_vm5 = vcmp.ge.f32.partialorder %v839_v53, 0.0  ;;  %v903_v59 = vmul.f32 0.2, %v839_v53  ;;  %v837_v60 = vadd.f32 %v1755_v35, %v766_v54 }
 0x120   : > { %v778_v61 = vpop.f32.mrf.mxu1  ;;  %v932_v7 = vsel %vm868_vm6, %v836_v47, %v900_v58 }
 0x121   : > { %v842_v62 = vadd.f32 %v1755_v35, %v787_v56  ;;  %v779_v63 = vadd.f32 %v778_v61, %v563_v57  ;;  %v1506_v0 = vpop.f32.mrf.mxu0  ;;  %v935_v2 = vsel %vm871_vm5, %v839_v53, %v903_v59  ;;  %vm869_vm7 = vcmp.ge.f32.partialorder %v837_v60, 0.0 }
 0x122   : > { %v901_v3 = vmul.f32 0.2, %v837_v60  ;;  %v1554_v4 = vpop.f32.mrf.mxu1  ;;  %v1378_v5 = vpack.c.bf16 %v935_v2, %v934_v1 }
 0x123   : > { %v566_v6 = vpop.f32.mrf.mxu0  ;;  %v840_v9 = vadd.f32 %v1755_v35, %v779_v63  ;;  %v790_v10 = vadd.f32 %v1554_v4, %v1506_v0  ;;  %v906_v13 = vmul.f32 0.2, %v842_v62  ;;  %vm874_vm8 = vcmp.ge.f32.partialorder %v842_v62, 0.0 }
 0x124   : > { %v933_v8 = vsel %vm869_vm7, %v837_v60, %v901_v3  ;;  %v781_v11 = vpop.f32.mrf.mxu1  ;;  %1410 = vst [vmem:[%s1765_s7 + $0x58] sm:$0xff] %v1378_v5  }
 0x125   : > { %v1373_v12 = vpack.c.bf16 %v933_v8, %v932_v7  ;;  %v1509_v14 = vpop.f32.mrf.mxu0  ;;  %v843_v15 = vadd.f32 %v1755_v35, %v790_v10  ;;  %v782_v16 = vadd.f32 %v781_v11, %v566_v6  ;;  %v904_v20 = vmul.f32 0.2, %v840_v9 }
 0x126   : > { %v1557_v17 = vpop.f32.mrf.mxu1  ;;  %v938_v24 = vsel %vm874_vm8, %v842_v62, %v906_v13  ;;  %vm872_vm10 = vcmp.ge.f32.partialorder %v840_v9, 0.0 }
 0x127   : > { %1409 = vst [vmem:[%s1765_s7 + $0x50] sm:$0xff] %v1373_v12   ;;  %v803_v18 = vadd.f32 %v1557_v17, %v1509_v14  ;;  %v579_v19 = vpop.f32.mrf.mxu0  ;;  %vm875_vm9 = vcmp.ge.f32.partialorder %v843_v15, 0.0  ;;  %v907_v21 = vmul.f32 0.2, %v843_v15  ;;  %v841_v22 = vadd.f32 %v1755_v35, %v782_v16 }
 0x128   : > { %v794_v23 = vpop.f32.mrf.mxu1  ;;  %v936_v33 = vsel %vm872_vm10, %v840_v9, %v904_v20 }
 0x129   : > { %v795_v25 = vadd.f32 %v794_v23, %v579_v19  ;;  %v1510_v26 = vpop.f32.mrf.mxu0  ;;  %v939_v27 = vsel %vm875_vm9, %v843_v15, %v907_v21  ;;  %vm873_vm11 = vcmp.ge.f32.partialorder %v841_v22, 0.0  ;;  %v905_v28 = vmul.f32 0.2, %v841_v22 }
 0x12a   : > { %v846_v29 = vadd.f32 %v1755_v35, %v803_v18  ;;  %v1558_v30 = vpop.f32.mrf.mxu1  ;;  %v1388_v31 = vpack.c.bf16 %v939_v27, %v938_v24 }
 0x12b   : > { %v582_v32 = vpop.f32.mrf.mxu0  ;;  %v937_v34 = vsel %vm873_vm11, %v841_v22, %v905_v28  ;;  %v844_v36 = vadd.f32 %v1755_v35, %v795_v25  ;;  %v806_v37 = vadd.f32 %v1558_v30, %v1510_v26 }
 0x12c   : > { %v797_v38 = vpop.f32.mrf.mxu1  ;;  %1412 = vst [vmem:[%s1765_s7 + $0x68] sm:$0xff] %v1388_v31   ;;  %v1383_v39 = vpack.c.bf16 %v937_v34, %v936_v33  ;;  %v910_v40 = vmul.f32 0.2, %v846_v29  ;;  %vm878_vm12 = vcmp.ge.f32.partialorder %v846_v29, 0.0 }
 0x12d   : > { %v847_v41 = vadd.f32 %v1755_v35, %v806_v37  ;;  %v798_v42 = vadd.f32 %v797_v38, %v582_v32  ;;  %v908_v43 = vmul.f32 0.2, %v844_v36  ;;  %vm876_vm14 = vcmp.ge.f32.partialorder %v844_v36, 0.0 }
 0x12e   : > { %1411 = vst [vmem:[%s1765_s7 + $0x60] sm:$0xff] %v1383_v39   ;;  %v942_v46 = vsel %vm878_vm12, %v846_v29, %v910_v40 }
 0x12f   : > { %vm879_vm13 = vcmp.ge.f32.partialorder %v847_v41, 0.0  ;;  %v911_v44 = vmul.f32 0.2, %v847_v41  ;;  %v845_v45 = vadd.f32 %v1755_v35, %v798_v42  ;;  %v940_v50 = vsel %vm876_vm14, %v844_v36, %v908_v43 }
 0x131   : > { %v943_v47 = vsel %vm879_vm13, %v847_v41, %v911_v44  ;;  %vm877_vm15 = vcmp.ge.f32.partialorder %v845_v45, 0.0  ;;  %v909_v48 = vmul.f32 0.2, %v845_v45 }
 0x132   : > { %v1398_v49 = vpack.c.bf16 %v943_v47, %v942_v46 }
 0x133   : > { %v941_v51 = vsel %vm877_vm15, %v845_v45, %v909_v48 }
 0x134   : > { %1414 = vst [vmem:[%s1765_s7 + $0x78] sm:$0xff] %v1398_v49   ;;  %v1393_v52 = vpack.c.bf16 %v941_v51, %v940_v50 }
 0x136   : > { %1413 = vst [vmem:[%s1765_s7 + $0x70] sm:$0xff] %v1393_v52  }
 0x137 PF: > { %s13_s14 = sadd.s32 1, %s1639_s14   ;;  %s1824_s12 = smov %s1635_s13 }
 0x138   : > { %p10_p5 = scmp.ge.s32.totalorder %s13_s14, 4   ;;  %s1825_s13 = smov %s1827_s15 }
 0x13a   :  { %12 = sbr.rel (!%p10_p5) target bundleno = 2 (0x2), region = 68 }

// kernel: discriminator_forward.10
= control target key start
LH: loop header
LB: loop body
LE: loop exit
PB: predicated region body
PF: predicated region fallthrough
CT: control target
= control target key end

     0   :  { %s499_s6 = smov 0   ;;  %s501_s7 = smov 0   ;;  %s539_s0 = inlined_call_operand.vmem [shape: bf16[2,64,128], index: 0, kind: input, shape index: {}]   ;;  %s540_s1 = inlined_call_operand.vmem [shape: bf16[2,64,128], index: 1, kind: output, shape index: {}]  }
   0x1   :  { %s503_s8 = smov 0  }
   0x2 LB: > { %s23_s9 = sadd.s32 1, %s483_s7  ;;  %p372_p0 = scmp.ge.s32.totalorder %s487_s8, 1  ;;  %s487_s8 = sphi %s503_s8, %s11_s8   ;;  %s483_s7 = sphi %s501_s7, %s542_s7   ;;  %s479_s6 = sphi %s499_s6, %s541_s6  }
   0x3   : > { %p25_p1 = scmp.ge.s32.totalorder %s23_s9, 2  ;;  %p106_p2 = scmp.lt.s32.totalorder %s487_s8, 3 }
   0x5   : > { %s544_s9 = smov (%p25_p1, %s23_s9), 0  ;;  %p107_p3 = pnand %p372_p0, %p106_p2 }
   0x6   : > { %p132_p4 = scmp.lt.s32.totalorder (!%p107_p3), %s479_s6, 1 }
   0x7   : > { %110 = sbr.rel (%p107_p3) target bundleno = 81 (0x51), region = 24 }
   0xc   : > { %s546_s6 = smov (!%p132_p4, %s479_s6), 1 }
   0xd   : > { %s387_s10 = sshll.u32 %s546_s6, 5 }
   0xe   : > { %s139_s13 = scalar_lea.vmem %s539_s0, %s387_s10  ;;  %s147_s16 = scalar_lea.vmem %s540_s1, %s387_s10 }
   0xf   : > { %v398_v0 = vld [vmem:[%s139_s13] sm:$0xff]   ;;  %v433_v1 = vld [vmem:[%s139_s13 + $0x8] sm:$0xff]   ;;  %v434_v2 = vld [vmem:[%s139_s13 + $0x10] sm:$0xff]  }
  0x10   : > { %v399_v3 = vunpack.c.l.bf16 %v398_v0  ;;  %v400_v4 = vunpack.c.h.bf16 %v398_v0  ;;  %v403_v5 = vunpack.c.l.bf16 %v433_v1  ;;  %v404_v6 = vunpack.c.h.bf16 %v433_v1  ;;  %v435_v12 = vld [vmem:[%s139_s13 + $0x18] sm:$0xff]  }
  0x11   : > { %v407_v7 = vunpack.c.l.bf16 %v434_v2  ;;  %v408_v13 = vunpack.c.h.bf16 %v434_v2  ;;  %v411_v17 = vunpack.c.l.bf16 %v435_v12  ;;  %v412_v21 = vunpack.c.h.bf16 %v435_v12 }
  0x12   : > { %v164_v8 = vadd.f32 %v400_v4, %v399_v3  ;;  %v177_v9 = vmul.f32 %v399_v3, %v399_v3  ;;  %v178_v10 = vmul.f32 %v400_v4, %v400_v4  ;;  %v179_v11 = vmul.f32 %v403_v5, %v403_v5 }
  0x13   : > { %v180_v15 = vmul.f32 %v404_v6, %v404_v6  ;;  %v181_v19 = vmul.f32 %v407_v7, %v407_v7  ;;  %v182_v23 = vmul.f32 %v408_v13, %v408_v13  ;;  %v183_v26 = vmul.f32 %v411_v17, %v411_v17 }
  0x14   : > { %v165_v14 = vadd.f32 %v403_v5, %v164_v8  ;;  %v185_v16 = vadd.f32 %v178_v10, %v177_v9  ;;  %v184_v29 = vmul.f32 %v412_v21, %v412_v21 }
  0x16   : > { %v166_v18 = vadd.f32 %v404_v6, %v165_v14  ;;  %v186_v20 = vadd.f32 %v185_v16, %v179_v11 }
  0x18   : > { %v167_v22 = vadd.f32 %v407_v7, %v166_v18  ;;  %v187_v24 = vadd.f32 %v186_v20, %v180_v15 }
  0x1a   : > { %v168_v25 = vadd.f32 %v408_v13, %v167_v22  ;;  %v188_v27 = vadd.f32 %v187_v24, %v181_v19 }
  0x1c   : > { %v169_v28 = vadd.f32 %v411_v17, %v168_v25  ;;  %v189_v30 = vadd.f32 %v188_v27, %v182_v23 }
  0x1e   : > { %v170_v31 = vadd.f32 %v412_v21, %v169_v28  ;;  %v190_v32 = vadd.f32 %v189_v30, %v183_v26 }
  0x20   : > { %v171_v33 = vrot.slane %v170_v31, 4  ;;  %v191_v34 = vadd.f32 %v190_v32, %v184_v29 }
  0x22   : > { %v172_v35 = vadd.f32 %v171_v33, %v170_v31  ;;  %v192_v36 = vrot.slane %v191_v34, 4 }
  0x24   : > { %v173_v37 = vrot.slane %v172_v35, 2  ;;  %v193_v38 = vadd.f32 %v192_v36, %v191_v34 }
  0x26   : > { %v174_v39 = vadd.f32 %v173_v37, %v172_v35  ;;  %v194_v40 = vrot.slane %v193_v38, 2 }
  0x28   : > { %v175_v41 = vrot.slane %v174_v39, 1  ;;  %v195_v42 = vadd.f32 %v194_v40, %v193_v38 }
  0x2a   : > { %v176_v43 = vadd.f32 %v175_v41, %v174_v39  ;;  %v196_v44 = vrot.slane %v195_v42, 1 }
  0x2c   : > { %v197_v45 = vadd.f32 %v196_v44, %v195_v42  ;;  %v198_v46 = vmul.f32 0.015625, %v176_v43 }
  0x2e   : > { %v199_v47 = vmul.f32 0.015625, %v197_v45  ;;  %v200_v48 = vmul.f32 %v198_v46, %v198_v46  ;;  %v203_v52 = vsub.f32 %v399_v3, %v198_v46  ;;  %v204_v53 = vsub.f32 %v400_v4, %v198_v46 }
  0x2f   : > { %v205_v54 = vsub.f32 %v403_v5, %v198_v46  ;;  %v206_v55 = vsub.f32 %v404_v6, %v198_v46  ;;  %v207_v56 = vsub.f32 %v407_v7, %v198_v46  ;;  %v208_v57 = vsub.f32 %v408_v13, %v198_v46 }
  0x30   : > { %v201_v49 = vsub.f32 %v199_v47, %v200_v48  ;;  %v209_v58 = vsub.f32 %v411_v17, %v198_v46  ;;  %v210_v59 = vsub.f32 %v412_v21, %v198_v46 }
  0x32   : > { %v202_v50 = vmax.f32 %v201_v49, 0.0 }
  0x34   : > { %v211_v51 = vadd.f32 1e-05, %v202_v50 }
  0x36   : > { %463 = vrsqrt.f32 %v211_v51 }
  0x43   : > { %v464_v60 = vpop.eup %463 }
  0x44   : > { %v213_v61 = vmul.f32 %v464_v60, %v203_v52  ;;  %v214_v62 = vmul.f32 %v464_v60, %v204_v53  ;;  %v215_v63 = vmul.f32 %v464_v60, %v205_v54  ;;  %v216_v0 = vmul.f32 %v464_v60, %v206_v55 }
  0x45   : > { %v217_v1 = vmul.f32 %v464_v60, %v207_v56  ;;  %v218_v2 = vmul.f32 %v464_v60, %v208_v57  ;;  %v219_v8 = vmul.f32 %v464_v60, %v209_v58  ;;  %v220_v9 = vmul.f32 %v464_v60, %v210_v59 }
  0x46   : > { %vm221_vm0 = vcmp.ge.f32.partialorder %v213_v61, 0.0  ;;  %vm222_vm1 = vcmp.ge.f32.partialorder %v214_v62, 0.0  ;;  %v229_v3 = vmul.f32 0.2, %v213_v61  ;;  %v230_v4 = vmul.f32 0.2, %v214_v62 }
  0x47   : > { %vm223_vm2 = vcmp.ge.f32.partialorder %v215_v63, 0.0  ;;  %vm224_vm3 = vcmp.ge.f32.partialorder %v216_v0, 0.0  ;;  %v231_v5 = vmul.f32 0.2, %v215_v63  ;;  %v232_v6 = vmul.f32 0.2, %v216_v0 }
  0x48   : > { %v237_v7 = vsel %vm221_vm0, %v213_v61, %v229_v3  ;;  %v238_v10 = vsel %vm222_vm1, %v214_v62, %v230_v4  ;;  %vm225_vm4 = vcmp.ge.f32.partialorder %v217_v1, 0.0  ;;  %vm226_vm5 = vcmp.ge.f32.partialorder %v218_v2, 0.0 }
  0x49   : > { %v416_v11 = vpack.c.bf16 %v238_v10, %v237_v7  ;;  %v239_v12 = vsel %vm223_vm2, %v215_v63, %v231_v5  ;;  %v240_v13 = vsel %vm224_vm3, %v216_v0, %v232_v6  ;;  %v233_v14 = vmul.f32 0.2, %v217_v1 }
  0x4a   : > { %v421_v15 = vpack.c.bf16 %v240_v13, %v239_v12  ;;  %v234_v16 = vmul.f32 0.2, %v218_v2  ;;  %vm227_vm6 = vcmp.ge.f32.partialorder %v219_v8, 0.0  ;;  %vm228_vm7 = vcmp.ge.f32.partialorder %v220_v9, 0.0 }
  0x4b   : > { %417 = vst [vmem:[%s147_s16] sm:$0xff] %v416_v11   ;;  %v241_v17 = vsel %vm225_vm4, %v217_v1, %v233_v14  ;;  %v235_v18 = vmul.f32 0.2, %v219_v8  ;;  %v236_v19 = vmul.f32 0.2, %v220_v9 }
  0x4c   : > { %436 = vst [vmem:[%s147_s16 + $0x8] sm:$0xff] %v421_v15   ;;  %v242_v20 = vsel %vm226_vm5, %v218_v2, %v234_v16 }
  0x4d   : > { %v426_v21 = vpack.c.bf16 %v242_v20, %v241_v17  ;;  %v243_v22 = vsel %vm227_vm6, %v219_v8, %v235_v18  ;;  %v244_v23 = vsel %vm228_vm7, %v220_v9, %v236_v19 }
  0x4e   : > { %v431_v24 = vpack.c.bf16 %v244_v23, %v243_v22 }
  0x4f   : > { %437 = vst [vmem:[%s147_s16 + $0x10] sm:$0xff] %v426_v21  }
  0x50   : > { %438 = vst [vmem:[%s147_s16 + $0x18] sm:$0xff] %v431_v24  }
  0x51 PF: > { %s11_s8 = sadd.s32 1, %s487_s8   ;;  %s541_s6 = smov %s483_s7 }
  0x52   : > { %p8_p5 = scmp.ge.s32.totalorder %s11_s8, 4   ;;  %s542_s7 = smov %s544_s9 }
  0x54   :  { %10 = sbr.rel (!%p8_p5) target bundleno = 2 (0x2), region = 54 }

// kernel: discriminator_forward.9
= control target key start
LH: loop header
LB: loop body
LE: loop exit
PB: predicated region body
PF: predicated region fallthrough
CT: control target
= control target key end

     0   :  { %s2100_s9 = smov 0   ;;  %s2102_s10 = smov 0   ;;  %s2605_s0 = inlined_call_operand.vmem [shape: bf16[2,144,512], index: 0, kind: input, shape index: {}]   ;;  %s2606_s1 = inlined_call_operand.vmem [shape: bf16[2,512,128], index: 1, kind: input, shape index: {}]   ;;  %s2607_s2 = inlined_call_operand.vmem [shape: bf16[2,128,128], index: 2, kind: output, shape index: {}]  }
   0x1   :  { %s2104_s11 = smov 0  }
   0x2 LB: > { %s24_s12 = sadd.s32 1, %s2079_s10  ;;  %p1476_p0 = scmp.ge.s32.totalorder %s2083_s11, 1  ;;  %s2083_s11 = sphi %s2104_s11, %s12_s11   ;;  %s2079_s10 = sphi %s2102_s10, %s2609_s10   ;;  %s2075_s9 = sphi %s2100_s9, %s2608_s9  }
   0x3   : > { %p26_p1 = scmp.ge.s32.totalorder %s24_s12, 2  ;;  %p135_p2 = scmp.lt.s32.totalorder %s2083_s11, 3 }
   0x5   : > { %s2611_s12 = smov (%p26_p1, %s24_s12), 0  ;;  %p136_p3 = pnand %p1476_p0, %p135_p2 }
   0x6   : > { %p164_p4 = scmp.lt.s32.totalorder (!%p136_p3), %s2075_s9, 1 }
   0x7   : > { %139 = sbr.rel (%p136_p3) target bundleno = 374 (0x176), region = 28 }
   0xc   : > { %v1943_v0 = vld [vmem:[%s2606_s1 + $0x178] sm:$0xff]   ;;  %v1947_v4 = vld [vmem:[%s2606_s1 + $0x170] sm:$0xff]   ;;  %v1951_v8 = vld [vmem:[%s2606_s1 + $0x168] sm:$0xff]   ;;  %s2613_s9 = smov (!%p164_p4, %s2075_s9), 1 }
   0xd   : > { %v1944_v1 = vld [vmem:[%s2606_s1 + $0x1f8] sm:$0xff]   ;;  %1662 = vmatprep.subr.bf16.mxu0 %v1943_v0  ;;  %v1948_v5 = vld [vmem:[%s2606_s1 + $0x1f0] sm:$0xff]   ;;  %v1952_v9 = vld [vmem:[%s2606_s1 + $0x1e8] sm:$0xff]   ;;  %s1918_s17 = smul.u32 288, %s2613_s9 }
   0xe   : > { %v1945_v2 = vld [vmem:[%s2606_s1 + $0x138] sm:$0xff]   ;;  %1726 = vmatprep.subr.bf16.mxu1 %v1944_v1  ;;  %v1949_v6 = vld [vmem:[%s2606_s1 + $0x130] sm:$0xff]   ;;  %v1953_v10 = vld [vmem:[%s2606_s1 + $0x128] sm:$0xff]  }
   0xf   : > { %v1946_v3 = vld [vmem:[%s2606_s1 + $0x1b8] sm:$0xff]   ;;  %1663 = vmatpush3.bf16.msra.mxu0 %v1945_v2  ;;  %v1950_v7 = vld [vmem:[%s2606_s1 + $0x1b0] sm:$0xff]   ;;  %v1954_v11 = vld [vmem:[%s2606_s1 + $0x1a8] sm:$0xff]   ;;  %s2218_s28 = scalar_lea.vmem %s2605_s0, %s1918_s17 }
  0x10   : > { %1727 = vmatpush3.bf16.msra.mxu1 %v1946_v3  ;;  %1664 = vmatprep.subr.bf16.mxu0 %v1947_v4  ;;  %v1955_v12 = vld [vmem:[%s2606_s1 + $0x160] sm:$0xff]   ;;  %v1959_v16 = vld [vmem:[%s2606_s1 + $0x158] sm:$0xff]   ;;  %v1963_v20 = vld [vmem:[%s2606_s1 + $0x150] sm:$0xff]  }
  0x11   : > { %1728 = vmatprep.subr.bf16.mxu1 %v1948_v5  ;;  %v1956_v13 = vld [vmem:[%s2606_s1 + $0x1e0] sm:$0xff]   ;;  %v1960_v17 = vld [vmem:[%s2606_s1 + $0x1d8] sm:$0xff]   ;;  %v1964_v21 = vld [vmem:[%s2606_s1 + $0x1d0] sm:$0xff]  }
  0x12   : > { %v1957_v14 = vld [vmem:[%s2606_s1 + $0x120] sm:$0xff]   ;;  %v1961_v18 = vld [vmem:[%s2606_s1 + $0x118] sm:$0xff]   ;;  %v1965_v22 = vld [vmem:[%s2606_s1 + $0x110] sm:$0xff]  }
  0x13   : > { %1665 = vmatpush3.bf16.msra.mxu0 %v1949_v6  ;;  %v1958_v15 = vld [vmem:[%s2606_s1 + $0x1a0] sm:$0xff]   ;;  %v1962_v19 = vld [vmem:[%s2606_s1 + $0x198] sm:$0xff]   ;;  %v1966_v23 = vld [vmem:[%s2606_s1 + $0x190] sm:$0xff]  }
  0x14   : > { %1729 = vmatpush3.bf16.msra.mxu1 %v1950_v7  ;;  %1666 = vmatprep.subr.bf16.mxu0 %v1951_v8  ;;  %v1967_v24 = vld [vmem:[%s2606_s1 + $0x148] sm:$0xff]   ;;  %v1971_v28 = vld [vmem:[%s2606_s1 + $0x140] sm:$0xff]   ;;  %v1981_v36 = vld [vmem:[%s2606_s1 + $0x78] sm:$0xff]  }
  0x15   : > { %1730 = vmatprep.subr.bf16.mxu1 %v1952_v9  ;;  %v1968_v25 = vld [vmem:[%s2606_s1 + $0x1c8] sm:$0xff]   ;;  %v1972_v29 = vld [vmem:[%s2606_s1 + $0x1c0] sm:$0xff]   ;;  %v1982_v37 = vld [vmem:[%s2606_s1 + $0x38] sm:$0xff]  }
  0x16   : > { %v1969_v26 = vld [vmem:[%s2606_s1 + $0x108] sm:$0xff]   ;;  %v1973_v30 = vld [vmem:[%s2606_s1 + $0x100] sm:$0xff]   ;;  %v1983_v38 = vld [vmem:[%s2606_s1 + $0xf8] sm:$0xff]  }
  0x17   : > { %1667 = vmatpush3.bf16.msra.mxu0 %v1953_v10  ;;  %v1970_v27 = vld [vmem:[%s2606_s1 + $0x188] sm:$0xff]   ;;  %v1974_v31 = vld [vmem:[%s2606_s1 + $0x180] sm:$0xff]   ;;  %v1984_v39 = vld [vmem:[%s2606_s1 + $0xb8] sm:$0xff]  }
  0x18   : > { %1731 = vmatpush3.bf16.msra.mxu1 %v1954_v11  ;;  %1668 = vmatprep.subr.bf16.mxu0 %v1955_v12  ;;  %v2227_v32 = vld [vmem:[%s2218_s28 + $0x20] ss:$16 sps:$4 sm:$0xff]   ;;  %v2230_v33 = vld [vmem:[%s2218_s28 + $0x24] ss:$16 sps:$4 sm:$0xff]   ;;  %v2233_v34 = vld [vmem:[%s2218_s28 + $0x28] ss:$16 sps:$4 sm:$0xff]  }
  0x19   : > { %1732 = vmatprep.subr.bf16.mxu1 %v1956_v13  ;;  %v2236_v35 = vld [vmem:[%s2218_s28 + $0x2c] ss:$16 sps:$4 sm:$0xff]   ;;  %730 = vmatprep.mubr.bf16.mxu0 %v2230_v33  ;;  %v2255_v40 = vld [vmem:[%s2218_s28 + $0x44] ss:$16 sps:$4 sm:$0xff]   ;;  %v2261_v42 = vld [vmem:[%s2218_s28 + $0x40] ss:$16 sps:$4 sm:$0xff]  }
  0x1a   : > { %827 = vmatprep.mubr.bf16.mxu1 %v2236_v35  ;;  %v2258_v41 = vld [vmem:[%s2218_s28 + $0x4c] ss:$16 sps:$4 sm:$0xff]   ;;  %v2265_v43 = vld [vmem:[%s2218_s28 + $0x48] ss:$16 sps:$4 sm:$0xff]   ;;  %v1991_v44 = vld [vmem:[%s2606_s1 + $0x70] sm:$0xff]  }
  0x1b   : > { %1669 = vmatpush3.bf16.msra.mxu0 %v1957_v14  ;;  %v1992_v45 = vld [vmem:[%s2606_s1 + $0x30] sm:$0xff]   ;;  %v2286_v49 = vld [vmem:[%s2218_s28 + $0x6c] ss:$16 sps:$4 sm:$0xff]   ;;  %v2292_v51 = vld [vmem:[%s2218_s28 + $0x68] ss:$16 sps:$4 sm:$0xff]  }
  0x1c   : > { %1733 = vmatpush3.bf16.msra.mxu1 %v1958_v15  ;;  %1670 = vmatprep.subr.bf16.mxu0 %v1959_v16  ;;  %v1993_v46 = vld [vmem:[%s2606_s1 + $0xf0] sm:$0xff]   ;;  %v2001_v52 = vld [vmem:[%s2606_s1 + $0x68] sm:$0xff]   ;;  %v2011_v60 = vld [vmem:[%s2606_s1 + $0x60] sm:$0xff]  }
  0x1d   : > { %1734 = vmatprep.subr.bf16.mxu1 %v1960_v17  ;;  %v1994_v47 = vld [vmem:[%s2606_s1 + $0xb0] sm:$0xff]   ;;  %v2002_v53 = vld [vmem:[%s2606_s1 + $0x28] sm:$0xff]   ;;  %v2012_v61 = vld [vmem:[%s2606_s1 + $0x20] sm:$0xff]  }
  0x1e   : > { %v2283_v48 = vld [vmem:[%s2218_s28 + $0x64] ss:$16 sps:$4 sm:$0xff]   ;;  %v2289_v50 = vld [vmem:[%s2218_s28 + $0x60] ss:$16 sps:$4 sm:$0xff]   ;;  %v2003_v54 = vld [vmem:[%s2606_s1 + $0xe8] sm:$0xff]  }
  0x1f   : > { %1671 = vmatpush3.bf16.msra.mxu0 %v1961_v18  ;;  %v2004_v55 = vld [vmem:[%s2606_s1 + $0xa8] sm:$0xff]   ;;  %v2310_v56 = vld [vmem:[%s2218_s28 + $0x84] ss:$16 sps:$4 sm:$0xff]   ;;  %v2318_v58 = vld [vmem:[%s2218_s28 + $0x80] ss:$16 sps:$4 sm:$0xff]  }
  0x20   : > { %1735 = vmatpush3.bf16.msra.mxu1 %v1962_v19  ;;  %1672 = vmatprep.subr.bf16.mxu0 %v1963_v20  ;;  %v2314_v57 = vld [vmem:[%s2218_s28 + $0x8c] ss:$16 sps:$4 sm:$0xff]   ;;  %v2322_v59 = vld [vmem:[%s2218_s28 + $0x88] ss:$16 sps:$4 sm:$0xff]   ;;  %v2013_v62 = vld [vmem:[%s2606_s1 + $0xe0] sm:$0xff]  }
  0x21   : > { %1736 = vmatprep.subr.bf16.mxu1 %v1964_v21  ;;  %v2014_v63 = vld [vmem:[%s2606_s1 + $0xa0] sm:$0xff]   ;;  %v2341_v1 = vld [vmem:[%s2218_s28 + $0xac] ss:$16 sps:$4 sm:$0xff]   ;;  %v2353_v4 = vld [vmem:[%s2218_s28 + $0xa8] ss:$16 sps:$4 sm:$0xff]  }
  0x22   : > { %v2337_v0 = vld [vmem:[%s2218_s28 + $0xa4] ss:$16 sps:$4 sm:$0xff]   ;;  %v2347_v2 = vld [vmem:[%s2218_s28 + $0xa0] ss:$16 sps:$4 sm:$0xff]   ;;  %v2021_v3 = vld [vmem:[%s2606_s1 + $0x58] sm:$0xff]  }
  0x23   : > { %1673 = vmatpush3.bf16.msra.mxu0 %v1965_v22  ;;  %v2022_v5 = vld [vmem:[%s2606_s1 + $0x18] sm:$0xff]   ;;  %v2365_v8 = vld [vmem:[%s2218_s28 + $0xc4] ss:$16 sps:$4 sm:$0xff]   ;;  %v2381_v12 = vld [vmem:[%s2218_s28 + $0xc0] ss:$16 sps:$4 sm:$0xff]  }
  0x24   : > { %1737 = vmatpush3.bf16.msra.mxu1 %v1966_v23  ;;  %1674 = vmatprep.subr.bf16.mxu0 %v1967_v24  ;;  %v2023_v6 = vld [vmem:[%s2606_s1 + $0xd8] sm:$0xff]   ;;  %v2031_v10 = vld [vmem:[%s2606_s1 + $0x50] sm:$0xff]   ;;  %v2041_v18 = vld [vmem:[%s2606_s1 + $0x48] sm:$0xff]  }
  0x25   : > { %1738 = vmatprep.subr.bf16.mxu1 %v1968_v25  ;;  %v2024_v7 = vld [vmem:[%s2606_s1 + $0x98] sm:$0xff]   ;;  %v2032_v11 = vld [vmem:[%s2606_s1 + $0x10] sm:$0xff]   ;;  %v2042_v19 = vld [vmem:[%s2606_s1 + $0x8] sm:$0xff]  }
  0x26   : > { %v2368_v9 = vld [vmem:[%s2218_s28 + $0xcc] ss:$16 sps:$4 sm:$0xff]   ;;  %v2033_v13 = vld [vmem:[%s2606_s1 + $0xd0] sm:$0xff]   ;;  %v2390_v15 = vld [vmem:[%s2218_s28 + $0xc8] ss:$16 sps:$4 sm:$0xff]  }
  0x27   : > { %1675 = vmatpush3.bf16.msra.mxu0 %v1969_v26  ;;  %v2034_v14 = vld [vmem:[%s2606_s1 + $0x90] sm:$0xff]   ;;  %v2396_v17 = vld [vmem:[%s2218_s28 + $0xec] ss:$16 sps:$4 sm:$0xff]   ;;  %v2040_v23 = vld [vmem:[%s2218_s28 + $0xe8] ss:$16 sps:$4 sm:$0xff]  }
  0x28   : > { %1739 = vmatpush3.bf16.msra.mxu1 %v1970_v27  ;;  %1676 = vmatprep.subr.bf16.mxu0 %v1971_v28  ;;  %v2393_v16 = vld [vmem:[%s2218_s28 + $0xe4] ss:$16 sps:$4 sm:$0xff]   ;;  %v2043_v20 = vld [vmem:[%s2606_s1 + $0xc8] sm:$0xff]   ;;  %v2039_v22 = vld [vmem:[%s2218_s28 + $0xe0] ss:$16 sps:$4 sm:$0xff]  }
  0x29   : > { %1740 = vmatprep.subr.bf16.mxu1 %v1972_v29  ;;  %v2044_v21 = vld [vmem:[%s2606_s1 + $0x88] sm:$0xff]   ;;  %v2045_v24 = vld [vmem:[%s2218_s28 + $0x104] ss:$16 sps:$4 sm:$0xff]  }
  0x2a   : > { %v2047_v25 = vld [vmem:[%s2218_s28 + $0x10c] ss:$16 sps:$4 sm:$0xff]   ;;  %v2051_v26 = vld [vmem:[%s2606_s1 + $0x40] sm:$0xff]  }
  0x2b   : > { %1677 = vmatpush3.bf16.msra.mxu0 %v1973_v30  ;;  %v2052_v27 = vld [vmem:[%s2606_s1] sm:$0xff]  }
  0x2c   : > { %1741 = vmatpush3.bf16.msra.mxu1 %v1974_v31  ;;  %1790 = vmatprep.subr.bf16.mxu0 %v1981_v36  ;;  %v2053_v28 = vld [vmem:[%s2606_s1 + $0xc0] sm:$0xff]   ;;  %v2050_v31 = vld [vmem:[%s2218_s28 + $0x108] ss:$16 sps:$4 sm:$0xff]  }
  0x2d   : > { %1854 = vmatprep.subr.bf16.mxu1 %v1983_v38  ;;  %v2054_v29 = vld [vmem:[%s2606_s1 + $0x80] sm:$0xff]  }
  0x2e   : > { %731 = vmatmul.mubr.bf16.vlgmr.msra.gmra.mxu0 %v2227_v32  ;;  %v2049_v30 = vld [vmem:[%s2218_s28 + $0x100] ss:$16 sps:$4 sm:$0xff]   ;;  %v2057_v36 = vld [vmem:[%s2218_s28 + $0x4] ss:$16 sps:$4 sm:$0xff]  }
  0x2f   : > { %828 = vmatmul.mubr.bf16.vlgmr.msra.gmra.mxu1 %v2233_v34  ;;  %1791 = vmatpush3.bf16.msra.mxu0 %v1982_v37  ;;  %v2060_v37 = vld [vmem:[%s2218_s28 + $0xc] ss:$16 sps:$4 sm:$0xff]   ;;  %v2055_v38 = vld [vmem:[%s2218_s28] ss:$16 sps:$4 sm:$0xff]  }
  0x30   : > { %1855 = vmatpush3.bf16.msra.mxu1 %v1984_v39  ;;  %738 = vmatprep.mubr.bf16.mxu0 %v2255_v40  ;;  %v2058_v39 = vld [vmem:[%s2218_s28 + $0x8] ss:$16 sps:$4 sm:$0xff]   ;;  %s1598_s28 = sshll.u32 %s2613_s9, 6 }
  0x31   : > { %835 = vmatprep.mubr.bf16.mxu1 %v2258_v41  ;;  %1792 = vmatprep.subr.bf16.mxu0 %v1991_v44  ;;  %s2555_s30 = scalar_lea.vmem %s2607_s2, %s1598_s28 }
  0x32   : > { %1856 = vmatprep.subr.bf16.mxu1 %v1993_v46 }
  0x33   : > { %1793 = vmatpush3.bf16.msra.mxu0 %v1992_v45 }
  0x34   : > { %1857 = vmatpush3.bf16.msra.mxu1 %v1994_v47  ;;  %1794 = vmatprep.subr.bf16.mxu0 %v2001_v52 }
  0x35   : > { %1858 = vmatprep.subr.bf16.mxu1 %v2003_v54 }
  0x36   : > { %739 = vmatmul.mubr.bf16.gmra.mxu0 %v2261_v42 }
  0x37   : > { %836 = vmatmul.mubr.bf16.gmra.mxu1 %v2265_v43  ;;  %746 = vmatprep.mubr.bf16.mxu0 %v2283_v48 }
  0x38   : > { %843 = vmatprep.mubr.bf16.mxu1 %v2286_v49  ;;  %1795 = vmatpush3.bf16.msra.mxu0 %v2002_v53 }
  0x39   : > { %1859 = vmatpush3.bf16.msra.mxu1 %v2004_v55  ;;  %1796 = vmatprep.subr.bf16.mxu0 %v2011_v60 }
  0x3a   : > { %1860 = vmatprep.subr.bf16.mxu1 %v2013_v62 }
  0x3c   : > { %1797 = vmatpush3.bf16.msra.mxu0 %v2012_v61 }
  0x3d   : > { %1861 = vmatpush3.bf16.msra.mxu1 %v2014_v63  ;;  %1798 = vmatprep.subr.bf16.mxu0 %v2021_v3 }
  0x3e   : > { %747 = vmatmul.mubr.bf16.gmra.mxu0 %v2289_v50  ;;  %1862 = vmatprep.subr.bf16.mxu1 %v2023_v6 }
  0x3f   : > { %844 = vmatmul.mubr.bf16.gmra.mxu1 %v2292_v51  ;;  %754 = vmatprep.mubr.bf16.mxu0 %v2310_v56 }
  0x40   : > { %851 = vmatprep.mubr.bf16.mxu1 %v2314_v57  ;;  %1799 = vmatpush3.bf16.msra.mxu0 %v2022_v5 }
  0x41   : > { %1863 = vmatpush3.bf16.msra.mxu1 %v2024_v7  ;;  %1800 = vmatprep.subr.bf16.mxu0 %v2031_v10 }
  0x42   : > { %1864 = vmatprep.subr.bf16.mxu1 %v2033_v13 }
  0x44   : > { %1801 = vmatpush3.bf16.msra.mxu0 %v2032_v11 }
  0x45   : > { %1865 = vmatpush3.bf16.msra.mxu1 %v2034_v14  ;;  %1802 = vmatprep.subr.bf16.mxu0 %v2041_v18 }
  0x46   : > { %755 = vmatmul.mubr.bf16.gmra.mxu0 %v2318_v58  ;;  %1866 = vmatprep.subr.bf16.mxu1 %v2043_v20 }
  0x47   : > { %852 = vmatmul.mubr.bf16.gmra.mxu1 %v2322_v59  ;;  %762 = vmatprep.mubr.bf16.mxu0 %v2337_v0 }
  0x48   : > { %859 = vmatprep.mubr.bf16.mxu1 %v2341_v1  ;;  %1803 = vmatpush3.bf16.msra.mxu0 %v2042_v19 }
  0x49   : > { %1867 = vmatpush3.bf16.msra.mxu1 %v2044_v21  ;;  %1804 = vmatprep.subr.bf16.mxu0 %v2051_v26 }
  0x4a   : > { %1868 = vmatprep.subr.bf16.mxu1 %v2053_v28 }
  0x4c   : > { %1805 = vmatpush3.bf16.msra.mxu0 %v2052_v27 }
  0x4d   : > { %1869 = vmatpush3.bf16.msra.mxu1 %v2054_v29 }
  0x4e   : > { %763 = vmatmul.mubr.bf16.gmra.mxu0 %v2347_v2 }
  0x4f   : > { %860 = vmatmul.mubr.bf16.gmra.mxu1 %v2353_v4  ;;  %770 = vmatprep.mubr.bf16.mxu0 %v2365_v8 }
  0x50   : > { %867 = vmatprep.mubr.bf16.mxu1 %v2368_v9 }
  0x56   : > { %771 = vmatmul.mubr.bf16.gmra.mxu0 %v2381_v12 }
  0x57   : > { %868 = vmatmul.mubr.bf16.gmra.mxu1 %v2390_v15  ;;  %778 = vmatprep.mubr.bf16.mxu0 %v2393_v16 }
  0x58   : > { %875 = vmatprep.mubr.bf16.mxu1 %v2396_v17 }
  0x5e   : > { %779 = vmatmul.mubr.bf16.gmra.mxu0 %v2039_v22 }
  0x5f   : > { %876 = vmatmul.mubr.bf16.gmra.mxu1 %v2040_v23  ;;  %786 = vmatprep.mubr.bf16.mxu0 %v2045_v24 }
  0x60   : > { %883 = vmatprep.mubr.bf16.mxu1 %v2047_v25 }
  0x66   : > { %787 = vmatmul.mubr.bf16.gmra.mxu0 %v2049_v30 }
  0x67   : > { %884 = vmatmul.mubr.bf16.gmra.mxu1 %v2050_v31  ;;  %1136 = vmatprep.mubr.bf16.mxu0 %v2057_v36 }
  0x68   : > { %1233 = vmatprep.mubr.bf16.mxu1 %v2060_v37 }
  0x6e   : > { %1137 = vmatmul.mubr.bf16.vlgmr.msra.gmra.mxu0 %v2055_v38 }
  0x6f   : > { %1234 = vmatmul.mubr.bf16.vlgmr.msra.gmra.mxu1 %v2058_v39  ;;  %1144 = vmatprep.mubr.bf16.mxu0 %v2230_v33 }
  0x70   : > { %1241 = vmatprep.mubr.bf16.mxu1 %v2236_v35 }
  0x76   : > { %1145 = vmatmul.mubr.bf16.gmra.mxu0 %v2227_v32 }
  0x77   : > { %1242 = vmatmul.mubr.bf16.gmra.mxu1 %v2233_v34  ;;  %1152 = vmatprep.mubr.bf16.mxu0 %v2255_v40 }
  0x78   : > { %1249 = vmatprep.mubr.bf16.mxu1 %v2258_v41 }
  0x7e   : > { %1153 = vmatmul.mubr.bf16.gmra.mxu0 %v2261_v42 }
  0x7f   : > { %1250 = vmatmul.mubr.bf16.gmra.mxu1 %v2265_v43  ;;  %1160 = vmatprep.mubr.bf16.mxu0 %v2283_v48 }
  0x80   : > { %1257 = vmatprep.mubr.bf16.mxu1 %v2286_v49 }
  0x86   : > { %1161 = vmatmul.mubr.bf16.gmra.mxu0 %v2289_v50 }
  0x87   : > { %1258 = vmatmul.mubr.bf16.gmra.mxu1 %v2292_v51  ;;  %1168 = vmatprep.mubr.bf16.mxu0 %v2310_v56 }
  0x88   : > { %1265 = vmatprep.mubr.bf16.mxu1 %v2314_v57 }
  0x8e   : > { %1169 = vmatmul.mubr.bf16.gmra.mxu0 %v2318_v58 }
  0x8f   : > { %1266 = vmatmul.mubr.bf16.gmra.mxu1 %v2322_v59  ;;  %1176 = vmatprep.mubr.bf16.mxu0 %v2337_v0 }
  0x90   : > { %1273 = vmatprep.mubr.bf16.mxu1 %v2341_v1 }
  0x96   : > { %1177 = vmatmul.mubr.bf16.gmra.mxu0 %v2347_v2 }
  0x97   : > { %1274 = vmatmul.mubr.bf16.gmra.mxu1 %v2353_v4  ;;  %1184 = vmatprep.mubr.bf16.mxu0 %v2365_v8 }
  0x98   : > { %1281 = vmatprep.mubr.bf16.mxu1 %v2368_v9 }
  0x9e   : > { %1185 = vmatmul.mubr.bf16.gmra.mxu0 %v2381_v12 }
  0x9f   : > { %1282 = vmatmul.mubr.bf16.gmra.mxu1 %v2390_v15  ;;  %1192 = vmatprep.mubr.bf16.mxu0 %v2393_v16 }
  0xa0   : > { %1289 = vmatprep.mubr.bf16.mxu1 %v2396_v17 }
  0xa6   : > { %1193 = vmatmul.mubr.bf16.gmra.mxu0 %v2039_v22 }
  0xa7   : > { %1290 = vmatmul.mubr.bf16.gmra.mxu1 %v2040_v23 }
  0xee   : > { %v1678_v32 = vpop.f32.mrf.mxu0 }
  0xef   : > { %v1742_v33 = vpop.f32.mrf.mxu1 }
  0xf0   : > { %v1679_v34 = vpop.f32.mrf.mxu0 }
  0xf1   : > { %v1680_v35 = vadd.f32 %v1679_v34, %v1678_v32  ;;  %v1743_v40 = vpop.f32.mrf.mxu1 }
  0xf2   : > { %v1744_v41 = vadd.f32 %v1743_v40, %v1742_v33  ;;  %v2462_v42 = vpop.f32.mrf.mxu0 }
  0xf3   : > { %v2464_v43 = vpop.f32.mrf.mxu1 }
  0xf4   : > { %v2466_v44 = vadd.f32 %v1744_v41, %v1680_v35  ;;  %v2468_v45 = vpop.f32.mrf.mxu0 }
  0xf5   : > { %v2470_v46 = vpop.f32.mrf.mxu1 }
  0xf6   : > { %v1684_v47 = vpop.f32.mrf.mxu0 }
  0xf7   : > { %v1748_v48 = vpop.f32.mrf.mxu1 }
  0xf8   : > { %v1685_v49 = vpop.f32.mrf.mxu0 }
  0xf9   : > { %v1686_v50 = vadd.f32 %v1685_v49, %v1684_v47  ;;  %v1749_v51 = vpop.f32.mrf.mxu1 }
  0xfa   : > { %v1750_v52 = vadd.f32 %v1749_v51, %v1748_v48  ;;  %v2472_v53 = vpop.f32.mrf.mxu0 }
  0xfb   : > { %v2474_v54 = vpop.f32.mrf.mxu1 }
  0xfc   : > { %v2476_v55 = vadd.f32 %v1750_v52, %v1686_v50  ;;  %v2478_v56 = vpop.f32.mrf.mxu0 }
  0xfd   : > { %v2480_v57 = vpop.f32.mrf.mxu1 }
  0xfe   : > { %v1690_v58 = vpop.f32.mrf.mxu0 }
  0xff   : > { %v1754_v59 = vpop.f32.mrf.mxu1 }
 0x100   : > { %v1691_v60 = vpop.f32.mrf.mxu0 }
 0x101   : > { %v1692_v61 = vadd.f32 %v1691_v60, %v1690_v58  ;;  %v1755_v62 = vpop.f32.mrf.mxu1 }
 0x102   : > { %v1756_v63 = vadd.f32 %v1755_v62, %v1754_v59  ;;  %v2482_v0 = vpop.f32.mrf.mxu0 }
 0x103   : > { %v2484_v1 = vpop.f32.mrf.mxu1 }
 0x104   : > { %v2486_v2 = vadd.f32 %v1756_v63, %v1692_v61  ;;  %v2488_v3 = vpop.f32.mrf.mxu0 }
 0x105   : > { %v2490_v4 = vpop.f32.mrf.mxu1 }
 0x106   : > { %v1696_v5 = vpop.f32.mrf.mxu0 }
 0x107   : > { %v1760_v6 = vpop.f32.mrf.mxu1 }
 0x108   : > { %v1697_v7 = vpop.f32.mrf.mxu0 }
 0x109   : > { %v1698_v8 = vadd.f32 %v1697_v7, %v1696_v5  ;;  %v1761_v9 = vpop.f32.mrf.mxu1 }
 0x10a   : > { %v1762_v10 = vadd.f32 %v1761_v9, %v1760_v6  ;;  %v2492_v11 = vpop.f32.mrf.mxu0 }
 0x10b   : > { %v2494_v12 = vpop.f32.mrf.mxu1 }
 0x10c   : > { %v2496_v13 = vadd.f32 %v1762_v10, %v1698_v8  ;;  %v2498_v14 = vpop.f32.mrf.mxu0 }
 0x10d   : > { %v2500_v15 = vpop.f32.mrf.mxu1 }
 0x10e   : > { %v1702_v16 = vpop.f32.mrf.mxu0 }
 0x10f   : > { %v1766_v17 = vpop.f32.mrf.mxu1 }
 0x110   : > { %v1703_v18 = vpop.f32.mrf.mxu0 }
 0x111   : > { %v1704_v19 = vadd.f32 %v1703_v18, %v1702_v16  ;;  %v1767_v20 = vpop.f32.mrf.mxu1 }
 0x112   : > { %v1768_v21 = vadd.f32 %v1767_v20, %v1766_v17  ;;  %v2502_v22 = vpop.f32.mrf.mxu0  ;;  %v1747_v20 = vadd.f32 %v2470_v46, %v2464_v43 }
 0x113   : > { %v2504_v23 = vpop.f32.mrf.mxu1 }
 0x114   : > { %v2506_v24 = vadd.f32 %v1768_v21, %v1704_v19  ;;  %v2508_v25 = vpop.f32.mrf.mxu0  ;;  %v1683_v19 = vadd.f32 %v2468_v45, %v2462_v42  ;;  %v1689_v42 = vadd.f32 %v2478_v56, %v2472_v53  ;;  %v1753_v45 = vadd.f32 %v2480_v57, %v2474_v54 }
 0x115   : > { %v2510_v26 = vpop.f32.mrf.mxu1 }
 0x116   : > { %v1708_v27 = vpop.f32.mrf.mxu0 }
 0x117   : > { %v1772_v28 = vpop.f32.mrf.mxu1 }
 0x118   : > { %v1709_v29 = vpop.f32.mrf.mxu0 }
 0x119   : > { %v1710_v30 = vadd.f32 %v1709_v29, %v1708_v27  ;;  %v1773_v31 = vpop.f32.mrf.mxu1 }
 0x11a   : > { %v1774_v36 = vadd.f32 %v1773_v31, %v1772_v28  ;;  %v2512_v37 = vpop.f32.mrf.mxu0  ;;  %v833_v31 = vadd.f32 %v1747_v20, %v1683_v19 }
 0x11b   : > { %v2514_v38 = vpop.f32.mrf.mxu1 }
 0x11c   : > { %v2516_v39 = vadd.f32 %v1774_v36, %v1710_v30  ;;  %v2518_v32 = vpop.f32.mrf.mxu0 }
 0x11d   : > { %v2520_v33 = vpop.f32.mrf.mxu1 }
 0x11e   : > { %v1714_v34 = vpop.f32.mrf.mxu0 }
 0x11f   : > { %v1778_v35 = vpop.f32.mrf.mxu1 }
 0x120   : > { %v1715_v40 = vpop.f32.mrf.mxu0 }
 0x121   : > { %v1716_v41 = vadd.f32 %v1715_v40, %v1714_v34  ;;  %v1779_v47 = vpop.f32.mrf.mxu1 }
 0x122   : > { %v1780_v48 = vadd.f32 %v1779_v47, %v1778_v35  ;;  %v2522_v49 = vpop.f32.mrf.mxu0 }
 0x123   : > { %v2524_v50 = vpop.f32.mrf.mxu1 }
 0x124   : > { %v2526_v51 = vadd.f32 %v1780_v48, %v1716_v41  ;;  %v2528_v52 = vpop.f32.mrf.mxu0 }
 0x125   : > { %v2530_v58 = vpop.f32.mrf.mxu1 }
 0x126   : > { %v1720_v59 = vpop.f32.mrf.mxu0 }
 0x127   : > { %v1784_v60 = vpop.f32.mrf.mxu1 }
 0x128   : > { %v1721_v61 = vpop.f32.mrf.mxu0 }
 0x129   : > { %v1722_v62 = vadd.f32 %v1721_v61, %v1720_v59  ;;  %v1785_v63 = vpop.f32.mrf.mxu1 }
 0x12a   : > { %v1786_v5 = vadd.f32 %v1785_v63, %v1784_v60  ;;  %v2532_v6 = vpop.f32.mrf.mxu0 }
 0x12b   : > { %v2534_v7 = vpop.f32.mrf.mxu1 }
 0x12c   : > { %v2536_v8 = vadd.f32 %v1786_v5, %v1722_v62  ;;  %v2538_v9 = vpop.f32.mrf.mxu0 }
 0x12d   : > { %v2540_v10 = vpop.f32.mrf.mxu1 }
 0x12e   : > { %v1806_v16 = vpop.f32.mrf.mxu0 }
 0x12f   : > { %v1870_v17 = vpop.f32.mrf.mxu1 }
 0x130   : > { %v1807_v18 = vpop.f32.mrf.mxu0 }
 0x131   : > { %v1808_v21 = vadd.f32 %v1807_v18, %v1806_v16  ;;  %v1871_v27 = vpop.f32.mrf.mxu1 }
 0x132   : > { %v1809_v28 = vpop.f32.mrf.mxu0  ;;  %v1872_v41 = vadd.f32 %v1871_v27, %v1870_v17  ;;  %v841_v17 = vadd.f32 %v1753_v45, %v1689_v42  ;;  %v1695_v27 = vadd.f32 %v2488_v3, %v2482_v0 }
 0x133   : > { %v1873_v29 = vpop.f32.mrf.mxu1  ;;  %v1139_v36 = vadd.f32 %v1808_v21, %v2466_v44 }
 0x134   : > { %v1810_v30 = vpop.f32.mrf.mxu0 }
 0x135   : > { %v1811_v34 = vadd.f32 %v1810_v30, %v1809_v28  ;;  %v1874_v35 = vpop.f32.mrf.mxu1  ;;  %v1236_v46 = vadd.f32 %v1872_v41, %v1139_v36 }
 0x136   : > { %v1812_v40 = vpop.f32.mrf.mxu0  ;;  %v1875_v48 = vadd.f32 %v1874_v35, %v1873_v29  ;;  %v1759_v29 = vadd.f32 %v2490_v4, %v2484_v1  ;;  %v1701_v4 = vadd.f32 %v2498_v14, %v2492_v11 }
 0x137   : > { %v1142_v47 = vadd.f32 %v1811_v34, %v833_v31  ;;  %v1876_v59 = vpop.f32.mrf.mxu1 }
 0x138   : > { %v1813_v43 = vpop.f32.mrf.mxu0 }
 0x139   : > { %v1239_v60 = vadd.f32 %v1875_v48, %v1142_v47  ;;  %v1814_v61 = vadd.f32 %v1813_v43, %v1812_v40  ;;  %v1877_v62 = vpop.f32.mrf.mxu1  ;;  %v849_v47 = vadd.f32 %v1759_v29, %v1695_v27 }
 0x13a   : > { %v1815_v44 = vpop.f32.mrf.mxu0  ;;  %v1878_v18 = vadd.f32 %v1877_v62, %v1876_v59 }
 0x13b   : > { %v1618_v63 = vpack.c.bf16 %v1239_v60, %v1236_v46  ;;  %v1879_v5 = vpop.f32.mrf.mxu1  ;;  %v1147_v53 = vadd.f32 %v1814_v61, %v2476_v55  ;;  %v1765_v60 = vadd.f32 %v2500_v15, %v2494_v12  ;;  %v1707_v15 = vadd.f32 %v2508_v25, %v2502_v22 }
 0x13c   : > { %v1816_v16 = vpop.f32.mrf.mxu0 }
 0x13d   : > { %1619 = vst [vmem:[%s2555_s30] sm:$0xff] %v1618_v63   ;;  %v1817_v56 = vadd.f32 %v1816_v16, %v1815_v44  ;;  %v1880_v54 = vpop.f32.mrf.mxu1  ;;  %v1244_v30 = vadd.f32 %v1878_v18, %v1147_v53  ;;  %v857_v53 = vadd.f32 %v1765_v60, %v1701_v4 }
 0x13e   : > { %v1818_v57 = vpop.f32.mrf.mxu0  ;;  %v1881_v20 = vadd.f32 %v1880_v54, %v1879_v5 }
 0x13f   : > { %v1150_v19 = vadd.f32 %v1817_v56, %v841_v17  ;;  %v1882_v21 = vpop.f32.mrf.mxu1 }
 0x140   : > { %v1819_v28 = vpop.f32.mrf.mxu0 }
 0x141   : > { %v1247_v31 = vadd.f32 %v1881_v20, %v1150_v19  ;;  %v1820_v36 = vadd.f32 %v1819_v28, %v1818_v57  ;;  %v1883_v34 = vpop.f32.mrf.mxu1 }
 0x142   : > { %v1821_v55 = vpop.f32.mrf.mxu0  ;;  %v1884_v0 = vadd.f32 %v1883_v34, %v1882_v21  ;;  %v1771_v21 = vadd.f32 %v2510_v26, %v2504_v23  ;;  %v1713_v26 = vadd.f32 %v2518_v32, %v2512_v37 }
 0x143   : > { %v1623_v35 = vpack.c.bf16 %v1247_v31, %v1244_v30  ;;  %v1885_v40 = vpop.f32.mrf.mxu1  ;;  %v1155_v48 = vadd.f32 %v1820_v36, %v2486_v2 }
 0x144   : > { %v1822_v41 = vpop.f32.mrf.mxu0 }
 0x145   : > { %1655 = vst [vmem:[%s2555_s30 + $0x8] sm:$0xff] %v1623_v35   ;;  %v1823_v59 = vadd.f32 %v1822_v41, %v1821_v55  ;;  %v1886_v42 = vpop.f32.mrf.mxu1  ;;  %v1252_v61 = vadd.f32 %v1884_v0, %v1155_v48  ;;  %v865_v55 = vadd.f32 %v1771_v21, %v1707_v15 }
 0x146   : > { %v1824_v43 = vpop.f32.mrf.mxu0  ;;  %v1887_v45 = vadd.f32 %v1886_v42, %v1885_v40  ;;  %v1777_v42 = vadd.f32 %v2520_v33, %v2514_v38  ;;  %v1719_v33 = vadd.f32 %v2528_v52, %v2522_v49 }
 0x147   : > { %v1158_v3 = vadd.f32 %v1823_v59, %v849_v47  ;;  %v1888_v1 = vpop.f32.mrf.mxu1 }
 0x148   : > { %v1825_v46 = vpop.f32.mrf.mxu0  ;;  %v873_v60 = vadd.f32 %v1777_v42, %v1713_v26 }
 0x149   : > { %v1255_v62 = vadd.f32 %v1887_v45, %v1158_v3  ;;  %v1826_v44 = vadd.f32 %v1825_v46, %v1824_v43  ;;  %v1889_v63 = vpop.f32.mrf.mxu1 }
 0x14a   : > { %v1827_v2 = vpop.f32.mrf.mxu0  ;;  %v1890_v11 = vadd.f32 %v1889_v63, %v1888_v1 }
 0x14b   : > { %v1628_v5 = vpack.c.bf16 %v1255_v62, %v1252_v61  ;;  %v1891_v16 = vpop.f32.mrf.mxu1  ;;  %v1163_v56 = vadd.f32 %v1826_v44, %v2496_v13 }
 0x14c   : > { %v1828_v17 = vpop.f32.mrf.mxu0 }
 0x14d   : > { %1656 = vst [vmem:[%s2555_s30 + $0x10] sm:$0xff] %v1628_v5   ;;  %v1829_v54 = vadd.f32 %v1828_v17, %v1827_v2  ;;  %v1892_v57 = vpop.f32.mrf.mxu1  ;;  %v1260_v27 = vadd.f32 %v1890_v11, %v1163_v56 }
 0x14e   : > { %v1830_v18 = vpop.f32.mrf.mxu0  ;;  %v1893_v19 = vadd.f32 %v1892_v57, %v1891_v16  ;;  %v1783_v16 = vadd.f32 %v2530_v58, %v2524_v50  ;;  %v1725_v58 = vadd.f32 %v2538_v9, %v2532_v6 }
 0x14f   : > { %v1166_v14 = vadd.f32 %v1829_v54, %v857_v53  ;;  %v1894_v12 = vpop.f32.mrf.mxu1 }
 0x150   : > { %v1831_v20 = vpop.f32.mrf.mxu0 }
 0x151   : > { %v1263_v28 = vadd.f32 %v1893_v19, %v1166_v14  ;;  %v1832_v29 = vadd.f32 %v1831_v20, %v1830_v18  ;;  %v1895_v30 = vpop.f32.mrf.mxu1  ;;  %v881_v14 = vadd.f32 %v1783_v16, %v1719_v33 }
 0x152   : > { %v1833_v13 = vpop.f32.mrf.mxu0  ;;  %v1896_v22 = vadd.f32 %v1895_v30, %v1894_v12 }
 0x153   : > { %v1633_v31 = vpack.c.bf16 %v1263_v28, %v1260_v27  ;;  %v1897_v36 = vpop.f32.mrf.mxu1  ;;  %v1171_v35 = vadd.f32 %v1832_v29, %v2506_v24  ;;  %v1789_v28 = vadd.f32 %v2540_v10, %v2534_v7 }
 0x154   : > { %v1834_v34 = vpop.f32.mrf.mxu0 }
 0x155   : > { %1657 = vst [vmem:[%s2555_s30 + $0x18] sm:$0xff] %v1633_v31   ;;  %v1835_v40 = vadd.f32 %v1834_v34, %v1833_v13  ;;  %v1898_v41 = vpop.f32.mrf.mxu1  ;;  %v1268_v43 = vadd.f32 %v1896_v22, %v1171_v35  ;;  %v889_v35 = vadd.f32 %v1789_v28, %v1725_v58 }
 0x156   : > { %v1836_v47 = vpop.f32.mrf.mxu0  ;;  %v1899_v48 = vadd.f32 %v1898_v41, %v1897_v36 }
 0x157   : > { %v1174_v25 = vadd.f32 %v1835_v40, %v865_v55  ;;  %v1900_v23 = vpop.f32.mrf.mxu1 }
 0x158   : > { %v1837_v59 = vpop.f32.mrf.mxu0 }
 0x159   : > { %v1271_v0 = vadd.f32 %v1899_v48, %v1174_v25  ;;  %v1838_v3 = vadd.f32 %v1837_v59, %v1836_v47  ;;  %v1901_v45 = vpop.f32.mrf.mxu1 }
 0x15a   : > { %v1839_v24 = vpop.f32.mrf.mxu0  ;;  %v1902_v37 = vadd.f32 %v1901_v45, %v1900_v23 }
 0x15b   : > { %v1638_v1 = vpack.c.bf16 %v1271_v0, %v1268_v43  ;;  %v1903_v4 = vpop.f32.mrf.mxu1  ;;  %v1179_v61 = vadd.f32 %v1838_v3, %v2516_v39 }
 0x15c   : > { %v1840_v46 = vpop.f32.mrf.mxu0 }
 0x15d   : > { %1658 = vst [vmem:[%s2555_s30 + $0x20] sm:$0xff] %v1638_v1   ;;  %v1841_v62 = vadd.f32 %v1840_v46, %v1839_v24  ;;  %v1904_v44 = vpop.f32.mrf.mxu1  ;;  %v1276_v17 = vadd.f32 %v1902_v37, %v1179_v61 }
 0x15e   : > { %v1842_v63 = vpop.f32.mrf.mxu0  ;;  %v1905_v2 = vadd.f32 %v1904_v44, %v1903_v4 }
 0x15f   : > { %v1182_v32 = vadd.f32 %v1841_v62, %v873_v60  ;;  %v1906_v38 = vpop.f32.mrf.mxu1 }
 0x160   : > { %v1843_v5 = vpop.f32.mrf.mxu0 }
 0x161   : > { %v1279_v53 = vadd.f32 %v1905_v2, %v1182_v32  ;;  %v1844_v56 = vadd.f32 %v1843_v5, %v1842_v63  ;;  %v1907_v54 = vpop.f32.mrf.mxu1 }
 0x162   : > { %v1845_v39 = vpop.f32.mrf.mxu0  ;;  %v1908_v49 = vadd.f32 %v1907_v54, %v1906_v38 }
 0x163   : > { %v1643_v57 = vpack.c.bf16 %v1279_v53, %v1276_v17  ;;  %v1909_v18 = vpop.f32.mrf.mxu1  ;;  %v1187_v19 = vadd.f32 %v1844_v56, %v2526_v51 }
 0x164   : > { %v1846_v11 = vpop.f32.mrf.mxu0 }
 0x165   : > { %1659 = vst [vmem:[%s2555_s30 + $0x28] sm:$0xff] %v1643_v57   ;;  %v1847_v12 = vadd.f32 %v1846_v11, %v1845_v39  ;;  %v1910_v15 = vpop.f32.mrf.mxu1  ;;  %v1284_v29 = vadd.f32 %v1908_v49, %v1187_v19 }
 0x166   : > { %v1848_v20 = vpop.f32.mrf.mxu0  ;;  %v1911_v21 = vadd.f32 %v1910_v15, %v1909_v18 }
 0x167   : > { %v1190_v52 = vadd.f32 %v1847_v12, %v881_v14  ;;  %v1912_v50 = vpop.f32.mrf.mxu1 }
 0x168   : > { %v1849_v27 = vpop.f32.mrf.mxu0 }
 0x169   : > { %v1287_v30 = vadd.f32 %v1911_v21, %v1190_v52  ;;  %v1850_v13 = vadd.f32 %v1849_v27, %v1848_v20  ;;  %v1913_v31 = vpop.f32.mrf.mxu1 }
 0x16a   : > { %v1851_v51 = vpop.f32.mrf.mxu0  ;;  %v1914_v6 = vadd.f32 %v1913_v31, %v1912_v50 }
 0x16b   : > { %v1648_v36 = vpack.c.bf16 %v1287_v30, %v1284_v29  ;;  %v1915_v34 = vpop.f32.mrf.mxu1  ;;  %v1195_v40 = vadd.f32 %v1850_v13, %v2536_v8 }
 0x16c   : > { %v1852_v55 = vpop.f32.mrf.mxu0 }
 0x16d   : > { %1660 = vst [vmem:[%s2555_s30 + $0x30] sm:$0xff] %v1648_v36   ;;  %v1853_v41 = vadd.f32 %v1852_v55, %v1851_v51  ;;  %v1916_v47 = vpop.f32.mrf.mxu1  ;;  %v1292_v25 = vadd.f32 %v1914_v6, %v1195_v40 }
 0x16e   : > { %v1917_v22 = vadd.f32 %v1916_v47, %v1915_v34 }
 0x16f   : > { %v1198_v9 = vadd.f32 %v1853_v41, %v889_v35 }
 0x171   : > { %v1295_v7 = vadd.f32 %v1917_v22, %v1198_v9 }
 0x173   : > { %v1653_v10 = vpack.c.bf16 %v1295_v7, %v1292_v25 }
 0x175   : > { %1661 = vst [vmem:[%s2555_s30 + $0x38] sm:$0xff] %v1653_v10  }
 0x176 PF: > { %s12_s11 = sadd.s32 1, %s2083_s11   ;;  %s2608_s9 = smov %s2079_s10 }
 0x177   : > { %p9_p5 = scmp.ge.s32.totalorder %s12_s11, 4   ;;  %s2609_s10 = smov %s2611_s12 }
 0x179   :  { %11 = sbr.rel (!%p9_p5) target bundleno = 2 (0x2), region = 61 }

// kernel: discriminator_forward.12
= control target key start
LH: loop header
LB: loop body
LE: loop exit
PB: predicated region body
PF: predicated region fallthrough
CT: control target
= control target key end

     0   :  { %s503_s6 = smov 0   ;;  %s505_s7 = smov 0   ;;  %s603_s0 = inlined_call_operand.vmem [shape: bf16[2,16,256], index: 0, kind: input, shape index: {}]   ;;  %s604_s1 = inlined_call_operand.vmem [shape: bf16[2,16,256], index: 1, kind: output, shape index: {}]  }
   0x1   :  { %s507_s8 = smov 0   ;;  %s509_s9 = smov 0  }
   0x2   :  { %s511_s10 = smov 0   ;;  %s513_s11 = smov 0  }
   0x3   :  { %s515_s12 = smov 0  }
   0x4 LB: > { %s20_s13 = sadd.s32 1, %s483_s10  ;;  %s23_s14 = sadd.s32 1, %s487_s11  ;;  %s491_s12 = sphi %s515_s12, %s11_s12   ;;  %s487_s11 = sphi %s513_s11, %s611_s11   ;;  %s483_s10 = sphi %s511_s10, %s610_s10   ;;  %s479_s9 = sphi %s509_s9, %s609_s9   ;;  %s475_s8 = sphi %s507_s8, %s608_s8   ;;  %s471_s7 = sphi %s505_s7, %s607_s7   ;;  %s467_s6 = sphi %s503_s6, %s606_s6  }
   0x5   : > { %p21_p0 = scmp.ge.s32.totalorder %s20_s13, 2  ;;  %s351_s15 = sadd.s32 4294967295, %s491_s12  }
   0x6   : > { %p39_p1 = scmp.ne.s32.totalorder %s471_s7, %s467_s6  ;;  %p40_p2 = scmp.eq.s32.totalorder %s491_s12, 0 }
   0x7   : > { %s613_s13 = smov (%p21_p0, %s20_s13), 0  ;;  %s615_s14 = smov (!%p21_p0, %s23_s14), %s487_s11 }
   0x8   : > { %p25_p3 = scmp.ge.s32.totalorder %s615_s14, 2  ;;  %p71_p4 = scmp.eq.s32.totalorder %s351_s15, 3 }
   0x9   : > { %s28_s16 = ssub.s32 %s483_s10, %s613_s13  ;;  %p41_p5 = por %p40_p2, %p39_p1 }
   0xa   : > { %s617_s14 = smov (%p25_p3, %s615_s14), 0  ;;  %p551_p6 = por %p71_p4, %p39_p1 }
   0xb   : > { %s27_s18 = ssub.s32 %s487_s11, %s617_s14  ;;  %s32_s20 = sadd.s32 1, %s471_s7 }
   0xc   : > { %s29_s19 = sor.u32 %s28_s16, %s27_s18  ;;  %p354_p8 = scmp.ge.s32.totalorder %s491_s12, 4 }
   0xd   : > { %p30_p7 = scmp.eq.s32.totalorder %s29_s19, 0 }
   0xe   : > { %93 = sbr.rel (%p354_p8) target bundleno = 26 (0x1a), region = 16 }
   0xf   : > { %s559_s21 = scalar_select %p30_p7, %s471_s7, %s32_s20  }
  0x13   : > { %96 = sbr.rel (!%p41_p5) target bundleno = 26 (0x1a), region = 20  ;;  %s98_s22 = sand.u32 (%p41_p5), 1, %s471_s7  }
  0x14   : > { %s356_s23 = sshll.u32 (%p41_p5), %s487_s11, 2  ;;  %s355_s24 = sshll.u32 (%p41_p5), %s98_s22, 3 }
  0x15   : > { %s102_s25 = sadd.s32 (%p41_p5), %s483_s10, %s356_s23  ;;  %s100_s30 = scalar_lea.vmem (%p41_p5), [#allocation2], %s355_s24 }
  0x16   : > { %s357_s26 = sshll.u32 (%p41_p5), %s102_s25, 2 }
  0x17   : > { %s104_s29 = scalar_lea.vmem (%p41_p5), %s603_s0, %s357_s26 }
  0x18   : > { %v121_v0 = vld [vmem:[%s104_s29] sm:$0xf]  ;;  %v123_v1 = vld [vmem:[%s104_s29 + $0x8] sm:$0xf] }
  0x19   : > { %122 = vst [vmem:[%s100_s30] sm:$0xf] %v121_v0  ;;  %124 = vst [vmem:[%s100_s30 + $0x4] sm:$0xf] %v123_v1 }
  0x1a PF: > { %p358_p9 = scmp.ge.s32.totalorder %s491_s12, 1  ;;  %p151_p10 = scmp.lt.s32.totalorder %s491_s12, 5 }
  0x1c   : > { %p152_p11 = pnand %p358_p9, %p151_p10 }
  0x1d   : > { %s158_s2 = sand.u32 (!%p152_p11), 1, %s467_s6  }
  0x1e   : > { %155 = sbr.rel (%p152_p11) target bundleno = 92 (0x5c), region = 61  ;;  %s571_s3 = sshll.u32 (!%p152_p11), %s158_s2, 3 }
  0x1f   : > { %s160_s4 = scalar_lea.vmem (!%p152_p11), [#allocation2], %s571_s3  ;;  %s175_s5 = scalar_lea.vmem (!%p152_p11), [#allocation3], %s571_s3 }
  0x23   : > { %v371_v2 = vld [vmem:[%s160_s4] sm:$0xff]   ;;  %s364_s6 = sshll.u32 (%p551_p6), %s479_s9, 2 }
  0x24   : > { %v372_v3 = vunpack.c.l.bf16 %v371_v2  ;;  %v373_v4 = vunpack.c.h.bf16 %v371_v2  ;;  %s231_s15 = sadd.s32 (%p551_p6), %s475_s8, %s364_s6 }
  0x25   : > { %s365_s16 = sshll.u32 (%p551_p6), %s231_s15, 2 }
  0x26   : > { %v180_v5 = vadd.f32 %v373_v4, %v372_v3  ;;  %v187_v6 = vmul.f32 %v372_v3, %v372_v3  ;;  %v188_v7 = vmul.f32 %v373_v4, %v373_v4  ;;  %s233_s20 = scalar_lea.vmem (%p551_p6), %s604_s1, %s365_s16 }
  0x28   : > { %v181_v8 = vrot.slane %v180_v5, 4  ;;  %v189_v9 = vadd.f32 %v188_v7, %v187_v6 }
  0x2a   : > { %v182_v10 = vadd.f32 %v181_v8, %v180_v5  ;;  %v190_v11 = vrot.slane %v189_v9, 4 }
  0x2c   : > { %v183_v12 = vrot.slane %v182_v10, 2  ;;  %v191_v13 = vadd.f32 %v190_v11, %v189_v9 }
  0x2e   : > { %v184_v14 = vadd.f32 %v183_v12, %v182_v10  ;;  %v192_v15 = vrot.slane %v191_v13, 2 }
  0x30   : > { %v185_v16 = vrot.slane %v184_v14, 1  ;;  %v193_v17 = vadd.f32 %v192_v15, %v191_v13 }
  0x32   : > { %v186_v18 = vadd.f32 %v185_v16, %v184_v14  ;;  %v194_v19 = vrot.slane %v193_v17, 1 }
  0x34   : > { %v195_v20 = vadd.f32 %v194_v19, %v193_v17  ;;  %v196_v21 = vmul.f32 0.0625, %v186_v18 }
  0x36   : > { %v197_v22 = vmul.f32 0.0625, %v195_v20  ;;  %v198_v23 = vmul.f32 %v196_v21, %v196_v21  ;;  %v201_v27 = vsub.f32 %v372_v3, %v196_v21  ;;  %v202_v28 = vsub.f32 %v373_v4, %v196_v21 }
  0x38   : > { %v199_v24 = vsub.f32 %v197_v22, %v198_v23 }
  0x3a   : > { %v200_v25 = vmax.f32 %v199_v24, 0.0 }
  0x3c   : > { %v203_v26 = vadd.f32 1e-05, %v200_v25 }
  0x3e   : > { %435 = vrsqrt.f32 %v203_v26 }
  0x4b   : > { %v436_v29 = vpop.eup %435 }
  0x4c   : > { %v205_v30 = vmul.f32 %v436_v29, %v201_v27  ;;  %v206_v31 = vmul.f32 %v436_v29, %v202_v28 }
  0x4e   : > { %vm207_vm0 = vcmp.ge.f32.partialorder %v205_v30, 0.0  ;;  %vm208_vm1 = vcmp.ge.f32.partialorder %v206_v31, 0.0  ;;  %v209_v32 = vmul.f32 0.2, %v205_v30  ;;  %v210_v33 = vmul.f32 0.2, %v206_v31 }
  0x4f   : > { %229 = sbr.rel (!%p551_p6) target bundleno = 92 (0x5c), region = 69 }
  0x50   : > { %v211_v34 = vsel %vm207_vm0, %v205_v30, %v209_v32  ;;  %v212_v35 = vsel %vm208_vm1, %v206_v31, %v210_v33 }
  0x51   : > { %v377_v36 = vpack.c.bf16 %v212_v35, %v211_v34 }
  0x53   : > { %378 = vst [vmem:[%s175_s5] sm:$0xff] %v377_v36  }
  0x5a   : > { %v250_v37 = vld [vmem:[%s175_s5] sm:$0xf]  ;;  %v252_v38 = vld [vmem:[%s175_s5 + $0x4] sm:$0xf] }
  0x5b   : > { %251 = vst [vmem:[%s233_s20] sm:$0xf] %v250_v37  ;;  %253 = vst [vmem:[%s233_s20 + $0x8] sm:$0xf] %v252_v38 }
  0x5c PF: > { %s11_s12 = sadd.s32 1, %s491_s12   ;;  %s606_s6 = smov %s471_s7 }
  0x5d   : > { %p8_p12 = scmp.ge.s32.totalorder %s11_s12, 6   ;;  %s607_s7 = smov %s559_s21 }
  0x5e   : > { %s608_s8 = smov %s483_s10  ;;  %s609_s9 = smov %s487_s11 }
  0x5f   : > { %s610_s10 = smov %s613_s13  ;;  %s611_s11 = smov %s617_s14 }
  0x60   :  { %10 = sbr.rel (!%p8_p12) target bundleno = 4 (0x4), region = 141 }

// kernel: discriminator_forward.11
= control target key start
LH: loop header
LB: loop body
LE: loop exit
PB: predicated region body
PF: predicated region fallthrough
CT: control target
= control target key end

     0   :  { %s3473_s9 = smov 0   ;;  %s3475_s10 = smov 0   ;;  %s4667_s0 = inlined_call_operand.vmem [shape: bf16[2,80,1024], index: 0, kind: input, shape index: {}]   ;;  %s4668_s1 = inlined_call_operand.vmem [shape: bf16[2,1024,256], index: 1, kind: input, shape index: {}]   ;;  %s4669_s2 = inlined_call_operand.vmem [shape: bf16[2,64,256], index: 2, kind: output, shape index: {}]  }
   0x1   :  { %s3477_s11 = smov 0  }
   0x2 LB: > { %s24_s12 = sadd.s32 1, %s3452_s10  ;;  %p2706_p0 = scmp.ge.s32.totalorder %s3456_s11, 1  ;;  %s3456_s11 = sphi %s3477_s11, %s12_s11   ;;  %s3452_s10 = sphi %s3475_s10, %s4717_s10   ;;  %s3448_s9 = sphi %s3473_s9, %s4716_s9  }
   0x3   : > { %p26_p1 = scmp.ge.s32.totalorder %s24_s12, 2  ;;  %p137_p2 = scmp.lt.s32.totalorder %s3456_s11, 3 }
   0x5   : > { %s4719_s12 = smov (%p26_p1, %s24_s12), 0  ;;  %p138_p3 = pnand %p2706_p0, %p137_p2 }
   0x7   : > { %141 = sbr.rel (%p138_p3) target bundleno = 499 (0x1f3), region = 28 }
   0xc   : > { %v3050_v0 = vld [vmem:[%s4668_s1 + $0x474] ss:$8 sps:$4 sm:$0xff]   ;;  %v3054_v2 = vld [vmem:[%s4668_s1 + $0x470] ss:$8 sps:$4 sm:$0xff]   ;;  %v3056_v4 = vld [vmem:[%s4668_s1 + $0x464] ss:$8 sps:$4 sm:$0xff]  }
   0xd   : > { %v3052_v1 = vld [vmem:[%s4668_s1 + $0x574] ss:$8 sps:$4 sm:$0xff]   ;;  %1285 = vmatprep.subr.bf16.mxu0 %v3050_v0  ;;  %v3055_v3 = vld [vmem:[%s4668_s1 + $0x570] ss:$8 sps:$4 sm:$0xff]   ;;  %v3058_v5 = vld [vmem:[%s4668_s1 + $0x564] ss:$8 sps:$4 sm:$0xff]  }
   0xe   : > { %1358 = vmatprep.subr.bf16.mxu1 %v3052_v1  ;;  %1286 = vmatpush1.bf16.msra.mxu0 %v3054_v2  ;;  %v3060_v6 = vld [vmem:[%s4668_s1 + $0x460] ss:$8 sps:$4 sm:$0xff]   ;;  %v3062_v8 = vld [vmem:[%s4668_s1 + $0x454] ss:$8 sps:$4 sm:$0xff]   ;;  %v3066_v10 = vld [vmem:[%s4668_s1 + $0x450] ss:$8 sps:$4 sm:$0xff]  }
   0xf   : > { %1359 = vmatpush1.bf16.msra.mxu1 %v3055_v3  ;;  %1287 = vmatprep.subr.bf16.mxu0 %v3056_v4  ;;  %v3061_v7 = vld [vmem:[%s4668_s1 + $0x560] ss:$8 sps:$4 sm:$0xff]   ;;  %v3064_v9 = vld [vmem:[%s4668_s1 + $0x554] ss:$8 sps:$4 sm:$0xff]   ;;  %v3067_v11 = vld [vmem:[%s4668_s1 + $0x550] ss:$8 sps:$4 sm:$0xff]  }
  0x10   : > { %1360 = vmatprep.subr.bf16.mxu1 %v3058_v5  ;;  %v3068_v12 = vld [vmem:[%s4668_s1 + $0x444] ss:$8 sps:$4 sm:$0xff]   ;;  %v3072_v14 = vld [vmem:[%s4668_s1 + $0x440] ss:$8 sps:$4 sm:$0xff]   ;;  %v3074_v16 = vld [vmem:[%s4668_s1 + $0x434] ss:$8 sps:$4 sm:$0xff]  }
  0x11   : > { %v3070_v13 = vld [vmem:[%s4668_s1 + $0x544] ss:$8 sps:$4 sm:$0xff]   ;;  %v3073_v15 = vld [vmem:[%s4668_s1 + $0x540] ss:$8 sps:$4 sm:$0xff]   ;;  %v3076_v17 = vld [vmem:[%s4668_s1 + $0x534] ss:$8 sps:$4 sm:$0xff]  }
  0x12   : > { %1288 = vmatpush1.bf16.msra.mxu0 %v3060_v6  ;;  %v3078_v18 = vld [vmem:[%s4668_s1 + $0x430] ss:$8 sps:$4 sm:$0xff]   ;;  %v3080_v20 = vld [vmem:[%s4668_s1 + $0x424] ss:$8 sps:$4 sm:$0xff]   ;;  %v3084_v22 = vld [vmem:[%s4668_s1 + $0x420] ss:$8 sps:$4 sm:$0xff]  }
  0x13   : > { %1361 = vmatpush1.bf16.msra.mxu1 %v3061_v7  ;;  %1289 = vmatprep.subr.bf16.mxu0 %v3062_v8  ;;  %v3079_v19 = vld [vmem:[%s4668_s1 + $0x530] ss:$8 sps:$4 sm:$0xff]   ;;  %v3082_v21 = vld [vmem:[%s4668_s1 + $0x524] ss:$8 sps:$4 sm:$0xff]   ;;  %v3085_v23 = vld [vmem:[%s4668_s1 + $0x520] ss:$8 sps:$4 sm:$0xff]  }
  0x14   : > { %1362 = vmatprep.subr.bf16.mxu1 %v3064_v9  ;;  %v3086_v24 = vld [vmem:[%s4668_s1 + $0x414] ss:$8 sps:$4 sm:$0xff]   ;;  %v3090_v26 = vld [vmem:[%s4668_s1 + $0x410] ss:$8 sps:$4 sm:$0xff]   ;;  %v3092_v28 = vld [vmem:[%s4668_s1 + $0x404] ss:$8 sps:$4 sm:$0xff]  }
  0x15   : > { %v3088_v25 = vld [vmem:[%s4668_s1 + $0x514] ss:$8 sps:$4 sm:$0xff]   ;;  %v3091_v27 = vld [vmem:[%s4668_s1 + $0x510] ss:$8 sps:$4 sm:$0xff]   ;;  %v3094_v29 = vld [vmem:[%s4668_s1 + $0x504] ss:$8 sps:$4 sm:$0xff]  }
  0x16   : > { %1290 = vmatpush1.bf16.msra.mxu0 %v3066_v10  ;;  %v3096_v30 = vld [vmem:[%s4668_s1 + $0x400] ss:$8 sps:$4 sm:$0xff]   ;;  %p168_p4 = scmp.lt.s32.totalorder %s3448_s9, 1  ;;  %v3098_v32 = vld [vmem:[%s4668_s1 + $0x4f4] ss:$8 sps:$4 sm:$0xff]  }
  0x17   : > { %1363 = vmatpush1.bf16.msra.mxu1 %v3067_v11  ;;  %1291 = vmatprep.subr.bf16.mxu0 %v3068_v12  ;;  %v3097_v31 = vld [vmem:[%s4668_s1 + $0x500] ss:$8 sps:$4 sm:$0xff]   ;;  %v3100_v33 = vld [vmem:[%s4668_s1 + $0x5f4] ss:$8 sps:$4 sm:$0xff]   ;;  %v3102_v34 = vld [vmem:[%s4668_s1 + $0x4f0] ss:$8 sps:$4 sm:$0xff]  }
  0x18   : > { %1364 = vmatprep.subr.bf16.mxu1 %v3070_v13  ;;  %v3103_v35 = vld [vmem:[%s4668_s1 + $0x5f0] ss:$8 sps:$4 sm:$0xff]   ;;  %s4721_s9 = smov (!%p168_p4, %s3448_s9), 1  ;;  %v3104_v36 = vld [vmem:[%s4668_s1 + $0x4e4] ss:$8 sps:$4 sm:$0xff]  }
  0x19   : > { %v3106_v37 = vld [vmem:[%s4668_s1 + $0x5e4] ss:$8 sps:$4 sm:$0xff]   ;;  %v3108_v38 = vld [vmem:[%s4668_s1 + $0x4e0] ss:$8 sps:$4 sm:$0xff]   ;;  %s3025_s19 = smul.u32 320, %s4721_s9  ;;  %s3016_s16 = sshll.u32 %s4721_s9, 6 }
  0x1a   : > { %1292 = vmatpush1.bf16.msra.mxu0 %v3072_v14  ;;  %v3109_v39 = vld [vmem:[%s4668_s1 + $0x5e0] ss:$8 sps:$4 sm:$0xff]   ;;  %v3110_v40 = vld [vmem:[%s4668_s1 + $0x4d4] ss:$8 sps:$4 sm:$0xff]   ;;  %v3114_v42 = vld [vmem:[%s4668_s1 + $0x4d0] ss:$8 sps:$4 sm:$0xff]   ;;  %s4606_s9 = scalar_lea.vmem %s4669_s2, %s3016_s16 }
  0x1b   : > { %1365 = vmatpush1.bf16.msra.mxu1 %v3073_v15  ;;  %1293 = vmatprep.subr.bf16.mxu0 %v3074_v16  ;;  %v3112_v41 = vld [vmem:[%s4668_s1 + $0x5d4] ss:$8 sps:$4 sm:$0xff]   ;;  %v3115_v43 = vld [vmem:[%s4668_s1 + $0x5d0] ss:$8 sps:$4 sm:$0xff]   ;;  %s3633_s4 = scalar_lea.vmem %s4667_s0, %s3025_s19  ;;  %v3116_v44 = vld [vmem:[%s4668_s1 + $0x4c4] ss:$8 sps:$4 sm:$0xff]  }
  0x1c   : > { %1366 = vmatprep.subr.bf16.mxu1 %v3076_v17  ;;  %v3118_v45 = vld [vmem:[%s4668_s1 + $0x5c4] ss:$8 sps:$4 sm:$0xff]   ;;  %v3120_v46 = vld [vmem:[%s4668_s1 + $0x4c0] ss:$8 sps:$4 sm:$0xff]   ;;  %v3122_v52 = vld [vmem:[%s4668_s1 + $0x4b4] ss:$8 sps:$4 sm:$0xff]  }
  0x1d   : > { %v3121_v47 = vld [vmem:[%s4668_s1 + $0x5c0] ss:$8 sps:$4 sm:$0xff]   ;;  %v3124_v54 = vld [vmem:[%s4668_s1 + $0x5b4] ss:$8 sps:$4 sm:$0xff]   ;;  %v3126_v56 = vld [vmem:[%s4668_s1 + $0x4b0] ss:$8 sps:$4 sm:$0xff]  }
  0x1e   : > { %1294 = vmatpush1.bf16.msra.mxu0 %v3078_v18  ;;  %v197_v48 = vld [vmem:[%s3633_s4 + $0x40] sm:$0xff]  ;;  %v198_v50 = vld [vmem:[%s3633_s4 + $0x48] sm:$0xff]  ;;  %v3127_v57 = vld [vmem:[%s4668_s1 + $0x5b0] ss:$8 sps:$4 sm:$0xff]  }
  0x1f   : > { %1367 = vmatpush1.bf16.msra.mxu1 %v3079_v19  ;;  %1295 = vmatprep.subr.bf16.mxu0 %v3080_v20  ;;  %v201_v49 = vld [vmem:[%s3633_s4 + $0x60] sm:$0xff]  ;;  %v202_v51 = vld [vmem:[%s3633_s4 + $0x68] sm:$0xff]  ;;  %v3134_v62 = vld [vmem:[%s4668_s1 + $0x494] ss:$8 sps:$4 sm:$0xff]  }
  0x20   : > { %1368 = vmatprep.subr.bf16.mxu1 %v3082_v21  ;;  %v3654_v53 = vcombine.high %v197_v48, %v201_v49  ;;  %v3659_v55 = vcombine.high %v198_v50, %v202_v51  ;;  %v3128_v58 = vld [vmem:[%s4668_s1 + $0x4a4] ss:$8 sps:$4 sm:$0xff]   ;;  %v3132_v60 = vld [vmem:[%s4668_s1 + $0x4a0] ss:$8 sps:$4 sm:$0xff]   ;;  %v3136_v63 = vld [vmem:[%s4668_s1 + $0x594] ss:$8 sps:$4 sm:$0xff]   ;;  %v3711_v8 = vcombine.low %v197_v48, %v201_v49  ;;  %v3713_v9 = vcombine.low %v198_v50, %v202_v51 }
  0x21   : > { %v3130_v59 = vld [vmem:[%s4668_s1 + $0x5a4] ss:$8 sps:$4 sm:$0xff]   ;;  %v3133_v61 = vld [vmem:[%s4668_s1 + $0x5a0] ss:$8 sps:$4 sm:$0xff]   ;;  %v3138_v0 = vld [vmem:[%s4668_s1 + $0x490] ss:$8 sps:$4 sm:$0xff]  }
  0x22   : > { %1296 = vmatpush1.bf16.msra.mxu0 %v3084_v22  ;;  %1317 = vmatprep.mubr.bf16.mxu0 %v3654_v53  ;;  %v3139_v1 = vld [vmem:[%s4668_s1 + $0x590] ss:$8 sps:$4 sm:$0xff]   ;;  %v3140_v2 = vld [vmem:[%s4668_s1 + $0x484] ss:$8 sps:$4 sm:$0xff]   ;;  %v3144_v4 = vld [vmem:[%s4668_s1 + $0x480] ss:$8 sps:$4 sm:$0xff]  }
  0x23   : > { %1369 = vmatpush1.bf16.msra.mxu1 %v3085_v23  ;;  %1297 = vmatprep.subr.bf16.mxu0 %v3086_v24  ;;  %v3142_v3 = vld [vmem:[%s4668_s1 + $0x584] ss:$8 sps:$4 sm:$0xff]   ;;  %v3145_v5 = vld [vmem:[%s4668_s1 + $0x580] ss:$8 sps:$4 sm:$0xff]   ;;  %v3148_v6 = vld [vmem:[%s4668_s1 + $0x674] ss:$8 sps:$4 sm:$0xff]  }
  0x24   : > { %1370 = vmatprep.subr.bf16.mxu1 %v3088_v25  ;;  %1390 = vmatprep.mubr.bf16.mxu1 %v3659_v55  ;;  %v3151_v7 = vld [vmem:[%s4668_s1 + $0x774] ss:$8 sps:$4 sm:$0xff]   ;;  %v3146_v10 = vld [vmem:[%s4668_s1 + $0x670] ss:$8 sps:$4 sm:$0xff]   ;;  %v3154_v12 = vld [vmem:[%s4668_s1 + $0x664] ss:$8 sps:$4 sm:$0xff]  }
  0x25   : > { %v3149_v11 = vld [vmem:[%s4668_s1 + $0x770] ss:$8 sps:$4 sm:$0xff]   ;;  %v3157_v13 = vld [vmem:[%s4668_s1 + $0x764] ss:$8 sps:$4 sm:$0xff]   ;;  %v3152_v14 = vld [vmem:[%s4668_s1 + $0x660] ss:$8 sps:$4 sm:$0xff]  }
  0x26   : > { %1298 = vmatpush1.bf16.msra.mxu0 %v3090_v26  ;;  %v3155_v15 = vld [vmem:[%s4668_s1 + $0x760] ss:$8 sps:$4 sm:$0xff]   ;;  %v3160_v16 = vld [vmem:[%s4668_s1 + $0x654] ss:$8 sps:$4 sm:$0xff]   ;;  %v3158_v24 = vld [vmem:[%s4668_s1 + $0x650] ss:$8 sps:$4 sm:$0xff]  }
  0x27   : > { %1371 = vmatpush1.bf16.msra.mxu1 %v3091_v27  ;;  %1299 = vmatprep.subr.bf16.mxu0 %v3092_v28  ;;  %v3163_v17 = vld [vmem:[%s4668_s1 + $0x754] ss:$8 sps:$4 sm:$0xff]   ;;  %v205_v18 = vld [vmem:[%s3633_s4 + $0x80] sm:$0xff]  ;;  %v206_v20 = vld [vmem:[%s3633_s4 + $0x88] sm:$0xff] }
  0x28   : > { %1372 = vmatprep.subr.bf16.mxu1 %v3094_v29  ;;  %v209_v19 = vld [vmem:[%s3633_s4 + $0xa0] sm:$0xff]  ;;  %v210_v22 = vld [vmem:[%s3633_s4 + $0xa8] sm:$0xff]  ;;  %v3161_v25 = vld [vmem:[%s4668_s1 + $0x750] ss:$8 sps:$4 sm:$0xff]  }
  0x29   : > { %v3744_v21 = vcombine.high %v205_v18, %v209_v19  ;;  %v3747_v23 = vcombine.high %v206_v20, %v210_v22  ;;  %v3756_v26 = vcombine.low %v205_v18, %v209_v19  ;;  %v3758_v27 = vcombine.low %v206_v20, %v210_v22  ;;  %v3166_v28 = vld [vmem:[%s4668_s1 + $0x644] ss:$8 sps:$4 sm:$0xff]   ;;  %v3176_v51 = vld [vmem:[%s4668_s1 + $0x620] ss:$8 sps:$4 sm:$0xff]   ;;  %v3208_v18 = vld [vmem:[%s4668_s1 + $0x6d4] ss:$8 sps:$4 sm:$0xff]  }
  0x2a   : > { %1300 = vmatpush1.bf16.msra.mxu0 %v3096_v30  ;;  %v3169_v29 = vld [vmem:[%s4668_s1 + $0x744] ss:$8 sps:$4 sm:$0xff]   ;;  %v3164_v30 = vld [vmem:[%s4668_s1 + $0x640] ss:$8 sps:$4 sm:$0xff]   ;;  %v3211_v19 = vld [vmem:[%s4668_s1 + $0x7d4] ss:$8 sps:$4 sm:$0xff]  }
  0x2b   : > { %1373 = vmatpush1.bf16.msra.mxu1 %v3097_v31  ;;  %1301 = vmatprep.subr.bf16.mxu0 %v3098_v32  ;;  %v3167_v31 = vld [vmem:[%s4668_s1 + $0x740] ss:$8 sps:$4 sm:$0xff]   ;;  %v3206_v20 = vld [vmem:[%s4668_s1 + $0x6d0] ss:$8 sps:$4 sm:$0xff]  }
  0x2c   : > { %1374 = vmatprep.subr.bf16.mxu1 %v3100_v33  ;;  %v213_v32 = vld [vmem:[%s3633_s4 + $0xc0] sm:$0xff]  ;;  %v222_v49 = vld [vmem:[%s3633_s4 + $0x108] sm:$0xff]  ;;  %v3209_v22 = vld [vmem:[%s4668_s1 + $0x7d0] ss:$8 sps:$4 sm:$0xff]  }
  0x2d   : > { %v217_v33 = vld [vmem:[%s3633_s4 + $0xe0] sm:$0xff]  ;;  %v226_v50 = vld [vmem:[%s3633_s4 + $0x128] sm:$0xff] }
  0x2e   : > { %1302 = vmatpush2.bf16.msra.mxu0 %v3102_v34  ;;  %v214_v34 = vld [vmem:[%s3633_s4 + $0xc8] sm:$0xff] }
  0x2f   : > { %1375 = vmatpush2.bf16.msra.mxu1 %v3103_v35  ;;  %1303 = vmatprep.subr.bf16.mxu0 %v3104_v36  ;;  %v218_v35 = vld [vmem:[%s3633_s4 + $0xe8] sm:$0xff]  ;;  %v3172_v36 = vld [vmem:[%s4668_s1 + $0x634] ss:$8 sps:$4 sm:$0xff]  }
  0x30   : > { %1376 = vmatprep.subr.bf16.mxu1 %v3106_v37  ;;  %v3782_v37 = vcombine.high %v213_v32, %v217_v33 }
  0x32   : > { %1304 = vmatpush2.bf16.msra.mxu0 %v3108_v38  ;;  %v3784_v38 = vcombine.high %v214_v34, %v218_v35 }
  0x33   : > { %1377 = vmatpush2.bf16.msra.mxu1 %v3109_v39  ;;  %1305 = vmatprep.subr.bf16.mxu0 %v3110_v40  ;;  %v3175_v39 = vld [vmem:[%s4668_s1 + $0x734] ss:$8 sps:$4 sm:$0xff]   ;;  %v3170_v40 = vld [vmem:[%s4668_s1 + $0x630] ss:$8 sps:$4 sm:$0xff]  }
  0x34   : > { %1378 = vmatprep.subr.bf16.mxu1 %v3112_v41  ;;  %v3173_v41 = vld [vmem:[%s4668_s1 + $0x730] ss:$8 sps:$4 sm:$0xff]  }
  0x36   : > { %1306 = vmatpush2.bf16.msra.mxu0 %v3114_v42  ;;  %v3797_v42 = vcombine.low %v213_v32, %v217_v33  ;;  %v3218_v32 = vld [vmem:[%s4668_s1 + $0x6b0] ss:$8 sps:$4 sm:$0xff]  }
  0x37   : > { %1379 = vmatpush2.bf16.msra.mxu1 %v3115_v43  ;;  %1307 = vmatprep.subr.bf16.mxu0 %v3116_v44  ;;  %v3799_v43 = vcombine.low %v214_v34, %v218_v35  ;;  %v3178_v44 = vld [vmem:[%s4668_s1 + $0x624] ss:$8 sps:$4 sm:$0xff]   ;;  %v3221_v33 = vld [vmem:[%s4668_s1 + $0x7b0] ss:$8 sps:$4 sm:$0xff]  }
  0x38   : > { %1380 = vmatprep.subr.bf16.mxu1 %v3118_v45  ;;  %v3181_v45 = vld [vmem:[%s4668_s1 + $0x724] ss:$8 sps:$4 sm:$0xff]  }
  0x39   : > { %v3226_v34 = vld [vmem:[%s4668_s1 + $0x6a4] ss:$8 sps:$4 sm:$0xff]  }
  0x3a   : > { %1308 = vmatpush2.bf16.msra.mxu0 %v3120_v46  ;;  %v221_v46 = vld [vmem:[%s3633_s4 + $0x100] sm:$0xff] }
  0x3b   : > { %1381 = vmatpush2.bf16.msra.mxu1 %v3121_v47  ;;  %1309 = vmatprep.subr.bf16.mxu0 %v3122_v52  ;;  %v225_v47 = vld [vmem:[%s3633_s4 + $0x120] sm:$0xff] }
  0x3c   : > { %1382 = vmatprep.subr.bf16.mxu1 %v3124_v54  ;;  %v2735_v48 = vcombine.high %v221_v46, %v225_v47  ;;  %v3179_v52 = vld [vmem:[%s4668_s1 + $0x720] ss:$8 sps:$4 sm:$0xff]   ;;  %v2737_v54 = vcombine.high %v222_v49, %v226_v50  ;;  %v3229_v35 = vld [vmem:[%s4668_s1 + $0x7a4] ss:$8 sps:$4 sm:$0xff]  }
  0x3e   : > { %1310 = vmatpush2.bf16.msra.mxu0 %v3126_v56  ;;  %v3184_v56 = vld [vmem:[%s4668_s1 + $0x614] ss:$8 sps:$4 sm:$0xff]  }
  0x3f   : > { %1383 = vmatpush2.bf16.msra.mxu1 %v3127_v57  ;;  %1311 = vmatprep.subr.bf16.mxu0 %v3128_v58  ;;  %v3187_v57 = vld [vmem:[%s4668_s1 + $0x714] ss:$8 sps:$4 sm:$0xff]   ;;  %v3182_v58 = vld [vmem:[%s4668_s1 + $0x610] ss:$8 sps:$4 sm:$0xff]  }
  0x40   : > { %1384 = vmatprep.subr.bf16.mxu1 %v3130_v59  ;;  %v3185_v59 = vld [vmem:[%s4668_s1 + $0x710] ss:$8 sps:$4 sm:$0xff]  }
  0x42   : > { %1312 = vmatpush2.bf16.msra.mxu0 %v3132_v60  ;;  %v2734_v60 = vcombine.low %v221_v46, %v225_v47  ;;  %v3238_v46 = vld [vmem:[%s4668_s1 + $0x684] ss:$8 sps:$4 sm:$0xff]  }
  0x43   : > { %1385 = vmatpush2.bf16.msra.mxu1 %v3133_v61  ;;  %1313 = vmatprep.subr.bf16.mxu0 %v3134_v62  ;;  %v2736_v61 = vcombine.low %v222_v49, %v226_v50  ;;  %v3190_v62 = vld [vmem:[%s4668_s1 + $0x604] ss:$8 sps:$4 sm:$0xff]   ;;  %v3239_v49 = vld [vmem:[%s4668_s1 + $0x780] ss:$8 sps:$4 sm:$0xff]   ;;  %v3244_v50 = vld [vmem:[%s4668_s1 + $0x74] ss:$8 sps:$4 sm:$0xff]  }
  0x44   : > { %1386 = vmatprep.subr.bf16.mxu1 %v3136_v63  ;;  %v3193_v63 = vld [vmem:[%s4668_s1 + $0x704] ss:$8 sps:$4 sm:$0xff]  }
  0x45   : > { %v3241_v47 = vld [vmem:[%s4668_s1 + $0x784] ss:$8 sps:$4 sm:$0xff]  }
  0x46   : > { %1314 = vmatpush2.bf16.msra.mxu0 %v3138_v0  ;;  %v3188_v0 = vld [vmem:[%s4668_s1 + $0x600] ss:$8 sps:$4 sm:$0xff]  }
  0x47   : > { %1387 = vmatpush2.bf16.msra.mxu1 %v3139_v1  ;;  %1315 = vmatprep.subr.bf16.mxu0 %v3140_v2  ;;  %v3191_v1 = vld [vmem:[%s4668_s1 + $0x700] ss:$8 sps:$4 sm:$0xff]   ;;  %v3844_v2 = vld [vmem:[%s3633_s4 + $0x50] sm:$0xff] }
  0x48   : > { %1388 = vmatprep.subr.bf16.mxu1 %v3142_v3  ;;  %v3847_v3 = vld [vmem:[%s3633_s4 + $0x70] sm:$0xff] }
  0x4a   : > { %1316 = vmatpush2.bf16.msra.mxu0 %v3144_v4  ;;  %v3850_v4 = vld [vmem:[%s3633_s4 + $0x58] sm:$0xff] }
  0x4b   : > { %1389 = vmatpush2.bf16.msra.mxu1 %v3145_v5  ;;  %1431 = vmatprep.subr.bf16.mxu0 %v3148_v6  ;;  %v3853_v5 = vld [vmem:[%s3633_s4 + $0x78] sm:$0xff] }
  0x4c   : > { %1504 = vmatprep.subr.bf16.mxu1 %v3151_v7  ;;  %v3196_v6 = vld [vmem:[%s4668_s1 + $0x6f4] ss:$8 sps:$4 sm:$0xff]   ;;  %v3860_v7 = vcombine.high %v3844_v2, %v3847_v3 }
  0x4d   : > { %1318 = vmatmul.mubr.bf16.vlgmr.msra.gmra.mxu0 %v3711_v8 }
  0x4e   : > { %1391 = vmatmul.mubr.bf16.vlgmr.msra.gmra.mxu1 %v3713_v9  ;;  %1432 = vmatpush1.bf16.msra.mxu0 %v3146_v10  ;;  %v3199_v10 = vld [vmem:[%s4668_s1 + $0x7f4] ss:$8 sps:$4 sm:$0xff]  }
  0x4f   : > { %1505 = vmatpush1.bf16.msra.mxu1 %v3149_v11  ;;  %1433 = vmatprep.subr.bf16.mxu0 %v3154_v12  ;;  %v3867_v11 = vcombine.high %v3850_v4, %v3853_v5  ;;  %v3194_v12 = vld [vmem:[%s4668_s1 + $0x6f0] ss:$8 sps:$4 sm:$0xff]  }
  0x50   : > { %1506 = vmatprep.subr.bf16.mxu1 %v3157_v13  ;;  %1327 = vmatprep.mubr.bf16.mxu0 %v3744_v21  ;;  %v3197_v13 = vld [vmem:[%s4668_s1 + $0x7f0] ss:$8 sps:$4 sm:$0xff]  }
  0x51   : > { %1400 = vmatprep.mubr.bf16.mxu1 %v3747_v23 }
  0x52   : > { %1434 = vmatpush1.bf16.msra.mxu0 %v3152_v14  ;;  %v3202_v14 = vld [vmem:[%s4668_s1 + $0x6e4] ss:$8 sps:$4 sm:$0xff]  }
  0x53   : > { %1507 = vmatpush1.bf16.msra.mxu1 %v3155_v15  ;;  %1435 = vmatprep.subr.bf16.mxu0 %v3160_v16  ;;  %v3205_v15 = vld [vmem:[%s4668_s1 + $0x7e4] ss:$8 sps:$4 sm:$0xff]   ;;  %v3200_v16 = vld [vmem:[%s4668_s1 + $0x6e0] ss:$8 sps:$4 sm:$0xff]  }
  0x54   : > { %1508 = vmatprep.subr.bf16.mxu1 %v3163_v17  ;;  %v3203_v17 = vld [vmem:[%s4668_s1 + $0x7e0] ss:$8 sps:$4 sm:$0xff]  }
  0x55   : > { %1328 = vmatmul.mubr.bf16.gmra.mxu0 %v3756_v26 }
  0x56   : > { %1401 = vmatmul.mubr.bf16.gmra.mxu1 %v3758_v27  ;;  %1436 = vmatpush1.bf16.msra.mxu0 %v3158_v24  ;;  %v3214_v24 = vld [vmem:[%s4668_s1 + $0x6c4] ss:$8 sps:$4 sm:$0xff]  }
  0x57   : > { %1509 = vmatpush1.bf16.msra.mxu1 %v3161_v25  ;;  %1437 = vmatprep.subr.bf16.mxu0 %v3166_v28  ;;  %v3217_v25 = vld [vmem:[%s4668_s1 + $0x7c4] ss:$8 sps:$4 sm:$0xff]   ;;  %v3212_v28 = vld [vmem:[%s4668_s1 + $0x6c0] ss:$8 sps:$4 sm:$0xff]  }
  0x58   : > { %1510 = vmatprep.subr.bf16.mxu1 %v3169_v29  ;;  %1337 = vmatprep.mubr.bf16.mxu0 %v3782_v37  ;;  %v3215_v29 = vld [vmem:[%s4668_s1 + $0x7c0] ss:$8 sps:$4 sm:$0xff]  }
  0x59   : > { %1410 = vmatprep.mubr.bf16.mxu1 %v3784_v38 }
  0x5a   : > { %1438 = vmatpush1.bf16.msra.mxu0 %v3164_v30  ;;  %v3220_v30 = vld [vmem:[%s4668_s1 + $0x6b4] ss:$8 sps:$4 sm:$0xff]  }
  0x5b   : > { %1511 = vmatpush1.bf16.msra.mxu1 %v3167_v31  ;;  %1439 = vmatprep.subr.bf16.mxu0 %v3172_v36  ;;  %v3223_v31 = vld [vmem:[%s4668_s1 + $0x7b4] ss:$8 sps:$4 sm:$0xff]   ;;  %v3224_v36 = vld [vmem:[%s4668_s1 + $0x6a0] ss:$8 sps:$4 sm:$0xff]  }
  0x5c   : > { %1512 = vmatprep.subr.bf16.mxu1 %v3175_v39  ;;  %v3227_v39 = vld [vmem:[%s4668_s1 + $0x7a0] ss:$8 sps:$4 sm:$0xff]  }
  0x5d   : > { %1338 = vmatmul.mubr.bf16.gmra.mxu0 %v3797_v42 }
  0x5e   : > { %1411 = vmatmul.mubr.bf16.gmra.mxu1 %v3799_v43  ;;  %1440 = vmatpush1.bf16.msra.mxu0 %v3170_v40  ;;  %v3232_v40 = vld [vmem:[%s4668_s1 + $0x694] ss:$8 sps:$4 sm:$0xff]  }
  0x5f   : > { %1513 = vmatpush1.bf16.msra.mxu1 %v3173_v41  ;;  %1441 = vmatprep.subr.bf16.mxu0 %v3178_v44  ;;  %v3235_v41 = vld [vmem:[%s4668_s1 + $0x794] ss:$8 sps:$4 sm:$0xff]   ;;  %v3230_v44 = vld [vmem:[%s4668_s1 + $0x690] ss:$8 sps:$4 sm:$0xff]  }
  0x60   : > { %1514 = vmatprep.subr.bf16.mxu1 %v3181_v45  ;;  %1347 = vmatprep.mubr.bf16.mxu0 %v2735_v48  ;;  %v3233_v45 = vld [vmem:[%s4668_s1 + $0x790] ss:$8 sps:$4 sm:$0xff]   ;;  %v3236_v48 = vld [vmem:[%s4668_s1 + $0x680] ss:$8 sps:$4 sm:$0xff]  }
  0x61   : > { %1420 = vmatprep.mubr.bf16.mxu1 %v2737_v54  ;;  %v3245_v54 = vld [vmem:[%s4668_s1 + $0x170] ss:$8 sps:$4 sm:$0xff]  }
  0x62   : > { %1442 = vmatpush1.bf16.msra.mxu0 %v3176_v51  ;;  %v3247_v51 = vld [vmem:[%s4668_s1 + $0x174] ss:$8 sps:$4 sm:$0xff]  }
  0x63   : > { %1515 = vmatpush1.bf16.msra.mxu1 %v3179_v52  ;;  %1443 = vmatprep.subr.bf16.mxu0 %v3184_v56  ;;  %v3242_v52 = vld [vmem:[%s4668_s1 + $0x70] ss:$8 sps:$4 sm:$0xff]  }
  0x64   : > { %1516 = vmatprep.subr.bf16.mxu1 %v3187_v57  ;;  %v207_v56 = vld [vmem:[%s3633_s4 + $0x90] sm:$0xff] }
  0x65   : > { %1348 = vmatmul.mubr.bf16.gmra.mxu0 %v2734_v60  ;;  %v211_v57 = vld [vmem:[%s3633_s4 + $0xb0] sm:$0xff]  ;;  %v208_v60 = vld [vmem:[%s3633_s4 + $0x98] sm:$0xff] }
  0x66   : > { %1421 = vmatmul.mubr.bf16.gmra.mxu1 %v2736_v61  ;;  %1444 = vmatpush1.bf16.msra.mxu0 %v3182_v58  ;;  %v3977_v58 = vcombine.low %v3844_v2, %v3847_v3  ;;  %v212_v61 = vld [vmem:[%s3633_s4 + $0xb8] sm:$0xff]  ;;  %v3248_v2 = vld [vmem:[%s4668_s1 + $0x60] ss:$8 sps:$4 sm:$0xff]  }
  0x67   : > { %1517 = vmatpush1.bf16.msra.mxu1 %v3185_v59  ;;  %1445 = vmatprep.subr.bf16.mxu0 %v3190_v62  ;;  %v3981_v59 = vcombine.low %v3850_v4, %v3853_v5  ;;  %v3250_v62 = vld [vmem:[%s4668_s1 + $0x64] ss:$8 sps:$4 sm:$0xff]   ;;  %v3251_v3 = vld [vmem:[%s4668_s1 + $0x160] ss:$8 sps:$4 sm:$0xff]   ;;  %v3256_v4 = vld [vmem:[%s4668_s1 + $0x54] ss:$8 sps:$4 sm:$0xff]  }
  0x68   : > { %1518 = vmatprep.subr.bf16.mxu1 %v3193_v63  ;;  %1463 = vmatprep.mubr.bf16.mxu0 %v3860_v7  ;;  %v3253_v63 = vld [vmem:[%s4668_s1 + $0x164] ss:$8 sps:$4 sm:$0xff]   ;;  %v3259_v5 = vld [vmem:[%s4668_s1 + $0x154] ss:$8 sps:$4 sm:$0xff]  }
  0x69   : > { %1536 = vmatprep.mubr.bf16.mxu1 %v3867_v11 }
  0x6a   : > { %1446 = vmatpush1.bf16.msra.mxu0 %v3188_v0  ;;  %v3991_v0 = vcombine.high %v207_v56, %v211_v57 }
  0x6b   : > { %1519 = vmatpush1.bf16.msra.mxu1 %v3191_v1  ;;  %1447 = vmatprep.subr.bf16.mxu0 %v3196_v6  ;;  %v3993_v1 = vcombine.high %v208_v60, %v212_v61  ;;  %v3254_v6 = vld [vmem:[%s4668_s1 + $0x50] ss:$8 sps:$4 sm:$0xff]  }
  0x6c   : > { %1520 = vmatprep.subr.bf16.mxu1 %v3199_v10  ;;  %v3257_v10 = vld [vmem:[%s4668_s1 + $0x150] ss:$8 sps:$4 sm:$0xff]  }
  0x6e   : > { %1448 = vmatpush2.bf16.msra.mxu0 %v3194_v12  ;;  %v215_v12 = vld [vmem:[%s3633_s4 + $0xd0] sm:$0xff] }
  0x6f   : > { %1521 = vmatpush2.bf16.msra.mxu1 %v3197_v13  ;;  %1449 = vmatprep.subr.bf16.mxu0 %v3202_v14  ;;  %v219_v13 = vld [vmem:[%s3633_s4 + $0xf0] sm:$0xff]  ;;  %v4019_v14 = vcombine.low %v207_v56, %v211_v57 }
  0x70   : > { %1522 = vmatprep.subr.bf16.mxu1 %v3205_v15  ;;  %v4021_v15 = vcombine.low %v208_v60, %v212_v61  ;;  %v4098_v60 = vld [vmem:[%s3633_s4 + $0x8] sm:$0xff] }
  0x71   : > { %v4101_v61 = vld [vmem:[%s3633_s4 + $0x28] sm:$0xff] }
  0x72   : > { %1450 = vmatpush2.bf16.msra.mxu0 %v3200_v16  ;;  %v216_v16 = vld [vmem:[%s3633_s4 + $0xd8] sm:$0xff] }
  0x73   : > { %1523 = vmatpush2.bf16.msra.mxu1 %v3203_v17  ;;  %1451 = vmatprep.subr.bf16.mxu0 %v3208_v18  ;;  %v220_v17 = vld [vmem:[%s3633_s4 + $0xf8] sm:$0xff]  ;;  %v3262_v18 = vld [vmem:[%s4668_s1 + $0x44] ss:$8 sps:$4 sm:$0xff]  }
  0x74   : > { %1524 = vmatprep.subr.bf16.mxu1 %v3211_v19  ;;  %v3265_v19 = vld [vmem:[%s4668_s1 + $0x144] ss:$8 sps:$4 sm:$0xff]  }
  0x76   : > { %1452 = vmatpush2.bf16.msra.mxu0 %v3206_v20  ;;  %v4031_v20 = vcombine.high %v215_v12, %v219_v13 }
  0x77   : > { %1525 = vmatpush2.bf16.msra.mxu1 %v3209_v22  ;;  %1453 = vmatprep.subr.bf16.mxu0 %v3214_v24  ;;  %v4033_v22 = vcombine.high %v216_v16, %v220_v17  ;;  %v3260_v24 = vld [vmem:[%s4668_s1 + $0x40] ss:$8 sps:$4 sm:$0xff]  }
  0x78   : > { %1526 = vmatprep.subr.bf16.mxu1 %v3217_v25  ;;  %v3263_v25 = vld [vmem:[%s4668_s1 + $0x140] ss:$8 sps:$4 sm:$0xff]  }
  0x7a   : > { %1454 = vmatpush2.bf16.msra.mxu0 %v3212_v28  ;;  %v3268_v28 = vld [vmem:[%s4668_s1 + $0x34] ss:$8 sps:$4 sm:$0xff]  }
  0x7b   : > { %1527 = vmatpush2.bf16.msra.mxu1 %v3215_v29  ;;  %1455 = vmatprep.subr.bf16.mxu0 %v3220_v30  ;;  %v3271_v29 = vld [vmem:[%s4668_s1 + $0x134] ss:$8 sps:$4 sm:$0xff]   ;;  %v3266_v30 = vld [vmem:[%s4668_s1 + $0x30] ss:$8 sps:$4 sm:$0xff]  }
  0x7c   : > { %1528 = vmatprep.subr.bf16.mxu1 %v3223_v31  ;;  %v3269_v31 = vld [vmem:[%s4668_s1 + $0x130] ss:$8 sps:$4 sm:$0xff]  }
  0x7e   : > { %1456 = vmatpush2.bf16.msra.mxu0 %v3218_v32  ;;  %v223_v32 = vld [vmem:[%s3633_s4 + $0x110] sm:$0xff] }
  0x7f   : > { %1529 = vmatpush2.bf16.msra.mxu1 %v3221_v33  ;;  %1457 = vmatprep.subr.bf16.mxu0 %v3226_v34  ;;  %v227_v33 = vld [vmem:[%s3633_s4 + $0x130] sm:$0xff]  ;;  %v4059_v34 = vcombine.low %v215_v12, %v219_v13 }
  0x80   : > { %1530 = vmatprep.subr.bf16.mxu1 %v3229_v35  ;;  %v4061_v35 = vcombine.low %v216_v16, %v220_v17  ;;  %v2738_v56 = vcombine.low %v223_v32, %v227_v33  ;;  %v3290_v12 = vld [vmem:[%s4668_s1 + $0xf0] ss:$8 sps:$4 sm:$0xff]   ;;  %v3298_v16 = vld [vmem:[%s4668_s1 + $0xe4] ss:$8 sps:$4 sm:$0xff]  }
  0x81   : > { %v3293_v13 = vld [vmem:[%s4668_s1 + $0x1f0] ss:$8 sps:$4 sm:$0xff]   ;;  %v3301_v17 = vld [vmem:[%s4668_s1 + $0x1e4] ss:$8 sps:$4 sm:$0xff]  }
  0x82   : > { %1458 = vmatpush2.bf16.msra.mxu0 %v3224_v36  ;;  %v224_v36 = vld [vmem:[%s3633_s4 + $0x118] sm:$0xff] }
  0x83   : > { %1531 = vmatpush2.bf16.msra.mxu1 %v3227_v39  ;;  %1459 = vmatprep.subr.bf16.mxu0 %v3232_v40  ;;  %v228_v39 = vld [vmem:[%s3633_s4 + $0x138] sm:$0xff]  ;;  %v3274_v40 = vld [vmem:[%s4668_s1 + $0x24] ss:$8 sps:$4 sm:$0xff]  }
  0x84   : > { %1532 = vmatprep.subr.bf16.mxu1 %v3235_v41  ;;  %v3277_v41 = vld [vmem:[%s4668_s1 + $0x124] ss:$8 sps:$4 sm:$0xff]   ;;  %v2740_v57 = vcombine.low %v224_v36, %v228_v39 }
  0x86   : > { %1460 = vmatpush2.bf16.msra.mxu0 %v3230_v44  ;;  %v2739_v44 = vcombine.high %v223_v32, %v227_v33  ;;  %v3308_v32 = vld [vmem:[%s4668_s1 + $0xc0] ss:$8 sps:$4 sm:$0xff]  }
  0x87   : > { %1533 = vmatpush2.bf16.msra.mxu1 %v3233_v45  ;;  %1461 = vmatprep.subr.bf16.mxu0 %v3238_v46  ;;  %v2741_v45 = vcombine.high %v224_v36, %v228_v39  ;;  %v3272_v46 = vld [vmem:[%s4668_s1 + $0x20] ss:$8 sps:$4 sm:$0xff]   ;;  %v3316_v36 = vld [vmem:[%s4668_s1 + $0xb4] ss:$8 sps:$4 sm:$0xff]  }
  0x88   : > { %1534 = vmatprep.subr.bf16.mxu1 %v3241_v47  ;;  %v3275_v47 = vld [vmem:[%s4668_s1 + $0x120] ss:$8 sps:$4 sm:$0xff]   ;;  %v3319_v39 = vld [vmem:[%s4668_s1 + $0x1b4] ss:$8 sps:$4 sm:$0xff]  }
  0x89   : > { %v3311_v33 = vld [vmem:[%s4668_s1 + $0x1c0] ss:$8 sps:$4 sm:$0xff]  }
  0x8a   : > { %1462 = vmatpush2.bf16.msra.mxu0 %v3236_v48  ;;  %v3280_v48 = vld [vmem:[%s4668_s1 + $0x14] ss:$8 sps:$4 sm:$0xff]  }
  0x8b   : > { %1535 = vmatpush2.bf16.msra.mxu1 %v3239_v49  ;;  %2257 = vmatprep.subr.bf16.mxu0 %v3244_v50  ;;  %v3283_v49 = vld [vmem:[%s4668_s1 + $0x114] ss:$8 sps:$4 sm:$0xff]   ;;  %v3278_v50 = vld [vmem:[%s4668_s1 + $0x10] ss:$8 sps:$4 sm:$0xff]  }
  0x8c   : > { %2330 = vmatprep.subr.bf16.mxu1 %v3247_v51  ;;  %v3281_v51 = vld [vmem:[%s4668_s1 + $0x110] ss:$8 sps:$4 sm:$0xff]  }
  0x8d   : > { %1464 = vmatmul.mubr.bf16.vlgmr.msra.gmra.mxu0 %v3977_v58 }
  0x8e   : > { %1537 = vmatmul.mubr.bf16.vlgmr.msra.gmra.mxu1 %v3981_v59  ;;  %2258 = vmatpush1.bf16.msra.mxu0 %v3242_v52  ;;  %v4092_v52 = vld [vmem:[%s3633_s4] sm:$0xff] }
  0x8f   : > { %2331 = vmatpush1.bf16.msra.mxu1 %v3245_v54  ;;  %2259 = vmatprep.subr.bf16.mxu0 %v3250_v62  ;;  %v4095_v54 = vld [vmem:[%s3633_s4 + $0x20] sm:$0xff] }
  0x90   : > { %2332 = vmatprep.subr.bf16.mxu1 %v3253_v63  ;;  %1473 = vmatprep.mubr.bf16.mxu0 %v3991_v0  ;;  %v3286_v62 = vld [vmem:[%s4668_s1 + $0x4] ss:$8 sps:$4 sm:$0xff]  }
  0x91   : > { %1546 = vmatprep.mubr.bf16.mxu1 %v3993_v1  ;;  %v3289_v63 = vld [vmem:[%s4668_s1 + $0x104] ss:$8 sps:$4 sm:$0xff]  }
  0x92   : > { %2260 = vmatpush1.bf16.msra.mxu0 %v3248_v2  ;;  %v2871_v2 = vcombine.high %v4092_v52, %v4095_v54 }
  0x93   : > { %2333 = vmatpush1.bf16.msra.mxu1 %v3251_v3  ;;  %2261 = vmatprep.subr.bf16.mxu0 %v3256_v4  ;;  %v2873_v3 = vcombine.high %v4098_v60, %v4101_v61  ;;  %v3284_v4 = vld [vmem:[%s4668_s1] ss:$8 sps:$4 sm:$0xff]  }
  0x94   : > { %2334 = vmatprep.subr.bf16.mxu1 %v3259_v5  ;;  %v3287_v5 = vld [vmem:[%s4668_s1 + $0x100] ss:$8 sps:$4 sm:$0xff]  }
  0x95   : > { %1474 = vmatmul.mubr.bf16.gmra.mxu0 %v4019_v14 }
  0x96   : > { %1547 = vmatmul.mubr.bf16.gmra.mxu1 %v4021_v15  ;;  %2262 = vmatpush1.bf16.msra.mxu0 %v3254_v6  ;;  %v3292_v6 = vld [vmem:[%s4668_s1 + $0xf4] ss:$8 sps:$4 sm:$0xff]  }
  0x97   : > { %2335 = vmatpush1.bf16.msra.mxu1 %v3257_v10  ;;  %2263 = vmatprep.subr.bf16.mxu0 %v3262_v18  ;;  %v3295_v10 = vld [vmem:[%s4668_s1 + $0x1f4] ss:$8 sps:$4 sm:$0xff]   ;;  %v3296_v18 = vld [vmem:[%s4668_s1 + $0xe0] ss:$8 sps:$4 sm:$0xff]  }
  0x98   : > { %2336 = vmatprep.subr.bf16.mxu1 %v3265_v19  ;;  %1483 = vmatprep.mubr.bf16.mxu0 %v4031_v20  ;;  %v3299_v19 = vld [vmem:[%s4668_s1 + $0x1e0] ss:$8 sps:$4 sm:$0xff]  }
  0x99   : > { %1556 = vmatprep.mubr.bf16.mxu1 %v4033_v22 }
  0x9a   : > { %2264 = vmatpush1.bf16.msra.mxu0 %v3260_v24  ;;  %v3304_v24 = vld [vmem:[%s4668_s1 + $0xd4] ss:$8 sps:$4 sm:$0xff]  }
  0x9b   : > { %2337 = vmatpush1.bf16.msra.mxu1 %v3263_v25  ;;  %2265 = vmatprep.subr.bf16.mxu0 %v3268_v28  ;;  %v3307_v25 = vld [vmem:[%s4668_s1 + $0x1d4] ss:$8 sps:$4 sm:$0xff]   ;;  %v3302_v28 = vld [vmem:[%s4668_s1 + $0xd0] ss:$8 sps:$4 sm:$0xff]  }
  0x9c   : > { %2338 = vmatprep.subr.bf16.mxu1 %v3271_v29  ;;  %v3305_v29 = vld [vmem:[%s4668_s1 + $0x1d0] ss:$8 sps:$4 sm:$0xff]  }
  0x9d   : > { %1484 = vmatmul.mubr.bf16.gmra.mxu0 %v4059_v34 }
  0x9e   : > { %1557 = vmatmul.mubr.bf16.gmra.mxu1 %v4061_v35  ;;  %2266 = vmatpush1.bf16.msra.mxu0 %v3266_v30  ;;  %v3310_v30 = vld [vmem:[%s4668_s1 + $0xc4] ss:$8 sps:$4 sm:$0xff]  }
  0x9f   : > { %2339 = vmatpush1.bf16.msra.mxu1 %v3269_v31  ;;  %2267 = vmatprep.subr.bf16.mxu0 %v3274_v40  ;;  %v3313_v31 = vld [vmem:[%s4668_s1 + $0x1c4] ss:$8 sps:$4 sm:$0xff]   ;;  %v3314_v40 = vld [vmem:[%s4668_s1 + $0xb0] ss:$8 sps:$4 sm:$0xff]  }
  0xa0   : > { %2340 = vmatprep.subr.bf16.mxu1 %v3277_v41  ;;  %1493 = vmatprep.mubr.bf16.mxu0 %v2739_v44  ;;  %v3317_v41 = vld [vmem:[%s4668_s1 + $0x1b0] ss:$8 sps:$4 sm:$0xff]   ;;  %v3322_v44 = vld [vmem:[%s4668_s1 + $0xa4] ss:$8 sps:$4 sm:$0xff]  }
  0xa1   : > { %1566 = vmatprep.mubr.bf16.mxu1 %v2741_v45  ;;  %v3325_v45 = vld [vmem:[%s4668_s1 + $0x1a4] ss:$8 sps:$4 sm:$0xff]  }
  0xa2   : > { %2268 = vmatpush1.bf16.msra.mxu0 %v3272_v46  ;;  %v3320_v46 = vld [vmem:[%s4668_s1 + $0xa0] ss:$8 sps:$4 sm:$0xff]  }
  0xa3   : > { %2341 = vmatpush1.bf16.msra.mxu1 %v3275_v47  ;;  %2269 = vmatprep.subr.bf16.mxu0 %v3280_v48  ;;  %v3323_v47 = vld [vmem:[%s4668_s1 + $0x1a0] ss:$8 sps:$4 sm:$0xff]   ;;  %v3328_v48 = vld [vmem:[%s4668_s1 + $0x94] ss:$8 sps:$4 sm:$0xff]  }
  0xa4   : > { %2342 = vmatprep.subr.bf16.mxu1 %v3283_v49  ;;  %v3331_v49 = vld [vmem:[%s4668_s1 + $0x194] ss:$8 sps:$4 sm:$0xff]  }
  0xa5   : > { %1494 = vmatmul.mubr.bf16.gmra.mxu0 %v2738_v56  ;;  %v3334_v56 = vld [vmem:[%s4668_s1 + $0x84] ss:$8 sps:$4 sm:$0xff]  }
  0xa6   : > { %1567 = vmatmul.mubr.bf16.gmra.mxu1 %v2740_v57  ;;  %2270 = vmatpush1.bf16.msra.mxu0 %v3278_v50  ;;  %v3326_v50 = vld [vmem:[%s4668_s1 + $0x90] ss:$8 sps:$4 sm:$0xff]   ;;  %v3337_v57 = vld [vmem:[%s4668_s1 + $0x184] ss:$8 sps:$4 sm:$0xff]  }
  0xa7   : > { %2343 = vmatpush1.bf16.msra.mxu1 %v3281_v51  ;;  %2271 = vmatprep.subr.bf16.mxu0 %v3286_v62  ;;  %v3329_v51 = vld [vmem:[%s4668_s1 + $0x190] ss:$8 sps:$4 sm:$0xff]   ;;  %v3332_v62 = vld [vmem:[%s4668_s1 + $0x80] ss:$8 sps:$4 sm:$0xff]  }
  0xa8   : > { %2344 = vmatprep.subr.bf16.mxu1 %v3289_v63  ;;  %2289 = vmatprep.mubr.bf16.mxu0 %v2871_v2  ;;  %v3335_v63 = vld [vmem:[%s4668_s1 + $0x180] ss:$8 sps:$4 sm:$0xff]   ;;  %v3340_v2 = vld [vmem:[%s4668_s1 + $0x274] ss:$8 sps:$4 sm:$0xff]  }
  0xa9   : > { %2362 = vmatprep.mubr.bf16.mxu1 %v2873_v3  ;;  %v3343_v3 = vld [vmem:[%s4668_s1 + $0x374] ss:$8 sps:$4 sm:$0xff]  }
  0xaa   : > { %2272 = vmatpush1.bf16.msra.mxu0 %v3284_v4  ;;  %v2870_v4 = vcombine.low %v4092_v52, %v4095_v54  ;;  %v3349_v52 = vld [vmem:[%s4668_s1 + $0x364] ss:$8 sps:$4 sm:$0xff]   ;;  %v3344_v54 = vld [vmem:[%s4668_s1 + $0x260] ss:$8 sps:$4 sm:$0xff]  }
  0xab   : > { %2345 = vmatpush1.bf16.msra.mxu1 %v3287_v5  ;;  %2273 = vmatprep.subr.bf16.mxu0 %v3292_v6  ;;  %v2872_v5 = vcombine.low %v4098_v60, %v4101_v61  ;;  %v3338_v6 = vld [vmem:[%s4668_s1 + $0x270] ss:$8 sps:$4 sm:$0xff]   ;;  %v3347_v60 = vld [vmem:[%s4668_s1 + $0x360] ss:$8 sps:$4 sm:$0xff]   ;;  %v3352_v61 = vld [vmem:[%s4668_s1 + $0x254] ss:$8 sps:$4 sm:$0xff]  }
  0xac   : > { %2346 = vmatprep.subr.bf16.mxu1 %v3295_v10  ;;  %v3341_v10 = vld [vmem:[%s4668_s1 + $0x370] ss:$8 sps:$4 sm:$0xff]  }
  0xae   : > { %2274 = vmatpush2.bf16.msra.mxu0 %v3290_v12  ;;  %v3346_v12 = vld [vmem:[%s4668_s1 + $0x264] ss:$8 sps:$4 sm:$0xff]  }
  0xaf   : > { %2347 = vmatpush2.bf16.msra.mxu1 %v3293_v13  ;;  %2275 = vmatprep.subr.bf16.mxu0 %v3298_v16  ;;  %v3355_v13 = vld [vmem:[%s4668_s1 + $0x354] ss:$8 sps:$4 sm:$0xff]   ;;  %v3350_v16 = vld [vmem:[%s4668_s1 + $0x250] ss:$8 sps:$4 sm:$0xff]  }
  0xb0   : > { %2348 = vmatprep.subr.bf16.mxu1 %v3301_v17  ;;  %v3353_v17 = vld [vmem:[%s4668_s1 + $0x350] ss:$8 sps:$4 sm:$0xff]  }
  0xb2   : > { %2276 = vmatpush2.bf16.msra.mxu0 %v3296_v18  ;;  %v3358_v18 = vld [vmem:[%s4668_s1 + $0x244] ss:$8 sps:$4 sm:$0xff]  }
  0xb3   : > { %2349 = vmatpush2.bf16.msra.mxu1 %v3299_v19  ;;  %2277 = vmatprep.subr.bf16.mxu0 %v3304_v24  ;;  %v3359_v19 = vld [vmem:[%s4668_s1 + $0x340] ss:$8 sps:$4 sm:$0xff]   ;;  %v3364_v24 = vld [vmem:[%s4668_s1 + $0x234] ss:$8 sps:$4 sm:$0xff]  }
  0xb4   : > { %2350 = vmatprep.subr.bf16.mxu1 %v3307_v25  ;;  %v3365_v25 = vld [vmem:[%s4668_s1 + $0x330] ss:$8 sps:$4 sm:$0xff]  }
  0xb6   : > { %2278 = vmatpush2.bf16.msra.mxu0 %v3302_v28  ;;  %v3368_v28 = vld [vmem:[%s4668_s1 + $0x220] ss:$8 sps:$4 sm:$0xff]  }
  0xb7   : > { %2351 = vmatpush2.bf16.msra.mxu1 %v3305_v29  ;;  %2279 = vmatprep.subr.bf16.mxu0 %v3310_v30  ;;  %v3371_v29 = vld [vmem:[%s4668_s1 + $0x320] ss:$8 sps:$4 sm:$0xff]   ;;  %v3376_v30 = vld [vmem:[%s4668_s1 + $0x214] ss:$8 sps:$4 sm:$0xff]  }
  0xb8   : > { %2352 = vmatprep.subr.bf16.mxu1 %v3313_v31  ;;  %v4311_v31 = vld [vmem:[%s3633_s4 + $0x30] sm:$0xff] }
  0xba   : > { %2280 = vmatpush2.bf16.msra.mxu0 %v3308_v32  ;;  %v4314_v32 = vld [vmem:[%s3633_s4 + $0x18] sm:$0xff] }
  0xbb   : > { %2353 = vmatpush2.bf16.msra.mxu1 %v3311_v33  ;;  %2281 = vmatprep.subr.bf16.mxu0 %v3316_v36  ;;  %v4317_v33 = vld [vmem:[%s3633_s4 + $0x38] sm:$0xff] }
  0xbc   : > { %2354 = vmatprep.subr.bf16.mxu1 %v3319_v39  ;;  %v3374_v36 = vld [vmem:[%s4668_s1 + $0x210] ss:$8 sps:$4 sm:$0xff]   ;;  %v3385_v39 = vld [vmem:[%s4668_s1 + $0x304] ss:$8 sps:$4 sm:$0xff]  }
  0xbe   : > { %2282 = vmatpush2.bf16.msra.mxu0 %v3314_v40 }
  0xbf   : > { %2355 = vmatpush2.bf16.msra.mxu1 %v3317_v41  ;;  %2283 = vmatprep.subr.bf16.mxu0 %v3322_v44  ;;  %v2877_v41 = vcombine.high %v4314_v32, %v4317_v33  ;;  %v3380_v44 = vld [vmem:[%s4668_s1 + $0x200] ss:$8 sps:$4 sm:$0xff]  }
  0xc0   : > { %2356 = vmatprep.subr.bf16.mxu1 %v3325_v45  ;;  %v3383_v45 = vld [vmem:[%s4668_s1 + $0x300] ss:$8 sps:$4 sm:$0xff]  }
  0xc2   : > { %2284 = vmatpush2.bf16.msra.mxu0 %v3320_v46  ;;  %v3388_v46 = vld [vmem:[%s4668_s1 + $0x2f4] ss:$8 sps:$4 sm:$0xff]  }
  0xc3   : > { %2357 = vmatpush2.bf16.msra.mxu1 %v3323_v47  ;;  %2285 = vmatprep.subr.bf16.mxu0 %v3328_v48  ;;  %v3389_v47 = vld [vmem:[%s4668_s1 + $0x3f0] ss:$8 sps:$4 sm:$0xff]   ;;  %v3394_v48 = vld [vmem:[%s4668_s1 + $0x2e4] ss:$8 sps:$4 sm:$0xff]  }
  0xc4   : > { %2358 = vmatprep.subr.bf16.mxu1 %v3331_v49  ;;  %v3397_v49 = vld [vmem:[%s4668_s1 + $0x3e4] ss:$8 sps:$4 sm:$0xff]  }
  0xc6   : > { %2286 = vmatpush2.bf16.msra.mxu0 %v3326_v50  ;;  %v3392_v50 = vld [vmem:[%s4668_s1 + $0x2e0] ss:$8 sps:$4 sm:$0xff]  }
  0xc7   : > { %2359 = vmatpush2.bf16.msra.mxu1 %v3329_v51  ;;  %2287 = vmatprep.subr.bf16.mxu0 %v3334_v56  ;;  %v3395_v51 = vld [vmem:[%s4668_s1 + $0x3e0] ss:$8 sps:$4 sm:$0xff]   ;;  %v3400_v56 = vld [vmem:[%s4668_s1 + $0x2d4] ss:$8 sps:$4 sm:$0xff]  }
  0xc8   : > { %2360 = vmatprep.subr.bf16.mxu1 %v3337_v57  ;;  %v3403_v57 = vld [vmem:[%s4668_s1 + $0x3d4] ss:$8 sps:$4 sm:$0xff]  }
  0xca   : > { %2288 = vmatpush2.bf16.msra.mxu0 %v3332_v62  ;;  %v3398_v62 = vld [vmem:[%s4668_s1 + $0x2d0] ss:$8 sps:$4 sm:$0xff]  }
  0xcb   : > { %2361 = vmatpush2.bf16.msra.mxu1 %v3335_v63  ;;  %2403 = vmatprep.subr.bf16.mxu0 %v3340_v2  ;;  %v3401_v63 = vld [vmem:[%s4668_s1 + $0x3d0] ss:$8 sps:$4 sm:$0xff]   ;;  %v3406_v2 = vld [vmem:[%s4668_s1 + $0x2c4] ss:$8 sps:$4 sm:$0xff]  }
  0xcc   : > { %2476 = vmatprep.subr.bf16.mxu1 %v3343_v3  ;;  %v3409_v3 = vld [vmem:[%s4668_s1 + $0x3c4] ss:$8 sps:$4 sm:$0xff]  }
  0xcd   : > { %2290 = vmatmul.mubr.bf16.vlgmr.msra.gmra.mxu0 %v2870_v4  ;;  %v3404_v4 = vld [vmem:[%s4668_s1 + $0x2c0] ss:$8 sps:$4 sm:$0xff]  }
  0xce   : > { %2363 = vmatmul.mubr.bf16.vlgmr.msra.gmra.mxu1 %v2872_v5  ;;  %2404 = vmatpush1.bf16.msra.mxu0 %v3338_v6  ;;  %v3407_v5 = vld [vmem:[%s4668_s1 + $0x3c0] ss:$8 sps:$4 sm:$0xff]   ;;  %v3412_v6 = vld [vmem:[%s4668_s1 + $0x2b4] ss:$8 sps:$4 sm:$0xff]  }
  0xcf   : > { %2477 = vmatpush1.bf16.msra.mxu1 %v3341_v10  ;;  %2405 = vmatprep.subr.bf16.mxu0 %v3346_v12  ;;  %v3415_v10 = vld [vmem:[%s4668_s1 + $0x3b4] ss:$8 sps:$4 sm:$0xff]   ;;  %v3410_v12 = vld [vmem:[%s4668_s1 + $0x2b0] ss:$8 sps:$4 sm:$0xff]  }
  0xd0   : > { %2478 = vmatprep.subr.bf16.mxu1 %v3349_v52  ;;  %2299 = vmatprep.mubr.bf16.mxu0 %v3654_v53  ;;  %v3361_v53 = vld [vmem:[%s4668_s1 + $0x344] ss:$8 sps:$4 sm:$0xff]   ;;  %v3413_v52 = vld [vmem:[%s4668_s1 + $0x3b0] ss:$8 sps:$4 sm:$0xff]  }
  0xd1   : > { %2372 = vmatprep.mubr.bf16.mxu1 %v3659_v55  ;;  %v3356_v55 = vld [vmem:[%s4668_s1 + $0x240] ss:$8 sps:$4 sm:$0xff]  }
  0xd2   : > { %2406 = vmatpush1.bf16.msra.mxu0 %v3344_v54  ;;  %v3418_v54 = vld [vmem:[%s4668_s1 + $0x2a4] ss:$8 sps:$4 sm:$0xff]  }
  0xd3   : > { %2479 = vmatpush1.bf16.msra.mxu1 %v3347_v60  ;;  %2407 = vmatprep.subr.bf16.mxu0 %v3352_v61  ;;  %v3421_v60 = vld [vmem:[%s4668_s1 + $0x3a4] ss:$8 sps:$4 sm:$0xff]   ;;  %v3416_v61 = vld [vmem:[%s4668_s1 + $0x2a0] ss:$8 sps:$4 sm:$0xff]  }
  0xd4   : > { %2480 = vmatprep.subr.bf16.mxu1 %v3355_v13  ;;  %v3419_v13 = vld [vmem:[%s4668_s1 + $0x3a0] ss:$8 sps:$4 sm:$0xff]  }
  0xd5   : > { %2300 = vmatmul.mubr.bf16.gmra.mxu0 %v3711_v8  ;;  %v3367_v8 = vld [vmem:[%s4668_s1 + $0x334] ss:$8 sps:$4 sm:$0xff]  }
  0xd6   : > { %2373 = vmatmul.mubr.bf16.gmra.mxu1 %v3713_v9  ;;  %2408 = vmatpush1.bf16.msra.mxu0 %v3350_v16  ;;  %v3362_v9 = vld [vmem:[%s4668_s1 + $0x230] ss:$8 sps:$4 sm:$0xff]   ;;  %v3424_v16 = vld [vmem:[%s4668_s1 + $0x294] ss:$8 sps:$4 sm:$0xff]  }
  0xd7   : > { %2481 = vmatpush1.bf16.msra.mxu1 %v3353_v17  ;;  %2409 = vmatprep.subr.bf16.mxu0 %v3358_v18  ;;  %v3427_v17 = vld [vmem:[%s4668_s1 + $0x394] ss:$8 sps:$4 sm:$0xff]   ;;  %v3422_v18 = vld [vmem:[%s4668_s1 + $0x290] ss:$8 sps:$4 sm:$0xff]  }
  0xd8   : > { %2482 = vmatprep.subr.bf16.mxu1 %v3361_v53  ;;  %2309 = vmatprep.mubr.bf16.mxu0 %v3744_v21  ;;  %v3370_v21 = vld [vmem:[%s4668_s1 + $0x224] ss:$8 sps:$4 sm:$0xff]   ;;  %v3425_v53 = vld [vmem:[%s4668_s1 + $0x390] ss:$8 sps:$4 sm:$0xff]  }
  0xd9   : > { %2382 = vmatprep.mubr.bf16.mxu1 %v3747_v23  ;;  %v3373_v23 = vld [vmem:[%s4668_s1 + $0x324] ss:$8 sps:$4 sm:$0xff]  }
  0xda   : > { %2410 = vmatpush1.bf16.msra.mxu0 %v3356_v55  ;;  %v3430_v55 = vld [vmem:[%s4668_s1 + $0x284] ss:$8 sps:$4 sm:$0xff]  }
  0xdb   : > { %2483 = vmatpush1.bf16.msra.mxu1 %v3359_v19  ;;  %2411 = vmatprep.subr.bf16.mxu0 %v3364_v24  ;;  %v3433_v19 = vld [vmem:[%s4668_s1 + $0x384] ss:$8 sps:$4 sm:$0xff]   ;;  %v3428_v24 = vld [vmem:[%s4668_s1 + $0x280] ss:$8 sps:$4 sm:$0xff]  }
  0xdc   : > { %2484 = vmatprep.subr.bf16.mxu1 %v3367_v8  ;;  %v3431_v8 = vld [vmem:[%s4668_s1 + $0x380] ss:$8 sps:$4 sm:$0xff]  }
  0xdd   : > { %2310 = vmatmul.mubr.bf16.gmra.mxu0 %v3756_v26  ;;  %v3379_v26 = vld [vmem:[%s4668_s1 + $0x314] ss:$8 sps:$4 sm:$0xff]  }
  0xde   : > { %2383 = vmatmul.mubr.bf16.gmra.mxu1 %v3758_v27  ;;  %2412 = vmatpush1.bf16.msra.mxu0 %v3362_v9  ;;  %v4308_v27 = vld [vmem:[%s3633_s4 + $0x10] sm:$0xff] }
  0xdf   : > { %2485 = vmatpush1.bf16.msra.mxu1 %v3365_v25  ;;  %2413 = vmatprep.subr.bf16.mxu0 %v3370_v21  ;;  %v2875_v40 = vcombine.high %v4308_v27, %v4311_v31  ;;  %v2874_v9 = vcombine.low %v4308_v27, %v4311_v31  ;;  %v2876_v25 = vcombine.low %v4314_v32, %v4317_v33 }
  0xe0   : > { %2486 = vmatprep.subr.bf16.mxu1 %v3373_v23  ;;  %2319 = vmatprep.mubr.bf16.mxu0 %v3782_v37  ;;  %v3377_v37 = vld [vmem:[%s4668_s1 + $0x310] ss:$8 sps:$4 sm:$0xff]  }
  0xe1   : > { %2392 = vmatprep.mubr.bf16.mxu1 %v3784_v38  ;;  %v3382_v38 = vld [vmem:[%s4668_s1 + $0x204] ss:$8 sps:$4 sm:$0xff]  }
  0xe2   : > { %2414 = vmatpush1.bf16.msra.mxu0 %v3368_v28 }
  0xe3   : > { %2487 = vmatpush1.bf16.msra.mxu1 %v3371_v29  ;;  %2415 = vmatprep.subr.bf16.mxu0 %v3376_v30 }
  0xe4   : > { %2488 = vmatprep.subr.bf16.mxu1 %v3379_v26 }
  0xe5   : > { %2320 = vmatmul.mubr.bf16.gmra.mxu0 %v3797_v42  ;;  %v3391_v42 = vld [vmem:[%s4668_s1 + $0x3f4] ss:$8 sps:$4 sm:$0xff]  }
  0xe6   : > { %2393 = vmatmul.mubr.bf16.gmra.mxu1 %v3799_v43  ;;  %2416 = vmatpush1.bf16.msra.mxu0 %v3374_v36  ;;  %v3386_v43 = vld [vmem:[%s4668_s1 + $0x2f0] ss:$8 sps:$4 sm:$0xff]  }
  0xe7   : > { %2489 = vmatpush1.bf16.msra.mxu1 %v3377_v37  ;;  %2417 = vmatprep.subr.bf16.mxu0 %v3382_v38 }
  0xe8   : > { %2490 = vmatprep.subr.bf16.mxu1 %v3385_v39  ;;  %2435 = vmatprep.mubr.bf16.mxu0 %v2875_v40 }
  0xe9   : > { %2508 = vmatprep.mubr.bf16.mxu1 %v2877_v41 }
  0xea   : > { %2418 = vmatpush1.bf16.msra.mxu0 %v3380_v44 }
  0xeb   : > { %2491 = vmatpush1.bf16.msra.mxu1 %v3383_v45  ;;  %2419 = vmatprep.subr.bf16.mxu0 %v3388_v46 }
  0xec   : > { %2492 = vmatprep.subr.bf16.mxu1 %v3391_v42 }
  0xee   : > { %2420 = vmatpush2.bf16.msra.mxu0 %v3386_v43 }
  0xef   : > { %2493 = vmatpush2.bf16.msra.mxu1 %v3389_v47  ;;  %2421 = vmatprep.subr.bf16.mxu0 %v3394_v48 }
  0xf0   : > { %2494 = vmatprep.subr.bf16.mxu1 %v3397_v49 }
  0xf2   : > { %2422 = vmatpush2.bf16.msra.mxu0 %v3392_v50 }
  0xf3   : > { %2495 = vmatpush2.bf16.msra.mxu1 %v3395_v51  ;;  %2423 = vmatprep.subr.bf16.mxu0 %v3400_v56 }
  0xf4   : > { %2496 = vmatprep.subr.bf16.mxu1 %v3403_v57 }
  0xf6   : > { %2424 = vmatpush2.bf16.msra.mxu0 %v3398_v62 }
  0xf7   : > { %2497 = vmatpush2.bf16.msra.mxu1 %v3401_v63  ;;  %2425 = vmatprep.subr.bf16.mxu0 %v3406_v2 }
  0xf8   : > { %2498 = vmatprep.subr.bf16.mxu1 %v3409_v3 }
  0xfa   : > { %2426 = vmatpush2.bf16.msra.mxu0 %v3404_v4 }
  0xfb   : > { %2499 = vmatpush2.bf16.msra.mxu1 %v3407_v5  ;;  %2427 = vmatprep.subr.bf16.mxu0 %v3412_v6 }
  0xfc   : > { %2500 = vmatprep.subr.bf16.mxu1 %v3415_v10 }
  0xfe   : > { %2428 = vmatpush2.bf16.msra.mxu0 %v3410_v12 }
  0xff   : > { %2501 = vmatpush2.bf16.msra.mxu1 %v3413_v52  ;;  %2429 = vmatprep.subr.bf16.mxu0 %v3418_v54 }
 0x100   : > { %2502 = vmatprep.subr.bf16.mxu1 %v3421_v60 }
 0x102   : > { %2430 = vmatpush2.bf16.msra.mxu0 %v3416_v61 }
 0x103   : > { %2503 = vmatpush2.bf16.msra.mxu1 %v3419_v13  ;;  %2431 = vmatprep.subr.bf16.mxu0 %v3424_v16 }
 0x104   : > { %2504 = vmatprep.subr.bf16.mxu1 %v3427_v17 }
 0x106   : > { %2432 = vmatpush2.bf16.msra.mxu0 %v3422_v18 }
 0x107   : > { %2505 = vmatpush2.bf16.msra.mxu1 %v3425_v53  ;;  %2433 = vmatprep.subr.bf16.mxu0 %v3430_v55 }
 0x108   : > { %2506 = vmatprep.subr.bf16.mxu1 %v3433_v19 }
 0x10a   : > { %2434 = vmatpush2.bf16.msra.mxu0 %v3428_v24 }
 0x10b   : > { %2507 = vmatpush2.bf16.msra.mxu1 %v3431_v8 }
 0x10d   : > { %v1319_v21 = vpop.f32.mrf.mxu0  ;;  %2436 = vmatmul.mubr.bf16.vlgmr.msra.gmra.mxu0 %v2874_v9 }
 0x10e   : > { %v1392_v23 = vpop.f32.mrf.mxu1  ;;  %2509 = vmatmul.mubr.bf16.vlgmr.msra.gmra.mxu1 %v2876_v25  ;;  %2445 = vmatprep.mubr.bf16.mxu0 %v3860_v7 }
 0x10f   : > { %v4443_v28 = vadd.f32 %v1392_v23, %v1319_v21  ;;  %2518 = vmatprep.mubr.bf16.mxu1 %v3867_v11  ;;  %v1321_v29 = vpop.f32.mrf.mxu0 }
 0x110   : > { %v1394_v30 = vpop.f32.mrf.mxu1 }
 0x111   : > { %v4447_v26 = vadd.f32 %v1394_v30, %v1321_v29  ;;  %v1323_v27 = vpop.f32.mrf.mxu0 }
 0x112   : > { %v1396_v31 = vpop.f32.mrf.mxu1 }
 0x113   : > { %v4449_v36 = vadd.f32 %v1396_v31, %v1323_v27  ;;  %v1325_v32 = vpop.f32.mrf.mxu0 }
 0x114   : > { %v1398_v33 = vpop.f32.mrf.mxu1 }
 0x115   : > { %v4451_v37 = vadd.f32 %v1398_v33, %v1325_v32  ;;  %2446 = vmatmul.mubr.bf16.gmra.mxu0 %v3977_v58  ;;  %v1329_v38 = vpop.f32.mrf.mxu0 }
 0x116   : > { %2519 = vmatmul.mubr.bf16.gmra.mxu1 %v3981_v59  ;;  %v1402_v7 = vpop.f32.mrf.mxu1  ;;  %2455 = vmatprep.mubr.bf16.mxu0 %v3991_v0 }
 0x117   : > { %2528 = vmatprep.mubr.bf16.mxu1 %v3993_v1  ;;  %v4457_v11 = vadd.f32 %v1402_v7, %v1329_v38  ;;  %v1331_v39 = vpop.f32.mrf.mxu0 }
 0x118   : > { %v1404_v40 = vpop.f32.mrf.mxu1 }
 0x119   : > { %v4459_v41 = vadd.f32 %v1404_v40, %v1331_v39  ;;  %v1333_v44 = vpop.f32.mrf.mxu0 }
 0x11a   : > { %v1406_v45 = vpop.f32.mrf.mxu1 }
 0x11b   : > { %v4461_v46 = vadd.f32 %v1406_v45, %v1333_v44  ;;  %v1335_v42 = vpop.f32.mrf.mxu0 }
 0x11c   : > { %v1408_v58 = vpop.f32.mrf.mxu1 }
 0x11d   : > { %v4463_v43 = vadd.f32 %v1408_v58, %v1335_v42  ;;  %2456 = vmatmul.mubr.bf16.gmra.mxu0 %v4019_v14  ;;  %v1339_v59 = vpop.f32.mrf.mxu0 }
 0x11e   : > { %2529 = vmatmul.mubr.bf16.gmra.mxu1 %v4021_v15  ;;  %v1412_v0 = vpop.f32.mrf.mxu1  ;;  %2465 = vmatprep.mubr.bf16.mxu0 %v4031_v20 }
 0x11f   : > { %2538 = vmatprep.mubr.bf16.mxu1 %v4033_v22  ;;  %v4469_v1 = vadd.f32 %v1412_v0, %v1339_v59  ;;  %v1341_v47 = vpop.f32.mrf.mxu0 }
 0x120   : > { %v1414_v48 = vpop.f32.mrf.mxu1 }
 0x121   : > { %v4471_v49 = vadd.f32 %v1414_v48, %v1341_v47  ;;  %v1343_v50 = vpop.f32.mrf.mxu0 }
 0x122   : > { %v1416_v51 = vpop.f32.mrf.mxu1 }
 0x123   : > { %v4473_v56 = vadd.f32 %v1416_v51, %v1343_v50  ;;  %v1345_v57 = vpop.f32.mrf.mxu0 }
 0x124   : > { %v1418_v14 = vpop.f32.mrf.mxu1 }
 0x125   : > { %v4475_v62 = vadd.f32 %v1418_v14, %v1345_v57  ;;  %2466 = vmatmul.mubr.bf16.gmra.mxu0 %v4059_v34  ;;  %v1349_v15 = vpop.f32.mrf.mxu0 }
 0x126   : > { %2539 = vmatmul.mubr.bf16.gmra.mxu1 %v4061_v35  ;;  %v1422_v20 = vpop.f32.mrf.mxu1 }
 0x127   : > { %v4479_v22 = vadd.f32 %v1422_v20, %v1349_v15  ;;  %v1351_v63 = vpop.f32.mrf.mxu0 }
 0x128   : > { %v1424_v2 = vpop.f32.mrf.mxu1 }
 0x129   : > { %v4481_v3 = vadd.f32 %v1424_v2, %v1351_v63  ;;  %v1353_v4 = vpop.f32.mrf.mxu0 }
 0x12a   : > { %v1426_v5 = vpop.f32.mrf.mxu1 }
 0x12b   : > { %4670 = vst [vmem:[#allocation2_spill] sm:$0xff] %v4481_v3  ;;  %v4483_v6 = vadd.f32 %v1426_v5, %v1353_v4  ;;  %v1355_v10 = vpop.f32.mrf.mxu0 }
 0x12c   : > { %v1428_v12 = vpop.f32.mrf.mxu1 }
 0x12d   : > { %4671 = vst [vmem:[#allocation3_spill] sm:$0xff] %v4483_v6  ;;  %v4485_v52 = vadd.f32 %v1428_v12, %v1355_v10 }
 0x12f   : > { %4672 = vst [vmem:[#allocation4_spill] sm:$0xff] %v4485_v52 }
 0x14d   : > { %v1465_v54 = vpop.f32.mrf.mxu0 }
 0x14e   : > { %v1538_v34 = vpop.f32.mrf.mxu1 }
 0x14f   : > { %v1467_v60 = vpop.f32.mrf.mxu0 }
 0x150   : > { %v4487_v35 = vpop.f32.mrf.mxu1 }
 0x151   : > { %v1469_v61 = vpop.f32.mrf.mxu0 }
 0x152   : > { %v4489_v13 = vpop.f32.mrf.mxu1 }
 0x153   : > { %v1471_v16 = vpop.f32.mrf.mxu0 }
 0x154   : > { %v4491_v17 = vpop.f32.mrf.mxu1 }
 0x155   : > { %v1475_v18 = vpop.f32.mrf.mxu0 }
 0x156   : > { %v4493_v53 = vpop.f32.mrf.mxu1 }
 0x157   : > { %v1477_v55 = vpop.f32.mrf.mxu0 }
 0x158   : > { %v4495_v19 = vpop.f32.mrf.mxu1 }
 0x159   : > { %v4497_v24 = vpop.f32.mrf.mxu0 }
 0x15a   : > { %v4499_v8 = vpop.f32.mrf.mxu1 }
 0x15b   : > { %v4501_v9 = vpop.f32.mrf.mxu0 }
 0x15c   : > { %v4503_v25 = vpop.f32.mrf.mxu1 }
 0x15d   : > { %v4505_v21 = vpop.f32.mrf.mxu0 }
 0x15e   : > { %v4507_v23 = vpop.f32.mrf.mxu1 }
 0x15f   : > { %v4509_v29 = vpop.f32.mrf.mxu0 }
 0x160   : > { %v4511_v30 = vpop.f32.mrf.mxu1 }
 0x161   : > { %v4513_v27 = vpop.f32.mrf.mxu0 }
 0x162   : > { %v4515_v31 = vpop.f32.mrf.mxu1 }
 0x163   : > { %v4517_v32 = vpop.f32.mrf.mxu0 }
 0x164   : > { %v4519_v33 = vpop.f32.mrf.mxu1 }
 0x165   : > { %4673 = vst [vmem:[#allocation5_spill] sm:$0xff] %v4519_v33  ;;  %v4521_v38 = vpop.f32.mrf.mxu0  ;;  %v1466_v33 = vadd.f32 %v1465_v54, %v4443_v28  ;;  %v1476_v54 = vadd.f32 %v1475_v18, %v4457_v11 }
 0x166   : > { %v4523_v7 = vpop.f32.mrf.mxu1 }
 0x167   : > { %4674 = vst [vmem:[#allocation6_spill] sm:$0xff] %v4523_v7  ;;  %v4525_v39 = vpop.f32.mrf.mxu0 }
 0x168   : > { %4675 = vst [vmem:[#allocation7_spill] sm:$0xff] %v4525_v39  ;;  %v4527_v40 = vpop.f32.mrf.mxu1 }
 0x169   : > { %4676 = vst [vmem:[#allocation8_spill] sm:$0xff] %v4527_v40  ;;  %v4529_v44 = vpop.f32.mrf.mxu0 }
 0x16a   : > { %4677 = vst [vmem:[#allocation9_spill] sm:$0xff] %v4529_v44  ;;  %v4531_v45 = vpop.f32.mrf.mxu1 }
 0x16b   : > { %4678 = vst [vmem:[#allocation10_spill] sm:$0xff] %v4531_v45  ;;  %v4533_v42 = vpop.f32.mrf.mxu0 }
 0x16c   : > { %4679 = vst [vmem:[#allocation11_spill] sm:$0xff] %v4533_v42  ;;  %v4535_v58 = vpop.f32.mrf.mxu1 }
 0x16d   : > { %4680 = vst [vmem:[#allocation12_spill] sm:$0xff] %v4535_v58 }
 0x18d   : > { %v2291_v59 = vpop.f32.mrf.mxu0 }
 0x18e   : > { %v2364_v0 = vpop.f32.mrf.mxu1 }
 0x18f   : > { %v2293_v47 = vpop.f32.mrf.mxu0 }
 0x190   : > { %v2366_v48 = vpop.f32.mrf.mxu1 }
 0x191   : > { %v2295_v50 = vpop.f32.mrf.mxu0 }
 0x192   : > { %v2368_v51 = vpop.f32.mrf.mxu1 }
 0x193   : > { %v2297_v57 = vpop.f32.mrf.mxu0 }
 0x194   : > { %v2370_v14 = vpop.f32.mrf.mxu1 }
 0x195   : > { %v2301_v15 = vpop.f32.mrf.mxu0 }
 0x196   : > { %v4537_v20 = vpop.f32.mrf.mxu1 }
 0x197   : > { %v2303_v63 = vpop.f32.mrf.mxu0 }
 0x198   : > { %v4539_v2 = vpop.f32.mrf.mxu1 }
 0x199   : > { %v4541_v4 = vpop.f32.mrf.mxu0 }
 0x19a   : > { %v4543_v5 = vpop.f32.mrf.mxu1 }
 0x19b   : > { %v4545_v10 = vpop.f32.mrf.mxu0 }
 0x19c   : > { %v4547_v12 = vpop.f32.mrf.mxu1 }
 0x19d   : > { %4681 = vst [vmem:[#allocation13_spill] sm:$0xff] %v4547_v12  ;;  %v4549_v58 = vpop.f32.mrf.mxu0 }
 0x19e   : > { %v4551_v45 = vpop.f32.mrf.mxu1 }
 0x19f   : > { %4682 = vst [vmem:[#allocation14_spill] sm:$0xff] %v4551_v45  ;;  %v4553_v42 = vpop.f32.mrf.mxu0 }
 0x1a0   : > { %4683 = vst [vmem:[#allocation15_spill] sm:$0xff] %v4553_v42  ;;  %v4555_v52 = vpop.f32.mrf.mxu1  ;;  %v1539_v42 = vadd.f32 %v1538_v34, %v1466_v33 }
 0x1a1   : > { %4684 = vst [vmem:[#allocation16_spill] sm:$0xff] %v4555_v52  ;;  %v4557_v40 = vpop.f32.mrf.mxu0  ;;  %v1468_v52 = vadd.f32 %v1467_v60, %v4447_v26 }
 0x1a2   : > { %4685 = vst [vmem:[#allocation17_spill] sm:$0xff] %v4557_v40  ;;  %v4559_v44 = vpop.f32.mrf.mxu1  ;;  %v1470_v40 = vadd.f32 %v1469_v61, %v4449_v36 }
 0x1a3   : > { %4686 = vst [vmem:[#allocation18_spill] sm:$0xff] %v4559_v44  ;;  %v4561_v6 = vpop.f32.mrf.mxu0 }
 0x1a4   : > { %4687 = vst [vmem:[#allocation19_spill] sm:$0xff] %v4561_v6  ;;  %v4563_v7 = vpop.f32.mrf.mxu1  ;;  %v1543_v28 = vadd.f32 %v4489_v13, %v1470_v40  ;;  %v1549_v13 = vadd.f32 %v4493_v53, %v1476_v54 }
 0x1a5   : > { %4688 = vst [vmem:[#allocation20_spill] sm:$0xff] %v4563_v7  ;;  %v4565_v39 = vpop.f32.mrf.mxu0  ;;  %v1541_v7 = vadd.f32 %v4487_v35, %v1468_v52 }
 0x1a6   : > { %4689 = vst [vmem:[#allocation21_spill] sm:$0xff] %v4565_v39  ;;  %v4567_v3 = vpop.f32.mrf.mxu1  ;;  %v1472_v39 = vadd.f32 %v1471_v16, %v4451_v37  ;;  %v2296_v61 = vadd.f32 %v2295_v50, %v1543_v28  ;;  %v1480_v37 = vadd.f32 %v4497_v24, %v4461_v46  ;;  %v1486_v24 = vadd.f32 %v4505_v21, %v4469_v1 }
 0x1a7   : > { %4690 = vst [vmem:[#allocation22_spill] sm:$0xff] %v4567_v3  ;;  %v4570_v12 = vpop.f32.mrf.mxu0  ;;  %v2292_v3 = vadd.f32 %v2291_v59, %v1539_v42 }
 0x1a8   : > { %4691 = vst [vmem:[#allocation23_spill] sm:$0xff] %v4570_v12  ;;  %v4572_v45 = vpop.f32.mrf.mxu1  ;;  %v2294_v12 = vadd.f32 %v2293_v47, %v1541_v7  ;;  %v1545_v36 = vadd.f32 %v4491_v17, %v1472_v39  ;;  %v2302_v7 = vadd.f32 %v2301_v15, %v1549_v13  ;;  %v1553_v46 = vadd.f32 %v4499_v8, %v1480_v37  ;;  %v4695_v13 = vld [vmem:[#allocation5_spill] sm:$0xff] }
 0x1a9   : > { %4692 = vst [vmem:[#allocation24_spill] sm:$0xff] %v4572_v45  ;;  %v4576_v44 = vpop.f32.mrf.mxu0  ;;  %v1478_v45 = vadd.f32 %v1477_v55, %v4459_v41  ;;  %v2365_v60 = vadd.f32 %v2364_v0, %v2292_v3  ;;  %v1482_v55 = vadd.f32 %v4501_v9, %v4463_v43  ;;  %v2369_v3 = vadd.f32 %v2368_v51, %v2296_v61 }
 0x1aa   : > { %v4578_v6 = vpop.f32.mrf.mxu1  ;;  %v2367_v11 = vadd.f32 %v2366_v48, %v2294_v12  ;;  %v2298_v16 = vadd.f32 %v2297_v57, %v1545_v36  ;;  %v1488_v9 = vadd.f32 %v4509_v29, %v4471_v49  ;;  %v2375_v21 = vadd.f32 %v4537_v20, %v2302_v7  ;;  %v4700_v7 = vld [vmem:[#allocation6_spill] sm:$0xff] }
 0x1ab   : > { %v4585_v26 = vpop.f32.mrf.mxu0  ;;  %v1551_v41 = vadd.f32 %v4495_v19, %v1478_v45  ;;  %v1555_v43 = vadd.f32 %v4503_v25, %v1482_v55  ;;  %v2306_v47 = vadd.f32 %v4541_v4, %v1553_v46  ;;  %v1559_v51 = vadd.f32 %v4507_v23, %v1486_v24  ;;  %v4698_v55 = vld [vmem:[#allocation14_spill] sm:$0xff]  ;;  %v4701_v46 = vld [vmem:[#allocation3_spill] sm:$0xff]  ;;  %v4702_v24 = vld [vmem:[#allocation9_spill] sm:$0xff] }
 0x1ac   : > { %v4587_v34 = vpop.f32.mrf.mxu1  ;;  %v2371_v59 = vadd.f32 %v2370_v14, %v2298_v16  ;;  %v1490_v25 = vadd.f32 %v4513_v27, %v4473_v56  ;;  %v1561_v4 = vadd.f32 %v4511_v30, %v1488_v9  ;;  %v1492_v12 = vadd.f32 %v4517_v32, %v4475_v62  ;;  %v4697_v16 = vld [vmem:[#allocation7_spill] sm:$0xff] }
 0x1ad   : > { %v2304_v53 = vadd.f32 %v2303_v63, %v1551_v41  ;;  %v2308_v14 = vadd.f32 %v4545_v10, %v1555_v43  ;;  %v2379_v56 = vadd.f32 %v4543_v5, %v2306_v47  ;;  %v2312_v27 = vadd.f32 %v4549_v58, %v1559_v51  ;;  %v4706_v47 = vld [vmem:[#allocation4_spill] sm:$0xff] }
 0x1ae   : > { %v1563_v10 = vadd.f32 %v4515_v31, %v1490_v25  ;;  %v1496_v36 = vadd.f32 %v4521_v38, %v4479_v22  ;;  %v1565_v58 = vadd.f32 %v4695_v13, %v1492_v12  ;;  %v4699_v38 = vld [vmem:[#allocation17_spill] sm:$0xff] }
 0x1af   : > { %v2377_v49 = vadd.f32 %v4539_v2, %v2304_v53  ;;  %v2385_v22 = vadd.f32 %v4698_v55, %v2312_v27  ;;  %v1500_v53 = vadd.f32 %v4702_v24, %v4701_v46  ;;  %v4711_v12 = vld [vmem:[#allocation23_spill] sm:$0xff]  ;;  %v4712_v27 = vld [vmem:[#allocation20_spill] sm:$0xff] }
 0x1b0   : > { %v4715_v13 = vld [vmem:[#allocation24_spill] sm:$0xff] }
 0x1cd   : > { %v2437_v52 = vpop.f32.mrf.mxu0 }
 0x1ce   : > { %v2510_v35 = vpop.f32.mrf.mxu1  ;;  %v2438_v18 = vadd.f32 %v2437_v52, %v2365_v60  ;;  %v4693_v60 = vld [vmem:[#allocation15_spill] sm:$0xff]  ;;  %v4694_v52 = vld [vmem:[#allocation13_spill] sm:$0xff] }
 0x1cf   : > { %v2439_v33 = vpop.f32.mrf.mxu0  ;;  %v2314_v61 = vadd.f32 %v4693_v60, %v1561_v4  ;;  %v4713_v60 = vld [vmem:[#allocation12_spill] sm:$0xff] }
 0x1d0   : > { %v2512_v17 = vpop.f32.mrf.mxu1  ;;  %v2440_v39 = vadd.f32 %v2439_v33, %v2367_v11  ;;  %v2511_v0 = vadd.f32 %v2510_v35, %v2438_v18  ;;  %v2381_v35 = vadd.f32 %v4694_v52, %v2308_v14  ;;  %v4696_v11 = vld [vmem:[#allocation2_spill] sm:$0xff]  ;;  %v2316_v33 = vadd.f32 %v4699_v38, %v1563_v10 }
 0x1d1   : > { %v2441_v40 = vpop.f32.mrf.mxu0  ;;  %v1498_v18 = vadd.f32 %v4697_v16, %v4696_v11  ;;  %v4714_v52 = vld [vmem:[#allocation22_spill] sm:$0xff] }
 0x1d2   : > { %v2514_v42 = vpop.f32.mrf.mxu1  ;;  %v2513_v19 = vadd.f32 %v2512_v17, %v2440_v39  ;;  %v2442_v45 = vadd.f32 %v2441_v40, %v2369_v3  ;;  %v1569_v39 = vadd.f32 %v4700_v7, %v1496_v36  ;;  %v4703_v40 = vld [vmem:[#allocation16_spill] sm:$0xff] }
 0x1d3   : > { %v2443_v8 = vpop.f32.mrf.mxu0 }
 0x1d4   : > { %v2516_v1 = vpop.f32.mrf.mxu1  ;;  %v3017_v48 = vpack.c.bf16 %v2513_v19, %v2511_v0  ;;  %v2444_v50 = vadd.f32 %v2443_v8, %v2371_v59  ;;  %v2515_v15 = vadd.f32 %v2514_v42, %v2442_v45  ;;  %v2387_v42 = vadd.f32 %v4703_v40, %v2314_v61  ;;  %v4704_v19 = vld [vmem:[#allocation19_spill] sm:$0xff] }
 0x1d5   : > { %v2447_v29 = vpop.f32.mrf.mxu0  ;;  %v2318_v45 = vadd.f32 %v4704_v19, %v1565_v58 }
 0x1d6   : > { %v2520_v57 = vpop.f32.mrf.mxu1  ;;  %2597 = vst [vmem:[%s4606_s9] sm:$0xff] %v3017_v48  ;;  %v2517_v63 = vadd.f32 %v2516_v1, %v2444_v50  ;;  %v2448_v20 = vadd.f32 %v2447_v29, %v2375_v21  ;;  %v4705_v1 = vld [vmem:[#allocation8_spill] sm:$0xff]  ;;  %v4707_v48 = vld [vmem:[#allocation11_spill] sm:$0xff] }
 0x1d7   : > { %v2449_v23 = vpop.f32.mrf.mxu0  ;;  %v1571_v21 = vadd.f32 %v4705_v1, %v1498_v18  ;;  %v1502_v50 = vadd.f32 %v4707_v48, %v4706_v47 }
 0x1d8   : > { %v2522_v28 = vpop.f32.mrf.mxu1  ;;  %v3018_v2 = vpack.c.bf16 %v2517_v63, %v2515_v15  ;;  %v2450_v54 = vadd.f32 %v2449_v23, %v2377_v49  ;;  %v2521_v62 = vadd.f32 %v2520_v57, %v2448_v20  ;;  %v4708_v49 = vld [vmem:[#allocation18_spill] sm:$0xff]  ;;  %v4709_v57 = vld [vmem:[#allocation21_spill] sm:$0xff] }
 0x1d9   : > { %v2451_v37 = vpop.f32.mrf.mxu0  ;;  %v2389_v29 = vadd.f32 %v4708_v49, %v2316_v33  ;;  %v2322_v14 = vadd.f32 %v4709_v57, %v1569_v39  ;;  %v4710_v20 = vld [vmem:[#allocation10_spill] sm:$0xff]  ;;  %v2324_v23 = vadd.f32 %v4711_v12, %v1571_v21  ;;  %v1575_v61 = vadd.f32 %v4713_v60, %v1502_v50 }
 0x1da   : > { %v2524_v30 = vpop.f32.mrf.mxu1  ;;  %2598 = vst [vmem:[%s4606_s9 + $0x8] sm:$0xff] %v3018_v2  ;;  %v2523_v32 = vadd.f32 %v2522_v28, %v2450_v54  ;;  %v2452_v5 = vadd.f32 %v2451_v37, %v2379_v56  ;;  %v1573_v4 = vadd.f32 %v4710_v20, %v1500_v53  ;;  %v2391_v2 = vadd.f32 %v4712_v27, %v2318_v45 }
 0x1db   : > { %v2453_v31 = vpop.f32.mrf.mxu0  ;;  %v2397_v58 = vadd.f32 %v4715_v13, %v2324_v23  ;;  %v2328_v18 = vadd.f32 %v4585_v26, %v1575_v61 }
 0x1dc   : > { %v2526_v41 = vpop.f32.mrf.mxu1  ;;  %v3019_v17 = vpack.c.bf16 %v2523_v32, %v2521_v62  ;;  %v2454_v3 = vadd.f32 %v2453_v31, %v2381_v35  ;;  %v2525_v43 = vadd.f32 %v2524_v30, %v2452_v5  ;;  %v2395_v35 = vadd.f32 %v4714_v52, %v2322_v14 }
 0x1dd   : > { %v2457_v59 = vpop.f32.mrf.mxu0  ;;  %v2326_v62 = vadd.f32 %v4576_v44, %v1573_v4  ;;  %v2401_v39 = vadd.f32 %v4587_v34, %v2328_v18 }
 0x1de   : > { %v2530_v0 = vpop.f32.mrf.mxu1  ;;  %2599 = vst [vmem:[%s4606_s9 + $0x10] sm:$0xff] %v3019_v17  ;;  %v2527_v9 = vadd.f32 %v2526_v41, %v2454_v3  ;;  %v2458_v8 = vadd.f32 %v2457_v59, %v2385_v22 }
 0x1df   : > { %v2459_v51 = vpop.f32.mrf.mxu0  ;;  %v2399_v33 = vadd.f32 %v4578_v6, %v2326_v62 }
 0x1e0   : > { %v2532_v25 = vpop.f32.mrf.mxu1  ;;  %v3020_v15 = vpack.c.bf16 %v2527_v9, %v2525_v43  ;;  %v2460_v63 = vadd.f32 %v2459_v51, %v2387_v42  ;;  %v2531_v54 = vadd.f32 %v2530_v0, %v2458_v8 }
 0x1e1   : > { %v2461_v28 = vpop.f32.mrf.mxu0 }
 0x1e2   : > { %v2534_v56 = vpop.f32.mrf.mxu1  ;;  %2600 = vst [vmem:[%s4606_s9 + $0x18] sm:$0xff] %v3020_v15  ;;  %v2533_v10 = vadd.f32 %v2532_v25, %v2460_v63  ;;  %v2462_v36 = vadd.f32 %v2461_v28, %v2389_v29 }
 0x1e3   : > { %v2463_v37 = vpop.f32.mrf.mxu0 }
 0x1e4   : > { %v2536_v30 = vpop.f32.mrf.mxu1  ;;  %v3021_v32 = vpack.c.bf16 %v2533_v10, %v2531_v54  ;;  %v2464_v5 = vadd.f32 %v2463_v37, %v2391_v2  ;;  %v2535_v31 = vadd.f32 %v2534_v56, %v2462_v36 }
 0x1e5   : > { %v2467_v11 = vpop.f32.mrf.mxu0 }
 0x1e6   : > { %v2540_v16 = vpop.f32.mrf.mxu1  ;;  %2601 = vst [vmem:[%s4606_s9 + $0x20] sm:$0xff] %v3021_v32  ;;  %v2537_v41 = vadd.f32 %v2536_v30, %v2464_v5  ;;  %v2468_v55 = vadd.f32 %v2467_v11, %v2395_v35 }
 0x1e7   : > { %v2469_v22 = vpop.f32.mrf.mxu0 }
 0x1e8   : > { %v2542_v38 = vpop.f32.mrf.mxu1  ;;  %v3022_v17 = vpack.c.bf16 %v2537_v41, %v2535_v31  ;;  %v2470_v44 = vadd.f32 %v2469_v22, %v2397_v58  ;;  %v2541_v46 = vadd.f32 %v2540_v16, %v2468_v55 }
 0x1e9   : > { %v2471_v3 = vpop.f32.mrf.mxu0 }
 0x1ea   : > { %v2544_v7 = vpop.f32.mrf.mxu1  ;;  %2602 = vst [vmem:[%s4606_s9 + $0x28] sm:$0xff] %v3022_v17  ;;  %v2543_v24 = vadd.f32 %v2542_v38, %v2470_v44  ;;  %v2472_v26 = vadd.f32 %v2471_v3, %v2399_v33 }
 0x1eb   : > { %v2473_v53 = vpop.f32.mrf.mxu0 }
 0x1ec   : > { %v3023_v40 = vpack.c.bf16 %v2543_v24, %v2541_v46  ;;  %v2474_v42 = vadd.f32 %v2473_v53, %v2401_v39  ;;  %v2546_v59 = vpop.f32.mrf.mxu1  ;;  %v2545_v0 = vadd.f32 %v2544_v7, %v2472_v26 }
 0x1ee   : > { %2603 = vst [vmem:[%s4606_s9 + $0x30] sm:$0xff] %v3023_v40  ;;  %v2547_v19 = vadd.f32 %v2546_v59, %v2474_v42 }
 0x1f0   : > { %v3024_v45 = vpack.c.bf16 %v2547_v19, %v2545_v0 }
 0x1f2   : > { %2604 = vst [vmem:[%s4606_s9 + $0x38] sm:$0xff] %v3024_v45 }
 0x1f3 PF: > { %s12_s11 = sadd.s32 1, %s3456_s11   ;;  %s4716_s9 = smov %s3452_s10 }
 0x1f4   : > { %p9_p5 = scmp.ge.s32.totalorder %s12_s11, 4   ;;  %s4717_s10 = smov %s4719_s12 }
 0x1f6   :  { %11 = sbr.rel (!%p9_p5) target bundleno = 2 (0x2), region = 61 }

// kernel: discriminator_forward.14
= control target key start
LH: loop header
LB: loop body
LE: loop exit
PB: predicated region body
PF: predicated region fallthrough
CT: control target
= control target key end

     0   :  { %s369_s6 = smov 0   ;;  %s371_s7 = smov 0   ;;  %s427_s0 = inlined_call_operand.vmem [shape: bf16[2,4,512], index: 0, kind: input, shape index: {}]   ;;  %s428_s1 = inlined_call_operand.vmem [shape: bf16[2,4,512], index: 1, kind: output, shape index: {}]  }
   0x1   :  { %s373_s8 = smov 0   ;;  %s375_s9 = smov 0  }
   0x2   :  { %s377_s10 = smov 0  }
   0x3 LB: > { %s20_s11 = sadd.s32 1, %s349_s8  ;;  %s23_s12 = sadd.s32 1, %s353_s9  ;;  %s357_s10 = sphi %s377_s10, %s11_s10   ;;  %s353_s9 = sphi %s375_s9, %s432_s9   ;;  %s349_s8 = sphi %s373_s8, %s431_s8   ;;  %s345_s7 = sphi %s371_s7, %s430_s7   ;;  %s341_s6 = sphi %s369_s6, %s429_s6  }
   0x4   : > { %p21_p0 = scmp.ge.s32.totalorder %s20_s11, 4  ;;  %p270_p1 = scmp.ge.s32.totalorder %s357_s10, 1 }
   0x5   : > { %p106_p2 = scmp.lt.s32.totalorder %s357_s10, 9 }
   0x6   : > { %s434_s11 = smov (%p21_p0, %s20_s11), 0  ;;  %s436_s12 = smov (!%p21_p0, %s23_s12), %s353_s9 }
   0x7   : > { %p107_p3 = pnand %p270_p1, %p106_p2  ;;  %p25_p4 = scmp.ge.s32.totalorder %s436_s12, 2 }
   0x8   : > { %p132_p5 = scmp.lt.s32.totalorder (!%p107_p3), %s345_s7, 1  ;;  %p134_p6 = scmp.lt.s32.totalorder (!%p107_p3), %s341_s6, 3 }
   0x9   : > { %s438_s12 = smov (%p25_p4, %s436_s12), 0  ;;  %110 = sbr.rel (%p107_p3) target bundleno = 67 (0x43), region = 24 }
   0xe   : > { %s440_s7 = smov (!%p132_p5, %s345_s7), 1  ;;  %s442_s6 = smov (!%p134_p6, %s341_s6), 3  ;;  %vm150_vm0 = vcmask 1043456  }
   0xf   : > { %s271_s13 = sshll.u32 %s440_s7, 2 }
  0x10   : > { %s399_s14 = sadd.s32 %s271_s13, %s442_s6 }
  0x11   : > { %s272_s15 = sshll.u32 %s399_s14, 1 }
  0x12   : > { %s139_s18 = scalar_lea.vmem %s427_s0, %s272_s15  ;;  %s147_s21 = scalar_lea.vmem %s428_s1, %s272_s15 }
  0x13   : > { %v148_v0 = vld [vmem:[%s139_s18] sm:$0x3] }
  0x14   : > { %v149_v1 = vunpack.c.l.bf16 %v148_v0 }
  0x16   : > { %v151_v2 = vsel %vm150_vm0, %v149_v1, 0.0  ;;  %v158_v3 = vmul.f32 %v149_v1, %v149_v1 }
  0x17   : > { %v152_v4 = vrot.slane %v151_v2, 4 }
  0x18   : > { %v159_v5 = vsel %vm150_vm0, %v158_v3, 0.0 }
  0x19   : > { %v153_v6 = vadd.f32 %v152_v4, %v151_v2  ;;  %v160_v7 = vrot.slane %v159_v5, 4 }
  0x1b   : > { %v154_v8 = vrot.slane %v153_v6, 2  ;;  %v161_v9 = vadd.f32 %v160_v7, %v159_v5 }
  0x1d   : > { %v155_v10 = vadd.f32 %v154_v8, %v153_v6  ;;  %v162_v11 = vrot.slane %v161_v9, 2 }
  0x1f   : > { %v156_v12 = vrot.slane %v155_v10, 1  ;;  %v163_v13 = vadd.f32 %v162_v11, %v161_v9 }
  0x21   : > { %v157_v14 = vadd.f32 %v156_v12, %v155_v10  ;;  %v164_v15 = vrot.slane %v163_v13, 1 }
  0x23   : > { %v165_v16 = vadd.f32 %v164_v15, %v163_v13  ;;  %v166_v17 = vmul.f32 0.25, %v157_v14 }
  0x25   : > { %v167_v18 = vmul.f32 0.25, %v165_v16  ;;  %v168_v19 = vmul.f32 %v166_v17, %v166_v17  ;;  %v171_v23 = vsub.f32 %v149_v1, %v166_v17 }
  0x27   : > { %v169_v20 = vsub.f32 %v167_v18, %v168_v19 }
  0x29   : > { %v170_v21 = vmax.f32 %v169_v20, 0.0 }
  0x2b   : > { %v172_v22 = vadd.f32 1e-05, %v170_v21 }
  0x2d   : > { %317 = vrsqrt.f32 %v172_v22 }
  0x3a   : > { %v318_v24 = vpop.eup %317 }
  0x3b   : > { %v174_v25 = vmul.f32 %v318_v24, %v171_v23 }
  0x3d   : > { %vm175_vm1 = vcmp.ge.f32.partialorder %v174_v25, 0.0  ;;  %v176_v26 = vmul.f32 0.2, %v174_v25 }
  0x3f   : > { %v177_v27 = vsel %vm175_vm1, %v174_v25, %v176_v26 }
  0x40   : > { %v178_v28 = vpack.c.bf16 %v177_v27, %v177_v27 }
  0x42   : > { %179 = vst [vmem:[%s147_s21] sm:$0x3] %v178_v28 }
  0x43 PF: > { %s11_s10 = sadd.s32 1, %s357_s10   ;;  %s429_s6 = smov %s349_s8 }
  0x44   : > { %p8_p7 = scmp.ge.s32.totalorder %s11_s10, 10   ;;  %s430_s7 = smov %s353_s9 }
  0x45   : > { %s431_s8 = smov %s434_s11  ;;  %s432_s9 = smov %s438_s12 }
  0x46   :  { %10 = sbr.rel (!%p8_p7) target bundleno = 3 (0x3), region = 54 }

// kernel: discriminator_forward.13
= control target key start
LH: loop header
LB: loop body
LE: loop exit
PB: predicated region body
PF: predicated region fallthrough
CT: control target
= control target key end

     0   :  { %s10241_s9 = smov 0   ;;  %s10243_s10 = smov 0   ;;  %s12394_s0 = inlined_call_operand.vmem [shape: bf16[2,48,2048], index: 0, kind: input, shape index: {}]   ;;  %s12395_s1 = inlined_call_operand.vmem [shape: bf16[2,2048,512], index: 1, kind: input, shape index: {}]   ;;  %s12396_s2 = inlined_call_operand.vmem [shape: bf16[2,32,512], index: 2, kind: output, shape index: {}]  }
   0x1   :  { %s10245_s11 = smov 0   ;;  %s10247_s12 = smov 0  }
   0x2   :  { %s10249_s13 = smov 0   ;;  %s10251_s14 = smov 0  }
   0x3   :  { %s10253_s15 = smov 0   ;;  %s10255_s16 = smov 0  }
   0x4   :  { %s10257_s17 = smov 0  }
   0x5 LB: > { %s8727_s18 = sadd.s32 4294967295, %s10224_s17   ;;  %s21_s19 = sadd.s32 1, %s10216_s15  ;;  %s10224_s17 = sphi %s10257_s17, %s12_s17   ;;  %s10220_s16 = sphi %s10255_s16, %s12443_s16   ;;  %s10216_s15 = sphi %s10253_s15, %s12442_s15   ;;  %s10212_s14 = sphi %s10251_s14, %s12441_s14   ;;  %s10208_s13 = sphi %s10249_s13, %s12440_s13   ;;  %s10204_s12 = sphi %s10247_s12, %s12439_s12   ;;  %s10200_s11 = sphi %s10245_s11, %s12438_s11   ;;  %s10196_s10 = sphi %s10243_s10, %s12437_s10   ;;  %s10192_s9 = sphi %s10241_s9, %s12436_s9  }
   0x6   : > { %p22_p0 = scmp.ge.s32.totalorder %s21_s19, 2  ;;  %s24_s20 = sadd.s32 1, %s10220_s16 }
   0x7   : > { %s57_s21 = sadd.s32 1, %s10204_s12  ;;  %p64_p1 = scmp.ne.s32.totalorder %s10204_s12, %s10200_s11 }
   0x8   : > { %s12445_s19 = smov (%p22_p0, %s21_s19), 0  ;;  %s12447_s20 = smov (!%p22_p0, %s24_s20), %s10220_s16 }
   0x9   : > { %s54_s22 = ssub.s32 %s10216_s15, %s12445_s19  ;;  %p65_p2 = scmp.eq.s32.totalorder %s10224_s17, 0 }
   0xa   : > { %p26_p3 = scmp.ge.s32.totalorder %s12447_s20, 2  ;;  %p55_p4 = scmp.eq.s32.totalorder %s54_s22, 0 }
   0xb   : > { %p66_p5 = por %p65_p2, %p64_p1  ;;  %s85_s23 = sadd.s32 1, %s10196_s10 }
   0xc   : > { %s12449_s20 = smov (%p26_p3, %s12447_s20), 0  ;;  %p95_p6 = scmp.ne.s32.totalorder %s10196_s10, %s10192_s9 }
   0xd   : > { %s10302_s24 = scalar_select %p55_p4, %s10204_s12, %s57_s21  }
   0xe   : > { %s80_s25 = ssub.s32 %s10220_s16, %s12449_s20  ;;  %p96_p7 = scmp.eq.s32.totalorder %s8727_s18, 3 }
   0xf   : > { %s82_s26 = sor.u32 %s80_s25, %s54_s22  ;;  %p8730_p10 = scmp.ge.s32.totalorder %s10224_s17, 4 }
  0x10   : > { %p83_p8 = scmp.eq.s32.totalorder %s82_s26, 0  ;;  %p10308_p9 = por %p96_p7, %p95_p6 }
  0x11   : > { %118 = sbr.rel (%p8730_p10) target bundleno = 282 (0x11a), region = 16 }
  0x12   : > { %s10313_s28 = scalar_select %p83_p8, %s10196_s10, %s85_s23  }
  0x16   : > { %129 = sbr.rel (!%p66_p5) target bundleno = 282 (0x11a), region = 24  ;;  %s131_s29 = sand.u32 (%p66_p5), 1, %s10204_s12  }
  0x17   : > { %s9308_s30 = sshll.u32 (%p66_p5), %s10216_s15, 3  ;;  %s8731_s3 = sshll.u32 (%p66_p5), %s131_s29, 12 }
  0x18   : > { %s10321_s6 = scalar_lea.vmem (%p66_p5), %s12395_s1, %s9308_s30  ;;  %s10326_s7 = scalar_lea.vmem (%p66_p5), [#allocation2], %s8731_s3 }
  0x19   : > { %v1190_v0 = vld [vmem:[%s10321_s6] sm:$0xff] (%p66_p5)  ;;  %v1192_v1 = vld [vmem:[%s10321_s6 + $0x10] sm:$0xff] (%p66_p5) }
  0x1a   : > { %v1194_v2 = vld [vmem:[%s10321_s6 + $0x20] sm:$0xff] (%p66_p5)  ;;  %1191 = vst [vmem:[%s10326_s7] sm:$0xff] (%p66_p5), %v1190_v0  ;;  %1193 = vst [vmem:[%s10326_s7 + $0x8] sm:$0xff] (%p66_p5), %v1192_v1  ;;  %v1196_v3 = vld [vmem:[%s10321_s6 + $0x30] sm:$0xff] (%p66_p5) }
  0x1b   : > { %1195 = vst [vmem:[%s10326_s7 + $0x10] sm:$0xff] %v1194_v2  ;;  %v1198_v4 = vld [vmem:[%s10321_s6 + $0x40] sm:$0xff]  ;;  %v1200_v5 = vld [vmem:[%s10321_s6 + $0x50] sm:$0xff]  ;;  %1197 = vst [vmem:[%s10326_s7 + $0x18] sm:$0xff] %v1196_v3 }
  0x1c   : > { %1199 = vst [vmem:[%s10326_s7 + $0x20] sm:$0xff] %v1198_v4  ;;  %1201 = vst [vmem:[%s10326_s7 + $0x28] sm:$0xff] %v1200_v5  ;;  %v1202_v6 = vld [vmem:[%s10321_s6 + $0x60] sm:$0xff]  ;;  %v1204_v7 = vld [vmem:[%s10321_s6 + $0x70] sm:$0xff] }
  0x1d   : > { %v1206_v8 = vld [vmem:[%s10321_s6 + $0x80] sm:$0xff]  ;;  %1203 = vst [vmem:[%s10326_s7 + $0x30] sm:$0xff] %v1202_v6  ;;  %1205 = vst [vmem:[%s10326_s7 + $0x38] sm:$0xff] %v1204_v7  ;;  %v1208_v9 = vld [vmem:[%s10321_s6 + $0x90] sm:$0xff] }
  0x1e   : > { %1207 = vst [vmem:[%s10326_s7 + $0x40] sm:$0xff] %v1206_v8  ;;  %v1210_v10 = vld [vmem:[%s10321_s6 + $0xa0] sm:$0xff]  ;;  %v1212_v11 = vld [vmem:[%s10321_s6 + $0xb0] sm:$0xff]  ;;  %1209 = vst [vmem:[%s10326_s7 + $0x48] sm:$0xff] %v1208_v9 }
  0x1f   : > { %1211 = vst [vmem:[%s10326_s7 + $0x50] sm:$0xff] %v1210_v10  ;;  %1213 = vst [vmem:[%s10326_s7 + $0x58] sm:$0xff] %v1212_v11  ;;  %v1214_v12 = vld [vmem:[%s10321_s6 + $0xc0] sm:$0xff]  ;;  %v1216_v13 = vld [vmem:[%s10321_s6 + $0xd0] sm:$0xff] }
  0x20   : > { %v1218_v14 = vld [vmem:[%s10321_s6 + $0xe0] sm:$0xff]  ;;  %1215 = vst [vmem:[%s10326_s7 + $0x60] sm:$0xff] %v1214_v12  ;;  %1217 = vst [vmem:[%s10326_s7 + $0x68] sm:$0xff] %v1216_v13  ;;  %v1220_v15 = vld [vmem:[%s10321_s6 + $0xf0] sm:$0xff] }
  0x21   : > { %1219 = vst [vmem:[%s10326_s7 + $0x70] sm:$0xff] %v1218_v14  ;;  %v1222_v16 = vld [vmem:[%s10321_s6 + $0x100] sm:$0xff]  ;;  %v1224_v17 = vld [vmem:[%s10321_s6 + $0x110] sm:$0xff]  ;;  %1221 = vst [vmem:[%s10326_s7 + $0x78] sm:$0xff] %v1220_v15 }
  0x22   : > { %1223 = vst [vmem:[%s10326_s7 + $0x80] sm:$0xff] %v1222_v16  ;;  %1225 = vst [vmem:[%s10326_s7 + $0x88] sm:$0xff] %v1224_v17  ;;  %v1226_v18 = vld [vmem:[%s10321_s6 + $0x120] sm:$0xff]  ;;  %v1228_v19 = vld [vmem:[%s10321_s6 + $0x130] sm:$0xff] }
  0x23   : > { %v1230_v20 = vld [vmem:[%s10321_s6 + $0x140] sm:$0xff]  ;;  %1227 = vst [vmem:[%s10326_s7 + $0x90] sm:$0xff] %v1226_v18  ;;  %1229 = vst [vmem:[%s10326_s7 + $0x98] sm:$0xff] %v1228_v19  ;;  %v1232_v21 = vld [vmem:[%s10321_s6 + $0x150] sm:$0xff] }
  0x24   : > { %1231 = vst [vmem:[%s10326_s7 + $0xa0] sm:$0xff] %v1230_v20  ;;  %v1234_v22 = vld [vmem:[%s10321_s6 + $0x160] sm:$0xff]  ;;  %v1236_v23 = vld [vmem:[%s10321_s6 + $0x170] sm:$0xff]  ;;  %1233 = vst [vmem:[%s10326_s7 + $0xa8] sm:$0xff] %v1232_v21 }
  0x25   : > { %1235 = vst [vmem:[%s10326_s7 + $0xb0] sm:$0xff] %v1234_v22  ;;  %1237 = vst [vmem:[%s10326_s7 + $0xb8] sm:$0xff] %v1236_v23  ;;  %v1238_v24 = vld [vmem:[%s10321_s6 + $0x180] sm:$0xff]  ;;  %v1240_v25 = vld [vmem:[%s10321_s6 + $0x190] sm:$0xff] }
  0x26   : > { %v1242_v26 = vld [vmem:[%s10321_s6 + $0x1a0] sm:$0xff]  ;;  %1239 = vst [vmem:[%s10326_s7 + $0xc0] sm:$0xff] %v1238_v24  ;;  %1241 = vst [vmem:[%s10326_s7 + $0xc8] sm:$0xff] %v1240_v25  ;;  %v1244_v27 = vld [vmem:[%s10321_s6 + $0x1b0] sm:$0xff] }
  0x27   : > { %1243 = vst [vmem:[%s10326_s7 + $0xd0] sm:$0xff] %v1242_v26  ;;  %v1246_v28 = vld [vmem:[%s10321_s6 + $0x1c0] sm:$0xff]  ;;  %v1248_v29 = vld [vmem:[%s10321_s6 + $0x1d0] sm:$0xff]  ;;  %1245 = vst [vmem:[%s10326_s7 + $0xd8] sm:$0xff] %v1244_v27 }
  0x28   : > { %1247 = vst [vmem:[%s10326_s7 + $0xe0] sm:$0xff] %v1246_v28  ;;  %1249 = vst [vmem:[%s10326_s7 + $0xe8] sm:$0xff] %v1248_v29  ;;  %v1250_v30 = vld [vmem:[%s10321_s6 + $0x1e0] sm:$0xff]  ;;  %v1252_v31 = vld [vmem:[%s10321_s6 + $0x1f0] sm:$0xff] }
  0x29   : > { %v1254_v32 = vld [vmem:[%s10321_s6 + $0x200] sm:$0xff]  ;;  %1251 = vst [vmem:[%s10326_s7 + $0xf0] sm:$0xff] %v1250_v30  ;;  %1253 = vst [vmem:[%s10326_s7 + $0xf8] sm:$0xff] %v1252_v31  ;;  %v1256_v33 = vld [vmem:[%s10321_s6 + $0x210] sm:$0xff] }
  0x2a   : > { %1255 = vst [vmem:[%s10326_s7 + $0x100] sm:$0xff] %v1254_v32  ;;  %v1258_v34 = vld [vmem:[%s10321_s6 + $0x220] sm:$0xff]  ;;  %v1260_v35 = vld [vmem:[%s10321_s6 + $0x230] sm:$0xff]  ;;  %1257 = vst [vmem:[%s10326_s7 + $0x108] sm:$0xff] %v1256_v33 }
  0x2b   : > { %1259 = vst [vmem:[%s10326_s7 + $0x110] sm:$0xff] %v1258_v34  ;;  %1261 = vst [vmem:[%s10326_s7 + $0x118] sm:$0xff] %v1260_v35  ;;  %v1262_v36 = vld [vmem:[%s10321_s6 + $0x240] sm:$0xff]  ;;  %v1264_v37 = vld [vmem:[%s10321_s6 + $0x250] sm:$0xff] }
  0x2c   : > { %v1266_v38 = vld [vmem:[%s10321_s6 + $0x260] sm:$0xff]  ;;  %1263 = vst [vmem:[%s10326_s7 + $0x120] sm:$0xff] %v1262_v36  ;;  %1265 = vst [vmem:[%s10326_s7 + $0x128] sm:$0xff] %v1264_v37  ;;  %v1268_v39 = vld [vmem:[%s10321_s6 + $0x270] sm:$0xff] }
  0x2d   : > { %1267 = vst [vmem:[%s10326_s7 + $0x130] sm:$0xff] %v1266_v38  ;;  %v1270_v40 = vld [vmem:[%s10321_s6 + $0x280] sm:$0xff]  ;;  %v1272_v41 = vld [vmem:[%s10321_s6 + $0x290] sm:$0xff]  ;;  %1269 = vst [vmem:[%s10326_s7 + $0x138] sm:$0xff] %v1268_v39 }
  0x2e   : > { %1271 = vst [vmem:[%s10326_s7 + $0x140] sm:$0xff] %v1270_v40  ;;  %1273 = vst [vmem:[%s10326_s7 + $0x148] sm:$0xff] %v1272_v41  ;;  %v1274_v42 = vld [vmem:[%s10321_s6 + $0x2a0] sm:$0xff]  ;;  %v1276_v43 = vld [vmem:[%s10321_s6 + $0x2b0] sm:$0xff] }
  0x2f   : > { %v1278_v44 = vld [vmem:[%s10321_s6 + $0x2c0] sm:$0xff]  ;;  %1275 = vst [vmem:[%s10326_s7 + $0x150] sm:$0xff] %v1274_v42  ;;  %1277 = vst [vmem:[%s10326_s7 + $0x158] sm:$0xff] %v1276_v43  ;;  %v1280_v45 = vld [vmem:[%s10321_s6 + $0x2d0] sm:$0xff] }
  0x30   : > { %1279 = vst [vmem:[%s10326_s7 + $0x160] sm:$0xff] %v1278_v44  ;;  %v1282_v46 = vld [vmem:[%s10321_s6 + $0x2e0] sm:$0xff]  ;;  %v1284_v47 = vld [vmem:[%s10321_s6 + $0x2f0] sm:$0xff]  ;;  %1281 = vst [vmem:[%s10326_s7 + $0x168] sm:$0xff] %v1280_v45 }
  0x31   : > { %1283 = vst [vmem:[%s10326_s7 + $0x170] sm:$0xff] %v1282_v46  ;;  %1285 = vst [vmem:[%s10326_s7 + $0x178] sm:$0xff] %v1284_v47  ;;  %v1286_v48 = vld [vmem:[%s10321_s6 + $0x300] sm:$0xff]  ;;  %v1288_v49 = vld [vmem:[%s10321_s6 + $0x310] sm:$0xff] }
  0x32   : > { %v1290_v50 = vld [vmem:[%s10321_s6 + $0x320] sm:$0xff]  ;;  %1287 = vst [vmem:[%s10326_s7 + $0x180] sm:$0xff] %v1286_v48  ;;  %1289 = vst [vmem:[%s10326_s7 + $0x188] sm:$0xff] %v1288_v49  ;;  %v1292_v51 = vld [vmem:[%s10321_s6 + $0x330] sm:$0xff] }
  0x33   : > { %1291 = vst [vmem:[%s10326_s7 + $0x190] sm:$0xff] %v1290_v50  ;;  %v1294_v52 = vld [vmem:[%s10321_s6 + $0x340] sm:$0xff]  ;;  %v1296_v53 = vld [vmem:[%s10321_s6 + $0x350] sm:$0xff]  ;;  %1293 = vst [vmem:[%s10326_s7 + $0x198] sm:$0xff] %v1292_v51 }
  0x34   : > { %1295 = vst [vmem:[%s10326_s7 + $0x1a0] sm:$0xff] %v1294_v52  ;;  %1297 = vst [vmem:[%s10326_s7 + $0x1a8] sm:$0xff] %v1296_v53  ;;  %v1298_v54 = vld [vmem:[%s10321_s6 + $0x360] sm:$0xff]  ;;  %v1300_v55 = vld [vmem:[%s10321_s6 + $0x370] sm:$0xff] }
  0x35   : > { %v1302_v56 = vld [vmem:[%s10321_s6 + $0x380] sm:$0xff]  ;;  %1299 = vst [vmem:[%s10326_s7 + $0x1b0] sm:$0xff] %v1298_v54  ;;  %1301 = vst [vmem:[%s10326_s7 + $0x1b8] sm:$0xff] %v1300_v55  ;;  %v1304_v57 = vld [vmem:[%s10321_s6 + $0x390] sm:$0xff] }
  0x36   : > { %1303 = vst [vmem:[%s10326_s7 + $0x1c0] sm:$0xff] %v1302_v56  ;;  %v1306_v58 = vld [vmem:[%s10321_s6 + $0x3a0] sm:$0xff]  ;;  %v1308_v59 = vld [vmem:[%s10321_s6 + $0x3b0] sm:$0xff]  ;;  %1305 = vst [vmem:[%s10326_s7 + $0x1c8] sm:$0xff] %v1304_v57 }
  0x37   : > { %1307 = vst [vmem:[%s10326_s7 + $0x1d0] sm:$0xff] %v1306_v58  ;;  %1309 = vst [vmem:[%s10326_s7 + $0x1d8] sm:$0xff] %v1308_v59  ;;  %v1310_v60 = vld [vmem:[%s10321_s6 + $0x3c0] sm:$0xff]  ;;  %v1312_v61 = vld [vmem:[%s10321_s6 + $0x3d0] sm:$0xff] }
  0x38   : > { %v1314_v62 = vld [vmem:[%s10321_s6 + $0x3e0] sm:$0xff]  ;;  %1311 = vst [vmem:[%s10326_s7 + $0x1e0] sm:$0xff] %v1310_v60  ;;  %1313 = vst [vmem:[%s10326_s7 + $0x1e8] sm:$0xff] %v1312_v61  ;;  %v1316_v63 = vld [vmem:[%s10321_s6 + $0x3f0] sm:$0xff] }
  0x39   : > { %1315 = vst [vmem:[%s10326_s7 + $0x1f0] sm:$0xff] %v1314_v62  ;;  %v1318_v0 = vld [vmem:[%s10321_s6 + $0x400] sm:$0xff]  ;;  %v1320_v1 = vld [vmem:[%s10321_s6 + $0x410] sm:$0xff]  ;;  %1317 = vst [vmem:[%s10326_s7 + $0x1f8] sm:$0xff] %v1316_v63 }
  0x3a   : > { %1319 = vst [vmem:[%s10326_s7 + $0x200] sm:$0xff] %v1318_v0  ;;  %1321 = vst [vmem:[%s10326_s7 + $0x208] sm:$0xff] %v1320_v1  ;;  %v1322_v2 = vld [vmem:[%s10321_s6 + $0x420] sm:$0xff]  ;;  %v1324_v3 = vld [vmem:[%s10321_s6 + $0x430] sm:$0xff] }
  0x3b   : > { %v1326_v4 = vld [vmem:[%s10321_s6 + $0x440] sm:$0xff]  ;;  %1323 = vst [vmem:[%s10326_s7 + $0x210] sm:$0xff] %v1322_v2  ;;  %1325 = vst [vmem:[%s10326_s7 + $0x218] sm:$0xff] %v1324_v3  ;;  %v1328_v5 = vld [vmem:[%s10321_s6 + $0x450] sm:$0xff] }
  0x3c   : > { %1327 = vst [vmem:[%s10326_s7 + $0x220] sm:$0xff] %v1326_v4  ;;  %v1330_v6 = vld [vmem:[%s10321_s6 + $0x460] sm:$0xff]  ;;  %v1332_v7 = vld [vmem:[%s10321_s6 + $0x470] sm:$0xff]  ;;  %1329 = vst [vmem:[%s10326_s7 + $0x228] sm:$0xff] %v1328_v5 }
  0x3d   : > { %1331 = vst [vmem:[%s10326_s7 + $0x230] sm:$0xff] %v1330_v6  ;;  %1333 = vst [vmem:[%s10326_s7 + $0x238] sm:$0xff] %v1332_v7  ;;  %v1334_v8 = vld [vmem:[%s10321_s6 + $0x480] sm:$0xff]  ;;  %v1336_v9 = vld [vmem:[%s10321_s6 + $0x490] sm:$0xff] }
  0x3e   : > { %v1338_v10 = vld [vmem:[%s10321_s6 + $0x4a0] sm:$0xff]  ;;  %1335 = vst [vmem:[%s10326_s7 + $0x240] sm:$0xff] %v1334_v8  ;;  %1337 = vst [vmem:[%s10326_s7 + $0x248] sm:$0xff] %v1336_v9  ;;  %v1340_v11 = vld [vmem:[%s10321_s6 + $0x4b0] sm:$0xff] }
  0x3f   : > { %1339 = vst [vmem:[%s10326_s7 + $0x250] sm:$0xff] %v1338_v10  ;;  %v1342_v12 = vld [vmem:[%s10321_s6 + $0x4c0] sm:$0xff]  ;;  %v1344_v13 = vld [vmem:[%s10321_s6 + $0x4d0] sm:$0xff]  ;;  %1341 = vst [vmem:[%s10326_s7 + $0x258] sm:$0xff] %v1340_v11 }
  0x40   : > { %1343 = vst [vmem:[%s10326_s7 + $0x260] sm:$0xff] %v1342_v12  ;;  %1345 = vst [vmem:[%s10326_s7 + $0x268] sm:$0xff] %v1344_v13  ;;  %v1346_v14 = vld [vmem:[%s10321_s6 + $0x4e0] sm:$0xff]  ;;  %v1348_v15 = vld [vmem:[%s10321_s6 + $0x4f0] sm:$0xff] }
  0x41   : > { %v1350_v16 = vld [vmem:[%s10321_s6 + $0x500] sm:$0xff]  ;;  %1347 = vst [vmem:[%s10326_s7 + $0x270] sm:$0xff] %v1346_v14  ;;  %1349 = vst [vmem:[%s10326_s7 + $0x278] sm:$0xff] %v1348_v15  ;;  %v1352_v17 = vld [vmem:[%s10321_s6 + $0x510] sm:$0xff] }
  0x42   : > { %1351 = vst [vmem:[%s10326_s7 + $0x280] sm:$0xff] %v1350_v16  ;;  %v1354_v18 = vld [vmem:[%s10321_s6 + $0x520] sm:$0xff]  ;;  %v1356_v19 = vld [vmem:[%s10321_s6 + $0x530] sm:$0xff]  ;;  %1353 = vst [vmem:[%s10326_s7 + $0x288] sm:$0xff] %v1352_v17 }
  0x43   : > { %1355 = vst [vmem:[%s10326_s7 + $0x290] sm:$0xff] %v1354_v18  ;;  %1357 = vst [vmem:[%s10326_s7 + $0x298] sm:$0xff] %v1356_v19  ;;  %v1358_v20 = vld [vmem:[%s10321_s6 + $0x540] sm:$0xff]  ;;  %v1360_v21 = vld [vmem:[%s10321_s6 + $0x550] sm:$0xff] }
  0x44   : > { %v1362_v22 = vld [vmem:[%s10321_s6 + $0x560] sm:$0xff]  ;;  %1359 = vst [vmem:[%s10326_s7 + $0x2a0] sm:$0xff] %v1358_v20  ;;  %1361 = vst [vmem:[%s10326_s7 + $0x2a8] sm:$0xff] %v1360_v21  ;;  %v1364_v23 = vld [vmem:[%s10321_s6 + $0x570] sm:$0xff] }
  0x45   : > { %1363 = vst [vmem:[%s10326_s7 + $0x2b0] sm:$0xff] %v1362_v22  ;;  %v1366_v24 = vld [vmem:[%s10321_s6 + $0x580] sm:$0xff]  ;;  %v1368_v25 = vld [vmem:[%s10321_s6 + $0x590] sm:$0xff]  ;;  %1365 = vst [vmem:[%s10326_s7 + $0x2b8] sm:$0xff] %v1364_v23 }
  0x46   : > { %1367 = vst [vmem:[%s10326_s7 + $0x2c0] sm:$0xff] %v1366_v24  ;;  %1369 = vst [vmem:[%s10326_s7 + $0x2c8] sm:$0xff] %v1368_v25  ;;  %v1370_v26 = vld [vmem:[%s10321_s6 + $0x5a0] sm:$0xff]  ;;  %v1372_v27 = vld [vmem:[%s10321_s6 + $0x5b0] sm:$0xff] }
  0x47   : > { %v1374_v28 = vld [vmem:[%s10321_s6 + $0x5c0] sm:$0xff]  ;;  %1371 = vst [vmem:[%s10326_s7 + $0x2d0] sm:$0xff] %v1370_v26  ;;  %1373 = vst [vmem:[%s10326_s7 + $0x2d8] sm:$0xff] %v1372_v27  ;;  %v1376_v29 = vld [vmem:[%s10321_s6 + $0x5d0] sm:$0xff] }
  0x48   : > { %1375 = vst [vmem:[%s10326_s7 + $0x2e0] sm:$0xff] %v1374_v28  ;;  %v1378_v30 = vld [vmem:[%s10321_s6 + $0x5e0] sm:$0xff]  ;;  %v1380_v31 = vld [vmem:[%s10321_s6 + $0x5f0] sm:$0xff]  ;;  %1377 = vst [vmem:[%s10326_s7 + $0x2e8] sm:$0xff] %v1376_v29 }
  0x49   : > { %1379 = vst [vmem:[%s10326_s7 + $0x2f0] sm:$0xff] %v1378_v30  ;;  %1381 = vst [vmem:[%s10326_s7 + $0x2f8] sm:$0xff] %v1380_v31  ;;  %v1382_v32 = vld [vmem:[%s10321_s6 + $0x600] sm:$0xff]  ;;  %v1384_v33 = vld [vmem:[%s10321_s6 + $0x610] sm:$0xff] }
  0x4a   : > { %v1386_v34 = vld [vmem:[%s10321_s6 + $0x620] sm:$0xff]  ;;  %1383 = vst [vmem:[%s10326_s7 + $0x300] sm:$0xff] %v1382_v32  ;;  %1385 = vst [vmem:[%s10326_s7 + $0x308] sm:$0xff] %v1384_v33  ;;  %v1388_v35 = vld [vmem:[%s10321_s6 + $0x630] sm:$0xff] }
  0x4b   : > { %1387 = vst [vmem:[%s10326_s7 + $0x310] sm:$0xff] %v1386_v34  ;;  %v1390_v36 = vld [vmem:[%s10321_s6 + $0x640] sm:$0xff]  ;;  %v1392_v37 = vld [vmem:[%s10321_s6 + $0x650] sm:$0xff]  ;;  %1389 = vst [vmem:[%s10326_s7 + $0x318] sm:$0xff] %v1388_v35 }
  0x4c   : > { %1391 = vst [vmem:[%s10326_s7 + $0x320] sm:$0xff] %v1390_v36  ;;  %1393 = vst [vmem:[%s10326_s7 + $0x328] sm:$0xff] %v1392_v37  ;;  %v1394_v38 = vld [vmem:[%s10321_s6 + $0x660] sm:$0xff]  ;;  %v1396_v39 = vld [vmem:[%s10321_s6 + $0x670] sm:$0xff] }
  0x4d   : > { %v1398_v40 = vld [vmem:[%s10321_s6 + $0x680] sm:$0xff]  ;;  %1395 = vst [vmem:[%s10326_s7 + $0x330] sm:$0xff] %v1394_v38  ;;  %1397 = vst [vmem:[%s10326_s7 + $0x338] sm:$0xff] %v1396_v39  ;;  %v1400_v41 = vld [vmem:[%s10321_s6 + $0x690] sm:$0xff] }
  0x4e   : > { %1399 = vst [vmem:[%s10326_s7 + $0x340] sm:$0xff] %v1398_v40  ;;  %v1402_v42 = vld [vmem:[%s10321_s6 + $0x6a0] sm:$0xff]  ;;  %v1404_v43 = vld [vmem:[%s10321_s6 + $0x6b0] sm:$0xff]  ;;  %1401 = vst [vmem:[%s10326_s7 + $0x348] sm:$0xff] %v1400_v41 }
  0x4f   : > { %1403 = vst [vmem:[%s10326_s7 + $0x350] sm:$0xff] %v1402_v42  ;;  %1405 = vst [vmem:[%s10326_s7 + $0x358] sm:$0xff] %v1404_v43  ;;  %v1406_v44 = vld [vmem:[%s10321_s6 + $0x6c0] sm:$0xff]  ;;  %v1408_v45 = vld [vmem:[%s10321_s6 + $0x6d0] sm:$0xff] }
  0x50   : > { %v1410_v46 = vld [vmem:[%s10321_s6 + $0x6e0] sm:$0xff]  ;;  %1407 = vst [vmem:[%s10326_s7 + $0x360] sm:$0xff] %v1406_v44  ;;  %1409 = vst [vmem:[%s10326_s7 + $0x368] sm:$0xff] %v1408_v45  ;;  %v1412_v47 = vld [vmem:[%s10321_s6 + $0x6f0] sm:$0xff] }
  0x51   : > { %1411 = vst [vmem:[%s10326_s7 + $0x370] sm:$0xff] %v1410_v46  ;;  %v1414_v48 = vld [vmem:[%s10321_s6 + $0x700] sm:$0xff]  ;;  %v1416_v49 = vld [vmem:[%s10321_s6 + $0x710] sm:$0xff]  ;;  %1413 = vst [vmem:[%s10326_s7 + $0x378] sm:$0xff] %v1412_v47 }
  0x52   : > { %1415 = vst [vmem:[%s10326_s7 + $0x380] sm:$0xff] %v1414_v48  ;;  %1417 = vst [vmem:[%s10326_s7 + $0x388] sm:$0xff] %v1416_v49  ;;  %v1418_v50 = vld [vmem:[%s10321_s6 + $0x720] sm:$0xff]  ;;  %v1420_v51 = vld [vmem:[%s10321_s6 + $0x730] sm:$0xff] }
  0x53   : > { %v1422_v52 = vld [vmem:[%s10321_s6 + $0x740] sm:$0xff]  ;;  %1419 = vst [vmem:[%s10326_s7 + $0x390] sm:$0xff] %v1418_v50  ;;  %1421 = vst [vmem:[%s10326_s7 + $0x398] sm:$0xff] %v1420_v51  ;;  %v1424_v53 = vld [vmem:[%s10321_s6 + $0x750] sm:$0xff] }
  0x54   : > { %1423 = vst [vmem:[%s10326_s7 + $0x3a0] sm:$0xff] %v1422_v52  ;;  %v1426_v54 = vld [vmem:[%s10321_s6 + $0x760] sm:$0xff]  ;;  %v1428_v55 = vld [vmem:[%s10321_s6 + $0x770] sm:$0xff]  ;;  %1425 = vst [vmem:[%s10326_s7 + $0x3a8] sm:$0xff] %v1424_v53 }
  0x55   : > { %1427 = vst [vmem:[%s10326_s7 + $0x3b0] sm:$0xff] %v1426_v54  ;;  %1429 = vst [vmem:[%s10326_s7 + $0x3b8] sm:$0xff] %v1428_v55  ;;  %v1430_v56 = vld [vmem:[%s10321_s6 + $0x780] sm:$0xff]  ;;  %v1432_v57 = vld [vmem:[%s10321_s6 + $0x790] sm:$0xff] }
  0x56   : > { %v1434_v58 = vld [vmem:[%s10321_s6 + $0x7a0] sm:$0xff]  ;;  %1431 = vst [vmem:[%s10326_s7 + $0x3c0] sm:$0xff] %v1430_v56  ;;  %1433 = vst [vmem:[%s10326_s7 + $0x3c8] sm:$0xff] %v1432_v57  ;;  %v1436_v59 = vld [vmem:[%s10321_s6 + $0x7b0] sm:$0xff] }
  0x57   : > { %1435 = vst [vmem:[%s10326_s7 + $0x3d0] sm:$0xff] %v1434_v58  ;;  %v1438_v60 = vld [vmem:[%s10321_s6 + $0x7c0] sm:$0xff]  ;;  %v1440_v61 = vld [vmem:[%s10321_s6 + $0x7d0] sm:$0xff]  ;;  %1437 = vst [vmem:[%s10326_s7 + $0x3d8] sm:$0xff] %v1436_v59 }
  0x58   : > { %1439 = vst [vmem:[%s10326_s7 + $0x3e0] sm:$0xff] %v1438_v60  ;;  %1441 = vst [vmem:[%s10326_s7 + $0x3e8] sm:$0xff] %v1440_v61  ;;  %v1442_v62 = vld [vmem:[%s10321_s6 + $0x7e0] sm:$0xff]  ;;  %v1444_v63 = vld [vmem:[%s10321_s6 + $0x7f0] sm:$0xff] }
  0x59   : > { %v1446_v0 = vld [vmem:[%s10321_s6 + $0x800] sm:$0xff]  ;;  %1443 = vst [vmem:[%s10326_s7 + $0x3f0] sm:$0xff] %v1442_v62  ;;  %1445 = vst [vmem:[%s10326_s7 + $0x3f8] sm:$0xff] %v1444_v63  ;;  %v1448_v1 = vld [vmem:[%s10321_s6 + $0x810] sm:$0xff] }
  0x5a   : > { %1447 = vst [vmem:[%s10326_s7 + $0x400] sm:$0xff] %v1446_v0  ;;  %v1450_v2 = vld [vmem:[%s10321_s6 + $0x820] sm:$0xff]  ;;  %v1452_v3 = vld [vmem:[%s10321_s6 + $0x830] sm:$0xff]  ;;  %1449 = vst [vmem:[%s10326_s7 + $0x408] sm:$0xff] %v1448_v1 }
  0x5b   : > { %1451 = vst [vmem:[%s10326_s7 + $0x410] sm:$0xff] %v1450_v2  ;;  %1453 = vst [vmem:[%s10326_s7 + $0x418] sm:$0xff] %v1452_v3  ;;  %v1454_v4 = vld [vmem:[%s10321_s6 + $0x840] sm:$0xff]  ;;  %v1456_v5 = vld [vmem:[%s10321_s6 + $0x850] sm:$0xff] }
  0x5c   : > { %v1458_v6 = vld [vmem:[%s10321_s6 + $0x860] sm:$0xff]  ;;  %1455 = vst [vmem:[%s10326_s7 + $0x420] sm:$0xff] %v1454_v4  ;;  %1457 = vst [vmem:[%s10326_s7 + $0x428] sm:$0xff] %v1456_v5  ;;  %v1460_v7 = vld [vmem:[%s10321_s6 + $0x870] sm:$0xff] }
  0x5d   : > { %1459 = vst [vmem:[%s10326_s7 + $0x430] sm:$0xff] %v1458_v6  ;;  %v1462_v8 = vld [vmem:[%s10321_s6 + $0x880] sm:$0xff]  ;;  %v1464_v9 = vld [vmem:[%s10321_s6 + $0x890] sm:$0xff]  ;;  %1461 = vst [vmem:[%s10326_s7 + $0x438] sm:$0xff] %v1460_v7 }
  0x5e   : > { %1463 = vst [vmem:[%s10326_s7 + $0x440] sm:$0xff] %v1462_v8  ;;  %1465 = vst [vmem:[%s10326_s7 + $0x448] sm:$0xff] %v1464_v9  ;;  %v1466_v10 = vld [vmem:[%s10321_s6 + $0x8a0] sm:$0xff]  ;;  %v1468_v11 = vld [vmem:[%s10321_s6 + $0x8b0] sm:$0xff] }
  0x5f   : > { %v1470_v12 = vld [vmem:[%s10321_s6 + $0x8c0] sm:$0xff]  ;;  %1467 = vst [vmem:[%s10326_s7 + $0x450] sm:$0xff] %v1466_v10  ;;  %1469 = vst [vmem:[%s10326_s7 + $0x458] sm:$0xff] %v1468_v11  ;;  %v1472_v13 = vld [vmem:[%s10321_s6 + $0x8d0] sm:$0xff] }
  0x60   : > { %1471 = vst [vmem:[%s10326_s7 + $0x460] sm:$0xff] %v1470_v12  ;;  %v1474_v14 = vld [vmem:[%s10321_s6 + $0x8e0] sm:$0xff]  ;;  %v1476_v15 = vld [vmem:[%s10321_s6 + $0x8f0] sm:$0xff]  ;;  %1473 = vst [vmem:[%s10326_s7 + $0x468] sm:$0xff] %v1472_v13 }
  0x61   : > { %1475 = vst [vmem:[%s10326_s7 + $0x470] sm:$0xff] %v1474_v14  ;;  %1477 = vst [vmem:[%s10326_s7 + $0x478] sm:$0xff] %v1476_v15  ;;  %v1478_v16 = vld [vmem:[%s10321_s6 + $0x900] sm:$0xff]  ;;  %v1480_v17 = vld [vmem:[%s10321_s6 + $0x910] sm:$0xff] }
  0x62   : > { %v1482_v18 = vld [vmem:[%s10321_s6 + $0x920] sm:$0xff]  ;;  %1479 = vst [vmem:[%s10326_s7 + $0x480] sm:$0xff] %v1478_v16  ;;  %1481 = vst [vmem:[%s10326_s7 + $0x488] sm:$0xff] %v1480_v17  ;;  %v1484_v19 = vld [vmem:[%s10321_s6 + $0x930] sm:$0xff] }
  0x63   : > { %1483 = vst [vmem:[%s10326_s7 + $0x490] sm:$0xff] %v1482_v18  ;;  %v1486_v20 = vld [vmem:[%s10321_s6 + $0x940] sm:$0xff]  ;;  %v1488_v21 = vld [vmem:[%s10321_s6 + $0x950] sm:$0xff]  ;;  %1485 = vst [vmem:[%s10326_s7 + $0x498] sm:$0xff] %v1484_v19 }
  0x64   : > { %1487 = vst [vmem:[%s10326_s7 + $0x4a0] sm:$0xff] %v1486_v20  ;;  %1489 = vst [vmem:[%s10326_s7 + $0x4a8] sm:$0xff] %v1488_v21  ;;  %v1490_v22 = vld [vmem:[%s10321_s6 + $0x960] sm:$0xff]  ;;  %v1492_v23 = vld [vmem:[%s10321_s6 + $0x970] sm:$0xff] }
  0x65   : > { %v1494_v24 = vld [vmem:[%s10321_s6 + $0x980] sm:$0xff]  ;;  %1491 = vst [vmem:[%s10326_s7 + $0x4b0] sm:$0xff] %v1490_v22  ;;  %1493 = vst [vmem:[%s10326_s7 + $0x4b8] sm:$0xff] %v1492_v23  ;;  %v1496_v25 = vld [vmem:[%s10321_s6 + $0x990] sm:$0xff] }
  0x66   : > { %1495 = vst [vmem:[%s10326_s7 + $0x4c0] sm:$0xff] %v1494_v24  ;;  %v1498_v26 = vld [vmem:[%s10321_s6 + $0x9a0] sm:$0xff]  ;;  %v1500_v27 = vld [vmem:[%s10321_s6 + $0x9b0] sm:$0xff]  ;;  %1497 = vst [vmem:[%s10326_s7 + $0x4c8] sm:$0xff] %v1496_v25 }
  0x67   : > { %1499 = vst [vmem:[%s10326_s7 + $0x4d0] sm:$0xff] %v1498_v26  ;;  %1501 = vst [vmem:[%s10326_s7 + $0x4d8] sm:$0xff] %v1500_v27  ;;  %v1502_v28 = vld [vmem:[%s10321_s6 + $0x9c0] sm:$0xff]  ;;  %v1504_v29 = vld [vmem:[%s10321_s6 + $0x9d0] sm:$0xff] }
  0x68   : > { %v1506_v30 = vld [vmem:[%s10321_s6 + $0x9e0] sm:$0xff]  ;;  %1503 = vst [vmem:[%s10326_s7 + $0x4e0] sm:$0xff] %v1502_v28  ;;  %1505 = vst [vmem:[%s10326_s7 + $0x4e8] sm:$0xff] %v1504_v29  ;;  %v1508_v31 = vld [vmem:[%s10321_s6 + $0x9f0] sm:$0xff] }
  0x69   : > { %1507 = vst [vmem:[%s10326_s7 + $0x4f0] sm:$0xff] %v1506_v30  ;;  %v1510_v32 = vld [vmem:[%s10321_s6 + $0xa00] sm:$0xff]  ;;  %v1512_v33 = vld [vmem:[%s10321_s6 + $0xa10] sm:$0xff]  ;;  %1509 = vst [vmem:[%s10326_s7 + $0x4f8] sm:$0xff] %v1508_v31 }
  0x6a   : > { %1511 = vst [vmem:[%s10326_s7 + $0x500] sm:$0xff] %v1510_v32  ;;  %1513 = vst [vmem:[%s10326_s7 + $0x508] sm:$0xff] %v1512_v33  ;;  %v1514_v34 = vld [vmem:[%s10321_s6 + $0xa20] sm:$0xff]  ;;  %v1516_v35 = vld [vmem:[%s10321_s6 + $0xa30] sm:$0xff] }
  0x6b   : > { %v1518_v36 = vld [vmem:[%s10321_s6 + $0xa40] sm:$0xff]  ;;  %1515 = vst [vmem:[%s10326_s7 + $0x510] sm:$0xff] %v1514_v34  ;;  %1517 = vst [vmem:[%s10326_s7 + $0x518] sm:$0xff] %v1516_v35  ;;  %v1520_v37 = vld [vmem:[%s10321_s6 + $0xa50] sm:$0xff] }
  0x6c   : > { %1519 = vst [vmem:[%s10326_s7 + $0x520] sm:$0xff] %v1518_v36  ;;  %v1522_v38 = vld [vmem:[%s10321_s6 + $0xa60] sm:$0xff]  ;;  %v1524_v39 = vld [vmem:[%s10321_s6 + $0xa70] sm:$0xff]  ;;  %1521 = vst [vmem:[%s10326_s7 + $0x528] sm:$0xff] %v1520_v37 }
  0x6d   : > { %1523 = vst [vmem:[%s10326_s7 + $0x530] sm:$0xff] %v1522_v38  ;;  %1525 = vst [vmem:[%s10326_s7 + $0x538] sm:$0xff] %v1524_v39  ;;  %v1526_v40 = vld [vmem:[%s10321_s6 + $0xa80] sm:$0xff]  ;;  %v1528_v41 = vld [vmem:[%s10321_s6 + $0xa90] sm:$0xff] }
  0x6e   : > { %v1530_v42 = vld [vmem:[%s10321_s6 + $0xaa0] sm:$0xff]  ;;  %1527 = vst [vmem:[%s10326_s7 + $0x540] sm:$0xff] %v1526_v40  ;;  %1529 = vst [vmem:[%s10326_s7 + $0x548] sm:$0xff] %v1528_v41  ;;  %v1532_v43 = vld [vmem:[%s10321_s6 + $0xab0] sm:$0xff] }
  0x6f   : > { %1531 = vst [vmem:[%s10326_s7 + $0x550] sm:$0xff] %v1530_v42  ;;  %v1534_v44 = vld [vmem:[%s10321_s6 + $0xac0] sm:$0xff]  ;;  %v1536_v45 = vld [vmem:[%s10321_s6 + $0xad0] sm:$0xff]  ;;  %1533 = vst [vmem:[%s10326_s7 + $0x558] sm:$0xff] %v1532_v43 }
  0x70   : > { %1535 = vst [vmem:[%s10326_s7 + $0x560] sm:$0xff] %v1534_v44  ;;  %1537 = vst [vmem:[%s10326_s7 + $0x568] sm:$0xff] %v1536_v45  ;;  %v1538_v46 = vld [vmem:[%s10321_s6 + $0xae0] sm:$0xff]  ;;  %v1540_v47 = vld [vmem:[%s10321_s6 + $0xaf0] sm:$0xff] }
  0x71   : > { %v1542_v48 = vld [vmem:[%s10321_s6 + $0xb00] sm:$0xff]  ;;  %1539 = vst [vmem:[%s10326_s7 + $0x570] sm:$0xff] %v1538_v46  ;;  %1541 = vst [vmem:[%s10326_s7 + $0x578] sm:$0xff] %v1540_v47  ;;  %v1544_v49 = vld [vmem:[%s10321_s6 + $0xb10] sm:$0xff] }
  0x72   : > { %1543 = vst [vmem:[%s10326_s7 + $0x580] sm:$0xff] %v1542_v48  ;;  %v1546_v50 = vld [vmem:[%s10321_s6 + $0xb20] sm:$0xff]  ;;  %v1548_v51 = vld [vmem:[%s10321_s6 + $0xb30] sm:$0xff]  ;;  %1545 = vst [vmem:[%s10326_s7 + $0x588] sm:$0xff] %v1544_v49 }
  0x73   : > { %1547 = vst [vmem:[%s10326_s7 + $0x590] sm:$0xff] %v1546_v50  ;;  %1549 = vst [vmem:[%s10326_s7 + $0x598] sm:$0xff] %v1548_v51  ;;  %v1550_v52 = vld [vmem:[%s10321_s6 + $0xb40] sm:$0xff]  ;;  %v1552_v53 = vld [vmem:[%s10321_s6 + $0xb50] sm:$0xff] }
  0x74   : > { %v1554_v54 = vld [vmem:[%s10321_s6 + $0xb60] sm:$0xff]  ;;  %1551 = vst [vmem:[%s10326_s7 + $0x5a0] sm:$0xff] %v1550_v52  ;;  %1553 = vst [vmem:[%s10326_s7 + $0x5a8] sm:$0xff] %v1552_v53  ;;  %v1556_v55 = vld [vmem:[%s10321_s6 + $0xb70] sm:$0xff] }
  0x75   : > { %1555 = vst [vmem:[%s10326_s7 + $0x5b0] sm:$0xff] %v1554_v54  ;;  %v1558_v56 = vld [vmem:[%s10321_s6 + $0xb80] sm:$0xff]  ;;  %v1560_v57 = vld [vmem:[%s10321_s6 + $0xb90] sm:$0xff]  ;;  %1557 = vst [vmem:[%s10326_s7 + $0x5b8] sm:$0xff] %v1556_v55 }
  0x76   : > { %1559 = vst [vmem:[%s10326_s7 + $0x5c0] sm:$0xff] %v1558_v56  ;;  %1561 = vst [vmem:[%s10326_s7 + $0x5c8] sm:$0xff] %v1560_v57  ;;  %v1562_v58 = vld [vmem:[%s10321_s6 + $0xba0] sm:$0xff]  ;;  %v1564_v59 = vld [vmem:[%s10321_s6 + $0xbb0] sm:$0xff] }
  0x77   : > { %v1566_v60 = vld [vmem:[%s10321_s6 + $0xbc0] sm:$0xff]  ;;  %1563 = vst [vmem:[%s10326_s7 + $0x5d0] sm:$0xff] %v1562_v58  ;;  %1565 = vst [vmem:[%s10326_s7 + $0x5d8] sm:$0xff] %v1564_v59  ;;  %v1568_v61 = vld [vmem:[%s10321_s6 + $0xbd0] sm:$0xff] }
  0x78   : > { %1567 = vst [vmem:[%s10326_s7 + $0x5e0] sm:$0xff] %v1566_v60  ;;  %v1570_v62 = vld [vmem:[%s10321_s6 + $0xbe0] sm:$0xff]  ;;  %v1572_v63 = vld [vmem:[%s10321_s6 + $0xbf0] sm:$0xff]  ;;  %1569 = vst [vmem:[%s10326_s7 + $0x5e8] sm:$0xff] %v1568_v61 }
  0x79   : > { %1571 = vst [vmem:[%s10326_s7 + $0x5f0] sm:$0xff] %v1570_v62  ;;  %1573 = vst [vmem:[%s10326_s7 + $0x5f8] sm:$0xff] %v1572_v63  ;;  %v1574_v0 = vld [vmem:[%s10321_s6 + $0xc00] sm:$0xff]  ;;  %v1576_v1 = vld [vmem:[%s10321_s6 + $0xc10] sm:$0xff] }
  0x7a   : > { %v1578_v2 = vld [vmem:[%s10321_s6 + $0xc20] sm:$0xff]  ;;  %1575 = vst [vmem:[%s10326_s7 + $0x600] sm:$0xff] %v1574_v0  ;;  %1577 = vst [vmem:[%s10326_s7 + $0x608] sm:$0xff] %v1576_v1  ;;  %v1580_v3 = vld [vmem:[%s10321_s6 + $0xc30] sm:$0xff] }
  0x7b   : > { %1579 = vst [vmem:[%s10326_s7 + $0x610] sm:$0xff] %v1578_v2  ;;  %v1582_v4 = vld [vmem:[%s10321_s6 + $0xc40] sm:$0xff]  ;;  %v1584_v5 = vld [vmem:[%s10321_s6 + $0xc50] sm:$0xff]  ;;  %1581 = vst [vmem:[%s10326_s7 + $0x618] sm:$0xff] %v1580_v3 }
  0x7c   : > { %1583 = vst [vmem:[%s10326_s7 + $0x620] sm:$0xff] %v1582_v4  ;;  %1585 = vst [vmem:[%s10326_s7 + $0x628] sm:$0xff] %v1584_v5  ;;  %v1586_v6 = vld [vmem:[%s10321_s6 + $0xc60] sm:$0xff]  ;;  %v1588_v7 = vld [vmem:[%s10321_s6 + $0xc70] sm:$0xff] }
  0x7d   : > { %v1590_v8 = vld [vmem:[%s10321_s6 + $0xc80] sm:$0xff]  ;;  %1587 = vst [vmem:[%s10326_s7 + $0x630] sm:$0xff] %v1586_v6  ;;  %1589 = vst [vmem:[%s10326_s7 + $0x638] sm:$0xff] %v1588_v7  ;;  %v1592_v9 = vld [vmem:[%s10321_s6 + $0xc90] sm:$0xff] }
  0x7e   : > { %1591 = vst [vmem:[%s10326_s7 + $0x640] sm:$0xff] %v1590_v8  ;;  %v1594_v10 = vld [vmem:[%s10321_s6 + $0xca0] sm:$0xff]  ;;  %v1596_v11 = vld [vmem:[%s10321_s6 + $0xcb0] sm:$0xff]  ;;  %1593 = vst [vmem:[%s10326_s7 + $0x648] sm:$0xff] %v1592_v9 }
  0x7f   : > { %1595 = vst [vmem:[%s10326_s7 + $0x650] sm:$0xff] %v1594_v10  ;;  %1597 = vst [vmem:[%s10326_s7 + $0x658] sm:$0xff] %v1596_v11  ;;  %v1598_v12 = vld [vmem:[%s10321_s6 + $0xcc0] sm:$0xff]  ;;  %v1600_v13 = vld [vmem:[%s10321_s6 + $0xcd0] sm:$0xff] }
  0x80   : > { %v1602_v14 = vld [vmem:[%s10321_s6 + $0xce0] sm:$0xff]  ;;  %1599 = vst [vmem:[%s10326_s7 + $0x660] sm:$0xff] %v1598_v12  ;;  %1601 = vst [vmem:[%s10326_s7 + $0x668] sm:$0xff] %v1600_v13  ;;  %v1604_v15 = vld [vmem:[%s10321_s6 + $0xcf0] sm:$0xff] }
  0x81   : > { %1603 = vst [vmem:[%s10326_s7 + $0x670] sm:$0xff] %v1602_v14  ;;  %v1606_v16 = vld [vmem:[%s10321_s6 + $0xd00] sm:$0xff]  ;;  %v1608_v17 = vld [vmem:[%s10321_s6 + $0xd10] sm:$0xff]  ;;  %1605 = vst [vmem:[%s10326_s7 + $0x678] sm:$0xff] %v1604_v15 }
  0x82   : > { %1607 = vst [vmem:[%s10326_s7 + $0x680] sm:$0xff] %v1606_v16  ;;  %1609 = vst [vmem:[%s10326_s7 + $0x688] sm:$0xff] %v1608_v17  ;;  %v1610_v18 = vld [vmem:[%s10321_s6 + $0xd20] sm:$0xff]  ;;  %v1612_v19 = vld [vmem:[%s10321_s6 + $0xd30] sm:$0xff] }
  0x83   : > { %v1614_v20 = vld [vmem:[%s10321_s6 + $0xd40] sm:$0xff]  ;;  %1611 = vst [vmem:[%s10326_s7 + $0x690] sm:$0xff] %v1610_v18  ;;  %1613 = vst [vmem:[%s10326_s7 + $0x698] sm:$0xff] %v1612_v19  ;;  %v1616_v21 = vld [vmem:[%s10321_s6 + $0xd50] sm:$0xff] }
  0x84   : > { %1615 = vst [vmem:[%s10326_s7 + $0x6a0] sm:$0xff] %v1614_v20  ;;  %v1618_v22 = vld [vmem:[%s10321_s6 + $0xd60] sm:$0xff]  ;;  %v1620_v23 = vld [vmem:[%s10321_s6 + $0xd70] sm:$0xff]  ;;  %1617 = vst [vmem:[%s10326_s7 + $0x6a8] sm:$0xff] %v1616_v21 }
  0x85   : > { %1619 = vst [vmem:[%s10326_s7 + $0x6b0] sm:$0xff] %v1618_v22  ;;  %1621 = vst [vmem:[%s10326_s7 + $0x6b8] sm:$0xff] %v1620_v23  ;;  %v1622_v24 = vld [vmem:[%s10321_s6 + $0xd80] sm:$0xff]  ;;  %v1624_v25 = vld [vmem:[%s10321_s6 + $0xd90] sm:$0xff] }
  0x86   : > { %v1626_v26 = vld [vmem:[%s10321_s6 + $0xda0] sm:$0xff]  ;;  %1623 = vst [vmem:[%s10326_s7 + $0x6c0] sm:$0xff] %v1622_v24  ;;  %1625 = vst [vmem:[%s10326_s7 + $0x6c8] sm:$0xff] %v1624_v25  ;;  %v1628_v27 = vld [vmem:[%s10321_s6 + $0xdb0] sm:$0xff] }
  0x87   : > { %1627 = vst [vmem:[%s10326_s7 + $0x6d0] sm:$0xff] %v1626_v26  ;;  %v1630_v28 = vld [vmem:[%s10321_s6 + $0xdc0] sm:$0xff]  ;;  %v1632_v29 = vld [vmem:[%s10321_s6 + $0xdd0] sm:$0xff]  ;;  %1629 = vst [vmem:[%s10326_s7 + $0x6d8] sm:$0xff] %v1628_v27 }
  0x88   : > { %1631 = vst [vmem:[%s10326_s7 + $0x6e0] sm:$0xff] %v1630_v28  ;;  %1633 = vst [vmem:[%s10326_s7 + $0x6e8] sm:$0xff] %v1632_v29  ;;  %v1634_v30 = vld [vmem:[%s10321_s6 + $0xde0] sm:$0xff]  ;;  %v1636_v31 = vld [vmem:[%s10321_s6 + $0xdf0] sm:$0xff] }
  0x89   : > { %v1638_v32 = vld [vmem:[%s10321_s6 + $0xe00] sm:$0xff]  ;;  %1635 = vst [vmem:[%s10326_s7 + $0x6f0] sm:$0xff] %v1634_v30  ;;  %1637 = vst [vmem:[%s10326_s7 + $0x6f8] sm:$0xff] %v1636_v31  ;;  %v1640_v33 = vld [vmem:[%s10321_s6 + $0xe10] sm:$0xff] }
  0x8a   : > { %1639 = vst [vmem:[%s10326_s7 + $0x700] sm:$0xff] %v1638_v32  ;;  %v1642_v34 = vld [vmem:[%s10321_s6 + $0xe20] sm:$0xff]  ;;  %v1644_v35 = vld [vmem:[%s10321_s6 + $0xe30] sm:$0xff]  ;;  %1641 = vst [vmem:[%s10326_s7 + $0x708] sm:$0xff] %v1640_v33 }
  0x8b   : > { %1643 = vst [vmem:[%s10326_s7 + $0x710] sm:$0xff] %v1642_v34  ;;  %1645 = vst [vmem:[%s10326_s7 + $0x718] sm:$0xff] %v1644_v35  ;;  %v1646_v36 = vld [vmem:[%s10321_s6 + $0xe40] sm:$0xff]  ;;  %v1648_v37 = vld [vmem:[%s10321_s6 + $0xe50] sm:$0xff] }
  0x8c   : > { %v1650_v38 = vld [vmem:[%s10321_s6 + $0xe60] sm:$0xff]  ;;  %1647 = vst [vmem:[%s10326_s7 + $0x720] sm:$0xff] %v1646_v36  ;;  %1649 = vst [vmem:[%s10326_s7 + $0x728] sm:$0xff] %v1648_v37  ;;  %v1652_v39 = vld [vmem:[%s10321_s6 + $0xe70] sm:$0xff] }
  0x8d   : > { %1651 = vst [vmem:[%s10326_s7 + $0x730] sm:$0xff] %v1650_v38  ;;  %v1654_v40 = vld [vmem:[%s10321_s6 + $0xe80] sm:$0xff]  ;;  %v1656_v41 = vld [vmem:[%s10321_s6 + $0xe90] sm:$0xff]  ;;  %1653 = vst [vmem:[%s10326_s7 + $0x738] sm:$0xff] %v1652_v39 }
  0x8e   : > { %1655 = vst [vmem:[%s10326_s7 + $0x740] sm:$0xff] %v1654_v40  ;;  %1657 = vst [vmem:[%s10326_s7 + $0x748] sm:$0xff] %v1656_v41  ;;  %v1658_v42 = vld [vmem:[%s10321_s6 + $0xea0] sm:$0xff]  ;;  %v1660_v43 = vld [vmem:[%s10321_s6 + $0xeb0] sm:$0xff] }
  0x8f   : > { %v1662_v44 = vld [vmem:[%s10321_s6 + $0xec0] sm:$0xff]  ;;  %1659 = vst [vmem:[%s10326_s7 + $0x750] sm:$0xff] %v1658_v42  ;;  %1661 = vst [vmem:[%s10326_s7 + $0x758] sm:$0xff] %v1660_v43  ;;  %v1664_v45 = vld [vmem:[%s10321_s6 + $0xed0] sm:$0xff] }
  0x90   : > { %1663 = vst [vmem:[%s10326_s7 + $0x760] sm:$0xff] %v1662_v44  ;;  %v1666_v46 = vld [vmem:[%s10321_s6 + $0xee0] sm:$0xff]  ;;  %v1668_v47 = vld [vmem:[%s10321_s6 + $0xef0] sm:$0xff]  ;;  %1665 = vst [vmem:[%s10326_s7 + $0x768] sm:$0xff] %v1664_v45 }
  0x91   : > { %1667 = vst [vmem:[%s10326_s7 + $0x770] sm:$0xff] %v1666_v46  ;;  %1669 = vst [vmem:[%s10326_s7 + $0x778] sm:$0xff] %v1668_v47  ;;  %v1670_v48 = vld [vmem:[%s10321_s6 + $0xf00] sm:$0xff]  ;;  %v1672_v49 = vld [vmem:[%s10321_s6 + $0xf10] sm:$0xff] }
  0x92   : > { %v1674_v50 = vld [vmem:[%s10321_s6 + $0xf20] sm:$0xff]  ;;  %1671 = vst [vmem:[%s10326_s7 + $0x780] sm:$0xff] %v1670_v48  ;;  %1673 = vst [vmem:[%s10326_s7 + $0x788] sm:$0xff] %v1672_v49  ;;  %v1676_v51 = vld [vmem:[%s10321_s6 + $0xf30] sm:$0xff] }
  0x93   : > { %1675 = vst [vmem:[%s10326_s7 + $0x790] sm:$0xff] %v1674_v50  ;;  %v1678_v52 = vld [vmem:[%s10321_s6 + $0xf40] sm:$0xff]  ;;  %v1680_v53 = vld [vmem:[%s10321_s6 + $0xf50] sm:$0xff]  ;;  %1677 = vst [vmem:[%s10326_s7 + $0x798] sm:$0xff] %v1676_v51 }
  0x94   : > { %1679 = vst [vmem:[%s10326_s7 + $0x7a0] sm:$0xff] %v1678_v52  ;;  %1681 = vst [vmem:[%s10326_s7 + $0x7a8] sm:$0xff] %v1680_v53  ;;  %v1682_v54 = vld [vmem:[%s10321_s6 + $0xf60] sm:$0xff]  ;;  %v1684_v55 = vld [vmem:[%s10321_s6 + $0xf70] sm:$0xff] }
  0x95   : > { %v1686_v56 = vld [vmem:[%s10321_s6 + $0xf80] sm:$0xff]  ;;  %1683 = vst [vmem:[%s10326_s7 + $0x7b0] sm:$0xff] %v1682_v54  ;;  %1685 = vst [vmem:[%s10326_s7 + $0x7b8] sm:$0xff] %v1684_v55  ;;  %v1688_v57 = vld [vmem:[%s10321_s6 + $0xf90] sm:$0xff] }
  0x96   : > { %1687 = vst [vmem:[%s10326_s7 + $0x7c0] sm:$0xff] %v1686_v56  ;;  %v1690_v58 = vld [vmem:[%s10321_s6 + $0xfa0] sm:$0xff]  ;;  %v1692_v59 = vld [vmem:[%s10321_s6 + $0xfb0] sm:$0xff]  ;;  %1689 = vst [vmem:[%s10326_s7 + $0x7c8] sm:$0xff] %v1688_v57 }
  0x97   : > { %1691 = vst [vmem:[%s10326_s7 + $0x7d0] sm:$0xff] %v1690_v58  ;;  %1693 = vst [vmem:[%s10326_s7 + $0x7d8] sm:$0xff] %v1692_v59  ;;  %v1694_v60 = vld [vmem:[%s10321_s6 + $0xfc0] sm:$0xff]  ;;  %v1696_v61 = vld [vmem:[%s10321_s6 + $0xfd0] sm:$0xff] }
  0x98   : > { %v1698_v62 = vld [vmem:[%s10321_s6 + $0xfe0] sm:$0xff]  ;;  %1695 = vst [vmem:[%s10326_s7 + $0x7e0] sm:$0xff] %v1694_v60  ;;  %1697 = vst [vmem:[%s10326_s7 + $0x7e8] sm:$0xff] %v1696_v61  ;;  %v1700_v63 = vld [vmem:[%s10321_s6 + $0xff0] sm:$0xff] }
  0x99   : > { %1699 = vst [vmem:[%s10326_s7 + $0x7f0] sm:$0xff] %v1698_v62  ;;  %v1702_v0 = vld [vmem:[%s10321_s6 + $0x1000] sm:$0xff]  ;;  %v1704_v1 = vld [vmem:[%s10321_s6 + $0x1010] sm:$0xff]  ;;  %1701 = vst [vmem:[%s10326_s7 + $0x7f8] sm:$0xff] %v1700_v63 }
  0x9a   : > { %1703 = vst [vmem:[%s10326_s7 + $0x800] sm:$0xff] %v1702_v0  ;;  %1705 = vst [vmem:[%s10326_s7 + $0x808] sm:$0xff] %v1704_v1  ;;  %v1706_v2 = vld [vmem:[%s10321_s6 + $0x1020] sm:$0xff]  ;;  %v1708_v3 = vld [vmem:[%s10321_s6 + $0x1030] sm:$0xff] }
  0x9b   : > { %v1710_v4 = vld [vmem:[%s10321_s6 + $0x1040] sm:$0xff]  ;;  %1707 = vst [vmem:[%s10326_s7 + $0x810] sm:$0xff] %v1706_v2  ;;  %1709 = vst [vmem:[%s10326_s7 + $0x818] sm:$0xff] %v1708_v3  ;;  %v1712_v5 = vld [vmem:[%s10321_s6 + $0x1050] sm:$0xff] }
  0x9c   : > { %1711 = vst [vmem:[%s10326_s7 + $0x820] sm:$0xff] %v1710_v4  ;;  %v1714_v6 = vld [vmem:[%s10321_s6 + $0x1060] sm:$0xff]  ;;  %v1716_v7 = vld [vmem:[%s10321_s6 + $0x1070] sm:$0xff]  ;;  %1713 = vst [vmem:[%s10326_s7 + $0x828] sm:$0xff] %v1712_v5 }
  0x9d   : > { %1715 = vst [vmem:[%s10326_s7 + $0x830] sm:$0xff] %v1714_v6  ;;  %1717 = vst [vmem:[%s10326_s7 + $0x838] sm:$0xff] %v1716_v7  ;;  %v1718_v8 = vld [vmem:[%s10321_s6 + $0x1080] sm:$0xff]  ;;  %v1720_v9 = vld [vmem:[%s10321_s6 + $0x1090] sm:$0xff] }
  0x9e   : > { %v1722_v10 = vld [vmem:[%s10321_s6 + $0x10a0] sm:$0xff]  ;;  %1719 = vst [vmem:[%s10326_s7 + $0x840] sm:$0xff] %v1718_v8  ;;  %1721 = vst [vmem:[%s10326_s7 + $0x848] sm:$0xff] %v1720_v9  ;;  %v1724_v11 = vld [vmem:[%s10321_s6 + $0x10b0] sm:$0xff] }
  0x9f   : > { %1723 = vst [vmem:[%s10326_s7 + $0x850] sm:$0xff] %v1722_v10  ;;  %v1726_v12 = vld [vmem:[%s10321_s6 + $0x10c0] sm:$0xff]  ;;  %v1728_v13 = vld [vmem:[%s10321_s6 + $0x10d0] sm:$0xff]  ;;  %1725 = vst [vmem:[%s10326_s7 + $0x858] sm:$0xff] %v1724_v11 }
  0xa0   : > { %1727 = vst [vmem:[%s10326_s7 + $0x860] sm:$0xff] %v1726_v12  ;;  %1729 = vst [vmem:[%s10326_s7 + $0x868] sm:$0xff] %v1728_v13  ;;  %v1730_v14 = vld [vmem:[%s10321_s6 + $0x10e0] sm:$0xff]  ;;  %v1732_v15 = vld [vmem:[%s10321_s6 + $0x10f0] sm:$0xff] }
  0xa1   : > { %v1734_v16 = vld [vmem:[%s10321_s6 + $0x1100] sm:$0xff]  ;;  %1731 = vst [vmem:[%s10326_s7 + $0x870] sm:$0xff] %v1730_v14  ;;  %1733 = vst [vmem:[%s10326_s7 + $0x878] sm:$0xff] %v1732_v15  ;;  %v1736_v17 = vld [vmem:[%s10321_s6 + $0x1110] sm:$0xff] }
  0xa2   : > { %1735 = vst [vmem:[%s10326_s7 + $0x880] sm:$0xff] %v1734_v16  ;;  %v1738_v18 = vld [vmem:[%s10321_s6 + $0x1120] sm:$0xff]  ;;  %v1740_v19 = vld [vmem:[%s10321_s6 + $0x1130] sm:$0xff]  ;;  %1737 = vst [vmem:[%s10326_s7 + $0x888] sm:$0xff] %v1736_v17 }
  0xa3   : > { %1739 = vst [vmem:[%s10326_s7 + $0x890] sm:$0xff] %v1738_v18  ;;  %1741 = vst [vmem:[%s10326_s7 + $0x898] sm:$0xff] %v1740_v19  ;;  %v1742_v20 = vld [vmem:[%s10321_s6 + $0x1140] sm:$0xff]  ;;  %v1744_v21 = vld [vmem:[%s10321_s6 + $0x1150] sm:$0xff] }
  0xa4   : > { %v1746_v22 = vld [vmem:[%s10321_s6 + $0x1160] sm:$0xff]  ;;  %1743 = vst [vmem:[%s10326_s7 + $0x8a0] sm:$0xff] %v1742_v20  ;;  %1745 = vst [vmem:[%s10326_s7 + $0x8a8] sm:$0xff] %v1744_v21  ;;  %v1748_v23 = vld [vmem:[%s10321_s6 + $0x1170] sm:$0xff] }
  0xa5   : > { %1747 = vst [vmem:[%s10326_s7 + $0x8b0] sm:$0xff] %v1746_v22  ;;  %v1750_v24 = vld [vmem:[%s10321_s6 + $0x1180] sm:$0xff]  ;;  %v1752_v25 = vld [vmem:[%s10321_s6 + $0x1190] sm:$0xff]  ;;  %1749 = vst [vmem:[%s10326_s7 + $0x8b8] sm:$0xff] %v1748_v23 }
  0xa6   : > { %1751 = vst [vmem:[%s10326_s7 + $0x8c0] sm:$0xff] %v1750_v24  ;;  %1753 = vst [vmem:[%s10326_s7 + $0x8c8] sm:$0xff] %v1752_v25  ;;  %v1754_v26 = vld [vmem:[%s10321_s6 + $0x11a0] sm:$0xff]  ;;  %v1756_v27 = vld [vmem:[%s10321_s6 + $0x11b0] sm:$0xff] }
  0xa7   : > { %v1758_v28 = vld [vmem:[%s10321_s6 + $0x11c0] sm:$0xff]  ;;  %1755 = vst [vmem:[%s10326_s7 + $0x8d0] sm:$0xff] %v1754_v26  ;;  %1757 = vst [vmem:[%s10326_s7 + $0x8d8] sm:$0xff] %v1756_v27  ;;  %v1760_v29 = vld [vmem:[%s10321_s6 + $0x11d0] sm:$0xff] }
  0xa8   : > { %1759 = vst [vmem:[%s10326_s7 + $0x8e0] sm:$0xff] %v1758_v28  ;;  %v1762_v30 = vld [vmem:[%s10321_s6 + $0x11e0] sm:$0xff]  ;;  %v1764_v31 = vld [vmem:[%s10321_s6 + $0x11f0] sm:$0xff]  ;;  %1761 = vst [vmem:[%s10326_s7 + $0x8e8] sm:$0xff] %v1760_v29 }
  0xa9   : > { %1763 = vst [vmem:[%s10326_s7 + $0x8f0] sm:$0xff] %v1762_v30  ;;  %1765 = vst [vmem:[%s10326_s7 + $0x8f8] sm:$0xff] %v1764_v31  ;;  %v1766_v32 = vld [vmem:[%s10321_s6 + $0x1200] sm:$0xff]  ;;  %v1768_v33 = vld [vmem:[%s10321_s6 + $0x1210] sm:$0xff] }
  0xaa   : > { %v1770_v34 = vld [vmem:[%s10321_s6 + $0x1220] sm:$0xff]  ;;  %1767 = vst [vmem:[%s10326_s7 + $0x900] sm:$0xff] %v1766_v32  ;;  %1769 = vst [vmem:[%s10326_s7 + $0x908] sm:$0xff] %v1768_v33  ;;  %v1772_v35 = vld [vmem:[%s10321_s6 + $0x1230] sm:$0xff] }
  0xab   : > { %1771 = vst [vmem:[%s10326_s7 + $0x910] sm:$0xff] %v1770_v34  ;;  %v1774_v36 = vld [vmem:[%s10321_s6 + $0x1240] sm:$0xff]  ;;  %v1776_v37 = vld [vmem:[%s10321_s6 + $0x1250] sm:$0xff]  ;;  %1773 = vst [vmem:[%s10326_s7 + $0x918] sm:$0xff] %v1772_v35 }
  0xac   : > { %1775 = vst [vmem:[%s10326_s7 + $0x920] sm:$0xff] %v1774_v36  ;;  %1777 = vst [vmem:[%s10326_s7 + $0x928] sm:$0xff] %v1776_v37  ;;  %v1778_v38 = vld [vmem:[%s10321_s6 + $0x1260] sm:$0xff]  ;;  %v1780_v39 = vld [vmem:[%s10321_s6 + $0x1270] sm:$0xff] }
  0xad   : > { %v1782_v40 = vld [vmem:[%s10321_s6 + $0x1280] sm:$0xff]  ;;  %1779 = vst [vmem:[%s10326_s7 + $0x930] sm:$0xff] %v1778_v38  ;;  %1781 = vst [vmem:[%s10326_s7 + $0x938] sm:$0xff] %v1780_v39  ;;  %v1784_v41 = vld [vmem:[%s10321_s6 + $0x1290] sm:$0xff] }
  0xae   : > { %1783 = vst [vmem:[%s10326_s7 + $0x940] sm:$0xff] %v1782_v40  ;;  %v1786_v42 = vld [vmem:[%s10321_s6 + $0x12a0] sm:$0xff]  ;;  %v1788_v43 = vld [vmem:[%s10321_s6 + $0x12b0] sm:$0xff]  ;;  %1785 = vst [vmem:[%s10326_s7 + $0x948] sm:$0xff] %v1784_v41 }
  0xaf   : > { %1787 = vst [vmem:[%s10326_s7 + $0x950] sm:$0xff] %v1786_v42  ;;  %1789 = vst [vmem:[%s10326_s7 + $0x958] sm:$0xff] %v1788_v43  ;;  %v1790_v44 = vld [vmem:[%s10321_s6 + $0x12c0] sm:$0xff]  ;;  %v1792_v45 = vld [vmem:[%s10321_s6 + $0x12d0] sm:$0xff] }
  0xb0   : > { %v1794_v46 = vld [vmem:[%s10321_s6 + $0x12e0] sm:$0xff]  ;;  %1791 = vst [vmem:[%s10326_s7 + $0x960] sm:$0xff] %v1790_v44  ;;  %1793 = vst [vmem:[%s10326_s7 + $0x968] sm:$0xff] %v1792_v45  ;;  %v1796_v47 = vld [vmem:[%s10321_s6 + $0x12f0] sm:$0xff] }
  0xb1   : > { %1795 = vst [vmem:[%s10326_s7 + $0x970] sm:$0xff] %v1794_v46  ;;  %v1798_v48 = vld [vmem:[%s10321_s6 + $0x1300] sm:$0xff]  ;;  %v1800_v49 = vld [vmem:[%s10321_s6 + $0x1310] sm:$0xff]  ;;  %1797 = vst [vmem:[%s10326_s7 + $0x978] sm:$0xff] %v1796_v47 }
  0xb2   : > { %1799 = vst [vmem:[%s10326_s7 + $0x980] sm:$0xff] %v1798_v48  ;;  %1801 = vst [vmem:[%s10326_s7 + $0x988] sm:$0xff] %v1800_v49  ;;  %v1802_v50 = vld [vmem:[%s10321_s6 + $0x1320] sm:$0xff]  ;;  %v1804_v51 = vld [vmem:[%s10321_s6 + $0x1330] sm:$0xff] }
  0xb3   : > { %v1806_v52 = vld [vmem:[%s10321_s6 + $0x1340] sm:$0xff]  ;;  %1803 = vst [vmem:[%s10326_s7 + $0x990] sm:$0xff] %v1802_v50  ;;  %1805 = vst [vmem:[%s10326_s7 + $0x998] sm:$0xff] %v1804_v51  ;;  %v1808_v53 = vld [vmem:[%s10321_s6 + $0x1350] sm:$0xff] }
  0xb4   : > { %1807 = vst [vmem:[%s10326_s7 + $0x9a0] sm:$0xff] %v1806_v52  ;;  %v1810_v54 = vld [vmem:[%s10321_s6 + $0x1360] sm:$0xff]  ;;  %v1812_v55 = vld [vmem:[%s10321_s6 + $0x1370] sm:$0xff]  ;;  %1809 = vst [vmem:[%s10326_s7 + $0x9a8] sm:$0xff] %v1808_v53 }
  0xb5   : > { %1811 = vst [vmem:[%s10326_s7 + $0x9b0] sm:$0xff] %v1810_v54  ;;  %1813 = vst [vmem:[%s10326_s7 + $0x9b8] sm:$0xff] %v1812_v55  ;;  %v1814_v56 = vld [vmem:[%s10321_s6 + $0x1380] sm:$0xff]  ;;  %v1816_v57 = vld [vmem:[%s10321_s6 + $0x1390] sm:$0xff] }
  0xb6   : > { %v1818_v58 = vld [vmem:[%s10321_s6 + $0x13a0] sm:$0xff]  ;;  %1815 = vst [vmem:[%s10326_s7 + $0x9c0] sm:$0xff] %v1814_v56  ;;  %1817 = vst [vmem:[%s10326_s7 + $0x9c8] sm:$0xff] %v1816_v57  ;;  %v1820_v59 = vld [vmem:[%s10321_s6 + $0x13b0] sm:$0xff] }
  0xb7   : > { %1819 = vst [vmem:[%s10326_s7 + $0x9d0] sm:$0xff] %v1818_v58  ;;  %v1822_v60 = vld [vmem:[%s10321_s6 + $0x13c0] sm:$0xff]  ;;  %v1824_v61 = vld [vmem:[%s10321_s6 + $0x13d0] sm:$0xff]  ;;  %1821 = vst [vmem:[%s10326_s7 + $0x9d8] sm:$0xff] %v1820_v59 }
  0xb8   : > { %1823 = vst [vmem:[%s10326_s7 + $0x9e0] sm:$0xff] %v1822_v60  ;;  %1825 = vst [vmem:[%s10326_s7 + $0x9e8] sm:$0xff] %v1824_v61  ;;  %v1826_v62 = vld [vmem:[%s10321_s6 + $0x13e0] sm:$0xff]  ;;  %v1828_v63 = vld [vmem:[%s10321_s6 + $0x13f0] sm:$0xff] }
  0xb9   : > { %v1830_v0 = vld [vmem:[%s10321_s6 + $0x1400] sm:$0xff]  ;;  %1827 = vst [vmem:[%s10326_s7 + $0x9f0] sm:$0xff] %v1826_v62  ;;  %1829 = vst [vmem:[%s10326_s7 + $0x9f8] sm:$0xff] %v1828_v63  ;;  %v1832_v1 = vld [vmem:[%s10321_s6 + $0x1410] sm:$0xff] }
  0xba   : > { %1831 = vst [vmem:[%s10326_s7 + $0xa00] sm:$0xff] %v1830_v0  ;;  %v1834_v2 = vld [vmem:[%s10321_s6 + $0x1420] sm:$0xff]  ;;  %v1836_v3 = vld [vmem:[%s10321_s6 + $0x1430] sm:$0xff]  ;;  %1833 = vst [vmem:[%s10326_s7 + $0xa08] sm:$0xff] %v1832_v1 }
  0xbb   : > { %1835 = vst [vmem:[%s10326_s7 + $0xa10] sm:$0xff] %v1834_v2  ;;  %1837 = vst [vmem:[%s10326_s7 + $0xa18] sm:$0xff] %v1836_v3  ;;  %v1838_v4 = vld [vmem:[%s10321_s6 + $0x1440] sm:$0xff]  ;;  %v1840_v5 = vld [vmem:[%s10321_s6 + $0x1450] sm:$0xff] }
  0xbc   : > { %v1842_v6 = vld [vmem:[%s10321_s6 + $0x1460] sm:$0xff]  ;;  %1839 = vst [vmem:[%s10326_s7 + $0xa20] sm:$0xff] %v1838_v4  ;;  %1841 = vst [vmem:[%s10326_s7 + $0xa28] sm:$0xff] %v1840_v5  ;;  %v1844_v7 = vld [vmem:[%s10321_s6 + $0x1470] sm:$0xff] }
  0xbd   : > { %1843 = vst [vmem:[%s10326_s7 + $0xa30] sm:$0xff] %v1842_v6  ;;  %v1846_v8 = vld [vmem:[%s10321_s6 + $0x1480] sm:$0xff]  ;;  %v1848_v9 = vld [vmem:[%s10321_s6 + $0x1490] sm:$0xff]  ;;  %1845 = vst [vmem:[%s10326_s7 + $0xa38] sm:$0xff] %v1844_v7 }
  0xbe   : > { %1847 = vst [vmem:[%s10326_s7 + $0xa40] sm:$0xff] %v1846_v8  ;;  %1849 = vst [vmem:[%s10326_s7 + $0xa48] sm:$0xff] %v1848_v9  ;;  %v1850_v10 = vld [vmem:[%s10321_s6 + $0x14a0] sm:$0xff]  ;;  %v1852_v11 = vld [vmem:[%s10321_s6 + $0x14b0] sm:$0xff] }
  0xbf   : > { %v1854_v12 = vld [vmem:[%s10321_s6 + $0x14c0] sm:$0xff]  ;;  %1851 = vst [vmem:[%s10326_s7 + $0xa50] sm:$0xff] %v1850_v10  ;;  %1853 = vst [vmem:[%s10326_s7 + $0xa58] sm:$0xff] %v1852_v11  ;;  %v1856_v13 = vld [vmem:[%s10321_s6 + $0x14d0] sm:$0xff] }
  0xc0   : > { %1855 = vst [vmem:[%s10326_s7 + $0xa60] sm:$0xff] %v1854_v12  ;;  %v1858_v14 = vld [vmem:[%s10321_s6 + $0x14e0] sm:$0xff]  ;;  %v1860_v15 = vld [vmem:[%s10321_s6 + $0x14f0] sm:$0xff]  ;;  %1857 = vst [vmem:[%s10326_s7 + $0xa68] sm:$0xff] %v1856_v13 }
  0xc1   : > { %1859 = vst [vmem:[%s10326_s7 + $0xa70] sm:$0xff] %v1858_v14  ;;  %1861 = vst [vmem:[%s10326_s7 + $0xa78] sm:$0xff] %v1860_v15  ;;  %v1862_v16 = vld [vmem:[%s10321_s6 + $0x1500] sm:$0xff]  ;;  %v1864_v17 = vld [vmem:[%s10321_s6 + $0x1510] sm:$0xff] }
  0xc2   : > { %v1866_v18 = vld [vmem:[%s10321_s6 + $0x1520] sm:$0xff]  ;;  %1863 = vst [vmem:[%s10326_s7 + $0xa80] sm:$0xff] %v1862_v16  ;;  %1865 = vst [vmem:[%s10326_s7 + $0xa88] sm:$0xff] %v1864_v17  ;;  %v1868_v19 = vld [vmem:[%s10321_s6 + $0x1530] sm:$0xff] }
  0xc3   : > { %1867 = vst [vmem:[%s10326_s7 + $0xa90] sm:$0xff] %v1866_v18  ;;  %v1870_v20 = vld [vmem:[%s10321_s6 + $0x1540] sm:$0xff]  ;;  %v1872_v21 = vld [vmem:[%s10321_s6 + $0x1550] sm:$0xff]  ;;  %1869 = vst [vmem:[%s10326_s7 + $0xa98] sm:$0xff] %v1868_v19 }
  0xc4   : > { %1871 = vst [vmem:[%s10326_s7 + $0xaa0] sm:$0xff] %v1870_v20  ;;  %1873 = vst [vmem:[%s10326_s7 + $0xaa8] sm:$0xff] %v1872_v21  ;;  %v1874_v22 = vld [vmem:[%s10321_s6 + $0x1560] sm:$0xff]  ;;  %v1876_v23 = vld [vmem:[%s10321_s6 + $0x1570] sm:$0xff] }
  0xc5   : > { %v1878_v24 = vld [vmem:[%s10321_s6 + $0x1580] sm:$0xff]  ;;  %1875 = vst [vmem:[%s10326_s7 + $0xab0] sm:$0xff] %v1874_v22  ;;  %1877 = vst [vmem:[%s10326_s7 + $0xab8] sm:$0xff] %v1876_v23  ;;  %v1880_v25 = vld [vmem:[%s10321_s6 + $0x1590] sm:$0xff] }
  0xc6   : > { %1879 = vst [vmem:[%s10326_s7 + $0xac0] sm:$0xff] %v1878_v24  ;;  %v1882_v26 = vld [vmem:[%s10321_s6 + $0x15a0] sm:$0xff]  ;;  %v1884_v27 = vld [vmem:[%s10321_s6 + $0x15b0] sm:$0xff]  ;;  %1881 = vst [vmem:[%s10326_s7 + $0xac8] sm:$0xff] %v1880_v25 }
  0xc7   : > { %1883 = vst [vmem:[%s10326_s7 + $0xad0] sm:$0xff] %v1882_v26  ;;  %1885 = vst [vmem:[%s10326_s7 + $0xad8] sm:$0xff] %v1884_v27  ;;  %v1886_v28 = vld [vmem:[%s10321_s6 + $0x15c0] sm:$0xff]  ;;  %v1888_v29 = vld [vmem:[%s10321_s6 + $0x15d0] sm:$0xff] }
  0xc8   : > { %v1890_v30 = vld [vmem:[%s10321_s6 + $0x15e0] sm:$0xff]  ;;  %1887 = vst [vmem:[%s10326_s7 + $0xae0] sm:$0xff] %v1886_v28  ;;  %1889 = vst [vmem:[%s10326_s7 + $0xae8] sm:$0xff] %v1888_v29  ;;  %v1892_v31 = vld [vmem:[%s10321_s6 + $0x15f0] sm:$0xff] }
  0xc9   : > { %1891 = vst [vmem:[%s10326_s7 + $0xaf0] sm:$0xff] %v1890_v30  ;;  %v1894_v32 = vld [vmem:[%s10321_s6 + $0x1600] sm:$0xff]  ;;  %v1896_v33 = vld [vmem:[%s10321_s6 + $0x1610] sm:$0xff]  ;;  %1893 = vst [vmem:[%s10326_s7 + $0xaf8] sm:$0xff] %v1892_v31 }
  0xca   : > { %1895 = vst [vmem:[%s10326_s7 + $0xb00] sm:$0xff] %v1894_v32  ;;  %1897 = vst [vmem:[%s10326_s7 + $0xb08] sm:$0xff] %v1896_v33  ;;  %v1898_v34 = vld [vmem:[%s10321_s6 + $0x1620] sm:$0xff]  ;;  %v1900_v35 = vld [vmem:[%s10321_s6 + $0x1630] sm:$0xff] }
  0xcb   : > { %v1902_v36 = vld [vmem:[%s10321_s6 + $0x1640] sm:$0xff]  ;;  %1899 = vst [vmem:[%s10326_s7 + $0xb10] sm:$0xff] %v1898_v34  ;;  %1901 = vst [vmem:[%s10326_s7 + $0xb18] sm:$0xff] %v1900_v35  ;;  %v1904_v37 = vld [vmem:[%s10321_s6 + $0x1650] sm:$0xff] }
  0xcc   : > { %1903 = vst [vmem:[%s10326_s7 + $0xb20] sm:$0xff] %v1902_v36  ;;  %v1906_v38 = vld [vmem:[%s10321_s6 + $0x1660] sm:$0xff]  ;;  %v1908_v39 = vld [vmem:[%s10321_s6 + $0x1670] sm:$0xff]  ;;  %1905 = vst [vmem:[%s10326_s7 + $0xb28] sm:$0xff] %v1904_v37 }
  0xcd   : > { %1907 = vst [vmem:[%s10326_s7 + $0xb30] sm:$0xff] %v1906_v38  ;;  %1909 = vst [vmem:[%s10326_s7 + $0xb38] sm:$0xff] %v1908_v39  ;;  %v1910_v40 = vld [vmem:[%s10321_s6 + $0x1680] sm:$0xff]  ;;  %v1912_v41 = vld [vmem:[%s10321_s6 + $0x1690] sm:$0xff] }
  0xce   : > { %v1914_v42 = vld [vmem:[%s10321_s6 + $0x16a0] sm:$0xff]  ;;  %1911 = vst [vmem:[%s10326_s7 + $0xb40] sm:$0xff] %v1910_v40  ;;  %1913 = vst [vmem:[%s10326_s7 + $0xb48] sm:$0xff] %v1912_v41  ;;  %v1916_v43 = vld [vmem:[%s10321_s6 + $0x16b0] sm:$0xff] }
  0xcf   : > { %1915 = vst [vmem:[%s10326_s7 + $0xb50] sm:$0xff] %v1914_v42  ;;  %v1918_v44 = vld [vmem:[%s10321_s6 + $0x16c0] sm:$0xff]  ;;  %v1920_v45 = vld [vmem:[%s10321_s6 + $0x16d0] sm:$0xff]  ;;  %1917 = vst [vmem:[%s10326_s7 + $0xb58] sm:$0xff] %v1916_v43 }
  0xd0   : > { %1919 = vst [vmem:[%s10326_s7 + $0xb60] sm:$0xff] %v1918_v44  ;;  %1921 = vst [vmem:[%s10326_s7 + $0xb68] sm:$0xff] %v1920_v45  ;;  %v1922_v46 = vld [vmem:[%s10321_s6 + $0x16e0] sm:$0xff]  ;;  %v1924_v47 = vld [vmem:[%s10321_s6 + $0x16f0] sm:$0xff] }
  0xd1   : > { %v1926_v48 = vld [vmem:[%s10321_s6 + $0x1700] sm:$0xff]  ;;  %1923 = vst [vmem:[%s10326_s7 + $0xb70] sm:$0xff] %v1922_v46  ;;  %1925 = vst [vmem:[%s10326_s7 + $0xb78] sm:$0xff] %v1924_v47  ;;  %v1928_v49 = vld [vmem:[%s10321_s6 + $0x1710] sm:$0xff] }
  0xd2   : > { %1927 = vst [vmem:[%s10326_s7 + $0xb80] sm:$0xff] %v1926_v48  ;;  %v1930_v50 = vld [vmem:[%s10321_s6 + $0x1720] sm:$0xff]  ;;  %v1932_v51 = vld [vmem:[%s10321_s6 + $0x1730] sm:$0xff]  ;;  %1929 = vst [vmem:[%s10326_s7 + $0xb88] sm:$0xff] %v1928_v49 }
  0xd3   : > { %1931 = vst [vmem:[%s10326_s7 + $0xb90] sm:$0xff] %v1930_v50  ;;  %1933 = vst [vmem:[%s10326_s7 + $0xb98] sm:$0xff] %v1932_v51  ;;  %v1934_v52 = vld [vmem:[%s10321_s6 + $0x1740] sm:$0xff]  ;;  %v1936_v53 = vld [vmem:[%s10321_s6 + $0x1750] sm:$0xff] }
  0xd4   : > { %v1938_v54 = vld [vmem:[%s10321_s6 + $0x1760] sm:$0xff]  ;;  %1935 = vst [vmem:[%s10326_s7 + $0xba0] sm:$0xff] %v1934_v52  ;;  %1937 = vst [vmem:[%s10326_s7 + $0xba8] sm:$0xff] %v1936_v53  ;;  %v1940_v55 = vld [vmem:[%s10321_s6 + $0x1770] sm:$0xff] }
  0xd5   : > { %1939 = vst [vmem:[%s10326_s7 + $0xbb0] sm:$0xff] %v1938_v54  ;;  %v1942_v56 = vld [vmem:[%s10321_s6 + $0x1780] sm:$0xff]  ;;  %v1944_v57 = vld [vmem:[%s10321_s6 + $0x1790] sm:$0xff]  ;;  %1941 = vst [vmem:[%s10326_s7 + $0xbb8] sm:$0xff] %v1940_v55 }
  0xd6   : > { %1943 = vst [vmem:[%s10326_s7 + $0xbc0] sm:$0xff] %v1942_v56  ;;  %1945 = vst [vmem:[%s10326_s7 + $0xbc8] sm:$0xff] %v1944_v57  ;;  %v1946_v58 = vld [vmem:[%s10321_s6 + $0x17a0] sm:$0xff]  ;;  %v1948_v59 = vld [vmem:[%s10321_s6 + $0x17b0] sm:$0xff] }
  0xd7   : > { %v1950_v60 = vld [vmem:[%s10321_s6 + $0x17c0] sm:$0xff]  ;;  %1947 = vst [vmem:[%s10326_s7 + $0xbd0] sm:$0xff] %v1946_v58  ;;  %1949 = vst [vmem:[%s10326_s7 + $0xbd8] sm:$0xff] %v1948_v59  ;;  %v1952_v61 = vld [vmem:[%s10321_s6 + $0x17d0] sm:$0xff] }
  0xd8   : > { %1951 = vst [vmem:[%s10326_s7 + $0xbe0] sm:$0xff] %v1950_v60  ;;  %v1954_v62 = vld [vmem:[%s10321_s6 + $0x17e0] sm:$0xff]  ;;  %v1956_v63 = vld [vmem:[%s10321_s6 + $0x17f0] sm:$0xff]  ;;  %1953 = vst [vmem:[%s10326_s7 + $0xbe8] sm:$0xff] %v1952_v61 }
  0xd9   : > { %1955 = vst [vmem:[%s10326_s7 + $0xbf0] sm:$0xff] %v1954_v62  ;;  %1957 = vst [vmem:[%s10326_s7 + $0xbf8] sm:$0xff] %v1956_v63  ;;  %v1958_v0 = vld [vmem:[%s10321_s6 + $0x1800] sm:$0xff]  ;;  %v1960_v1 = vld [vmem:[%s10321_s6 + $0x1810] sm:$0xff] }
  0xda   : > { %v1962_v2 = vld [vmem:[%s10321_s6 + $0x1820] sm:$0xff]  ;;  %1959 = vst [vmem:[%s10326_s7 + $0xc00] sm:$0xff] %v1958_v0  ;;  %1961 = vst [vmem:[%s10326_s7 + $0xc08] sm:$0xff] %v1960_v1  ;;  %v1964_v3 = vld [vmem:[%s10321_s6 + $0x1830] sm:$0xff] }
  0xdb   : > { %1963 = vst [vmem:[%s10326_s7 + $0xc10] sm:$0xff] %v1962_v2  ;;  %v1966_v4 = vld [vmem:[%s10321_s6 + $0x1840] sm:$0xff]  ;;  %v1968_v5 = vld [vmem:[%s10321_s6 + $0x1850] sm:$0xff]  ;;  %1965 = vst [vmem:[%s10326_s7 + $0xc18] sm:$0xff] %v1964_v3 }
  0xdc   : > { %1967 = vst [vmem:[%s10326_s7 + $0xc20] sm:$0xff] %v1966_v4  ;;  %1969 = vst [vmem:[%s10326_s7 + $0xc28] sm:$0xff] %v1968_v5  ;;  %v1970_v6 = vld [vmem:[%s10321_s6 + $0x1860] sm:$0xff]  ;;  %v1972_v7 = vld [vmem:[%s10321_s6 + $0x1870] sm:$0xff] }
  0xdd   : > { %v1974_v8 = vld [vmem:[%s10321_s6 + $0x1880] sm:$0xff]  ;;  %1971 = vst [vmem:[%s10326_s7 + $0xc30] sm:$0xff] %v1970_v6  ;;  %1973 = vst [vmem:[%s10326_s7 + $0xc38] sm:$0xff] %v1972_v7  ;;  %v1976_v9 = vld [vmem:[%s10321_s6 + $0x1890] sm:$0xff] }
  0xde   : > { %1975 = vst [vmem:[%s10326_s7 + $0xc40] sm:$0xff] %v1974_v8  ;;  %v1978_v10 = vld [vmem:[%s10321_s6 + $0x18a0] sm:$0xff]  ;;  %v1980_v11 = vld [vmem:[%s10321_s6 + $0x18b0] sm:$0xff]  ;;  %1977 = vst [vmem:[%s10326_s7 + $0xc48] sm:$0xff] %v1976_v9 }
  0xdf   : > { %1979 = vst [vmem:[%s10326_s7 + $0xc50] sm:$0xff] %v1978_v10  ;;  %1981 = vst [vmem:[%s10326_s7 + $0xc58] sm:$0xff] %v1980_v11  ;;  %v1982_v12 = vld [vmem:[%s10321_s6 + $0x18c0] sm:$0xff]  ;;  %v1984_v13 = vld [vmem:[%s10321_s6 + $0x18d0] sm:$0xff] }
  0xe0   : > { %v1986_v14 = vld [vmem:[%s10321_s6 + $0x18e0] sm:$0xff]  ;;  %1983 = vst [vmem:[%s10326_s7 + $0xc60] sm:$0xff] %v1982_v12  ;;  %1985 = vst [vmem:[%s10326_s7 + $0xc68] sm:$0xff] %v1984_v13  ;;  %v1988_v15 = vld [vmem:[%s10321_s6 + $0x18f0] sm:$0xff] }
  0xe1   : > { %1987 = vst [vmem:[%s10326_s7 + $0xc70] sm:$0xff] %v1986_v14  ;;  %v1990_v16 = vld [vmem:[%s10321_s6 + $0x1900] sm:$0xff]  ;;  %v1992_v17 = vld [vmem:[%s10321_s6 + $0x1910] sm:$0xff]  ;;  %1989 = vst [vmem:[%s10326_s7 + $0xc78] sm:$0xff] %v1988_v15 }
  0xe2   : > { %1991 = vst [vmem:[%s10326_s7 + $0xc80] sm:$0xff] %v1990_v16  ;;  %1993 = vst [vmem:[%s10326_s7 + $0xc88] sm:$0xff] %v1992_v17  ;;  %v1994_v18 = vld [vmem:[%s10321_s6 + $0x1920] sm:$0xff]  ;;  %v1996_v19 = vld [vmem:[%s10321_s6 + $0x1930] sm:$0xff] }
  0xe3   : > { %v1998_v20 = vld [vmem:[%s10321_s6 + $0x1940] sm:$0xff]  ;;  %1995 = vst [vmem:[%s10326_s7 + $0xc90] sm:$0xff] %v1994_v18  ;;  %1997 = vst [vmem:[%s10326_s7 + $0xc98] sm:$0xff] %v1996_v19  ;;  %v2000_v21 = vld [vmem:[%s10321_s6 + $0x1950] sm:$0xff] }
  0xe4   : > { %1999 = vst [vmem:[%s10326_s7 + $0xca0] sm:$0xff] %v1998_v20  ;;  %v2002_v22 = vld [vmem:[%s10321_s6 + $0x1960] sm:$0xff]  ;;  %v2004_v23 = vld [vmem:[%s10321_s6 + $0x1970] sm:$0xff]  ;;  %2001 = vst [vmem:[%s10326_s7 + $0xca8] sm:$0xff] %v2000_v21 }
  0xe5   : > { %2003 = vst [vmem:[%s10326_s7 + $0xcb0] sm:$0xff] %v2002_v22  ;;  %2005 = vst [vmem:[%s10326_s7 + $0xcb8] sm:$0xff] %v2004_v23  ;;  %v2006_v24 = vld [vmem:[%s10321_s6 + $0x1980] sm:$0xff]  ;;  %v2008_v25 = vld [vmem:[%s10321_s6 + $0x1990] sm:$0xff] }
  0xe6   : > { %v2010_v26 = vld [vmem:[%s10321_s6 + $0x19a0] sm:$0xff]  ;;  %2007 = vst [vmem:[%s10326_s7 + $0xcc0] sm:$0xff] %v2006_v24  ;;  %2009 = vst [vmem:[%s10326_s7 + $0xcc8] sm:$0xff] %v2008_v25  ;;  %v2012_v27 = vld [vmem:[%s10321_s6 + $0x19b0] sm:$0xff] }
  0xe7   : > { %2011 = vst [vmem:[%s10326_s7 + $0xcd0] sm:$0xff] %v2010_v26  ;;  %v2014_v28 = vld [vmem:[%s10321_s6 + $0x19c0] sm:$0xff]  ;;  %v2016_v29 = vld [vmem:[%s10321_s6 + $0x19d0] sm:$0xff]  ;;  %2013 = vst [vmem:[%s10326_s7 + $0xcd8] sm:$0xff] %v2012_v27 }
  0xe8   : > { %2015 = vst [vmem:[%s10326_s7 + $0xce0] sm:$0xff] %v2014_v28  ;;  %2017 = vst [vmem:[%s10326_s7 + $0xce8] sm:$0xff] %v2016_v29  ;;  %v2018_v30 = vld [vmem:[%s10321_s6 + $0x19e0] sm:$0xff]  ;;  %v2020_v31 = vld [vmem:[%s10321_s6 + $0x19f0] sm:$0xff] }
  0xe9   : > { %v2022_v32 = vld [vmem:[%s10321_s6 + $0x1a00] sm:$0xff]  ;;  %2019 = vst [vmem:[%s10326_s7 + $0xcf0] sm:$0xff] %v2018_v30  ;;  %2021 = vst [vmem:[%s10326_s7 + $0xcf8] sm:$0xff] %v2020_v31  ;;  %v2024_v33 = vld [vmem:[%s10321_s6 + $0x1a10] sm:$0xff] }
  0xea   : > { %2023 = vst [vmem:[%s10326_s7 + $0xd00] sm:$0xff] %v2022_v32  ;;  %v2026_v34 = vld [vmem:[%s10321_s6 + $0x1a20] sm:$0xff]  ;;  %v2028_v35 = vld [vmem:[%s10321_s6 + $0x1a30] sm:$0xff]  ;;  %2025 = vst [vmem:[%s10326_s7 + $0xd08] sm:$0xff] %v2024_v33 }
  0xeb   : > { %2027 = vst [vmem:[%s10326_s7 + $0xd10] sm:$0xff] %v2026_v34  ;;  %2029 = vst [vmem:[%s10326_s7 + $0xd18] sm:$0xff] %v2028_v35  ;;  %v2030_v36 = vld [vmem:[%s10321_s6 + $0x1a40] sm:$0xff]  ;;  %v2032_v37 = vld [vmem:[%s10321_s6 + $0x1a50] sm:$0xff] }
  0xec   : > { %v2034_v38 = vld [vmem:[%s10321_s6 + $0x1a60] sm:$0xff]  ;;  %2031 = vst [vmem:[%s10326_s7 + $0xd20] sm:$0xff] %v2030_v36  ;;  %2033 = vst [vmem:[%s10326_s7 + $0xd28] sm:$0xff] %v2032_v37  ;;  %v2036_v39 = vld [vmem:[%s10321_s6 + $0x1a70] sm:$0xff] }
  0xed   : > { %2035 = vst [vmem:[%s10326_s7 + $0xd30] sm:$0xff] %v2034_v38  ;;  %v2038_v40 = vld [vmem:[%s10321_s6 + $0x1a80] sm:$0xff]  ;;  %v2040_v41 = vld [vmem:[%s10321_s6 + $0x1a90] sm:$0xff]  ;;  %2037 = vst [vmem:[%s10326_s7 + $0xd38] sm:$0xff] %v2036_v39 }
  0xee   : > { %2039 = vst [vmem:[%s10326_s7 + $0xd40] sm:$0xff] %v2038_v40  ;;  %2041 = vst [vmem:[%s10326_s7 + $0xd48] sm:$0xff] %v2040_v41  ;;  %v2042_v42 = vld [vmem:[%s10321_s6 + $0x1aa0] sm:$0xff]  ;;  %v2044_v43 = vld [vmem:[%s10321_s6 + $0x1ab0] sm:$0xff] }
  0xef   : > { %v2046_v44 = vld [vmem:[%s10321_s6 + $0x1ac0] sm:$0xff]  ;;  %2043 = vst [vmem:[%s10326_s7 + $0xd50] sm:$0xff] %v2042_v42  ;;  %2045 = vst [vmem:[%s10326_s7 + $0xd58] sm:$0xff] %v2044_v43  ;;  %v2048_v45 = vld [vmem:[%s10321_s6 + $0x1ad0] sm:$0xff] }
  0xf0   : > { %2047 = vst [vmem:[%s10326_s7 + $0xd60] sm:$0xff] %v2046_v44  ;;  %v2050_v46 = vld [vmem:[%s10321_s6 + $0x1ae0] sm:$0xff]  ;;  %v2052_v47 = vld [vmem:[%s10321_s6 + $0x1af0] sm:$0xff]  ;;  %2049 = vst [vmem:[%s10326_s7 + $0xd68] sm:$0xff] %v2048_v45 }
  0xf1   : > { %2051 = vst [vmem:[%s10326_s7 + $0xd70] sm:$0xff] %v2050_v46  ;;  %2053 = vst [vmem:[%s10326_s7 + $0xd78] sm:$0xff] %v2052_v47  ;;  %v2054_v48 = vld [vmem:[%s10321_s6 + $0x1b00] sm:$0xff]  ;;  %v2056_v49 = vld [vmem:[%s10321_s6 + $0x1b10] sm:$0xff] }
  0xf2   : > { %v2058_v50 = vld [vmem:[%s10321_s6 + $0x1b20] sm:$0xff]  ;;  %2055 = vst [vmem:[%s10326_s7 + $0xd80] sm:$0xff] %v2054_v48  ;;  %2057 = vst [vmem:[%s10326_s7 + $0xd88] sm:$0xff] %v2056_v49  ;;  %v2060_v51 = vld [vmem:[%s10321_s6 + $0x1b30] sm:$0xff] }
  0xf3   : > { %2059 = vst [vmem:[%s10326_s7 + $0xd90] sm:$0xff] %v2058_v50  ;;  %v2062_v52 = vld [vmem:[%s10321_s6 + $0x1b40] sm:$0xff]  ;;  %v2064_v53 = vld [vmem:[%s10321_s6 + $0x1b50] sm:$0xff]  ;;  %2061 = vst [vmem:[%s10326_s7 + $0xd98] sm:$0xff] %v2060_v51 }
  0xf4   : > { %2063 = vst [vmem:[%s10326_s7 + $0xda0] sm:$0xff] %v2062_v52  ;;  %2065 = vst [vmem:[%s10326_s7 + $0xda8] sm:$0xff] %v2064_v53  ;;  %v2066_v54 = vld [vmem:[%s10321_s6 + $0x1b60] sm:$0xff]  ;;  %v2068_v55 = vld [vmem:[%s10321_s6 + $0x1b70] sm:$0xff] }
  0xf5   : > { %v2070_v56 = vld [vmem:[%s10321_s6 + $0x1b80] sm:$0xff]  ;;  %2067 = vst [vmem:[%s10326_s7 + $0xdb0] sm:$0xff] %v2066_v54  ;;  %2069 = vst [vmem:[%s10326_s7 + $0xdb8] sm:$0xff] %v2068_v55  ;;  %v2072_v57 = vld [vmem:[%s10321_s6 + $0x1b90] sm:$0xff] }
  0xf6   : > { %2071 = vst [vmem:[%s10326_s7 + $0xdc0] sm:$0xff] %v2070_v56  ;;  %v2074_v58 = vld [vmem:[%s10321_s6 + $0x1ba0] sm:$0xff]  ;;  %v2076_v59 = vld [vmem:[%s10321_s6 + $0x1bb0] sm:$0xff]  ;;  %2073 = vst [vmem:[%s10326_s7 + $0xdc8] sm:$0xff] %v2072_v57 }
  0xf7   : > { %2075 = vst [vmem:[%s10326_s7 + $0xdd0] sm:$0xff] %v2074_v58  ;;  %2077 = vst [vmem:[%s10326_s7 + $0xdd8] sm:$0xff] %v2076_v59  ;;  %v2078_v60 = vld [vmem:[%s10321_s6 + $0x1bc0] sm:$0xff]  ;;  %v2080_v61 = vld [vmem:[%s10321_s6 + $0x1bd0] sm:$0xff] }
  0xf8   : > { %v2082_v62 = vld [vmem:[%s10321_s6 + $0x1be0] sm:$0xff]  ;;  %2079 = vst [vmem:[%s10326_s7 + $0xde0] sm:$0xff] %v2078_v60  ;;  %2081 = vst [vmem:[%s10326_s7 + $0xde8] sm:$0xff] %v2080_v61  ;;  %v2084_v63 = vld [vmem:[%s10321_s6 + $0x1bf0] sm:$0xff] }
  0xf9   : > { %2083 = vst [vmem:[%s10326_s7 + $0xdf0] sm:$0xff] %v2082_v62  ;;  %v2086_v0 = vld [vmem:[%s10321_s6 + $0x1c00] sm:$0xff]  ;;  %v2088_v1 = vld [vmem:[%s10321_s6 + $0x1c10] sm:$0xff]  ;;  %2085 = vst [vmem:[%s10326_s7 + $0xdf8] sm:$0xff] %v2084_v63 }
  0xfa   : > { %2087 = vst [vmem:[%s10326_s7 + $0xe00] sm:$0xff] %v2086_v0  ;;  %2089 = vst [vmem:[%s10326_s7 + $0xe08] sm:$0xff] %v2088_v1  ;;  %v2090_v2 = vld [vmem:[%s10321_s6 + $0x1c20] sm:$0xff]  ;;  %v2092_v3 = vld [vmem:[%s10321_s6 + $0x1c30] sm:$0xff] }
  0xfb   : > { %v2094_v4 = vld [vmem:[%s10321_s6 + $0x1c40] sm:$0xff]  ;;  %2091 = vst [vmem:[%s10326_s7 + $0xe10] sm:$0xff] %v2090_v2  ;;  %2093 = vst [vmem:[%s10326_s7 + $0xe18] sm:$0xff] %v2092_v3  ;;  %v2096_v5 = vld [vmem:[%s10321_s6 + $0x1c50] sm:$0xff] }
  0xfc   : > { %2095 = vst [vmem:[%s10326_s7 + $0xe20] sm:$0xff] %v2094_v4  ;;  %v2098_v6 = vld [vmem:[%s10321_s6 + $0x1c60] sm:$0xff]  ;;  %v2100_v7 = vld [vmem:[%s10321_s6 + $0x1c70] sm:$0xff]  ;;  %2097 = vst [vmem:[%s10326_s7 + $0xe28] sm:$0xff] %v2096_v5 }
  0xfd   : > { %2099 = vst [vmem:[%s10326_s7 + $0xe30] sm:$0xff] %v2098_v6  ;;  %2101 = vst [vmem:[%s10326_s7 + $0xe38] sm:$0xff] %v2100_v7  ;;  %v2102_v8 = vld [vmem:[%s10321_s6 + $0x1c80] sm:$0xff]  ;;  %v2104_v9 = vld [vmem:[%s10321_s6 + $0x1c90] sm:$0xff] }
  0xfe   : > { %v2106_v10 = vld [vmem:[%s10321_s6 + $0x1ca0] sm:$0xff]  ;;  %2103 = vst [vmem:[%s10326_s7 + $0xe40] sm:$0xff] %v2102_v8  ;;  %2105 = vst [vmem:[%s10326_s7 + $0xe48] sm:$0xff] %v2104_v9  ;;  %v2108_v11 = vld [vmem:[%s10321_s6 + $0x1cb0] sm:$0xff] }
  0xff   : > { %2107 = vst [vmem:[%s10326_s7 + $0xe50] sm:$0xff] %v2106_v10  ;;  %v2110_v12 = vld [vmem:[%s10321_s6 + $0x1cc0] sm:$0xff]  ;;  %v2112_v13 = vld [vmem:[%s10321_s6 + $0x1cd0] sm:$0xff]  ;;  %2109 = vst [vmem:[%s10326_s7 + $0xe58] sm:$0xff] %v2108_v11 }
 0x100   : > { %2111 = vst [vmem:[%s10326_s7 + $0xe60] sm:$0xff] %v2110_v12  ;;  %2113 = vst [vmem:[%s10326_s7 + $0xe68] sm:$0xff] %v2112_v13  ;;  %v2114_v14 = vld [vmem:[%s10321_s6 + $0x1ce0] sm:$0xff]  ;;  %v2116_v15 = vld [vmem:[%s10321_s6 + $0x1cf0] sm:$0xff] }
 0x101   : > { %v2118_v16 = vld [vmem:[%s10321_s6 + $0x1d00] sm:$0xff]  ;;  %2115 = vst [vmem:[%s10326_s7 + $0xe70] sm:$0xff] %v2114_v14  ;;  %2117 = vst [vmem:[%s10326_s7 + $0xe78] sm:$0xff] %v2116_v15  ;;  %v2120_v17 = vld [vmem:[%s10321_s6 + $0x1d10] sm:$0xff] }
 0x102   : > { %2119 = vst [vmem:[%s10326_s7 + $0xe80] sm:$0xff] %v2118_v16  ;;  %v2122_v18 = vld [vmem:[%s10321_s6 + $0x1d20] sm:$0xff]  ;;  %v2124_v19 = vld [vmem:[%s10321_s6 + $0x1d30] sm:$0xff]  ;;  %2121 = vst [vmem:[%s10326_s7 + $0xe88] sm:$0xff] %v2120_v17 }
 0x103   : > { %2123 = vst [vmem:[%s10326_s7 + $0xe90] sm:$0xff] %v2122_v18  ;;  %2125 = vst [vmem:[%s10326_s7 + $0xe98] sm:$0xff] %v2124_v19  ;;  %v2126_v20 = vld [vmem:[%s10321_s6 + $0x1d40] sm:$0xff]  ;;  %v2128_v21 = vld [vmem:[%s10321_s6 + $0x1d50] sm:$0xff] }
 0x104   : > { %v2130_v22 = vld [vmem:[%s10321_s6 + $0x1d60] sm:$0xff]  ;;  %2127 = vst [vmem:[%s10326_s7 + $0xea0] sm:$0xff] %v2126_v20  ;;  %2129 = vst [vmem:[%s10326_s7 + $0xea8] sm:$0xff] %v2128_v21  ;;  %v2132_v23 = vld [vmem:[%s10321_s6 + $0x1d70] sm:$0xff] }
 0x105   : > { %2131 = vst [vmem:[%s10326_s7 + $0xeb0] sm:$0xff] %v2130_v22  ;;  %v2134_v24 = vld [vmem:[%s10321_s6 + $0x1d80] sm:$0xff]  ;;  %v2136_v25 = vld [vmem:[%s10321_s6 + $0x1d90] sm:$0xff]  ;;  %2133 = vst [vmem:[%s10326_s7 + $0xeb8] sm:$0xff] %v2132_v23 }
 0x106   : > { %2135 = vst [vmem:[%s10326_s7 + $0xec0] sm:$0xff] %v2134_v24  ;;  %2137 = vst [vmem:[%s10326_s7 + $0xec8] sm:$0xff] %v2136_v25  ;;  %v2138_v26 = vld [vmem:[%s10321_s6 + $0x1da0] sm:$0xff]  ;;  %v2140_v27 = vld [vmem:[%s10321_s6 + $0x1db0] sm:$0xff] }
 0x107   : > { %v2142_v28 = vld [vmem:[%s10321_s6 + $0x1dc0] sm:$0xff]  ;;  %2139 = vst [vmem:[%s10326_s7 + $0xed0] sm:$0xff] %v2138_v26  ;;  %2141 = vst [vmem:[%s10326_s7 + $0xed8] sm:$0xff] %v2140_v27  ;;  %v2144_v29 = vld [vmem:[%s10321_s6 + $0x1dd0] sm:$0xff] }
 0x108   : > { %2143 = vst [vmem:[%s10326_s7 + $0xee0] sm:$0xff] %v2142_v28  ;;  %v2146_v30 = vld [vmem:[%s10321_s6 + $0x1de0] sm:$0xff]  ;;  %v2148_v31 = vld [vmem:[%s10321_s6 + $0x1df0] sm:$0xff]  ;;  %2145 = vst [vmem:[%s10326_s7 + $0xee8] sm:$0xff] %v2144_v29 }
 0x109   : > { %2147 = vst [vmem:[%s10326_s7 + $0xef0] sm:$0xff] %v2146_v30  ;;  %2149 = vst [vmem:[%s10326_s7 + $0xef8] sm:$0xff] %v2148_v31  ;;  %v2150_v32 = vld [vmem:[%s10321_s6 + $0x1e00] sm:$0xff]  ;;  %v2152_v33 = vld [vmem:[%s10321_s6 + $0x1e10] sm:$0xff] }
 0x10a   : > { %v2154_v34 = vld [vmem:[%s10321_s6 + $0x1e20] sm:$0xff]  ;;  %2151 = vst [vmem:[%s10326_s7 + $0xf00] sm:$0xff] %v2150_v32  ;;  %2153 = vst [vmem:[%s10326_s7 + $0xf08] sm:$0xff] %v2152_v33  ;;  %v2156_v35 = vld [vmem:[%s10321_s6 + $0x1e30] sm:$0xff] }
 0x10b   : > { %2155 = vst [vmem:[%s10326_s7 + $0xf10] sm:$0xff] %v2154_v34  ;;  %v2158_v36 = vld [vmem:[%s10321_s6 + $0x1e40] sm:$0xff]  ;;  %v2160_v37 = vld [vmem:[%s10321_s6 + $0x1e50] sm:$0xff]  ;;  %2157 = vst [vmem:[%s10326_s7 + $0xf18] sm:$0xff] %v2156_v35 }
 0x10c   : > { %2159 = vst [vmem:[%s10326_s7 + $0xf20] sm:$0xff] %v2158_v36  ;;  %2161 = vst [vmem:[%s10326_s7 + $0xf28] sm:$0xff] %v2160_v37  ;;  %v2162_v38 = vld [vmem:[%s10321_s6 + $0x1e60] sm:$0xff]  ;;  %v2164_v39 = vld [vmem:[%s10321_s6 + $0x1e70] sm:$0xff] }
 0x10d   : > { %v2166_v40 = vld [vmem:[%s10321_s6 + $0x1e80] sm:$0xff]  ;;  %2163 = vst [vmem:[%s10326_s7 + $0xf30] sm:$0xff] %v2162_v38  ;;  %2165 = vst [vmem:[%s10326_s7 + $0xf38] sm:$0xff] %v2164_v39  ;;  %v2168_v41 = vld [vmem:[%s10321_s6 + $0x1e90] sm:$0xff] }
 0x10e   : > { %2167 = vst [vmem:[%s10326_s7 + $0xf40] sm:$0xff] %v2166_v40  ;;  %v2170_v42 = vld [vmem:[%s10321_s6 + $0x1ea0] sm:$0xff]  ;;  %v2172_v43 = vld [vmem:[%s10321_s6 + $0x1eb0] sm:$0xff]  ;;  %2169 = vst [vmem:[%s10326_s7 + $0xf48] sm:$0xff] %v2168_v41 }
 0x10f   : > { %2171 = vst [vmem:[%s10326_s7 + $0xf50] sm:$0xff] %v2170_v42  ;;  %2173 = vst [vmem:[%s10326_s7 + $0xf58] sm:$0xff] %v2172_v43  ;;  %v2174_v44 = vld [vmem:[%s10321_s6 + $0x1ec0] sm:$0xff]  ;;  %v2176_v45 = vld [vmem:[%s10321_s6 + $0x1ed0] sm:$0xff] }
 0x110   : > { %v2178_v46 = vld [vmem:[%s10321_s6 + $0x1ee0] sm:$0xff]  ;;  %2175 = vst [vmem:[%s10326_s7 + $0xf60] sm:$0xff] %v2174_v44  ;;  %2177 = vst [vmem:[%s10326_s7 + $0xf68] sm:$0xff] %v2176_v45  ;;  %v2180_v47 = vld [vmem:[%s10321_s6 + $0x1ef0] sm:$0xff] }
 0x111   : > { %2179 = vst [vmem:[%s10326_s7 + $0xf70] sm:$0xff] %v2178_v46  ;;  %v2182_v48 = vld [vmem:[%s10321_s6 + $0x1f00] sm:$0xff]  ;;  %v2184_v49 = vld [vmem:[%s10321_s6 + $0x1f10] sm:$0xff]  ;;  %2181 = vst [vmem:[%s10326_s7 + $0xf78] sm:$0xff] %v2180_v47 }
 0x112   : > { %2183 = vst [vmem:[%s10326_s7 + $0xf80] sm:$0xff] %v2182_v48  ;;  %2185 = vst [vmem:[%s10326_s7 + $0xf88] sm:$0xff] %v2184_v49  ;;  %v2186_v50 = vld [vmem:[%s10321_s6 + $0x1f20] sm:$0xff]  ;;  %v2188_v51 = vld [vmem:[%s10321_s6 + $0x1f30] sm:$0xff] }
 0x113   : > { %v2190_v52 = vld [vmem:[%s10321_s6 + $0x1f40] sm:$0xff]  ;;  %2187 = vst [vmem:[%s10326_s7 + $0xf90] sm:$0xff] %v2186_v50  ;;  %2189 = vst [vmem:[%s10326_s7 + $0xf98] sm:$0xff] %v2188_v51  ;;  %v2192_v53 = vld [vmem:[%s10321_s6 + $0x1f50] sm:$0xff] }
 0x114   : > { %2191 = vst [vmem:[%s10326_s7 + $0xfa0] sm:$0xff] %v2190_v52  ;;  %v2194_v54 = vld [vmem:[%s10321_s6 + $0x1f60] sm:$0xff]  ;;  %v2196_v55 = vld [vmem:[%s10321_s6 + $0x1f70] sm:$0xff]  ;;  %2193 = vst [vmem:[%s10326_s7 + $0xfa8] sm:$0xff] %v2192_v53 }
 0x115   : > { %2195 = vst [vmem:[%s10326_s7 + $0xfb0] sm:$0xff] %v2194_v54  ;;  %2197 = vst [vmem:[%s10326_s7 + $0xfb8] sm:$0xff] %v2196_v55  ;;  %v2198_v56 = vld [vmem:[%s10321_s6 + $0x1f80] sm:$0xff]  ;;  %v2200_v57 = vld [vmem:[%s10321_s6 + $0x1f90] sm:$0xff] }
 0x116   : > { %v2202_v58 = vld [vmem:[%s10321_s6 + $0x1fa0] sm:$0xff]  ;;  %2199 = vst [vmem:[%s10326_s7 + $0xfc0] sm:$0xff] %v2198_v56  ;;  %2201 = vst [vmem:[%s10326_s7 + $0xfc8] sm:$0xff] %v2200_v57  ;;  %v2204_v59 = vld [vmem:[%s10321_s6 + $0x1fb0] sm:$0xff] }
 0x117   : > { %2203 = vst [vmem:[%s10326_s7 + $0xfd0] sm:$0xff] %v2202_v58  ;;  %v2206_v60 = vld [vmem:[%s10321_s6 + $0x1fc0] sm:$0xff]  ;;  %v2208_v61 = vld [vmem:[%s10321_s6 + $0x1fd0] sm:$0xff]  ;;  %2205 = vst [vmem:[%s10326_s7 + $0xfd8] sm:$0xff] %v2204_v59 }
 0x118   : > { %2207 = vst [vmem:[%s10326_s7 + $0xfe0] sm:$0xff] %v2206_v60  ;;  %2209 = vst [vmem:[%s10326_s7 + $0xfe8] sm:$0xff] %v2208_v61  ;;  %v2210_v62 = vld [vmem:[%s10321_s6 + $0x1fe0] sm:$0xff]  ;;  %v2212_v63 = vld [vmem:[%s10321_s6 + $0x1ff0] sm:$0xff] }
 0x119   : > { %2211 = vst [vmem:[%s10326_s7 + $0xff0] sm:$0xff] %v2210_v62  ;;  %2213 = vst [vmem:[%s10326_s7 + $0xff8] sm:$0xff] %v2212_v63 }
 0x11a PF: > { %p8734_p11 = scmp.ge.s32.totalorder %s10224_s17, 1  ;;  %p4303_p12 = scmp.lt.s32.totalorder %s10224_s17, 5 }
 0x11c   : > { %p4304_p13 = pnand %p8734_p11, %p4303_p12 }
 0x11e   : > { %4307 = sbr.rel (%p4304_p13) target bundleno = 1029 (0x405), region = 76 }
 0x123   : > { %s4310_s8 = sand.u32 1, %s10200_s11   ;;  %p4335_p0 = scmp.lt.s32.totalorder %s10212_s14, 1 }
 0x124   : > { %s8735_s18 = sshll.u32 %s4310_s8, 12  ;;  %s4332_s29 = sand.u32 1, %s10192_s9  }
 0x125   : > { %s11352_s21 = scalar_lea.vmem [#allocation2], %s8735_s18  ;;  %s8736_s30 = sshll.u32 %s4332_s29, 5 }
 0x126   : > { %v9386_v0 = vld [vmem:[%s11352_s21 + $0x874] ss:$8 sps:$4 sm:$0xff]   ;;  %v9390_v2 = vld [vmem:[%s11352_s21 + $0x870] ss:$8 sps:$4 sm:$0xff]   ;;  %v9392_v4 = vld [vmem:[%s11352_s21 + $0x864] ss:$8 sps:$4 sm:$0xff]  }
 0x127   : > { %v9388_v1 = vld [vmem:[%s11352_s21 + $0x974] ss:$8 sps:$4 sm:$0xff]   ;;  %6342 = vmatprep.subr.bf16.mxu0 %v9386_v0  ;;  %v9391_v3 = vld [vmem:[%s11352_s21 + $0x970] ss:$8 sps:$4 sm:$0xff]   ;;  %v9394_v5 = vld [vmem:[%s11352_s21 + $0x964] ss:$8 sps:$4 sm:$0xff]  }
 0x128   : > { %6395 = vmatprep.subr.bf16.mxu1 %v9388_v1  ;;  %6343 = vmatpush1.bf16.msra.mxu0 %v9390_v2  ;;  %v9396_v6 = vld [vmem:[%s11352_s21 + $0x860] ss:$8 sps:$4 sm:$0xff]   ;;  %v9398_v8 = vld [vmem:[%s11352_s21 + $0x854] ss:$8 sps:$4 sm:$0xff]   ;;  %v9402_v10 = vld [vmem:[%s11352_s21 + $0x850] ss:$8 sps:$4 sm:$0xff]  }
 0x129   : > { %6396 = vmatpush1.bf16.msra.mxu1 %v9391_v3  ;;  %6344 = vmatprep.subr.bf16.mxu0 %v9392_v4  ;;  %v9397_v7 = vld [vmem:[%s11352_s21 + $0x960] ss:$8 sps:$4 sm:$0xff]   ;;  %v9400_v9 = vld [vmem:[%s11352_s21 + $0x954] ss:$8 sps:$4 sm:$0xff]   ;;  %v9403_v11 = vld [vmem:[%s11352_s21 + $0x950] ss:$8 sps:$4 sm:$0xff]  }
 0x12a   : > { %6397 = vmatprep.subr.bf16.mxu1 %v9394_v5  ;;  %v9404_v12 = vld [vmem:[%s11352_s21 + $0x844] ss:$8 sps:$4 sm:$0xff]   ;;  %v9408_v14 = vld [vmem:[%s11352_s21 + $0x840] ss:$8 sps:$4 sm:$0xff]   ;;  %v9410_v16 = vld [vmem:[%s11352_s21 + $0x834] ss:$8 sps:$4 sm:$0xff]  }
 0x12b   : > { %v9406_v13 = vld [vmem:[%s11352_s21 + $0x944] ss:$8 sps:$4 sm:$0xff]   ;;  %v9409_v15 = vld [vmem:[%s11352_s21 + $0x940] ss:$8 sps:$4 sm:$0xff]   ;;  %v9412_v17 = vld [vmem:[%s11352_s21 + $0x934] ss:$8 sps:$4 sm:$0xff]  }
 0x12c   : > { %6345 = vmatpush1.bf16.msra.mxu0 %v9396_v6  ;;  %v9414_v18 = vld [vmem:[%s11352_s21 + $0x830] ss:$8 sps:$4 sm:$0xff]   ;;  %v9416_v20 = vld [vmem:[%s11352_s21 + $0x824] ss:$8 sps:$4 sm:$0xff]   ;;  %v9420_v22 = vld [vmem:[%s11352_s21 + $0x820] ss:$8 sps:$4 sm:$0xff]  }
 0x12d   : > { %6398 = vmatpush1.bf16.msra.mxu1 %v9397_v7  ;;  %6346 = vmatprep.subr.bf16.mxu0 %v9398_v8  ;;  %v9415_v19 = vld [vmem:[%s11352_s21 + $0x930] ss:$8 sps:$4 sm:$0xff]   ;;  %v9418_v21 = vld [vmem:[%s11352_s21 + $0x924] ss:$8 sps:$4 sm:$0xff]   ;;  %v9421_v23 = vld [vmem:[%s11352_s21 + $0x920] ss:$8 sps:$4 sm:$0xff]  }
 0x12e   : > { %6399 = vmatprep.subr.bf16.mxu1 %v9400_v9  ;;  %v9422_v24 = vld [vmem:[%s11352_s21 + $0x814] ss:$8 sps:$4 sm:$0xff]   ;;  %v9426_v26 = vld [vmem:[%s11352_s21 + $0x810] ss:$8 sps:$4 sm:$0xff]   ;;  %v9428_v28 = vld [vmem:[%s11352_s21 + $0x804] ss:$8 sps:$4 sm:$0xff]  }
 0x12f   : > { %v9424_v25 = vld [vmem:[%s11352_s21 + $0x914] ss:$8 sps:$4 sm:$0xff]   ;;  %v9427_v27 = vld [vmem:[%s11352_s21 + $0x910] ss:$8 sps:$4 sm:$0xff]   ;;  %v9430_v29 = vld [vmem:[%s11352_s21 + $0x904] ss:$8 sps:$4 sm:$0xff]  }
 0x130   : > { %6347 = vmatpush1.bf16.msra.mxu0 %v9402_v10  ;;  %v9432_v30 = vld [vmem:[%s11352_s21 + $0x800] ss:$8 sps:$4 sm:$0xff]   ;;  %v9434_v32 = vld [vmem:[%s11352_s21 + $0x8f4] ss:$8 sps:$4 sm:$0xff]   ;;  %v9438_v34 = vld [vmem:[%s11352_s21 + $0x8f0] ss:$8 sps:$4 sm:$0xff]  }
 0x131   : > { %6400 = vmatpush1.bf16.msra.mxu1 %v9403_v11  ;;  %6348 = vmatprep.subr.bf16.mxu0 %v9404_v12  ;;  %v9433_v31 = vld [vmem:[%s11352_s21 + $0x900] ss:$8 sps:$4 sm:$0xff]   ;;  %v9436_v33 = vld [vmem:[%s11352_s21 + $0x9f4] ss:$8 sps:$4 sm:$0xff]   ;;  %v9439_v35 = vld [vmem:[%s11352_s21 + $0x9f0] ss:$8 sps:$4 sm:$0xff]  }
 0x132   : > { %6401 = vmatprep.subr.bf16.mxu1 %v9406_v13  ;;  %s4336_s11 = scalar_select %p4335_p0, %s10212_s14, 1  ;;  %v9440_v36 = vld [vmem:[%s11352_s21 + $0x8e4] ss:$8 sps:$4 sm:$0xff]   ;;  %v9444_v38 = vld [vmem:[%s11352_s21 + $0x8e0] ss:$8 sps:$4 sm:$0xff]  }
 0x133   : > { %v9442_v37 = vld [vmem:[%s11352_s21 + $0x9e4] ss:$8 sps:$4 sm:$0xff]   ;;  %v9445_v39 = vld [vmem:[%s11352_s21 + $0x9e0] ss:$8 sps:$4 sm:$0xff]   ;;  %v9446_v40 = vld [vmem:[%s11352_s21 + $0x8d4] ss:$8 sps:$4 sm:$0xff]  }
 0x134   : > { %6349 = vmatpush1.bf16.msra.mxu0 %v9408_v14  ;;  %s9313_s22 = smul.u32 384, %s4336_s11  ;;  %v9448_v41 = vld [vmem:[%s11352_s21 + $0x9d4] ss:$8 sps:$4 sm:$0xff]   ;;  %v9450_v42 = vld [vmem:[%s11352_s21 + $0x8d0] ss:$8 sps:$4 sm:$0xff]   ;;  %s12350_s9 = scalar_lea.vmem [#allocation3], %s8736_s30 }
 0x135   : > { %6402 = vmatpush1.bf16.msra.mxu1 %v9409_v15  ;;  %6350 = vmatprep.subr.bf16.mxu0 %v9410_v16  ;;  %v9451_v43 = vld [vmem:[%s11352_s21 + $0x9d0] ss:$8 sps:$4 sm:$0xff]   ;;  %v9452_v44 = vld [vmem:[%s11352_s21 + $0x8c4] ss:$8 sps:$4 sm:$0xff]   ;;  %v9456_v46 = vld [vmem:[%s11352_s21 + $0x8c0] ss:$8 sps:$4 sm:$0xff]  }
 0x136   : > { %6403 = vmatprep.subr.bf16.mxu1 %v9412_v17  ;;  %s11403_s26 = scalar_lea.vmem %s12394_s0, %s9313_s22  ;;  %v9454_v45 = vld [vmem:[%s11352_s21 + $0x9c4] ss:$8 sps:$4 sm:$0xff]   ;;  %v9457_v47 = vld [vmem:[%s11352_s21 + $0x9c0] ss:$8 sps:$4 sm:$0xff]   ;;  %v9458_v52 = vld [vmem:[%s11352_s21 + $0x8b4] ss:$8 sps:$4 sm:$0xff]  }
 0x137   : > { %v4358_v48 = vld [vmem:[%s11403_s26 + $0x80] sm:$0xff]  ;;  %v4359_v50 = vld [vmem:[%s11403_s26 + $0x88] sm:$0xff]  ;;  %v9460_v54 = vld [vmem:[%s11352_s21 + $0x9b4] ss:$8 sps:$4 sm:$0xff]   ;;  %s9303_s3 = sshll.u32 (%p10308_p9), %s10208_s13, 1  ;;  %s9304_s4 = sshll.u32 (%p10308_p9), %s10212_s14, 4 }
 0x138   : > { %6351 = vmatpush1.bf16.msra.mxu0 %v9414_v18  ;;  %v4366_v49 = vld [vmem:[%s11403_s26 + $0xc0] sm:$0xff]  ;;  %v4367_v51 = vld [vmem:[%s11403_s26 + $0xc8] sm:$0xff]  ;;  %v9462_v56 = vld [vmem:[%s11352_s21 + $0x8b0] ss:$8 sps:$4 sm:$0xff]   ;;  %s8587_s5 = sadd.s32 (%p10308_p9), %s9304_s4, %s9303_s3 }
 0x139   : > { %6404 = vmatpush1.bf16.msra.mxu1 %v9415_v19  ;;  %6352 = vmatprep.subr.bf16.mxu0 %v9416_v20  ;;  %v11414_v53 = vcombine.high %v4358_v48, %v4366_v49  ;;  %v11417_v55 = vcombine.high %v4359_v50, %v4367_v51  ;;  %v9463_v57 = vld [vmem:[%s11352_s21 + $0x9b0] ss:$8 sps:$4 sm:$0xff]   ;;  %v9464_v58 = vld [vmem:[%s11352_s21 + $0x8a4] ss:$8 sps:$4 sm:$0xff]   ;;  %v9468_v60 = vld [vmem:[%s11352_s21 + $0x8a0] ss:$8 sps:$4 sm:$0xff]   ;;  %v11437_v8 = vcombine.low %v4358_v48, %v4366_v49 }
 0x13a   : > { %6405 = vmatprep.subr.bf16.mxu1 %v9418_v21  ;;  %v9466_v59 = vld [vmem:[%s11352_s21 + $0x9a4] ss:$8 sps:$4 sm:$0xff]   ;;  %v9469_v61 = vld [vmem:[%s11352_s21 + $0x9a0] ss:$8 sps:$4 sm:$0xff]   ;;  %v9470_v62 = vld [vmem:[%s11352_s21 + $0x894] ss:$8 sps:$4 sm:$0xff]   ;;  %v11439_v9 = vcombine.low %v4359_v50, %v4367_v51 }
 0x13b   : > { %6374 = vmatprep.mubr.bf16.mxu0 %v11414_v53  ;;  %6427 = vmatprep.mubr.bf16.mxu1 %v11417_v55  ;;  %v9472_v63 = vld [vmem:[%s11352_s21 + $0x994] ss:$8 sps:$4 sm:$0xff]   ;;  %v9474_v0 = vld [vmem:[%s11352_s21 + $0x890] ss:$8 sps:$4 sm:$0xff]   ;;  %v9476_v2 = vld [vmem:[%s11352_s21 + $0x884] ss:$8 sps:$4 sm:$0xff]  }
 0x13c   : > { %6353 = vmatpush1.bf16.msra.mxu0 %v9420_v22  ;;  %v9475_v1 = vld [vmem:[%s11352_s21 + $0x990] ss:$8 sps:$4 sm:$0xff]   ;;  %v9478_v3 = vld [vmem:[%s11352_s21 + $0x984] ss:$8 sps:$4 sm:$0xff]   ;;  %v9480_v4 = vld [vmem:[%s11352_s21 + $0x880] ss:$8 sps:$4 sm:$0xff]  }
 0x13d   : > { %6406 = vmatpush1.bf16.msra.mxu1 %v9421_v23  ;;  %6354 = vmatprep.subr.bf16.mxu0 %v9422_v24  ;;  %v9481_v5 = vld [vmem:[%s11352_s21 + $0x980] ss:$8 sps:$4 sm:$0xff]   ;;  %v9484_v6 = vld [vmem:[%s11352_s21 + $0xa74] ss:$8 sps:$4 sm:$0xff]   ;;  %v9482_v10 = vld [vmem:[%s11352_s21 + $0xa70] ss:$8 sps:$4 sm:$0xff]  }
 0x13e   : > { %6407 = vmatprep.subr.bf16.mxu1 %v9424_v25  ;;  %v9487_v7 = vld [vmem:[%s11352_s21 + $0xb74] ss:$8 sps:$4 sm:$0xff]   ;;  %v9485_v11 = vld [vmem:[%s11352_s21 + $0xb70] ss:$8 sps:$4 sm:$0xff]   ;;  %v9490_v12 = vld [vmem:[%s11352_s21 + $0xa64] ss:$8 sps:$4 sm:$0xff]  }
 0x13f   : > { %v9493_v13 = vld [vmem:[%s11352_s21 + $0xb64] ss:$8 sps:$4 sm:$0xff]   ;;  %v9488_v14 = vld [vmem:[%s11352_s21 + $0xa60] ss:$8 sps:$4 sm:$0xff]   ;;  %v9496_v16 = vld [vmem:[%s11352_s21 + $0xa54] ss:$8 sps:$4 sm:$0xff]  }
 0x140   : > { %6355 = vmatpush1.bf16.msra.mxu0 %v9426_v26  ;;  %v9491_v15 = vld [vmem:[%s11352_s21 + $0xb60] ss:$8 sps:$4 sm:$0xff]   ;;  %v9499_v17 = vld [vmem:[%s11352_s21 + $0xb54] ss:$8 sps:$4 sm:$0xff]   ;;  %v9494_v18 = vld [vmem:[%s11352_s21 + $0xa50] ss:$8 sps:$4 sm:$0xff]  }
 0x141   : > { %6408 = vmatpush1.bf16.msra.mxu1 %v9427_v27  ;;  %6356 = vmatprep.subr.bf16.mxu0 %v9428_v28  ;;  %v9497_v19 = vld [vmem:[%s11352_s21 + $0xb50] ss:$8 sps:$4 sm:$0xff]   ;;  %v9502_v20 = vld [vmem:[%s11352_s21 + $0xa44] ss:$8 sps:$4 sm:$0xff]   ;;  %v9500_v22 = vld [vmem:[%s11352_s21 + $0xa40] ss:$8 sps:$4 sm:$0xff]  }
 0x142   : > { %6409 = vmatprep.subr.bf16.mxu1 %v9430_v29  ;;  %v9505_v21 = vld [vmem:[%s11352_s21 + $0xb44] ss:$8 sps:$4 sm:$0xff]   ;;  %v9503_v23 = vld [vmem:[%s11352_s21 + $0xb40] ss:$8 sps:$4 sm:$0xff]   ;;  %v9508_v24 = vld [vmem:[%s11352_s21 + $0xa34] ss:$8 sps:$4 sm:$0xff]  }
 0x143   : > { %v9511_v25 = vld [vmem:[%s11352_s21 + $0xb34] ss:$8 sps:$4 sm:$0xff]   ;;  %v9506_v26 = vld [vmem:[%s11352_s21 + $0xa30] ss:$8 sps:$4 sm:$0xff]   ;;  %v4374_v28 = vld [vmem:[%s11403_s26 + $0x100] sm:$0xff]  ;;  %s9305_s6 = sshll.u32 (%p10308_p9), %s8587_s5, 2 }
 0x144   : > { %6357 = vmatpush1.bf16.msra.mxu0 %v9432_v30  ;;  %v9509_v27 = vld [vmem:[%s11352_s21 + $0xb30] ss:$8 sps:$4 sm:$0xff]   ;;  %v4382_v29 = vld [vmem:[%s11403_s26 + $0x140] sm:$0xff]  ;;  %v4375_v30 = vld [vmem:[%s11403_s26 + $0x108] sm:$0xff]  ;;  %s8589_s18 = scalar_lea.vmem (%p10308_p9), %s12396_s2, %s9305_s6 }
 0x145   : > { %6410 = vmatpush1.bf16.msra.mxu1 %v9433_v31  ;;  %6358 = vmatprep.subr.bf16.mxu0 %v9434_v32  ;;  %v4383_v31 = vld [vmem:[%s11403_s26 + $0x148] sm:$0xff]  ;;  %v11482_v48 = vld [vmem:[%s11403_s26 + $0x98] sm:$0xff] }
 0x146   : > { %6411 = vmatprep.subr.bf16.mxu1 %v9436_v33  ;;  %v9514_v32 = vld [vmem:[%s11352_s21 + $0xa24] ss:$8 sps:$4 sm:$0xff]   ;;  %v8755_v33 = vcombine.high %v4374_v28, %v4382_v29  ;;  %v11489_v50 = vld [vmem:[%s11403_s26 + $0xd8] sm:$0xff] }
 0x147   : > { %v11493_v51 = vcombine.high %v11482_v48, %v11489_v50 }
 0x148   : > { %6359 = vmatpush2.bf16.msra.mxu0 %v9438_v34  ;;  %v8757_v34 = vcombine.high %v4375_v30, %v4383_v31 }
 0x149   : > { %6412 = vmatpush2.bf16.msra.mxu1 %v9439_v35  ;;  %6360 = vmatprep.subr.bf16.mxu0 %v9440_v36  ;;  %v8754_v35 = vcombine.low %v4374_v28, %v4382_v29  ;;  %v9517_v36 = vld [vmem:[%s11352_s21 + $0xb24] ss:$8 sps:$4 sm:$0xff]   ;;  %v9578_v28 = vld [vmem:[%s11352_s21 + $0xc70] ss:$8 sps:$4 sm:$0xff]  }
 0x14a   : > { %6413 = vmatprep.subr.bf16.mxu1 %v9442_v37  ;;  %v8756_v37 = vcombine.low %v4375_v30, %v4383_v31  ;;  %v9581_v29 = vld [vmem:[%s11352_s21 + $0xd70] ss:$8 sps:$4 sm:$0xff]  }
 0x14b   : > { %v4376_v30 = vld [vmem:[%s11403_s26 + $0x110] sm:$0xff] }
 0x14c   : > { %6361 = vmatpush2.bf16.msra.mxu0 %v9444_v38  ;;  %v9512_v38 = vld [vmem:[%s11352_s21 + $0xa20] ss:$8 sps:$4 sm:$0xff]   ;;  %v4384_v31 = vld [vmem:[%s11403_s26 + $0x150] sm:$0xff] }
 0x14d   : > { %6414 = vmatpush2.bf16.msra.mxu1 %v9445_v39  ;;  %6362 = vmatprep.subr.bf16.mxu0 %v9446_v40  ;;  %v9515_v39 = vld [vmem:[%s11352_s21 + $0xb20] ss:$8 sps:$4 sm:$0xff]   ;;  %v9520_v40 = vld [vmem:[%s11352_s21 + $0xa14] ss:$8 sps:$4 sm:$0xff]  }
 0x14e   : > { %6415 = vmatprep.subr.bf16.mxu1 %v9448_v41  ;;  %v9523_v41 = vld [vmem:[%s11352_s21 + $0xb14] ss:$8 sps:$4 sm:$0xff]  }
 0x150   : > { %6363 = vmatpush2.bf16.msra.mxu0 %v9450_v42  ;;  %v9518_v42 = vld [vmem:[%s11352_s21 + $0xa10] ss:$8 sps:$4 sm:$0xff]  }
 0x151   : > { %6416 = vmatpush2.bf16.msra.mxu1 %v9451_v43  ;;  %6364 = vmatprep.subr.bf16.mxu0 %v9452_v44  ;;  %v9521_v43 = vld [vmem:[%s11352_s21 + $0xb10] ss:$8 sps:$4 sm:$0xff]   ;;  %v9526_v44 = vld [vmem:[%s11352_s21 + $0xa04] ss:$8 sps:$4 sm:$0xff]  }
 0x152   : > { %6417 = vmatprep.subr.bf16.mxu1 %v9454_v45  ;;  %v9529_v45 = vld [vmem:[%s11352_s21 + $0xb04] ss:$8 sps:$4 sm:$0xff]  }
 0x154   : > { %6365 = vmatpush2.bf16.msra.mxu0 %v9456_v46  ;;  %v11476_v46 = vld [vmem:[%s11403_s26 + $0x90] sm:$0xff] }
 0x155   : > { %6418 = vmatpush2.bf16.msra.mxu1 %v9457_v47  ;;  %6366 = vmatprep.subr.bf16.mxu0 %v9458_v52  ;;  %v11479_v47 = vld [vmem:[%s11403_s26 + $0xd0] sm:$0xff]  ;;  %v9524_v52 = vld [vmem:[%s11352_s21 + $0xa00] ss:$8 sps:$4 sm:$0xff]  }
 0x156   : > { %6419 = vmatprep.subr.bf16.mxu1 %v9460_v54  ;;  %v11486_v49 = vcombine.high %v11476_v46, %v11479_v47  ;;  %v9527_v54 = vld [vmem:[%s11352_s21 + $0xb00] ss:$8 sps:$4 sm:$0xff]  }
 0x158   : > { %6367 = vmatpush2.bf16.msra.mxu0 %v9462_v56  ;;  %v9532_v56 = vld [vmem:[%s11352_s21 + $0xaf4] ss:$8 sps:$4 sm:$0xff]  }
 0x159   : > { %6420 = vmatpush2.bf16.msra.mxu1 %v9463_v57  ;;  %6368 = vmatprep.subr.bf16.mxu0 %v9464_v58  ;;  %v9535_v57 = vld [vmem:[%s11352_s21 + $0xbf4] ss:$8 sps:$4 sm:$0xff]   ;;  %v9530_v58 = vld [vmem:[%s11352_s21 + $0xaf0] ss:$8 sps:$4 sm:$0xff]  }
 0x15a   : > { %6421 = vmatprep.subr.bf16.mxu1 %v9466_v59  ;;  %v9533_v59 = vld [vmem:[%s11352_s21 + $0xbf0] ss:$8 sps:$4 sm:$0xff]  }
 0x15c   : > { %6369 = vmatpush2.bf16.msra.mxu0 %v9468_v60  ;;  %v9538_v60 = vld [vmem:[%s11352_s21 + $0xae4] ss:$8 sps:$4 sm:$0xff]  }
 0x15d   : > { %6422 = vmatpush2.bf16.msra.mxu1 %v9469_v61  ;;  %6370 = vmatprep.subr.bf16.mxu0 %v9470_v62  ;;  %v9541_v61 = vld [vmem:[%s11352_s21 + $0xbe4] ss:$8 sps:$4 sm:$0xff]   ;;  %v9536_v62 = vld [vmem:[%s11352_s21 + $0xae0] ss:$8 sps:$4 sm:$0xff]  }
 0x15e   : > { %6423 = vmatprep.subr.bf16.mxu1 %v9472_v63  ;;  %v9539_v63 = vld [vmem:[%s11352_s21 + $0xbe0] ss:$8 sps:$4 sm:$0xff]  }
 0x160   : > { %6371 = vmatpush2.bf16.msra.mxu0 %v9474_v0  ;;  %v9544_v0 = vld [vmem:[%s11352_s21 + $0xad4] ss:$8 sps:$4 sm:$0xff]  }
 0x161   : > { %6424 = vmatpush2.bf16.msra.mxu1 %v9475_v1  ;;  %6372 = vmatprep.subr.bf16.mxu0 %v9476_v2  ;;  %v9547_v1 = vld [vmem:[%s11352_s21 + $0xbd4] ss:$8 sps:$4 sm:$0xff]   ;;  %v9542_v2 = vld [vmem:[%s11352_s21 + $0xad0] ss:$8 sps:$4 sm:$0xff]  }
 0x162   : > { %6425 = vmatprep.subr.bf16.mxu1 %v9478_v3  ;;  %v9545_v3 = vld [vmem:[%s11352_s21 + $0xbd0] ss:$8 sps:$4 sm:$0xff]  }
 0x164   : > { %6373 = vmatpush2.bf16.msra.mxu0 %v9480_v4  ;;  %v9550_v4 = vld [vmem:[%s11352_s21 + $0xac4] ss:$8 sps:$4 sm:$0xff]  }
 0x165   : > { %6426 = vmatpush2.bf16.msra.mxu1 %v9481_v5  ;;  %6448 = vmatprep.subr.bf16.mxu0 %v9484_v6  ;;  %v9553_v5 = vld [vmem:[%s11352_s21 + $0xbc4] ss:$8 sps:$4 sm:$0xff]   ;;  %v9548_v6 = vld [vmem:[%s11352_s21 + $0xac0] ss:$8 sps:$4 sm:$0xff]  }
 0x166   : > { %6501 = vmatprep.subr.bf16.mxu1 %v9487_v7  ;;  %v9551_v7 = vld [vmem:[%s11352_s21 + $0xbc0] ss:$8 sps:$4 sm:$0xff]  }
 0x167   : > { %6375 = vmatmul.mubr.bf16.vlgmr.msra.gmra.mxu0 %v11437_v8 }
 0x168   : > { %6428 = vmatmul.mubr.bf16.vlgmr.msra.gmra.mxu1 %v11439_v9  ;;  %6449 = vmatpush1.bf16.msra.mxu0 %v9482_v10  ;;  %v9556_v10 = vld [vmem:[%s11352_s21 + $0xab4] ss:$8 sps:$4 sm:$0xff]  }
 0x169   : > { %6502 = vmatpush1.bf16.msra.mxu1 %v9485_v11  ;;  %6450 = vmatprep.subr.bf16.mxu0 %v9490_v12  ;;  %v9559_v11 = vld [vmem:[%s11352_s21 + $0xbb4] ss:$8 sps:$4 sm:$0xff]   ;;  %v9554_v12 = vld [vmem:[%s11352_s21 + $0xab0] ss:$8 sps:$4 sm:$0xff]  }
 0x16a   : > { %6503 = vmatprep.subr.bf16.mxu1 %v9493_v13  ;;  %6384 = vmatprep.mubr.bf16.mxu0 %v8755_v33  ;;  %v9557_v13 = vld [vmem:[%s11352_s21 + $0xbb0] ss:$8 sps:$4 sm:$0xff]   ;;  %v11543_v33 = vcombine.low %v11482_v48, %v11489_v50  ;;  %v8758_v48 = vcombine.low %v4376_v30, %v4384_v31 }
 0x16b   : > { %6437 = vmatprep.mubr.bf16.mxu1 %v8757_v34  ;;  %v4377_v34 = vld [vmem:[%s11403_s26 + $0x118] sm:$0xff] }
 0x16c   : > { %6451 = vmatpush1.bf16.msra.mxu0 %v9488_v14  ;;  %v9562_v14 = vld [vmem:[%s11352_s21 + $0xaa4] ss:$8 sps:$4 sm:$0xff]  }
 0x16d   : > { %6504 = vmatpush1.bf16.msra.mxu1 %v9491_v15  ;;  %6452 = vmatprep.subr.bf16.mxu0 %v9496_v16  ;;  %v9565_v15 = vld [vmem:[%s11352_s21 + $0xba4] ss:$8 sps:$4 sm:$0xff]   ;;  %v9560_v16 = vld [vmem:[%s11352_s21 + $0xaa0] ss:$8 sps:$4 sm:$0xff]  }
 0x16e   : > { %6505 = vmatprep.subr.bf16.mxu1 %v9499_v17  ;;  %v9563_v17 = vld [vmem:[%s11352_s21 + $0xba0] ss:$8 sps:$4 sm:$0xff]  }
 0x16f   : > { %6385 = vmatmul.mubr.bf16.gmra.mxu0 %v8754_v35  ;;  %v4385_v35 = vld [vmem:[%s11403_s26 + $0x158] sm:$0xff] }
 0x170   : > { %6453 = vmatpush1.bf16.msra.mxu0 %v9494_v18  ;;  %6438 = vmatmul.mubr.bf16.gmra.mxu1 %v8756_v37  ;;  %v9568_v18 = vld [vmem:[%s11352_s21 + $0xa94] ss:$8 sps:$4 sm:$0xff]   ;;  %v9589_v37 = vld [vmem:[%s11352_s21 + $0xd64] ss:$8 sps:$4 sm:$0xff]   ;;  %v8760_v50 = vcombine.low %v4377_v34, %v4385_v35 }
 0x171   : > { %6506 = vmatpush1.bf16.msra.mxu1 %v9497_v19  ;;  %6454 = vmatprep.subr.bf16.mxu0 %v9502_v20  ;;  %v9571_v19 = vld [vmem:[%s11352_s21 + $0xb94] ss:$8 sps:$4 sm:$0xff]   ;;  %v9566_v20 = vld [vmem:[%s11352_s21 + $0xa90] ss:$8 sps:$4 sm:$0xff]  }
 0x172   : > { %6507 = vmatprep.subr.bf16.mxu1 %v9505_v21  ;;  %6480 = vmatprep.mubr.bf16.mxu0 %v11486_v49  ;;  %v9569_v21 = vld [vmem:[%s11352_s21 + $0xb90] ss:$8 sps:$4 sm:$0xff]  }
 0x173   : > { %6533 = vmatprep.mubr.bf16.mxu1 %v11493_v51 }
 0x174   : > { %6455 = vmatpush1.bf16.msra.mxu0 %v9500_v22  ;;  %v9574_v22 = vld [vmem:[%s11352_s21 + $0xa84] ss:$8 sps:$4 sm:$0xff]  }
 0x175   : > { %6508 = vmatpush1.bf16.msra.mxu1 %v9503_v23  ;;  %6456 = vmatprep.subr.bf16.mxu0 %v9508_v24  ;;  %v9577_v23 = vld [vmem:[%s11352_s21 + $0xb84] ss:$8 sps:$4 sm:$0xff]   ;;  %v9572_v24 = vld [vmem:[%s11352_s21 + $0xa80] ss:$8 sps:$4 sm:$0xff]  }
 0x176   : > { %6509 = vmatprep.subr.bf16.mxu1 %v9511_v25  ;;  %v9575_v25 = vld [vmem:[%s11352_s21 + $0xb80] ss:$8 sps:$4 sm:$0xff]  }
 0x178   : > { %6457 = vmatpush1.bf16.msra.mxu0 %v9506_v26  ;;  %v9580_v26 = vld [vmem:[%s11352_s21 + $0xc74] ss:$8 sps:$4 sm:$0xff]  }
 0x179   : > { %6510 = vmatpush1.bf16.msra.mxu1 %v9509_v27  ;;  %6458 = vmatprep.subr.bf16.mxu0 %v9514_v32  ;;  %v9583_v27 = vld [vmem:[%s11352_s21 + $0xd74] ss:$8 sps:$4 sm:$0xff]   ;;  %v11539_v32 = vcombine.low %v11476_v46, %v11479_v47  ;;  %v11558_v46 = vld [vmem:[%s11403_s26 + $0xa0] sm:$0xff] }
 0x17a   : > { %6511 = vmatprep.subr.bf16.mxu1 %v9517_v36  ;;  %v9586_v36 = vld [vmem:[%s11352_s21 + $0xc64] ss:$8 sps:$4 sm:$0xff]  }
 0x17b   : > { %v11561_v47 = vld [vmem:[%s11403_s26 + $0xe0] sm:$0xff] }
 0x17c   : > { %6459 = vmatpush1.bf16.msra.mxu0 %v9512_v38  ;;  %v8759_v38 = vcombine.high %v4376_v30, %v4384_v31  ;;  %v9644_v30 = vld [vmem:[%s11352_s21 + $0xcc0] ss:$8 sps:$4 sm:$0xff]  }
 0x17d   : > { %6512 = vmatpush1.bf16.msra.mxu1 %v9515_v39  ;;  %6460 = vmatprep.subr.bf16.mxu0 %v9520_v40  ;;  %v8761_v39 = vcombine.high %v4377_v34, %v4385_v35  ;;  %v9584_v40 = vld [vmem:[%s11352_s21 + $0xc60] ss:$8 sps:$4 sm:$0xff]   ;;  %v9652_v34 = vld [vmem:[%s11352_s21 + $0xcb4] ss:$8 sps:$4 sm:$0xff]  }
 0x17e   : > { %6513 = vmatprep.subr.bf16.mxu1 %v9523_v41  ;;  %v9587_v41 = vld [vmem:[%s11352_s21 + $0xd60] ss:$8 sps:$4 sm:$0xff]   ;;  %v9655_v35 = vld [vmem:[%s11352_s21 + $0xdb4] ss:$8 sps:$4 sm:$0xff]  }
 0x17f   : > { %v9647_v31 = vld [vmem:[%s11352_s21 + $0xdc0] ss:$8 sps:$4 sm:$0xff]  }
 0x180   : > { %6461 = vmatpush1.bf16.msra.mxu0 %v9518_v42  ;;  %v9592_v42 = vld [vmem:[%s11352_s21 + $0xc54] ss:$8 sps:$4 sm:$0xff]  }
 0x181   : > { %6514 = vmatpush1.bf16.msra.mxu1 %v9521_v43  ;;  %6462 = vmatprep.subr.bf16.mxu0 %v9526_v44  ;;  %v9595_v43 = vld [vmem:[%s11352_s21 + $0xd54] ss:$8 sps:$4 sm:$0xff]   ;;  %v9590_v44 = vld [vmem:[%s11352_s21 + $0xc50] ss:$8 sps:$4 sm:$0xff]  }
 0x182   : > { %6515 = vmatprep.subr.bf16.mxu1 %v9529_v45  ;;  %v9593_v45 = vld [vmem:[%s11352_s21 + $0xd50] ss:$8 sps:$4 sm:$0xff]  }
 0x184   : > { %6463 = vmatpush1.bf16.msra.mxu0 %v9524_v52  ;;  %v11564_v52 = vld [vmem:[%s11403_s26 + $0xa8] sm:$0xff] }
 0x185   : > { %6516 = vmatpush1.bf16.msra.mxu1 %v9527_v54  ;;  %6464 = vmatprep.subr.bf16.mxu0 %v9532_v56  ;;  %v11567_v54 = vld [vmem:[%s11403_s26 + $0xe8] sm:$0xff] }
 0x186   : > { %6517 = vmatprep.subr.bf16.mxu1 %v9535_v57  ;;  %v9598_v56 = vld [vmem:[%s11352_s21 + $0xc44] ss:$8 sps:$4 sm:$0xff]  }
 0x187   : > { %v9601_v57 = vld [vmem:[%s11352_s21 + $0xd44] ss:$8 sps:$4 sm:$0xff]  }
 0x188   : > { %6465 = vmatpush2.bf16.msra.mxu0 %v9530_v58  ;;  %v11573_v58 = vcombine.high %v11558_v46, %v11561_v47 }
 0x189   : > { %6518 = vmatpush2.bf16.msra.mxu1 %v9533_v59  ;;  %6466 = vmatprep.subr.bf16.mxu0 %v9538_v60  ;;  %v11577_v59 = vcombine.high %v11564_v52, %v11567_v54  ;;  %v9596_v60 = vld [vmem:[%s11352_s21 + $0xc40] ss:$8 sps:$4 sm:$0xff]  }
 0x18a   : > { %6519 = vmatprep.subr.bf16.mxu1 %v9541_v61  ;;  %v9599_v61 = vld [vmem:[%s11352_s21 + $0xd40] ss:$8 sps:$4 sm:$0xff]  }
 0x18c   : > { %6467 = vmatpush2.bf16.msra.mxu0 %v9536_v62  ;;  %v9604_v62 = vld [vmem:[%s11352_s21 + $0xc34] ss:$8 sps:$4 sm:$0xff]  }
 0x18d   : > { %6520 = vmatpush2.bf16.msra.mxu1 %v9539_v63  ;;  %6468 = vmatprep.subr.bf16.mxu0 %v9544_v0  ;;  %v9607_v63 = vld [vmem:[%s11352_s21 + $0xd34] ss:$8 sps:$4 sm:$0xff]   ;;  %v9602_v0 = vld [vmem:[%s11352_s21 + $0xc30] ss:$8 sps:$4 sm:$0xff]  }
 0x18e   : > { %6521 = vmatprep.subr.bf16.mxu1 %v9547_v1  ;;  %v9605_v1 = vld [vmem:[%s11352_s21 + $0xd30] ss:$8 sps:$4 sm:$0xff]  }
 0x190   : > { %6469 = vmatpush2.bf16.msra.mxu0 %v9542_v2  ;;  %v9610_v2 = vld [vmem:[%s11352_s21 + $0xc24] ss:$8 sps:$4 sm:$0xff]  }
 0x191   : > { %6522 = vmatpush2.bf16.msra.mxu1 %v9545_v3  ;;  %6470 = vmatprep.subr.bf16.mxu0 %v9550_v4  ;;  %v9613_v3 = vld [vmem:[%s11352_s21 + $0xd24] ss:$8 sps:$4 sm:$0xff]   ;;  %v9608_v4 = vld [vmem:[%s11352_s21 + $0xc20] ss:$8 sps:$4 sm:$0xff]  }
 0x192   : > { %6523 = vmatprep.subr.bf16.mxu1 %v9553_v5  ;;  %v9611_v5 = vld [vmem:[%s11352_s21 + $0xd20] ss:$8 sps:$4 sm:$0xff]  }
 0x194   : > { %6471 = vmatpush2.bf16.msra.mxu0 %v9548_v6  ;;  %v9616_v6 = vld [vmem:[%s11352_s21 + $0xc14] ss:$8 sps:$4 sm:$0xff]  }
 0x195   : > { %6524 = vmatpush2.bf16.msra.mxu1 %v9551_v7  ;;  %6472 = vmatprep.subr.bf16.mxu0 %v9556_v10  ;;  %v9619_v7 = vld [vmem:[%s11352_s21 + $0xd14] ss:$8 sps:$4 sm:$0xff]   ;;  %v9614_v10 = vld [vmem:[%s11352_s21 + $0xc10] ss:$8 sps:$4 sm:$0xff]  }
 0x196   : > { %6525 = vmatprep.subr.bf16.mxu1 %v9559_v11  ;;  %v9617_v11 = vld [vmem:[%s11352_s21 + $0xd10] ss:$8 sps:$4 sm:$0xff]  }
 0x198   : > { %6473 = vmatpush2.bf16.msra.mxu0 %v9554_v12  ;;  %v9622_v12 = vld [vmem:[%s11352_s21 + $0xc04] ss:$8 sps:$4 sm:$0xff]  }
 0x199   : > { %6526 = vmatpush2.bf16.msra.mxu1 %v9557_v13  ;;  %6474 = vmatprep.subr.bf16.mxu0 %v9562_v14  ;;  %v9625_v13 = vld [vmem:[%s11352_s21 + $0xd04] ss:$8 sps:$4 sm:$0xff]   ;;  %v9620_v14 = vld [vmem:[%s11352_s21 + $0xc00] ss:$8 sps:$4 sm:$0xff]  }
 0x19a   : > { %6527 = vmatprep.subr.bf16.mxu1 %v9565_v15  ;;  %v9623_v15 = vld [vmem:[%s11352_s21 + $0xd00] ss:$8 sps:$4 sm:$0xff]  }
 0x19c   : > { %6475 = vmatpush2.bf16.msra.mxu0 %v9560_v16  ;;  %v9628_v16 = vld [vmem:[%s11352_s21 + $0xcf4] ss:$8 sps:$4 sm:$0xff]  }
 0x19d   : > { %6528 = vmatpush2.bf16.msra.mxu1 %v9563_v17  ;;  %6476 = vmatprep.subr.bf16.mxu0 %v9568_v18  ;;  %v9631_v17 = vld [vmem:[%s11352_s21 + $0xdf4] ss:$8 sps:$4 sm:$0xff]   ;;  %v9626_v18 = vld [vmem:[%s11352_s21 + $0xcf0] ss:$8 sps:$4 sm:$0xff]  }
 0x19e   : > { %6529 = vmatprep.subr.bf16.mxu1 %v9571_v19  ;;  %v9629_v19 = vld [vmem:[%s11352_s21 + $0xdf0] ss:$8 sps:$4 sm:$0xff]  }
 0x1a0   : > { %6477 = vmatpush2.bf16.msra.mxu0 %v9566_v20  ;;  %v9634_v20 = vld [vmem:[%s11352_s21 + $0xce4] ss:$8 sps:$4 sm:$0xff]  }
 0x1a1   : > { %6530 = vmatpush2.bf16.msra.mxu1 %v9569_v21  ;;  %6478 = vmatprep.subr.bf16.mxu0 %v9574_v22  ;;  %v9637_v21 = vld [vmem:[%s11352_s21 + $0xde4] ss:$8 sps:$4 sm:$0xff]   ;;  %v9632_v22 = vld [vmem:[%s11352_s21 + $0xce0] ss:$8 sps:$4 sm:$0xff]  }
 0x1a2   : > { %6531 = vmatprep.subr.bf16.mxu1 %v9577_v23  ;;  %v9635_v23 = vld [vmem:[%s11352_s21 + $0xde0] ss:$8 sps:$4 sm:$0xff]  }
 0x1a4   : > { %6479 = vmatpush2.bf16.msra.mxu0 %v9572_v24  ;;  %v9640_v24 = vld [vmem:[%s11352_s21 + $0xcd4] ss:$8 sps:$4 sm:$0xff]  }
 0x1a5   : > { %6532 = vmatpush2.bf16.msra.mxu1 %v9575_v25  ;;  %6554 = vmatprep.subr.bf16.mxu0 %v9580_v26  ;;  %v9643_v25 = vld [vmem:[%s11352_s21 + $0xdd4] ss:$8 sps:$4 sm:$0xff]   ;;  %v9638_v26 = vld [vmem:[%s11352_s21 + $0xcd0] ss:$8 sps:$4 sm:$0xff]  }
 0x1a6   : > { %6607 = vmatprep.subr.bf16.mxu1 %v9583_v27  ;;  %v9641_v27 = vld [vmem:[%s11352_s21 + $0xdd0] ss:$8 sps:$4 sm:$0xff]  }
 0x1a7   : > { %6481 = vmatmul.mubr.bf16.vlgmr.msra.gmra.mxu0 %v11539_v32 }
 0x1a8   : > { %6534 = vmatmul.mubr.bf16.vlgmr.msra.gmra.mxu1 %v11543_v33  ;;  %6555 = vmatpush1.bf16.msra.mxu0 %v9578_v28  ;;  %v9646_v28 = vld [vmem:[%s11352_s21 + $0xcc4] ss:$8 sps:$4 sm:$0xff]  }
 0x1a9   : > { %6608 = vmatpush1.bf16.msra.mxu1 %v9581_v29  ;;  %6556 = vmatprep.subr.bf16.mxu0 %v9586_v36  ;;  %v9649_v29 = vld [vmem:[%s11352_s21 + $0xdc4] ss:$8 sps:$4 sm:$0xff]   ;;  %v9650_v36 = vld [vmem:[%s11352_s21 + $0xcb0] ss:$8 sps:$4 sm:$0xff]  }
 0x1aa   : > { %6609 = vmatprep.subr.bf16.mxu1 %v9589_v37  ;;  %6490 = vmatprep.mubr.bf16.mxu0 %v8759_v38  ;;  %v9653_v37 = vld [vmem:[%s11352_s21 + $0xdb0] ss:$8 sps:$4 sm:$0xff]   ;;  %v9658_v38 = vld [vmem:[%s11352_s21 + $0xca4] ss:$8 sps:$4 sm:$0xff]  }
 0x1ab   : > { %6543 = vmatprep.mubr.bf16.mxu1 %v8761_v39  ;;  %v9661_v39 = vld [vmem:[%s11352_s21 + $0xda4] ss:$8 sps:$4 sm:$0xff]  }
 0x1ac   : > { %6557 = vmatpush1.bf16.msra.mxu0 %v9584_v40  ;;  %v9656_v40 = vld [vmem:[%s11352_s21 + $0xca0] ss:$8 sps:$4 sm:$0xff]  }
 0x1ad   : > { %6610 = vmatpush1.bf16.msra.mxu1 %v9587_v41  ;;  %6558 = vmatprep.subr.bf16.mxu0 %v9592_v42  ;;  %v9659_v41 = vld [vmem:[%s11352_s21 + $0xda0] ss:$8 sps:$4 sm:$0xff]   ;;  %v9664_v42 = vld [vmem:[%s11352_s21 + $0xc94] ss:$8 sps:$4 sm:$0xff]  }
 0x1ae   : > { %6611 = vmatprep.subr.bf16.mxu1 %v9595_v43  ;;  %v9667_v43 = vld [vmem:[%s11352_s21 + $0xd94] ss:$8 sps:$4 sm:$0xff]  }
 0x1af   : > { %6491 = vmatmul.mubr.bf16.gmra.mxu0 %v8758_v48  ;;  %v9670_v48 = vld [vmem:[%s11352_s21 + $0xc84] ss:$8 sps:$4 sm:$0xff]  }
 0x1b0   : > { %6544 = vmatmul.mubr.bf16.gmra.mxu1 %v8760_v50  ;;  %6559 = vmatpush1.bf16.msra.mxu0 %v9590_v44  ;;  %v9662_v44 = vld [vmem:[%s11352_s21 + $0xc90] ss:$8 sps:$4 sm:$0xff]   ;;  %v9673_v50 = vld [vmem:[%s11352_s21 + $0xd84] ss:$8 sps:$4 sm:$0xff]  }
 0x1b1   : > { %6612 = vmatpush1.bf16.msra.mxu1 %v9593_v45  ;;  %6560 = vmatprep.subr.bf16.mxu0 %v9598_v56  ;;  %v9665_v45 = vld [vmem:[%s11352_s21 + $0xd90] ss:$8 sps:$4 sm:$0xff]   ;;  %v9668_v56 = vld [vmem:[%s11352_s21 + $0xc80] ss:$8 sps:$4 sm:$0xff]  }
 0x1b2   : > { %6613 = vmatprep.subr.bf16.mxu1 %v9601_v57  ;;  %6586 = vmatprep.mubr.bf16.mxu0 %v11573_v58  ;;  %v9671_v57 = vld [vmem:[%s11352_s21 + $0xd80] ss:$8 sps:$4 sm:$0xff]  }
 0x1b3   : > { %6639 = vmatprep.mubr.bf16.mxu1 %v11577_v59 }
 0x1b4   : > { %6561 = vmatpush1.bf16.msra.mxu0 %v9596_v60  ;;  %v9676_v60 = vld [vmem:[%s11352_s21 + $0xe74] ss:$8 sps:$4 sm:$0xff]  }
 0x1b5   : > { %6614 = vmatpush1.bf16.msra.mxu1 %v9599_v61  ;;  %6562 = vmatprep.subr.bf16.mxu0 %v9604_v62  ;;  %v9679_v61 = vld [vmem:[%s11352_s21 + $0xf74] ss:$8 sps:$4 sm:$0xff]   ;;  %v9674_v62 = vld [vmem:[%s11352_s21 + $0xe70] ss:$8 sps:$4 sm:$0xff]  }
 0x1b6   : > { %6615 = vmatprep.subr.bf16.mxu1 %v9607_v63  ;;  %v9677_v63 = vld [vmem:[%s11352_s21 + $0xf70] ss:$8 sps:$4 sm:$0xff]  }
 0x1b8   : > { %6563 = vmatpush1.bf16.msra.mxu0 %v9602_v0  ;;  %v4378_v0 = vld [vmem:[%s11403_s26 + $0x120] sm:$0xff] }
 0x1b9   : > { %6616 = vmatpush1.bf16.msra.mxu1 %v9605_v1  ;;  %6564 = vmatprep.subr.bf16.mxu0 %v9610_v2  ;;  %v4386_v1 = vld [vmem:[%s11403_s26 + $0x160] sm:$0xff]  ;;  %v11639_v2 = vcombine.low %v11558_v46, %v11561_v47 }
 0x1ba   : > { %6617 = vmatprep.subr.bf16.mxu1 %v9613_v3  ;;  %v11643_v3 = vcombine.low %v11564_v52, %v11567_v54  ;;  %v9680_v47 = vld [vmem:[%s11352_s21 + $0xe60] ss:$8 sps:$4 sm:$0xff]   ;;  %v9688_v54 = vld [vmem:[%s11352_s21 + $0xe54] ss:$8 sps:$4 sm:$0xff]  }
 0x1bb   : > { %v9683_v52 = vld [vmem:[%s11352_s21 + $0xf60] ss:$8 sps:$4 sm:$0xff]  }
 0x1bc   : > { %6565 = vmatpush1.bf16.msra.mxu0 %v9608_v4  ;;  %v4379_v4 = vld [vmem:[%s11403_s26 + $0x128] sm:$0xff] }
 0x1bd   : > { %6618 = vmatpush1.bf16.msra.mxu1 %v9611_v5  ;;  %6566 = vmatprep.subr.bf16.mxu0 %v9616_v6  ;;  %v4387_v5 = vld [vmem:[%s11403_s26 + $0x168] sm:$0xff] }
 0x1be   : > { %6619 = vmatprep.subr.bf16.mxu1 %v9619_v7  ;;  %v9682_v6 = vld [vmem:[%s11352_s21 + $0xe64] ss:$8 sps:$4 sm:$0xff]   ;;  %v8765_v46 = vcombine.high %v4379_v4, %v4387_v5 }
 0x1bf   : > { %v9685_v7 = vld [vmem:[%s11352_s21 + $0xf64] ss:$8 sps:$4 sm:$0xff]  }
 0x1c0   : > { %6567 = vmatpush1.bf16.msra.mxu0 %v9614_v10  ;;  %v8763_v10 = vcombine.high %v4378_v0, %v4386_v1 }
 0x1c1   : > { %6620 = vmatpush1.bf16.msra.mxu1 %v9617_v11  ;;  %6568 = vmatprep.subr.bf16.mxu0 %v9622_v12  ;;  %v9691_v11 = vld [vmem:[%s11352_s21 + $0xf54] ss:$8 sps:$4 sm:$0xff]   ;;  %v9686_v12 = vld [vmem:[%s11352_s21 + $0xe50] ss:$8 sps:$4 sm:$0xff]  }
 0x1c2   : > { %6621 = vmatprep.subr.bf16.mxu1 %v9625_v13  ;;  %v9689_v13 = vld [vmem:[%s11352_s21 + $0xf50] ss:$8 sps:$4 sm:$0xff]  }
 0x1c4   : > { %6569 = vmatpush1.bf16.msra.mxu0 %v9620_v14  ;;  %v11658_v14 = vld [vmem:[%s11403_s26 + $0xb0] sm:$0xff] }
 0x1c5   : > { %6622 = vmatpush1.bf16.msra.mxu1 %v9623_v15  ;;  %6570 = vmatprep.subr.bf16.mxu0 %v9628_v16  ;;  %v11661_v15 = vld [vmem:[%s11403_s26 + $0xf0] sm:$0xff]  ;;  %v8762_v16 = vcombine.low %v4378_v0, %v4386_v1 }
 0x1c6   : > { %6623 = vmatprep.subr.bf16.mxu1 %v9631_v17  ;;  %v8764_v17 = vcombine.low %v4379_v4, %v4387_v5  ;;  %v9734_v0 = vld [vmem:[%s11352_s21 + $0xed0] ss:$8 sps:$4 sm:$0xff]   ;;  %v9742_v4 = vld [vmem:[%s11352_s21 + $0xec4] ss:$8 sps:$4 sm:$0xff]  }
 0x1c7   : > { %v9737_v1 = vld [vmem:[%s11352_s21 + $0xfd0] ss:$8 sps:$4 sm:$0xff]   ;;  %v9745_v5 = vld [vmem:[%s11352_s21 + $0xfc4] ss:$8 sps:$4 sm:$0xff]  }
 0x1c8   : > { %6571 = vmatpush2.bf16.msra.mxu0 %v9626_v18  ;;  %v11664_v18 = vld [vmem:[%s11403_s26 + $0xb8] sm:$0xff] }
 0x1c9   : > { %6624 = vmatpush2.bf16.msra.mxu1 %v9629_v19  ;;  %6572 = vmatprep.subr.bf16.mxu0 %v9634_v20  ;;  %v11667_v19 = vld [vmem:[%s11403_s26 + $0xf8] sm:$0xff]  ;;  %v9694_v20 = vld [vmem:[%s11352_s21 + $0xe44] ss:$8 sps:$4 sm:$0xff]  }
 0x1ca   : > { %6625 = vmatprep.subr.bf16.mxu1 %v9637_v21  ;;  %v9697_v21 = vld [vmem:[%s11352_s21 + $0xf44] ss:$8 sps:$4 sm:$0xff]  }
 0x1cc   : > { %6573 = vmatpush2.bf16.msra.mxu0 %v9632_v22  ;;  %v11673_v22 = vcombine.high %v11658_v14, %v11661_v15 }
 0x1cd   : > { %6626 = vmatpush2.bf16.msra.mxu1 %v9635_v23  ;;  %6574 = vmatprep.subr.bf16.mxu0 %v9640_v24  ;;  %v11677_v23 = vcombine.high %v11664_v18, %v11667_v19  ;;  %v9692_v24 = vld [vmem:[%s11352_s21 + $0xe40] ss:$8 sps:$4 sm:$0xff]  }
 0x1ce   : > { %6627 = vmatprep.subr.bf16.mxu1 %v9643_v25  ;;  %v9695_v25 = vld [vmem:[%s11352_s21 + $0xf40] ss:$8 sps:$4 sm:$0xff]  }
 0x1d0   : > { %6575 = vmatpush2.bf16.msra.mxu0 %v9638_v26  ;;  %v9700_v26 = vld [vmem:[%s11352_s21 + $0xe34] ss:$8 sps:$4 sm:$0xff]  }
 0x1d1   : > { %6628 = vmatpush2.bf16.msra.mxu1 %v9641_v27  ;;  %6576 = vmatprep.subr.bf16.mxu0 %v9646_v28  ;;  %v9703_v27 = vld [vmem:[%s11352_s21 + $0xf34] ss:$8 sps:$4 sm:$0xff]   ;;  %v9698_v28 = vld [vmem:[%s11352_s21 + $0xe30] ss:$8 sps:$4 sm:$0xff]  }
 0x1d2   : > { %6629 = vmatprep.subr.bf16.mxu1 %v9649_v29  ;;  %v9701_v29 = vld [vmem:[%s11352_s21 + $0xf30] ss:$8 sps:$4 sm:$0xff]  }
 0x1d4   : > { %6577 = vmatpush2.bf16.msra.mxu0 %v9644_v30  ;;  %v9706_v30 = vld [vmem:[%s11352_s21 + $0xe24] ss:$8 sps:$4 sm:$0xff]  }
 0x1d5   : > { %6630 = vmatpush2.bf16.msra.mxu1 %v9647_v31  ;;  %6578 = vmatprep.subr.bf16.mxu0 %v9652_v34  ;;  %v9709_v31 = vld [vmem:[%s11352_s21 + $0xf24] ss:$8 sps:$4 sm:$0xff]   ;;  %v9704_v34 = vld [vmem:[%s11352_s21 + $0xe20] ss:$8 sps:$4 sm:$0xff]  }
 0x1d6   : > { %6631 = vmatprep.subr.bf16.mxu1 %v9655_v35  ;;  %v9707_v35 = vld [vmem:[%s11352_s21 + $0xf20] ss:$8 sps:$4 sm:$0xff]  }
 0x1d8   : > { %6579 = vmatpush2.bf16.msra.mxu0 %v9650_v36  ;;  %v9712_v36 = vld [vmem:[%s11352_s21 + $0xe14] ss:$8 sps:$4 sm:$0xff]  }
 0x1d9   : > { %6632 = vmatpush2.bf16.msra.mxu1 %v9653_v37  ;;  %6580 = vmatprep.subr.bf16.mxu0 %v9658_v38  ;;  %v9715_v37 = vld [vmem:[%s11352_s21 + $0xf14] ss:$8 sps:$4 sm:$0xff]   ;;  %v9710_v38 = vld [vmem:[%s11352_s21 + $0xe10] ss:$8 sps:$4 sm:$0xff]  }
 0x1da   : > { %6633 = vmatprep.subr.bf16.mxu1 %v9661_v39  ;;  %v9713_v39 = vld [vmem:[%s11352_s21 + $0xf10] ss:$8 sps:$4 sm:$0xff]  }
 0x1dc   : > { %6581 = vmatpush2.bf16.msra.mxu0 %v9656_v40  ;;  %v9718_v40 = vld [vmem:[%s11352_s21 + $0xe04] ss:$8 sps:$4 sm:$0xff]  }
 0x1dd   : > { %6634 = vmatpush2.bf16.msra.mxu1 %v9659_v41  ;;  %6582 = vmatprep.subr.bf16.mxu0 %v9664_v42  ;;  %v9721_v41 = vld [vmem:[%s11352_s21 + $0xf04] ss:$8 sps:$4 sm:$0xff]   ;;  %v9716_v42 = vld [vmem:[%s11352_s21 + $0xe00] ss:$8 sps:$4 sm:$0xff]  }
 0x1de   : > { %6635 = vmatprep.subr.bf16.mxu1 %v9667_v43  ;;  %v9719_v43 = vld [vmem:[%s11352_s21 + $0xf00] ss:$8 sps:$4 sm:$0xff]  }
 0x1e0   : > { %6583 = vmatpush2.bf16.msra.mxu0 %v9662_v44  ;;  %v9724_v44 = vld [vmem:[%s11352_s21 + $0xef4] ss:$8 sps:$4 sm:$0xff]  }
 0x1e1   : > { %6636 = vmatpush2.bf16.msra.mxu1 %v9665_v45  ;;  %6584 = vmatprep.subr.bf16.mxu0 %v9670_v48  ;;  %v9727_v45 = vld [vmem:[%s11352_s21 + $0xff4] ss:$8 sps:$4 sm:$0xff]   ;;  %v9722_v48 = vld [vmem:[%s11352_s21 + $0xef0] ss:$8 sps:$4 sm:$0xff]  }
 0x1e2   : > { %6637 = vmatprep.subr.bf16.mxu1 %v9673_v50  ;;  %v9725_v50 = vld [vmem:[%s11352_s21 + $0xff0] ss:$8 sps:$4 sm:$0xff]  }
 0x1e4   : > { %6585 = vmatpush2.bf16.msra.mxu0 %v9668_v56  ;;  %v9730_v56 = vld [vmem:[%s11352_s21 + $0xee4] ss:$8 sps:$4 sm:$0xff]  }
 0x1e5   : > { %6638 = vmatpush2.bf16.msra.mxu1 %v9671_v57  ;;  %6660 = vmatprep.subr.bf16.mxu0 %v9676_v60  ;;  %v9733_v57 = vld [vmem:[%s11352_s21 + $0xfe4] ss:$8 sps:$4 sm:$0xff]   ;;  %v9728_v60 = vld [vmem:[%s11352_s21 + $0xee0] ss:$8 sps:$4 sm:$0xff]  }
 0x1e6   : > { %6713 = vmatprep.subr.bf16.mxu1 %v9679_v61  ;;  %v9731_v61 = vld [vmem:[%s11352_s21 + $0xfe0] ss:$8 sps:$4 sm:$0xff]  }
 0x1e7   : > { %6587 = vmatmul.mubr.bf16.vlgmr.msra.gmra.mxu0 %v11639_v2 }
 0x1e8   : > { %6640 = vmatmul.mubr.bf16.vlgmr.msra.gmra.mxu1 %v11643_v3  ;;  %6661 = vmatpush1.bf16.msra.mxu0 %v9674_v62  ;;  %v9736_v62 = vld [vmem:[%s11352_s21 + $0xed4] ss:$8 sps:$4 sm:$0xff]  }
 0x1e9   : > { %6714 = vmatpush1.bf16.msra.mxu1 %v9677_v63  ;;  %6662 = vmatprep.subr.bf16.mxu0 %v9682_v6  ;;  %v9739_v63 = vld [vmem:[%s11352_s21 + $0xfd4] ss:$8 sps:$4 sm:$0xff]   ;;  %v9740_v6 = vld [vmem:[%s11352_s21 + $0xec0] ss:$8 sps:$4 sm:$0xff]  }
 0x1ea   : > { %6715 = vmatprep.subr.bf16.mxu1 %v9685_v7  ;;  %6596 = vmatprep.mubr.bf16.mxu0 %v8763_v10  ;;  %v9743_v7 = vld [vmem:[%s11352_s21 + $0xfc0] ss:$8 sps:$4 sm:$0xff]   ;;  %v9748_v10 = vld [vmem:[%s11352_s21 + $0xeb4] ss:$8 sps:$4 sm:$0xff]  }
 0x1eb   : > { %6649 = vmatprep.mubr.bf16.mxu1 %v8765_v46  ;;  %v9751_v46 = vld [vmem:[%s11352_s21 + $0xfb4] ss:$8 sps:$4 sm:$0xff]  }
 0x1ec   : > { %6663 = vmatpush1.bf16.msra.mxu0 %v9680_v47  ;;  %v9746_v47 = vld [vmem:[%s11352_s21 + $0xeb0] ss:$8 sps:$4 sm:$0xff]  }
 0x1ed   : > { %6716 = vmatpush1.bf16.msra.mxu1 %v9683_v52  ;;  %6664 = vmatprep.subr.bf16.mxu0 %v9688_v54  ;;  %v9749_v52 = vld [vmem:[%s11352_s21 + $0xfb0] ss:$8 sps:$4 sm:$0xff]   ;;  %v9754_v54 = vld [vmem:[%s11352_s21 + $0xea4] ss:$8 sps:$4 sm:$0xff]  }
 0x1ee   : > { %6717 = vmatprep.subr.bf16.mxu1 %v9691_v11  ;;  %v9757_v11 = vld [vmem:[%s11352_s21 + $0xfa4] ss:$8 sps:$4 sm:$0xff]  }
 0x1ef   : > { %6597 = vmatmul.mubr.bf16.gmra.mxu0 %v8762_v16  ;;  %v9760_v16 = vld [vmem:[%s11352_s21 + $0xe94] ss:$8 sps:$4 sm:$0xff]  }
 0x1f0   : > { %6650 = vmatmul.mubr.bf16.gmra.mxu1 %v8764_v17  ;;  %6665 = vmatpush1.bf16.msra.mxu0 %v9686_v12  ;;  %v9752_v12 = vld [vmem:[%s11352_s21 + $0xea0] ss:$8 sps:$4 sm:$0xff]   ;;  %v9763_v17 = vld [vmem:[%s11352_s21 + $0xf94] ss:$8 sps:$4 sm:$0xff]  }
 0x1f1   : > { %6718 = vmatpush1.bf16.msra.mxu1 %v9689_v13  ;;  %6666 = vmatprep.subr.bf16.mxu0 %v9694_v20  ;;  %v9755_v13 = vld [vmem:[%s11352_s21 + $0xfa0] ss:$8 sps:$4 sm:$0xff]   ;;  %v9758_v20 = vld [vmem:[%s11352_s21 + $0xe90] ss:$8 sps:$4 sm:$0xff]  }
 0x1f2   : > { %6719 = vmatprep.subr.bf16.mxu1 %v9697_v21  ;;  %6692 = vmatprep.mubr.bf16.mxu0 %v11673_v22  ;;  %v9761_v21 = vld [vmem:[%s11352_s21 + $0xf90] ss:$8 sps:$4 sm:$0xff]  }
 0x1f3   : > { %6745 = vmatprep.mubr.bf16.mxu1 %v11677_v23 }
 0x1f4   : > { %6667 = vmatpush1.bf16.msra.mxu0 %v9692_v24  ;;  %v9766_v24 = vld [vmem:[%s11352_s21 + $0xe84] ss:$8 sps:$4 sm:$0xff]  }
 0x1f5   : > { %6720 = vmatpush1.bf16.msra.mxu1 %v9695_v25  ;;  %6668 = vmatprep.subr.bf16.mxu0 %v9700_v26  ;;  %v9769_v25 = vld [vmem:[%s11352_s21 + $0xf84] ss:$8 sps:$4 sm:$0xff]   ;;  %v9764_v26 = vld [vmem:[%s11352_s21 + $0xe80] ss:$8 sps:$4 sm:$0xff]  }
 0x1f6   : > { %6721 = vmatprep.subr.bf16.mxu1 %v9703_v27  ;;  %v9767_v27 = vld [vmem:[%s11352_s21 + $0xf80] ss:$8 sps:$4 sm:$0xff]  }
 0x1f8   : > { %6669 = vmatpush1.bf16.msra.mxu0 %v9698_v28  ;;  %v9772_v28 = vld [vmem:[%s11352_s21 + $0x74] ss:$8 sps:$4 sm:$0xff]  }
 0x1f9   : > { %6722 = vmatpush1.bf16.msra.mxu1 %v9701_v29  ;;  %6670 = vmatprep.subr.bf16.mxu0 %v9706_v30  ;;  %v9775_v29 = vld [vmem:[%s11352_s21 + $0x174] ss:$8 sps:$4 sm:$0xff]   ;;  %v9770_v30 = vld [vmem:[%s11352_s21 + $0x70] ss:$8 sps:$4 sm:$0xff]  }
 0x1fa   : > { %6723 = vmatprep.subr.bf16.mxu1 %v9709_v31  ;;  %v9773_v31 = vld [vmem:[%s11352_s21 + $0x170] ss:$8 sps:$4 sm:$0xff]  }
 0x1fc   : > { %6671 = vmatpush1.bf16.msra.mxu0 %v9704_v34  ;;  %v4380_v34 = vld [vmem:[%s11403_s26 + $0x130] sm:$0xff] }
 0x1fd   : > { %6724 = vmatpush1.bf16.msra.mxu1 %v9707_v35  ;;  %6672 = vmatprep.subr.bf16.mxu0 %v9712_v36  ;;  %v4388_v35 = vld [vmem:[%s11403_s26 + $0x170] sm:$0xff]  ;;  %v11739_v36 = vcombine.low %v11658_v14, %v11661_v15 }
 0x1fe   : > { %6725 = vmatprep.subr.bf16.mxu1 %v9715_v37  ;;  %v11743_v37 = vcombine.low %v11664_v18, %v11667_v19  ;;  %v9776_v18 = vld [vmem:[%s11352_s21 + $0x60] ss:$8 sps:$4 sm:$0xff]  }
 0x1ff   : > { %v9779_v19 = vld [vmem:[%s11352_s21 + $0x160] ss:$8 sps:$4 sm:$0xff]  }
 0x200   : > { %6673 = vmatpush1.bf16.msra.mxu0 %v9710_v38  ;;  %v4381_v38 = vld [vmem:[%s11403_s26 + $0x138] sm:$0xff] }
 0x201   : > { %6726 = vmatpush1.bf16.msra.mxu1 %v9713_v39  ;;  %6674 = vmatprep.subr.bf16.mxu0 %v9718_v40  ;;  %v4389_v39 = vld [vmem:[%s11403_s26 + $0x178] sm:$0xff]  ;;  %v9778_v40 = vld [vmem:[%s11352_s21 + $0x64] ss:$8 sps:$4 sm:$0xff]  }
 0x202   : > { %6727 = vmatprep.subr.bf16.mxu1 %v9721_v41  ;;  %v9781_v41 = vld [vmem:[%s11352_s21 + $0x164] ss:$8 sps:$4 sm:$0xff]  }
 0x204   : > { %6675 = vmatpush1.bf16.msra.mxu0 %v9716_v42  ;;  %v8767_v42 = vcombine.high %v4380_v34, %v4388_v35 }
 0x205   : > { %6728 = vmatpush1.bf16.msra.mxu1 %v9719_v43  ;;  %6676 = vmatprep.subr.bf16.mxu0 %v9724_v44  ;;  %v8769_v43 = vcombine.high %v4381_v38, %v4389_v39 }
 0x206   : > { %6729 = vmatprep.subr.bf16.mxu1 %v9727_v45  ;;  %v9784_v45 = vld [vmem:[%s11352_s21 + $0x54] ss:$8 sps:$4 sm:$0xff]  }
 0x208   : > { %6677 = vmatpush2.bf16.msra.mxu0 %v9722_v48 }
 0x209   : > { %6730 = vmatpush2.bf16.msra.mxu1 %v9725_v50  ;;  %6678 = vmatprep.subr.bf16.mxu0 %v9730_v56  ;;  %v9787_v56 = vld [vmem:[%s11352_s21 + $0x154] ss:$8 sps:$4 sm:$0xff]  }
 0x20a   : > { %6731 = vmatprep.subr.bf16.mxu1 %v9733_v57 }
 0x20c   : > { %6679 = vmatpush2.bf16.msra.mxu0 %v9728_v60  ;;  %v9782_v60 = vld [vmem:[%s11352_s21 + $0x50] ss:$8 sps:$4 sm:$0xff]  }
 0x20d   : > { %6732 = vmatpush2.bf16.msra.mxu1 %v9731_v61  ;;  %6680 = vmatprep.subr.bf16.mxu0 %v9736_v62  ;;  %v9785_v61 = vld [vmem:[%s11352_s21 + $0x150] ss:$8 sps:$4 sm:$0xff]   ;;  %v11762_v62 = vld [vmem:[%s11403_s26] sm:$0xff] }
 0x20e   : > { %6733 = vmatprep.subr.bf16.mxu1 %v9739_v63  ;;  %v11765_v63 = vld [vmem:[%s11403_s26 + $0x40] sm:$0xff] }
 0x210   : > { %6681 = vmatpush2.bf16.msra.mxu0 %v9734_v0 }
 0x211   : > { %6734 = vmatpush2.bf16.msra.mxu1 %v9737_v1  ;;  %6682 = vmatprep.subr.bf16.mxu0 %v9742_v4  ;;  %v8766_v4 = vcombine.low %v4380_v34, %v4388_v35  ;;  %v9808_v34 = vld [vmem:[%s11352_s21 + $0x14] ss:$8 sps:$4 sm:$0xff]  }
 0x212   : > { %6735 = vmatprep.subr.bf16.mxu1 %v9745_v5  ;;  %v8768_v5 = vcombine.low %v4381_v38, %v4389_v39  ;;  %v9811_v38 = vld [vmem:[%s11352_s21 + $0x114] ss:$8 sps:$4 sm:$0xff]  }
 0x214   : > { %6683 = vmatpush2.bf16.msra.mxu0 %v9740_v6  ;;  %v11768_v6 = vld [vmem:[%s11403_s26 + $0x8] sm:$0xff] }
 0x215   : > { %6736 = vmatpush2.bf16.msra.mxu1 %v9743_v7  ;;  %6684 = vmatprep.subr.bf16.mxu0 %v9748_v10  ;;  %v11771_v7 = vld [vmem:[%s11403_s26 + $0x48] sm:$0xff] }
 0x216   : > { %6737 = vmatprep.subr.bf16.mxu1 %v9751_v46  ;;  %v9790_v46 = vld [vmem:[%s11352_s21 + $0x44] ss:$8 sps:$4 sm:$0xff]  }
 0x218   : > { %6685 = vmatpush2.bf16.msra.mxu0 %v9746_v47 }
 0x219   : > { %6738 = vmatpush2.bf16.msra.mxu1 %v9749_v52  ;;  %6686 = vmatprep.subr.bf16.mxu0 %v9754_v54  ;;  %v9793_v54 = vld [vmem:[%s11352_s21 + $0x144] ss:$8 sps:$4 sm:$0xff]  }
 0x21a   : > { %6739 = vmatprep.subr.bf16.mxu1 %v9757_v11 }
 0x21c   : > { %6687 = vmatpush2.bf16.msra.mxu0 %v9752_v12  ;;  %v9027_v12 = vcombine.high %v11762_v62, %v11765_v63 }
 0x21d   : > { %6740 = vmatpush2.bf16.msra.mxu1 %v9755_v13  ;;  %6688 = vmatprep.subr.bf16.mxu0 %v9760_v16  ;;  %v9029_v13 = vcombine.high %v11768_v6, %v11771_v7  ;;  %v9788_v16 = vld [vmem:[%s11352_s21 + $0x40] ss:$8 sps:$4 sm:$0xff]  }
 0x21e   : > { %6741 = vmatprep.subr.bf16.mxu1 %v9763_v17  ;;  %v9791_v17 = vld [vmem:[%s11352_s21 + $0x140] ss:$8 sps:$4 sm:$0xff]  }
 0x220   : > { %6689 = vmatpush2.bf16.msra.mxu0 %v9758_v20  ;;  %v9796_v20 = vld [vmem:[%s11352_s21 + $0x34] ss:$8 sps:$4 sm:$0xff]  }
 0x221   : > { %6742 = vmatpush2.bf16.msra.mxu1 %v9761_v21  ;;  %6690 = vmatprep.subr.bf16.mxu0 %v9766_v24  ;;  %v9799_v21 = vld [vmem:[%s11352_s21 + $0x134] ss:$8 sps:$4 sm:$0xff]   ;;  %v9794_v24 = vld [vmem:[%s11352_s21 + $0x30] ss:$8 sps:$4 sm:$0xff]  }
 0x222   : > { %6743 = vmatprep.subr.bf16.mxu1 %v9769_v25  ;;  %v9797_v25 = vld [vmem:[%s11352_s21 + $0x130] ss:$8 sps:$4 sm:$0xff]  }
 0x224   : > { %6691 = vmatpush2.bf16.msra.mxu0 %v9764_v26  ;;  %v9802_v26 = vld [vmem:[%s11352_s21 + $0x24] ss:$8 sps:$4 sm:$0xff]  }
 0x225   : > { %6744 = vmatpush2.bf16.msra.mxu1 %v9767_v27  ;;  %8126 = vmatprep.subr.bf16.mxu0 %v9772_v28  ;;  %v9805_v27 = vld [vmem:[%s11352_s21 + $0x124] ss:$8 sps:$4 sm:$0xff]   ;;  %v9800_v28 = vld [vmem:[%s11352_s21 + $0x20] ss:$8 sps:$4 sm:$0xff]  }
 0x226   : > { %8179 = vmatprep.subr.bf16.mxu1 %v9775_v29  ;;  %v9803_v29 = vld [vmem:[%s11352_s21 + $0x120] ss:$8 sps:$4 sm:$0xff]  }
 0x227   : > { %v6376_v14 = vpop.f32.mrf.mxu0  ;;  %6693 = vmatmul.mubr.bf16.vlgmr.msra.gmra.mxu0 %v11739_v36 }
 0x228   : > { %v6429_v15 = vpop.f32.mrf.mxu1  ;;  %6746 = vmatmul.mubr.bf16.vlgmr.msra.gmra.mxu1 %v11743_v37  ;;  %8127 = vmatpush1.bf16.msra.mxu0 %v9770_v30 }
 0x229   : > { %v11753_v44 = vadd.f32 %v6429_v15, %v6376_v14  ;;  %8180 = vmatpush1.bf16.msra.mxu1 %v9773_v31  ;;  %v6378_v48 = vpop.f32.mrf.mxu0  ;;  %8128 = vmatprep.subr.bf16.mxu0 %v9778_v40 }
 0x22a   : > { %v6431_v50 = vpop.f32.mrf.mxu1  ;;  %8181 = vmatprep.subr.bf16.mxu1 %v9781_v41  ;;  %6702 = vmatprep.mubr.bf16.mxu0 %v8767_v42  ;;  %v9806_v42 = vld [vmem:[%s11352_s21 + $0x10] ss:$8 sps:$4 sm:$0xff]  }
 0x22b   : > { %v11757_v57 = vadd.f32 %v6431_v50, %v6378_v48  ;;  %6755 = vmatprep.mubr.bf16.mxu1 %v8769_v43  ;;  %v6380_v0 = vpop.f32.mrf.mxu0  ;;  %v9809_v43 = vld [vmem:[%s11352_s21 + $0x110] ss:$8 sps:$4 sm:$0xff]  }
 0x22c   : > { %v6433_v1 = vpop.f32.mrf.mxu1  ;;  %8129 = vmatpush1.bf16.msra.mxu0 %v9776_v18  ;;  %v9814_v18 = vld [vmem:[%s11352_s21 + $0x4] ss:$8 sps:$4 sm:$0xff]  }
 0x22d   : > { %v11773_v10 = vadd.f32 %v6433_v1, %v6380_v0  ;;  %8182 = vmatpush1.bf16.msra.mxu1 %v9779_v19  ;;  %v6382_v47 = vpop.f32.mrf.mxu0  ;;  %8130 = vmatprep.subr.bf16.mxu0 %v9784_v45  ;;  %v9817_v45 = vld [vmem:[%s11352_s21 + $0x104] ss:$8 sps:$4 sm:$0xff]   ;;  %v9820_v0 = vld [vmem:[%s11352_s21 + $0xf4] ss:$8 sps:$4 sm:$0xff]  }
 0x22e   : > { %v6435_v52 = vpop.f32.mrf.mxu1  ;;  %8183 = vmatprep.subr.bf16.mxu1 %v9787_v56  ;;  %v9823_v1 = vld [vmem:[%s11352_s21 + $0x1f4] ss:$8 sps:$4 sm:$0xff]  }
 0x22f   : > { %v11777_v11 = vadd.f32 %v6435_v52, %v6382_v47  ;;  %6703 = vmatmul.mubr.bf16.gmra.mxu0 %v8766_v4  ;;  %v6386_v30 = vpop.f32.mrf.mxu0  ;;  %v9818_v4 = vld [vmem:[%s11352_s21 + $0xf0] ss:$8 sps:$4 sm:$0xff]   ;;  %v9829_v47 = vld [vmem:[%s11352_s21 + $0x1e4] ss:$8 sps:$4 sm:$0xff]   ;;  %v9824_v52 = vld [vmem:[%s11352_s21 + $0xe0] ss:$8 sps:$4 sm:$0xff]  }
 0x230   : > { %6756 = vmatmul.mubr.bf16.gmra.mxu1 %v8768_v5  ;;  %8131 = vmatpush1.bf16.msra.mxu0 %v9782_v60  ;;  %v6439_v31 = vpop.f32.mrf.mxu1  ;;  %v9812_v60 = vld [vmem:[%s11352_s21] ss:$8 sps:$4 sm:$0xff]   ;;  %v9821_v5 = vld [vmem:[%s11352_s21 + $0x1f0] ss:$8 sps:$4 sm:$0xff]  }
 0x231   : > { %8184 = vmatpush1.bf16.msra.mxu1 %v9785_v61  ;;  %8132 = vmatprep.subr.bf16.mxu0 %v9790_v46  ;;  %v11794_v35 = vadd.f32 %v6439_v31, %v6386_v30  ;;  %v6388_v39 = vpop.f32.mrf.mxu0  ;;  %v9815_v61 = vld [vmem:[%s11352_s21 + $0x100] ss:$8 sps:$4 sm:$0xff]   ;;  %v9826_v46 = vld [vmem:[%s11352_s21 + $0xe4] ss:$8 sps:$4 sm:$0xff]  }
 0x232   : > { %8185 = vmatprep.subr.bf16.mxu1 %v9793_v54  ;;  %8158 = vmatprep.mubr.bf16.mxu0 %v9027_v12  ;;  %v6441_v40 = vpop.f32.mrf.mxu1  ;;  %v9827_v54 = vld [vmem:[%s11352_s21 + $0x1e0] ss:$8 sps:$4 sm:$0xff]   ;;  %v9832_v12 = vld [vmem:[%s11352_s21 + $0xd4] ss:$8 sps:$4 sm:$0xff]   ;;  %v9850_v30 = vld [vmem:[%s11352_s21 + $0xa4] ss:$8 sps:$4 sm:$0xff]  }
 0x233   : > { %8211 = vmatprep.mubr.bf16.mxu1 %v9029_v13  ;;  %v11797_v41 = vadd.f32 %v6441_v40, %v6388_v39  ;;  %v6390_v14 = vpop.f32.mrf.mxu0  ;;  %v9835_v13 = vld [vmem:[%s11352_s21 + $0x1d4] ss:$8 sps:$4 sm:$0xff]   ;;  %v9853_v31 = vld [vmem:[%s11352_s21 + $0x1a4] ss:$8 sps:$4 sm:$0xff]  }
 0x234   : > { %8133 = vmatpush1.bf16.msra.mxu0 %v9788_v16  ;;  %v6443_v15 = vpop.f32.mrf.mxu1  ;;  %v9830_v16 = vld [vmem:[%s11352_s21 + $0xd0] ss:$8 sps:$4 sm:$0xff]   ;;  %v9856_v39 = vld [vmem:[%s11352_s21 + $0x94] ss:$8 sps:$4 sm:$0xff]  }
 0x235   : > { %8186 = vmatpush1.bf16.msra.mxu1 %v9791_v17  ;;  %8134 = vmatprep.subr.bf16.mxu0 %v9796_v20  ;;  %v11802_v19 = vadd.f32 %v6443_v15, %v6390_v14  ;;  %v6392_v48 = vpop.f32.mrf.mxu0  ;;  %v9833_v17 = vld [vmem:[%s11352_s21 + $0x1d0] ss:$8 sps:$4 sm:$0xff]   ;;  %v9838_v20 = vld [vmem:[%s11352_s21 + $0xc4] ss:$8 sps:$4 sm:$0xff]   ;;  %v9859_v40 = vld [vmem:[%s11352_s21 + $0x194] ss:$8 sps:$4 sm:$0xff]  }
 0x236   : > { %8187 = vmatprep.subr.bf16.mxu1 %v9799_v21  ;;  %v6445_v50 = vpop.f32.mrf.mxu1  ;;  %v9841_v21 = vld [vmem:[%s11352_s21 + $0x1c4] ss:$8 sps:$4 sm:$0xff]  }
 0x237   : > { %v11805_v56 = vadd.f32 %v6445_v50, %v6392_v48  ;;  %v9862_v14 = vld [vmem:[%s11352_s21 + $0x84] ss:$8 sps:$4 sm:$0xff]   ;;  %v9868_v48 = vld [vmem:[%s11352_s21 + $0x274] ss:$8 sps:$4 sm:$0xff]  }
 0x238   : > { %8135 = vmatpush1.bf16.msra.mxu0 %v9794_v24  ;;  %v9836_v24 = vld [vmem:[%s11352_s21 + $0xc0] ss:$8 sps:$4 sm:$0xff]   ;;  %v9865_v15 = vld [vmem:[%s11352_s21 + $0x184] ss:$8 sps:$4 sm:$0xff]   ;;  %v9871_v50 = vld [vmem:[%s11352_s21 + $0x374] ss:$8 sps:$4 sm:$0xff]  }
 0x239   : > { %8188 = vmatpush1.bf16.msra.mxu1 %v9797_v25  ;;  %8136 = vmatprep.subr.bf16.mxu0 %v9802_v26  ;;  %v9839_v25 = vld [vmem:[%s11352_s21 + $0x1c0] ss:$8 sps:$4 sm:$0xff]   ;;  %v9844_v26 = vld [vmem:[%s11352_s21 + $0xb4] ss:$8 sps:$4 sm:$0xff]  }
 0x23a   : > { %8189 = vmatprep.subr.bf16.mxu1 %v9805_v27  ;;  %v9847_v27 = vld [vmem:[%s11352_s21 + $0x1b4] ss:$8 sps:$4 sm:$0xff]  }
 0x23c   : > { %8137 = vmatpush1.bf16.msra.mxu0 %v9800_v28  ;;  %v9842_v28 = vld [vmem:[%s11352_s21 + $0xb0] ss:$8 sps:$4 sm:$0xff]  }
 0x23d   : > { %8190 = vmatpush1.bf16.msra.mxu1 %v9803_v29  ;;  %8138 = vmatprep.subr.bf16.mxu0 %v9808_v34  ;;  %v9845_v29 = vld [vmem:[%s11352_s21 + $0x1b0] ss:$8 sps:$4 sm:$0xff]   ;;  %v9848_v34 = vld [vmem:[%s11352_s21 + $0xa0] ss:$8 sps:$4 sm:$0xff]  }
 0x23e   : > { %8191 = vmatprep.subr.bf16.mxu1 %v9811_v38  ;;  %v9851_v38 = vld [vmem:[%s11352_s21 + $0x1a0] ss:$8 sps:$4 sm:$0xff]  }
 0x240   : > { %8139 = vmatpush1.bf16.msra.mxu0 %v9806_v42  ;;  %v9854_v42 = vld [vmem:[%s11352_s21 + $0x90] ss:$8 sps:$4 sm:$0xff]  }
 0x241   : > { %8192 = vmatpush1.bf16.msra.mxu1 %v9809_v43  ;;  %8140 = vmatprep.subr.bf16.mxu0 %v9814_v18  ;;  %v9857_v43 = vld [vmem:[%s11352_s21 + $0x190] ss:$8 sps:$4 sm:$0xff]   ;;  %v9860_v18 = vld [vmem:[%s11352_s21 + $0x80] ss:$8 sps:$4 sm:$0xff]  }
 0x242   : > { %8193 = vmatprep.subr.bf16.mxu1 %v9817_v45  ;;  %v9863_v45 = vld [vmem:[%s11352_s21 + $0x180] ss:$8 sps:$4 sm:$0xff]  }
 0x244   : > { %8141 = vmatpush1.bf16.msra.mxu0 %v9812_v60  ;;  %v9026_v60 = vcombine.low %v11762_v62, %v11765_v63  ;;  %v9880_v62 = vld [vmem:[%s11352_s21 + $0x254] ss:$8 sps:$4 sm:$0xff]  }
 0x245   : > { %8194 = vmatpush1.bf16.msra.mxu1 %v9815_v61  ;;  %8142 = vmatprep.subr.bf16.mxu0 %v9820_v0  ;;  %v9028_v61 = vcombine.low %v11768_v6, %v11771_v7  ;;  %v9866_v0 = vld [vmem:[%s11352_s21 + $0x270] ss:$8 sps:$4 sm:$0xff]   ;;  %v9883_v63 = vld [vmem:[%s11352_s21 + $0x354] ss:$8 sps:$4 sm:$0xff]  }
 0x246   : > { %8195 = vmatprep.subr.bf16.mxu1 %v9823_v1  ;;  %v9869_v1 = vld [vmem:[%s11352_s21 + $0x370] ss:$8 sps:$4 sm:$0xff]  }
 0x248   : > { %8143 = vmatpush2.bf16.msra.mxu0 %v9818_v4  ;;  %v9874_v4 = vld [vmem:[%s11352_s21 + $0x264] ss:$8 sps:$4 sm:$0xff]  }
 0x249   : > { %8196 = vmatpush2.bf16.msra.mxu1 %v9821_v5  ;;  %8144 = vmatprep.subr.bf16.mxu0 %v9826_v46  ;;  %v9877_v5 = vld [vmem:[%s11352_s21 + $0x364] ss:$8 sps:$4 sm:$0xff]   ;;  %v9872_v46 = vld [vmem:[%s11352_s21 + $0x260] ss:$8 sps:$4 sm:$0xff]  }
 0x24a   : > { %8197 = vmatprep.subr.bf16.mxu1 %v9829_v47  ;;  %v9875_v47 = vld [vmem:[%s11352_s21 + $0x360] ss:$8 sps:$4 sm:$0xff]  }
 0x24c   : > { %8145 = vmatpush2.bf16.msra.mxu0 %v9824_v52 }
 0x24d   : > { %8198 = vmatpush2.bf16.msra.mxu1 %v9827_v54  ;;  %8146 = vmatprep.subr.bf16.mxu0 %v9832_v12 }
 0x24e   : > { %8199 = vmatprep.subr.bf16.mxu1 %v9835_v13  ;;  %v11857_v13 = vld [vmem:[%s11403_s26 + $0x10] sm:$0xff] }
 0x250   : > { %8147 = vmatpush2.bf16.msra.mxu0 %v9830_v16  ;;  %v11860_v16 = vld [vmem:[%s11403_s26 + $0x50] sm:$0xff] }
 0x251   : > { %8200 = vmatpush2.bf16.msra.mxu1 %v9833_v17  ;;  %8148 = vmatprep.subr.bf16.mxu0 %v9838_v20 }
 0x252   : > { %8201 = vmatprep.subr.bf16.mxu1 %v9841_v21  ;;  %v9878_v21 = vld [vmem:[%s11352_s21 + $0x250] ss:$8 sps:$4 sm:$0xff]  }
 0x254   : > { %8149 = vmatpush2.bf16.msra.mxu0 %v9836_v24  ;;  %v11870_v24 = vld [vmem:[%s11403_s26 + $0x18] sm:$0xff] }
 0x255   : > { %8202 = vmatpush2.bf16.msra.mxu1 %v9839_v25  ;;  %8150 = vmatprep.subr.bf16.mxu0 %v9844_v26  ;;  %v11873_v25 = vld [vmem:[%s11403_s26 + $0x58] sm:$0xff] }
 0x256   : > { %8203 = vmatprep.subr.bf16.mxu1 %v9847_v27 }
 0x258   : > { %8151 = vmatpush2.bf16.msra.mxu0 %v9842_v28 }
 0x259   : > { %8204 = vmatpush2.bf16.msra.mxu1 %v9845_v29  ;;  %8152 = vmatprep.subr.bf16.mxu0 %v9850_v30  ;;  %v9886_v30 = vld [vmem:[%s11352_s21 + $0x244] ss:$8 sps:$4 sm:$0xff]  }
 0x25a   : > { %8205 = vmatprep.subr.bf16.mxu1 %v9853_v31 }
 0x25c   : > { %8153 = vmatpush2.bf16.msra.mxu0 %v9848_v34 }
 0x25d   : > { %8206 = vmatpush2.bf16.msra.mxu1 %v9851_v38  ;;  %8154 = vmatprep.subr.bf16.mxu0 %v9856_v39  ;;  %v9884_v38 = vld [vmem:[%s11352_s21 + $0x240] ss:$8 sps:$4 sm:$0xff]  }
 0x25e   : > { %8207 = vmatprep.subr.bf16.mxu1 %v9859_v40  ;;  %v9887_v39 = vld [vmem:[%s11352_s21 + $0x340] ss:$8 sps:$4 sm:$0xff]   ;;  %v9031_v40 = vcombine.high %v11857_v13, %v11860_v16 }
 0x260   : > { %8155 = vmatpush2.bf16.msra.mxu0 %v9854_v42 }
 0x261   : > { %8208 = vmatpush2.bf16.msra.mxu1 %v9857_v43  ;;  %8156 = vmatprep.subr.bf16.mxu0 %v9862_v14 }
 0x262   : > { %8209 = vmatprep.subr.bf16.mxu1 %v9865_v15 }
 0x264   : > { %8157 = vmatpush2.bf16.msra.mxu0 %v9860_v18 }
 0x265   : > { %8210 = vmatpush2.bf16.msra.mxu1 %v9863_v45  ;;  %8232 = vmatprep.subr.bf16.mxu0 %v9868_v48  ;;  %v9892_v45 = vld [vmem:[%s11352_s21 + $0x234] ss:$8 sps:$4 sm:$0xff]  }
 0x266   : > { %8285 = vmatprep.subr.bf16.mxu1 %v9871_v50  ;;  %v9895_v48 = vld [vmem:[%s11352_s21 + $0x334] ss:$8 sps:$4 sm:$0xff]  }
 0x267   : > { %v6482_v52 = vpop.f32.mrf.mxu0  ;;  %8159 = vmatmul.mubr.bf16.vlgmr.msra.gmra.mxu0 %v9026_v60  ;;  %v9890_v60 = vld [vmem:[%s11352_s21 + $0x230] ss:$8 sps:$4 sm:$0xff]  }
 0x268   : > { %v6535_v54 = vpop.f32.mrf.mxu1  ;;  %8212 = vmatmul.mubr.bf16.vlgmr.msra.gmra.mxu1 %v9028_v61  ;;  %v6483_v6 = vadd.f32 %v6482_v52, %v11753_v44  ;;  %8233 = vmatpush1.bf16.msra.mxu0 %v9866_v0  ;;  %v9881_v44 = vld [vmem:[%s11352_s21 + $0x350] ss:$8 sps:$4 sm:$0xff]  }
 0x269   : > { %8286 = vmatpush1.bf16.msra.mxu1 %v9869_v1  ;;  %v6484_v7 = vpop.f32.mrf.mxu0  ;;  %8234 = vmatprep.subr.bf16.mxu0 %v9874_v4 }
 0x26a   : > { %v6537_v12 = vpop.f32.mrf.mxu1  ;;  %8287 = vmatprep.subr.bf16.mxu1 %v9877_v5  ;;  %v11862_v17 = vadd.f32 %v6535_v54, %v6483_v6  ;;  %v6485_v20 = vadd.f32 %v6484_v7, %v11757_v57  ;;  %8168 = vmatprep.mubr.bf16.mxu0 %v11414_v53  ;;  %v9898_v5 = vld [vmem:[%s11352_s21 + $0x224] ss:$8 sps:$4 sm:$0xff]   ;;  %v9896_v54 = vld [vmem:[%s11352_s21 + $0x220] ss:$8 sps:$4 sm:$0xff]   ;;  %v9907_v6 = vld [vmem:[%s11352_s21 + $0x314] ss:$8 sps:$4 sm:$0xff]  }
 0x26b   : > { %8221 = vmatprep.mubr.bf16.mxu1 %v11417_v55  ;;  %v6486_v26 = vpop.f32.mrf.mxu0  ;;  %v9889_v55 = vld [vmem:[%s11352_s21 + $0x344] ss:$8 sps:$4 sm:$0xff]   ;;  %v9905_v7 = vld [vmem:[%s11352_s21 + $0x310] ss:$8 sps:$4 sm:$0xff]  }
 0x26c   : > { %v6539_v27 = vpop.f32.mrf.mxu1  ;;  %v11875_v28 = vadd.f32 %v6537_v12, %v6485_v20  ;;  %v6487_v57 = vadd.f32 %v6486_v26, %v11773_v10  ;;  %8235 = vmatpush1.bf16.msra.mxu0 %v9872_v46  ;;  %v9033_v10 = vcombine.high %v11870_v24, %v11873_v25  ;;  %v9901_v46 = vld [vmem:[%s11352_s21 + $0x324] ss:$8 sps:$4 sm:$0xff]   ;;  %v9916_v26 = vld [vmem:[%s11352_s21 + $0x2f4] ss:$8 sps:$4 sm:$0xff]  }
 0x26d   : > { %8288 = vmatpush1.bf16.msra.mxu1 %v9875_v47  ;;  %v6488_v53 = vpop.f32.mrf.mxu0  ;;  %8236 = vmatprep.subr.bf16.mxu0 %v9880_v62  ;;  %v9899_v62 = vld [vmem:[%s11352_s21 + $0x320] ss:$8 sps:$4 sm:$0xff]   ;;  %v9910_v12 = vld [vmem:[%s11352_s21 + $0x204] ss:$8 sps:$4 sm:$0xff]  }
 0x26e   : > { %v6541_v29 = vpop.f32.mrf.mxu1  ;;  %8289 = vmatprep.subr.bf16.mxu1 %v9883_v63  ;;  %v11880_v31 = vadd.f32 %v6539_v27, %v6487_v57  ;;  %v6489_v34 = vadd.f32 %v6488_v53, %v11777_v11  ;;  %v9904_v63 = vld [vmem:[%s11352_s21 + $0x214] ss:$8 sps:$4 sm:$0xff]   ;;  %v9913_v20 = vld [vmem:[%s11352_s21 + $0x304] ss:$8 sps:$4 sm:$0xff]   ;;  %v9914_v57 = vld [vmem:[%s11352_s21 + $0x2f0] ss:$8 sps:$4 sm:$0xff]  }
 0x26f   : > { %v6492_v42 = vpop.f32.mrf.mxu0  ;;  %8169 = vmatmul.mubr.bf16.gmra.mxu0 %v11437_v8  ;;  %v9919_v27 = vld [vmem:[%s11352_s21 + $0x3f4] ss:$8 sps:$4 sm:$0xff]   ;;  %v9917_v53 = vld [vmem:[%s11352_s21 + $0x3f0] ss:$8 sps:$4 sm:$0xff]  }
 0x270   : > { %v6545_v43 = vpop.f32.mrf.mxu1  ;;  %8222 = vmatmul.mubr.bf16.gmra.mxu1 %v11439_v9  ;;  %v11891_v14 = vadd.f32 %v6541_v29, %v6489_v34  ;;  %v6493_v11 = vadd.f32 %v6492_v42, %v11794_v35  ;;  %8237 = vmatpush1.bf16.msra.mxu0 %v9878_v21  ;;  %v9893_v9 = vld [vmem:[%s11352_s21 + $0x330] ss:$8 sps:$4 sm:$0xff]   ;;  %v9908_v21 = vld [vmem:[%s11352_s21 + $0x200] ss:$8 sps:$4 sm:$0xff]   ;;  %v9922_v29 = vld [vmem:[%s11352_s21 + $0x2e4] ss:$8 sps:$4 sm:$0xff]  }
 0x271   : > { %8290 = vmatpush1.bf16.msra.mxu1 %v9881_v44  ;;  %v6494_v15 = vpop.f32.mrf.mxu0  ;;  %8238 = vmatprep.subr.bf16.mxu0 %v9886_v30  ;;  %v9911_v44 = vld [vmem:[%s11352_s21 + $0x300] ss:$8 sps:$4 sm:$0xff]   ;;  %v9925_v30 = vld [vmem:[%s11352_s21 + $0x3e4] ss:$8 sps:$4 sm:$0xff]  }
 0x272   : > { %v6547_v18 = vpop.f32.mrf.mxu1  ;;  %8291 = vmatprep.subr.bf16.mxu1 %v9889_v55  ;;  %v6495_v50 = vadd.f32 %v6494_v15, %v11797_v41  ;;  %v11897_v8 = vadd.f32 %v6545_v43, %v6493_v11  ;;  %8264 = vmatprep.mubr.bf16.mxu0 %v9031_v40  ;;  %v9920_v55 = vld [vmem:[%s11352_s21 + $0x2e0] ss:$8 sps:$4 sm:$0xff]   ;;  %v9926_v40 = vld [vmem:[%s11352_s21 + $0x2d0] ss:$8 sps:$4 sm:$0xff]   ;;  %v9934_v42 = vld [vmem:[%s11352_s21 + $0x2c4] ss:$8 sps:$4 sm:$0xff]  }
 0x273   : > { %8317 = vmatprep.mubr.bf16.mxu1 %v9033_v10  ;;  %v6496_v61 = vpop.f32.mrf.mxu0  ;;  %v9923_v34 = vld [vmem:[%s11352_s21 + $0x3e0] ss:$8 sps:$4 sm:$0xff]   ;;  %v9929_v10 = vld [vmem:[%s11352_s21 + $0x3d0] ss:$8 sps:$4 sm:$0xff]   ;;  %v9937_v43 = vld [vmem:[%s11352_s21 + $0x3c4] ss:$8 sps:$4 sm:$0xff]  }
 0x274   : > { %v6549_v35 = vpop.f32.mrf.mxu1  ;;  %v6497_v0 = vadd.f32 %v6496_v61, %v11802_v19  ;;  %v11902_v1 = vadd.f32 %v6547_v18, %v6495_v50  ;;  %8239 = vmatpush1.bf16.msra.mxu0 %v9884_v38  ;;  %v9928_v38 = vld [vmem:[%s11352_s21 + $0x2d4] ss:$8 sps:$4 sm:$0xff]   ;;  %v9932_v11 = vld [vmem:[%s11352_s21 + $0x2c0] ss:$8 sps:$4 sm:$0xff]   ;;  %v9941_v50 = vld [vmem:[%s11352_s21 + $0x3b0] ss:$8 sps:$4 sm:$0xff]  }
 0x275   : > { %8292 = vmatpush1.bf16.msra.mxu1 %v9887_v39  ;;  %v6498_v41 = vpop.f32.mrf.mxu0  ;;  %8240 = vmatprep.subr.bf16.mxu0 %v9892_v45  ;;  %v9931_v39 = vld [vmem:[%s11352_s21 + $0x3d4] ss:$8 sps:$4 sm:$0xff]   ;;  %v9935_v15 = vld [vmem:[%s11352_s21 + $0x3c0] ss:$8 sps:$4 sm:$0xff]  }
 0x276   : > { %v6551_v4 = vpop.f32.mrf.mxu1  ;;  %8293 = vmatprep.subr.bf16.mxu1 %v9895_v48  ;;  %v6499_v47 = vadd.f32 %v6498_v41, %v11805_v56  ;;  %v11907_v52 = vadd.f32 %v6549_v35, %v6497_v0  ;;  %v9902_v56 = vld [vmem:[%s11352_s21 + $0x210] ss:$8 sps:$4 sm:$0xff]   ;;  %v9940_v18 = vld [vmem:[%s11352_s21 + $0x2b4] ss:$8 sps:$4 sm:$0xff]   ;;  %v9944_v61 = vld [vmem:[%s11352_s21 + $0x2a0] ss:$8 sps:$4 sm:$0xff]  }
 0x277   : > { %v9943_v45 = vld [vmem:[%s11352_s21 + $0x3b4] ss:$8 sps:$4 sm:$0xff]   ;;  %v9938_v48 = vld [vmem:[%s11352_s21 + $0x2b0] ss:$8 sps:$4 sm:$0xff]   ;;  %v9947_v35 = vld [vmem:[%s11352_s21 + $0x3a0] ss:$8 sps:$4 sm:$0xff]  }
 0x278   : > { %v11909_v19 = vadd.f32 %v6551_v4, %v6499_v47  ;;  %8241 = vmatpush1.bf16.msra.mxu0 %v9890_v60  ;;  %v9946_v60 = vld [vmem:[%s11352_s21 + $0x2a4] ss:$8 sps:$4 sm:$0xff]   ;;  %v9952_v0 = vld [vmem:[%s11352_s21 + $0x294] ss:$8 sps:$4 sm:$0xff]   ;;  %v9950_v4 = vld [vmem:[%s11352_s21 + $0x290] ss:$8 sps:$4 sm:$0xff]  }
 0x279   : > { %8294 = vmatpush1.bf16.msra.mxu1 %v9893_v9  ;;  %8242 = vmatprep.subr.bf16.mxu0 %v9898_v5  ;;  %v9949_v9 = vld [vmem:[%s11352_s21 + $0x3a4] ss:$8 sps:$4 sm:$0xff]   ;;  %v9955_v41 = vld [vmem:[%s11352_s21 + $0x394] ss:$8 sps:$4 sm:$0xff]   ;;  %v9953_v5 = vld [vmem:[%s11352_s21 + $0x390] ss:$8 sps:$4 sm:$0xff]  }
 0x27a   : > { %8295 = vmatprep.subr.bf16.mxu1 %v9901_v46  ;;  %v9958_v46 = vld [vmem:[%s11352_s21 + $0x284] ss:$8 sps:$4 sm:$0xff]  }
 0x27b   : > { %v9961_v47 = vld [vmem:[%s11352_s21 + $0x384] ss:$8 sps:$4 sm:$0xff]  }
 0x27c   : > { %8243 = vmatpush1.bf16.msra.mxu0 %v9896_v54  ;;  %v9956_v54 = vld [vmem:[%s11352_s21 + $0x280] ss:$8 sps:$4 sm:$0xff]  }
 0x27d   : > { %8296 = vmatpush1.bf16.msra.mxu1 %v9899_v62  ;;  %8244 = vmatprep.subr.bf16.mxu0 %v9904_v63  ;;  %v9959_v62 = vld [vmem:[%s11352_s21 + $0x380] ss:$8 sps:$4 sm:$0xff]   ;;  %v9964_v63 = vld [vmem:[%s11352_s21 + $0x474] ss:$8 sps:$4 sm:$0xff]  }
 0x27e   : > { %8297 = vmatprep.subr.bf16.mxu1 %v9907_v6  ;;  %v9967_v6 = vld [vmem:[%s11352_s21 + $0x574] ss:$8 sps:$4 sm:$0xff]  }
 0x280   : > { %8245 = vmatpush1.bf16.msra.mxu0 %v9902_v56  ;;  %v9030_v56 = vcombine.low %v11857_v13, %v11860_v16  ;;  %v9968_v13 = vld [vmem:[%s11352_s21 + $0x460] ss:$8 sps:$4 sm:$0xff]  }
 0x281   : > { %8298 = vmatpush1.bf16.msra.mxu1 %v9905_v7  ;;  %8246 = vmatprep.subr.bf16.mxu0 %v9910_v12  ;;  %v9032_v7 = vcombine.low %v11870_v24, %v11873_v25  ;;  %v9962_v12 = vld [vmem:[%s11352_s21 + $0x470] ss:$8 sps:$4 sm:$0xff]   ;;  %v9971_v16 = vld [vmem:[%s11352_s21 + $0x560] ss:$8 sps:$4 sm:$0xff]   ;;  %v9976_v24 = vld [vmem:[%s11352_s21 + $0x454] ss:$8 sps:$4 sm:$0xff]  }
 0x282   : > { %8299 = vmatprep.subr.bf16.mxu1 %v9913_v20  ;;  %v9965_v20 = vld [vmem:[%s11352_s21 + $0x570] ss:$8 sps:$4 sm:$0xff]   ;;  %v9979_v25 = vld [vmem:[%s11352_s21 + $0x554] ss:$8 sps:$4 sm:$0xff]  }
 0x284   : > { %8247 = vmatpush1.bf16.msra.mxu0 %v9908_v21  ;;  %v9970_v21 = vld [vmem:[%s11352_s21 + $0x464] ss:$8 sps:$4 sm:$0xff]  }
 0x285   : > { %8300 = vmatpush1.bf16.msra.mxu1 %v9911_v44  ;;  %8248 = vmatprep.subr.bf16.mxu0 %v9916_v26  ;;  %v9973_v44 = vld [vmem:[%s11352_s21 + $0x564] ss:$8 sps:$4 sm:$0xff]  }
 0x286   : > { %8301 = vmatprep.subr.bf16.mxu1 %v9919_v27  ;;  %v11970_v26 = vld [vmem:[%s11403_s26 + $0x20] sm:$0xff] }
 0x287   : > { %v11973_v27 = vld [vmem:[%s11403_s26 + $0x60] sm:$0xff] }
 0x288   : > { %8249 = vmatpush2.bf16.msra.mxu0 %v9914_v57  ;;  %v11976_v57 = vld [vmem:[%s11403_s26 + $0x28] sm:$0xff] }
 0x289   : > { %8302 = vmatpush2.bf16.msra.mxu1 %v9917_v53  ;;  %8250 = vmatprep.subr.bf16.mxu0 %v9922_v29  ;;  %v11979_v53 = vld [vmem:[%s11403_s26 + $0x68] sm:$0xff]  ;;  %v9974_v29 = vld [vmem:[%s11352_s21 + $0x450] ss:$8 sps:$4 sm:$0xff]  }
 0x28a   : > { %8303 = vmatprep.subr.bf16.mxu1 %v9925_v30  ;;  %v9977_v30 = vld [vmem:[%s11352_s21 + $0x550] ss:$8 sps:$4 sm:$0xff]  }
 0x28c   : > { %8251 = vmatpush2.bf16.msra.mxu0 %v9920_v55  ;;  %v9035_v55 = vcombine.high %v11970_v26, %v11973_v27 }
 0x28d   : > { %8304 = vmatpush2.bf16.msra.mxu1 %v9923_v34  ;;  %8252 = vmatprep.subr.bf16.mxu0 %v9928_v38  ;;  %v9037_v34 = vcombine.high %v11976_v57, %v11979_v53  ;;  %v9980_v38 = vld [vmem:[%s11352_s21 + $0x440] ss:$8 sps:$4 sm:$0xff]  }
 0x28e   : > { %8305 = vmatprep.subr.bf16.mxu1 %v9931_v39  ;;  %v9983_v39 = vld [vmem:[%s11352_s21 + $0x540] ss:$8 sps:$4 sm:$0xff]  }
 0x290   : > { %8253 = vmatpush2.bf16.msra.mxu0 %v9926_v40  ;;  %v9988_v40 = vld [vmem:[%s11352_s21 + $0x434] ss:$8 sps:$4 sm:$0xff]  }
 0x291   : > { %8306 = vmatpush2.bf16.msra.mxu1 %v9929_v10  ;;  %8254 = vmatprep.subr.bf16.mxu0 %v9934_v42  ;;  %v9991_v10 = vld [vmem:[%s11352_s21 + $0x534] ss:$8 sps:$4 sm:$0xff]   ;;  %v9994_v42 = vld [vmem:[%s11352_s21 + $0x424] ss:$8 sps:$4 sm:$0xff]  }
 0x292   : > { %8307 = vmatprep.subr.bf16.mxu1 %v9937_v43  ;;  %v9997_v43 = vld [vmem:[%s11352_s21 + $0x524] ss:$8 sps:$4 sm:$0xff]  }
 0x294   : > { %8255 = vmatpush2.bf16.msra.mxu0 %v9932_v11  ;;  %v9992_v11 = vld [vmem:[%s11352_s21 + $0x420] ss:$8 sps:$4 sm:$0xff]  }
 0x295   : > { %8308 = vmatpush2.bf16.msra.mxu1 %v9935_v15  ;;  %8256 = vmatprep.subr.bf16.mxu0 %v9940_v18  ;;  %v9995_v15 = vld [vmem:[%s11352_s21 + $0x520] ss:$8 sps:$4 sm:$0xff]   ;;  %v10000_v18 = vld [vmem:[%s11352_s21 + $0x414] ss:$8 sps:$4 sm:$0xff]  }
 0x296   : > { %8309 = vmatprep.subr.bf16.mxu1 %v9943_v45  ;;  %v10003_v45 = vld [vmem:[%s11352_s21 + $0x514] ss:$8 sps:$4 sm:$0xff]  }
 0x298   : > { %8257 = vmatpush2.bf16.msra.mxu0 %v9938_v48  ;;  %v9998_v48 = vld [vmem:[%s11352_s21 + $0x410] ss:$8 sps:$4 sm:$0xff]  }
 0x299   : > { %8310 = vmatpush2.bf16.msra.mxu1 %v9941_v50  ;;  %8258 = vmatprep.subr.bf16.mxu0 %v9946_v60  ;;  %v10001_v50 = vld [vmem:[%s11352_s21 + $0x510] ss:$8 sps:$4 sm:$0xff]   ;;  %v10006_v60 = vld [vmem:[%s11352_s21 + $0x404] ss:$8 sps:$4 sm:$0xff]  }
 0x29a   : > { %8311 = vmatprep.subr.bf16.mxu1 %v9949_v9  ;;  %v10009_v9 = vld [vmem:[%s11352_s21 + $0x504] ss:$8 sps:$4 sm:$0xff]  }
 0x29c   : > { %8259 = vmatpush2.bf16.msra.mxu0 %v9944_v61  ;;  %v10004_v61 = vld [vmem:[%s11352_s21 + $0x400] ss:$8 sps:$4 sm:$0xff]  }
 0x29d   : > { %8312 = vmatpush2.bf16.msra.mxu1 %v9947_v35  ;;  %8260 = vmatprep.subr.bf16.mxu0 %v9952_v0  ;;  %v10007_v35 = vld [vmem:[%s11352_s21 + $0x500] ss:$8 sps:$4 sm:$0xff]   ;;  %v10012_v0 = vld [vmem:[%s11352_s21 + $0x4f4] ss:$8 sps:$4 sm:$0xff]  }
 0x29e   : > { %8313 = vmatprep.subr.bf16.mxu1 %v9955_v41  ;;  %v10015_v41 = vld [vmem:[%s11352_s21 + $0x5f4] ss:$8 sps:$4 sm:$0xff]  }
 0x2a0   : > { %8261 = vmatpush2.bf16.msra.mxu0 %v9950_v4  ;;  %v10010_v4 = vld [vmem:[%s11352_s21 + $0x4f0] ss:$8 sps:$4 sm:$0xff]  }
 0x2a1   : > { %8314 = vmatpush2.bf16.msra.mxu1 %v9953_v5  ;;  %8262 = vmatprep.subr.bf16.mxu0 %v9958_v46  ;;  %v10013_v5 = vld [vmem:[%s11352_s21 + $0x5f0] ss:$8 sps:$4 sm:$0xff]   ;;  %v10018_v46 = vld [vmem:[%s11352_s21 + $0x4e4] ss:$8 sps:$4 sm:$0xff]  }
 0x2a2   : > { %8315 = vmatprep.subr.bf16.mxu1 %v9961_v47  ;;  %v10021_v47 = vld [vmem:[%s11352_s21 + $0x5e4] ss:$8 sps:$4 sm:$0xff]  }
 0x2a4   : > { %8263 = vmatpush2.bf16.msra.mxu0 %v9956_v54  ;;  %v10016_v54 = vld [vmem:[%s11352_s21 + $0x4e0] ss:$8 sps:$4 sm:$0xff]  }
 0x2a5   : > { %8316 = vmatpush2.bf16.msra.mxu1 %v9959_v62  ;;  %8338 = vmatprep.subr.bf16.mxu0 %v9964_v63  ;;  %v10019_v62 = vld [vmem:[%s11352_s21 + $0x5e0] ss:$8 sps:$4 sm:$0xff]   ;;  %v10024_v63 = vld [vmem:[%s11352_s21 + $0x4d4] ss:$8 sps:$4 sm:$0xff]  }
 0x2a6   : > { %8391 = vmatprep.subr.bf16.mxu1 %v9967_v6  ;;  %v10027_v6 = vld [vmem:[%s11352_s21 + $0x5d4] ss:$8 sps:$4 sm:$0xff]  }
 0x2a7   : > { %8265 = vmatmul.mubr.bf16.vlgmr.msra.gmra.mxu0 %v9030_v56  ;;  %v10022_v56 = vld [vmem:[%s11352_s21 + $0x4d0] ss:$8 sps:$4 sm:$0xff]  }
 0x2a8   : > { %8318 = vmatmul.mubr.bf16.vlgmr.msra.gmra.mxu1 %v9032_v7  ;;  %8339 = vmatpush1.bf16.msra.mxu0 %v9962_v12  ;;  %v10025_v7 = vld [vmem:[%s11352_s21 + $0x5d0] ss:$8 sps:$4 sm:$0xff]   ;;  %v10030_v12 = vld [vmem:[%s11352_s21 + $0x4c4] ss:$8 sps:$4 sm:$0xff]  }
 0x2a9   : > { %8392 = vmatpush1.bf16.msra.mxu1 %v9965_v20  ;;  %8340 = vmatprep.subr.bf16.mxu0 %v9970_v21  ;;  %v10033_v20 = vld [vmem:[%s11352_s21 + $0x5c4] ss:$8 sps:$4 sm:$0xff]   ;;  %v10028_v21 = vld [vmem:[%s11352_s21 + $0x4c0] ss:$8 sps:$4 sm:$0xff]  }
 0x2aa   : > { %8393 = vmatprep.subr.bf16.mxu1 %v9973_v44  ;;  %8274 = vmatprep.mubr.bf16.mxu0 %v11486_v49  ;;  %v9982_v49 = vld [vmem:[%s11352_s21 + $0x444] ss:$8 sps:$4 sm:$0xff]   ;;  %v10031_v44 = vld [vmem:[%s11352_s21 + $0x5c0] ss:$8 sps:$4 sm:$0xff]  }
 0x2ab   : > { %8327 = vmatprep.mubr.bf16.mxu1 %v11493_v51  ;;  %v9985_v51 = vld [vmem:[%s11352_s21 + $0x544] ss:$8 sps:$4 sm:$0xff]  }
 0x2ac   : > { %8341 = vmatpush1.bf16.msra.mxu0 %v9968_v13  ;;  %v10036_v13 = vld [vmem:[%s11352_s21 + $0x4b4] ss:$8 sps:$4 sm:$0xff]  }
 0x2ad   : > { %8394 = vmatpush1.bf16.msra.mxu1 %v9971_v16  ;;  %8342 = vmatprep.subr.bf16.mxu0 %v9976_v24  ;;  %v10039_v16 = vld [vmem:[%s11352_s21 + $0x5b4] ss:$8 sps:$4 sm:$0xff]   ;;  %v10034_v24 = vld [vmem:[%s11352_s21 + $0x4b0] ss:$8 sps:$4 sm:$0xff]  }
 0x2ae   : > { %8395 = vmatprep.subr.bf16.mxu1 %v9979_v25  ;;  %v10037_v25 = vld [vmem:[%s11352_s21 + $0x5b0] ss:$8 sps:$4 sm:$0xff]  }
 0x2af   : > { %8275 = vmatmul.mubr.bf16.gmra.mxu0 %v11539_v32  ;;  %v9986_v32 = vld [vmem:[%s11352_s21 + $0x430] ss:$8 sps:$4 sm:$0xff]  }
 0x2b0   : > { %8328 = vmatmul.mubr.bf16.gmra.mxu1 %v11543_v33  ;;  %8343 = vmatpush1.bf16.msra.mxu0 %v9974_v29  ;;  %v9989_v33 = vld [vmem:[%s11352_s21 + $0x530] ss:$8 sps:$4 sm:$0xff]   ;;  %v10042_v29 = vld [vmem:[%s11352_s21 + $0x4a4] ss:$8 sps:$4 sm:$0xff]  }
 0x2b1   : > { %8396 = vmatpush1.bf16.msra.mxu1 %v9977_v30  ;;  %8344 = vmatprep.subr.bf16.mxu0 %v9982_v49  ;;  %v10045_v30 = vld [vmem:[%s11352_s21 + $0x5a4] ss:$8 sps:$4 sm:$0xff]   ;;  %v10040_v49 = vld [vmem:[%s11352_s21 + $0x4a0] ss:$8 sps:$4 sm:$0xff]  }
 0x2b2   : > { %8397 = vmatprep.subr.bf16.mxu1 %v9985_v51  ;;  %8370 = vmatprep.mubr.bf16.mxu0 %v9035_v55  ;;  %v10043_v51 = vld [vmem:[%s11352_s21 + $0x5a0] ss:$8 sps:$4 sm:$0xff]   ;;  %v10048_v55 = vld [vmem:[%s11352_s21 + $0x494] ss:$8 sps:$4 sm:$0xff]  }
 0x2b3   : > { %8423 = vmatprep.mubr.bf16.mxu1 %v9037_v34  ;;  %v10051_v34 = vld [vmem:[%s11352_s21 + $0x594] ss:$8 sps:$4 sm:$0xff]  }
 0x2b4   : > { %8345 = vmatpush1.bf16.msra.mxu0 %v9980_v38  ;;  %v10046_v38 = vld [vmem:[%s11352_s21 + $0x490] ss:$8 sps:$4 sm:$0xff]  }
 0x2b5   : > { %8398 = vmatpush1.bf16.msra.mxu1 %v9983_v39  ;;  %8346 = vmatprep.subr.bf16.mxu0 %v9988_v40  ;;  %v10049_v39 = vld [vmem:[%s11352_s21 + $0x590] ss:$8 sps:$4 sm:$0xff]   ;;  %v10054_v40 = vld [vmem:[%s11352_s21 + $0x484] ss:$8 sps:$4 sm:$0xff]  }
 0x2b6   : > { %8399 = vmatprep.subr.bf16.mxu1 %v9991_v10  ;;  %v10057_v10 = vld [vmem:[%s11352_s21 + $0x584] ss:$8 sps:$4 sm:$0xff]  }
 0x2b8   : > { %8347 = vmatpush1.bf16.msra.mxu0 %v9986_v32  ;;  %v10052_v32 = vld [vmem:[%s11352_s21 + $0x480] ss:$8 sps:$4 sm:$0xff]  }
 0x2b9   : > { %8400 = vmatpush1.bf16.msra.mxu1 %v9989_v33  ;;  %8348 = vmatprep.subr.bf16.mxu0 %v9994_v42  ;;  %v10055_v33 = vld [vmem:[%s11352_s21 + $0x580] ss:$8 sps:$4 sm:$0xff]   ;;  %v10060_v42 = vld [vmem:[%s11352_s21 + $0x674] ss:$8 sps:$4 sm:$0xff]  }
 0x2ba   : > { %8401 = vmatprep.subr.bf16.mxu1 %v9997_v43  ;;  %v10063_v43 = vld [vmem:[%s11352_s21 + $0x774] ss:$8 sps:$4 sm:$0xff]  }
 0x2bc   : > { %8349 = vmatpush1.bf16.msra.mxu0 %v9992_v11  ;;  %v9034_v11 = vcombine.low %v11970_v26, %v11973_v27  ;;  %v10064_v26 = vld [vmem:[%s11352_s21 + $0x660] ss:$8 sps:$4 sm:$0xff]  }
 0x2bd   : > { %8402 = vmatpush1.bf16.msra.mxu1 %v9995_v15  ;;  %8350 = vmatprep.subr.bf16.mxu0 %v10000_v18  ;;  %v9036_v15 = vcombine.low %v11976_v57, %v11979_v53  ;;  %v10058_v18 = vld [vmem:[%s11352_s21 + $0x670] ss:$8 sps:$4 sm:$0xff]   ;;  %v10067_v27 = vld [vmem:[%s11352_s21 + $0x760] ss:$8 sps:$4 sm:$0xff]   ;;  %v10072_v57 = vld [vmem:[%s11352_s21 + $0x654] ss:$8 sps:$4 sm:$0xff]  }
 0x2be   : > { %8403 = vmatprep.subr.bf16.mxu1 %v10003_v45  ;;  %v10061_v45 = vld [vmem:[%s11352_s21 + $0x770] ss:$8 sps:$4 sm:$0xff]   ;;  %v10075_v53 = vld [vmem:[%s11352_s21 + $0x754] ss:$8 sps:$4 sm:$0xff]  }
 0x2c0   : > { %8351 = vmatpush1.bf16.msra.mxu0 %v9998_v48  ;;  %v10066_v48 = vld [vmem:[%s11352_s21 + $0x664] ss:$8 sps:$4 sm:$0xff]  }
 0x2c1   : > { %8404 = vmatpush1.bf16.msra.mxu1 %v10001_v50  ;;  %8352 = vmatprep.subr.bf16.mxu0 %v10006_v60  ;;  %v10069_v50 = vld [vmem:[%s11352_s21 + $0x764] ss:$8 sps:$4 sm:$0xff]   ;;  %v12058_v60 = vld [vmem:[%s11403_s26 + $0x30] sm:$0xff] }
 0x2c2   : > { %8405 = vmatprep.subr.bf16.mxu1 %v10009_v9  ;;  %v12061_v9 = vld [vmem:[%s11403_s26 + $0x70] sm:$0xff] }
 0x2c4   : > { %8353 = vmatpush1.bf16.msra.mxu0 %v10004_v61  ;;  %v12064_v61 = vld [vmem:[%s11403_s26 + $0x38] sm:$0xff] }
 0x2c5   : > { %8406 = vmatpush1.bf16.msra.mxu1 %v10007_v35  ;;  %8354 = vmatprep.subr.bf16.mxu0 %v10012_v0  ;;  %v12067_v35 = vld [vmem:[%s11403_s26 + $0x78] sm:$0xff] }
 0x2c6   : > { %8407 = vmatprep.subr.bf16.mxu1 %v10015_v41  ;;  %v10070_v0 = vld [vmem:[%s11352_s21 + $0x650] ss:$8 sps:$4 sm:$0xff]  }
 0x2c7   : > { %v10073_v41 = vld [vmem:[%s11352_s21 + $0x750] ss:$8 sps:$4 sm:$0xff]  }
 0x2c8   : > { %8355 = vmatpush2.bf16.msra.mxu0 %v10010_v4  ;;  %v9039_v4 = vcombine.high %v12058_v60, %v12061_v9 }
 0x2c9   : > { %8408 = vmatpush2.bf16.msra.mxu1 %v10013_v5  ;;  %8356 = vmatprep.subr.bf16.mxu0 %v10018_v46  ;;  %v9041_v5 = vcombine.high %v12064_v61, %v12067_v35  ;;  %v10076_v46 = vld [vmem:[%s11352_s21 + $0x640] ss:$8 sps:$4 sm:$0xff]  }
 0x2ca   : > { %8409 = vmatprep.subr.bf16.mxu1 %v10021_v47  ;;  %v10079_v47 = vld [vmem:[%s11352_s21 + $0x740] ss:$8 sps:$4 sm:$0xff]  }
 0x2cc   : > { %8357 = vmatpush2.bf16.msra.mxu0 %v10016_v54  ;;  %v10084_v54 = vld [vmem:[%s11352_s21 + $0x634] ss:$8 sps:$4 sm:$0xff]  }
 0x2cd   : > { %8410 = vmatpush2.bf16.msra.mxu1 %v10019_v62  ;;  %8358 = vmatprep.subr.bf16.mxu0 %v10024_v63  ;;  %v10087_v62 = vld [vmem:[%s11352_s21 + $0x734] ss:$8 sps:$4 sm:$0xff]   ;;  %v10090_v63 = vld [vmem:[%s11352_s21 + $0x624] ss:$8 sps:$4 sm:$0xff]  }
 0x2ce   : > { %8411 = vmatprep.subr.bf16.mxu1 %v10027_v6  ;;  %v10093_v6 = vld [vmem:[%s11352_s21 + $0x724] ss:$8 sps:$4 sm:$0xff]  }
 0x2d0   : > { %8359 = vmatpush2.bf16.msra.mxu0 %v10022_v56  ;;  %v10088_v56 = vld [vmem:[%s11352_s21 + $0x620] ss:$8 sps:$4 sm:$0xff]  }
 0x2d1   : > { %8412 = vmatpush2.bf16.msra.mxu1 %v10025_v7  ;;  %8360 = vmatprep.subr.bf16.mxu0 %v10030_v12  ;;  %v10091_v7 = vld [vmem:[%s11352_s21 + $0x720] ss:$8 sps:$4 sm:$0xff]   ;;  %v10096_v12 = vld [vmem:[%s11352_s21 + $0x614] ss:$8 sps:$4 sm:$0xff]  }
 0x2d2   : > { %8413 = vmatprep.subr.bf16.mxu1 %v10033_v20  ;;  %v10099_v20 = vld [vmem:[%s11352_s21 + $0x714] ss:$8 sps:$4 sm:$0xff]  }
 0x2d4   : > { %8361 = vmatpush2.bf16.msra.mxu0 %v10028_v21  ;;  %v10094_v21 = vld [vmem:[%s11352_s21 + $0x610] ss:$8 sps:$4 sm:$0xff]  }
 0x2d5   : > { %8414 = vmatpush2.bf16.msra.mxu1 %v10031_v44  ;;  %8362 = vmatprep.subr.bf16.mxu0 %v10036_v13  ;;  %v10097_v44 = vld [vmem:[%s11352_s21 + $0x710] ss:$8 sps:$4 sm:$0xff]   ;;  %v10102_v13 = vld [vmem:[%s11352_s21 + $0x604] ss:$8 sps:$4 sm:$0xff]  }
 0x2d6   : > { %8415 = vmatprep.subr.bf16.mxu1 %v10039_v16  ;;  %v10105_v16 = vld [vmem:[%s11352_s21 + $0x704] ss:$8 sps:$4 sm:$0xff]  }
 0x2d8   : > { %8363 = vmatpush2.bf16.msra.mxu0 %v10034_v24  ;;  %v10100_v24 = vld [vmem:[%s11352_s21 + $0x600] ss:$8 sps:$4 sm:$0xff]  }
 0x2d9   : > { %8416 = vmatpush2.bf16.msra.mxu1 %v10037_v25  ;;  %8364 = vmatprep.subr.bf16.mxu0 %v10042_v29  ;;  %v10103_v25 = vld [vmem:[%s11352_s21 + $0x700] ss:$8 sps:$4 sm:$0xff]   ;;  %v10108_v29 = vld [vmem:[%s11352_s21 + $0x6f4] ss:$8 sps:$4 sm:$0xff]  }
 0x2da   : > { %8417 = vmatprep.subr.bf16.mxu1 %v10045_v30  ;;  %v10111_v30 = vld [vmem:[%s11352_s21 + $0x7f4] ss:$8 sps:$4 sm:$0xff]  }
 0x2dc   : > { %8365 = vmatpush2.bf16.msra.mxu0 %v10040_v49  ;;  %v10106_v49 = vld [vmem:[%s11352_s21 + $0x6f0] ss:$8 sps:$4 sm:$0xff]  }
 0x2dd   : > { %8418 = vmatpush2.bf16.msra.mxu1 %v10043_v51  ;;  %8366 = vmatprep.subr.bf16.mxu0 %v10048_v55  ;;  %v10109_v51 = vld [vmem:[%s11352_s21 + $0x7f0] ss:$8 sps:$4 sm:$0xff]   ;;  %v10114_v55 = vld [vmem:[%s11352_s21 + $0x6e4] ss:$8 sps:$4 sm:$0xff]  }
 0x2de   : > { %8419 = vmatprep.subr.bf16.mxu1 %v10051_v34  ;;  %v10117_v34 = vld [vmem:[%s11352_s21 + $0x7e4] ss:$8 sps:$4 sm:$0xff]  }
 0x2e0   : > { %8367 = vmatpush2.bf16.msra.mxu0 %v10046_v38  ;;  %v10112_v38 = vld [vmem:[%s11352_s21 + $0x6e0] ss:$8 sps:$4 sm:$0xff]  }
 0x2e1   : > { %8420 = vmatpush2.bf16.msra.mxu1 %v10049_v39  ;;  %8368 = vmatprep.subr.bf16.mxu0 %v10054_v40  ;;  %v10115_v39 = vld [vmem:[%s11352_s21 + $0x7e0] ss:$8 sps:$4 sm:$0xff]   ;;  %v10120_v40 = vld [vmem:[%s11352_s21 + $0x6d4] ss:$8 sps:$4 sm:$0xff]  }
 0x2e2   : > { %8421 = vmatprep.subr.bf16.mxu1 %v10057_v10  ;;  %v10123_v10 = vld [vmem:[%s11352_s21 + $0x7d4] ss:$8 sps:$4 sm:$0xff]  }
 0x2e4   : > { %8369 = vmatpush2.bf16.msra.mxu0 %v10052_v32  ;;  %v10118_v32 = vld [vmem:[%s11352_s21 + $0x6d0] ss:$8 sps:$4 sm:$0xff]  }
 0x2e5   : > { %8422 = vmatpush2.bf16.msra.mxu1 %v10055_v33  ;;  %8444 = vmatprep.subr.bf16.mxu0 %v10060_v42  ;;  %v10121_v33 = vld [vmem:[%s11352_s21 + $0x7d0] ss:$8 sps:$4 sm:$0xff]   ;;  %v10126_v42 = vld [vmem:[%s11352_s21 + $0x6c4] ss:$8 sps:$4 sm:$0xff]  }
 0x2e6   : > { %8497 = vmatprep.subr.bf16.mxu1 %v10063_v43  ;;  %v10129_v43 = vld [vmem:[%s11352_s21 + $0x7c4] ss:$8 sps:$4 sm:$0xff]  }
 0x2e7   : > { %8371 = vmatmul.mubr.bf16.vlgmr.msra.gmra.mxu0 %v9034_v11  ;;  %v10124_v11 = vld [vmem:[%s11352_s21 + $0x6c0] ss:$8 sps:$4 sm:$0xff]  }
 0x2e8   : > { %8424 = vmatmul.mubr.bf16.vlgmr.msra.gmra.mxu1 %v9036_v15  ;;  %8445 = vmatpush1.bf16.msra.mxu0 %v10058_v18  ;;  %v10127_v15 = vld [vmem:[%s11352_s21 + $0x7c0] ss:$8 sps:$4 sm:$0xff]   ;;  %v10132_v18 = vld [vmem:[%s11352_s21 + $0x6b4] ss:$8 sps:$4 sm:$0xff]  }
 0x2e9   : > { %8498 = vmatpush1.bf16.msra.mxu1 %v10061_v45  ;;  %8446 = vmatprep.subr.bf16.mxu0 %v10066_v48  ;;  %v10135_v45 = vld [vmem:[%s11352_s21 + $0x7b4] ss:$8 sps:$4 sm:$0xff]   ;;  %v10130_v48 = vld [vmem:[%s11352_s21 + $0x6b0] ss:$8 sps:$4 sm:$0xff]  }
 0x2ea   : > { %8499 = vmatprep.subr.bf16.mxu1 %v10069_v50  ;;  %8380 = vmatprep.mubr.bf16.mxu0 %v11573_v58  ;;  %v10078_v58 = vld [vmem:[%s11352_s21 + $0x644] ss:$8 sps:$4 sm:$0xff]   ;;  %v10133_v50 = vld [vmem:[%s11352_s21 + $0x7b0] ss:$8 sps:$4 sm:$0xff]  }
 0x2eb   : > { %8433 = vmatprep.mubr.bf16.mxu1 %v11577_v59  ;;  %v10081_v59 = vld [vmem:[%s11352_s21 + $0x744] ss:$8 sps:$4 sm:$0xff]  }
 0x2ec   : > { %8447 = vmatpush1.bf16.msra.mxu0 %v10064_v26  ;;  %v10138_v26 = vld [vmem:[%s11352_s21 + $0x6a4] ss:$8 sps:$4 sm:$0xff]  }
 0x2ed   : > { %8500 = vmatpush1.bf16.msra.mxu1 %v10067_v27  ;;  %8448 = vmatprep.subr.bf16.mxu0 %v10072_v57  ;;  %v10141_v27 = vld [vmem:[%s11352_s21 + $0x7a4] ss:$8 sps:$4 sm:$0xff]   ;;  %v10136_v57 = vld [vmem:[%s11352_s21 + $0x6a0] ss:$8 sps:$4 sm:$0xff]  }
 0x2ee   : > { %8501 = vmatprep.subr.bf16.mxu1 %v10075_v53  ;;  %v10139_v53 = vld [vmem:[%s11352_s21 + $0x7a0] ss:$8 sps:$4 sm:$0xff]  }
 0x2ef   : > { %8381 = vmatmul.mubr.bf16.gmra.mxu0 %v11639_v2  ;;  %v10082_v2 = vld [vmem:[%s11352_s21 + $0x630] ss:$8 sps:$4 sm:$0xff]  }
 0x2f0   : > { %8434 = vmatmul.mubr.bf16.gmra.mxu1 %v11643_v3  ;;  %8449 = vmatpush1.bf16.msra.mxu0 %v10070_v0  ;;  %v10085_v3 = vld [vmem:[%s11352_s21 + $0x730] ss:$8 sps:$4 sm:$0xff]   ;;  %v10144_v0 = vld [vmem:[%s11352_s21 + $0x694] ss:$8 sps:$4 sm:$0xff]  }
 0x2f1   : > { %8502 = vmatpush1.bf16.msra.mxu1 %v10073_v41  ;;  %8450 = vmatprep.subr.bf16.mxu0 %v10078_v58  ;;  %v10147_v41 = vld [vmem:[%s11352_s21 + $0x794] ss:$8 sps:$4 sm:$0xff]   ;;  %v10142_v58 = vld [vmem:[%s11352_s21 + $0x690] ss:$8 sps:$4 sm:$0xff]  }
 0x2f2   : > { %8503 = vmatprep.subr.bf16.mxu1 %v10081_v59  ;;  %8476 = vmatprep.mubr.bf16.mxu0 %v9039_v4  ;;  %v10145_v59 = vld [vmem:[%s11352_s21 + $0x790] ss:$8 sps:$4 sm:$0xff]   ;;  %v10150_v4 = vld [vmem:[%s11352_s21 + $0x684] ss:$8 sps:$4 sm:$0xff]  }
 0x2f3   : > { %8529 = vmatprep.mubr.bf16.mxu1 %v9041_v5  ;;  %v10153_v5 = vld [vmem:[%s11352_s21 + $0x784] ss:$8 sps:$4 sm:$0xff]  }
 0x2f4   : > { %8451 = vmatpush1.bf16.msra.mxu0 %v10076_v46  ;;  %v10148_v46 = vld [vmem:[%s11352_s21 + $0x680] ss:$8 sps:$4 sm:$0xff]  }
 0x2f5   : > { %8504 = vmatpush1.bf16.msra.mxu1 %v10079_v47  ;;  %8452 = vmatprep.subr.bf16.mxu0 %v10084_v54  ;;  %v10151_v47 = vld [vmem:[%s11352_s21 + $0x780] ss:$8 sps:$4 sm:$0xff]   ;;  %v9038_v54 = vcombine.low %v12058_v60, %v12061_v9  ;;  %v12143_v9 = vpop.f32.mrf.mxu1 }
 0x2f6   : > { %8505 = vmatprep.subr.bf16.mxu1 %v10087_v62  ;;  %v9040_v62 = vcombine.low %v12064_v61, %v12067_v35 }
 0x2f7   : > { %v12147_v35 = vpop.f32.mrf.mxu1 }
 0x2f8   : > { %8453 = vmatpush1.bf16.msra.mxu0 %v10082_v2  ;;  %v12137_v2 = vpop.f32.mrf.mxu0 }
 0x2f9   : > { %8506 = vmatpush1.bf16.msra.mxu1 %v10085_v3  ;;  %8454 = vmatprep.subr.bf16.mxu0 %v10090_v63 }
 0x2fa   : > { %8507 = vmatprep.subr.bf16.mxu1 %v10093_v6  ;;  %v12139_v3 = vpop.f32.mrf.mxu0 }
 0x2fc   : > { %8455 = vmatpush1.bf16.msra.mxu0 %v10088_v56  ;;  %v12141_v60 = vpop.f32.mrf.mxu0 }
 0x2fd   : > { %8508 = vmatpush1.bf16.msra.mxu1 %v10091_v7  ;;  %8456 = vmatprep.subr.bf16.mxu0 %v10096_v12 }
 0x2fe   : > { %8509 = vmatprep.subr.bf16.mxu1 %v10099_v20  ;;  %v12145_v61 = vpop.f32.mrf.mxu0 }
 0x300   : > { %8457 = vmatpush1.bf16.msra.mxu0 %v10094_v21  ;;  %v12149_v63 = vpop.f32.mrf.mxu0 }
 0x301   : > { %8510 = vmatpush1.bf16.msra.mxu1 %v10097_v44  ;;  %8458 = vmatprep.subr.bf16.mxu0 %v10102_v13 }
 0x302   : > { %8511 = vmatprep.subr.bf16.mxu1 %v10105_v16 }
 0x304   : > { %8459 = vmatpush1.bf16.msra.mxu0 %v10100_v24 }
 0x305   : > { %8512 = vmatpush1.bf16.msra.mxu1 %v10103_v25  ;;  %8460 = vmatprep.subr.bf16.mxu0 %v10108_v29 }
 0x306   : > { %8513 = vmatprep.subr.bf16.mxu1 %v10111_v30 }
 0x308   : > { %8461 = vmatpush2.bf16.msra.mxu0 %v10106_v49 }
 0x309   : > { %8514 = vmatpush2.bf16.msra.mxu1 %v10109_v51  ;;  %8462 = vmatprep.subr.bf16.mxu0 %v10114_v55 }
 0x30a   : > { %8515 = vmatprep.subr.bf16.mxu1 %v10117_v34 }
 0x30c   : > { %8463 = vmatpush2.bf16.msra.mxu0 %v10112_v38 }
 0x30d   : > { %8516 = vmatpush2.bf16.msra.mxu1 %v10115_v39  ;;  %8464 = vmatprep.subr.bf16.mxu0 %v10120_v40 }
 0x30e   : > { %8517 = vmatprep.subr.bf16.mxu1 %v10123_v10 }
 0x310   : > { %8465 = vmatpush2.bf16.msra.mxu0 %v10118_v32 }
 0x311   : > { %8518 = vmatpush2.bf16.msra.mxu1 %v10121_v33  ;;  %8466 = vmatprep.subr.bf16.mxu0 %v10126_v42 }
 0x312   : > { %8519 = vmatprep.subr.bf16.mxu1 %v10129_v43 }
 0x314   : > { %8467 = vmatpush2.bf16.msra.mxu0 %v10124_v11 }
 0x315   : > { %8520 = vmatpush2.bf16.msra.mxu1 %v10127_v15  ;;  %8468 = vmatprep.subr.bf16.mxu0 %v10132_v18 }
 0x316   : > { %8521 = vmatprep.subr.bf16.mxu1 %v10135_v45 }
 0x318   : > { %8469 = vmatpush2.bf16.msra.mxu0 %v10130_v48 }
 0x319   : > { %8522 = vmatpush2.bf16.msra.mxu1 %v10133_v50  ;;  %8470 = vmatprep.subr.bf16.mxu0 %v10138_v26 }
 0x31a   : > { %8523 = vmatprep.subr.bf16.mxu1 %v10141_v27 }
 0x31c   : > { %8471 = vmatpush2.bf16.msra.mxu0 %v10136_v57 }
 0x31d   : > { %8524 = vmatpush2.bf16.msra.mxu1 %v10139_v53  ;;  %8472 = vmatprep.subr.bf16.mxu0 %v10144_v0 }
 0x31e   : > { %8525 = vmatprep.subr.bf16.mxu1 %v10147_v41 }
 0x320   : > { %8473 = vmatpush2.bf16.msra.mxu0 %v10142_v58 }
 0x321   : > { %8526 = vmatpush2.bf16.msra.mxu1 %v10145_v59  ;;  %8474 = vmatprep.subr.bf16.mxu0 %v10150_v4 }
 0x322   : > { %8527 = vmatprep.subr.bf16.mxu1 %v10153_v5 }
 0x324   : > { %8475 = vmatpush2.bf16.msra.mxu0 %v10148_v46 }
 0x325   : > { %8528 = vmatpush2.bf16.msra.mxu1 %v10151_v47 }
 0x327   : > { %8477 = vmatmul.mubr.bf16.vlgmr.msra.gmra.mxu0 %v9038_v54 }
 0x328   : > { %8530 = vmatmul.mubr.bf16.vlgmr.msra.gmra.mxu1 %v9040_v62  ;;  %8486 = vmatprep.mubr.bf16.mxu0 %v11673_v22  ;;  %v12151_v22 = vpop.f32.mrf.mxu1 }
 0x329   : > { %8539 = vmatprep.mubr.bf16.mxu1 %v11677_v23  ;;  %v12153_v23 = vpop.f32.mrf.mxu0 }
 0x32b   : > { %v12159_v6 = vpop.f32.mrf.mxu0 }
 0x32d   : > { %v12163_v7 = vpop.f32.mrf.mxu0 }
 0x32f   : > { %8487 = vmatmul.mubr.bf16.gmra.mxu0 %v11739_v36  ;;  %v12155_v36 = vpop.f32.mrf.mxu1  ;;  %v6694_v12 = vpop.f32.mrf.mxu0 }
 0x330   : > { %8540 = vmatmul.mubr.bf16.gmra.mxu1 %v11743_v37 }
 0x331   : > { %v12157_v37 = vpop.f32.mrf.mxu1  ;;  %v6696_v21 = vpop.f32.mrf.mxu0 }
 0x333   : > { %v12161_v56 = vpop.f32.mrf.mxu1  ;;  %v12171_v16 = vpop.f32.mrf.mxu0 }
 0x335   : > { %v12165_v20 = vpop.f32.mrf.mxu1  ;;  %v12175_v25 = vpop.f32.mrf.mxu0 }
 0x337   : > { %v12167_v44 = vpop.f32.mrf.mxu1  ;;  %v12179_v30 = vpop.f32.mrf.mxu0 }
 0x339   : > { %v12169_v13 = vpop.f32.mrf.mxu1  ;;  %v12183_v51 = vpop.f32.mrf.mxu0 }
 0x33b   : > { %v12173_v24 = vpop.f32.mrf.mxu1  ;;  %v12187_v34 = vpop.f32.mrf.mxu0 }
 0x33d   : > { %v12177_v29 = vpop.f32.mrf.mxu1  ;;  %v12191_v39 = vpop.f32.mrf.mxu0 }
 0x33f   : > { %v12181_v49 = vpop.f32.mrf.mxu1  ;;  %v8160_v10 = vpop.f32.mrf.mxu0 }
 0x341   : > { %v12185_v55 = vpop.f32.mrf.mxu1  ;;  %v8162_v33 = vpop.f32.mrf.mxu0 }
 0x343   : > { %v12189_v38 = vpop.f32.mrf.mxu1  ;;  %v12199_v43 = vpop.f32.mrf.mxu0 }
 0x345   : > { %v12193_v40 = vpop.f32.mrf.mxu1  ;;  %v12203_v15 = vpop.f32.mrf.mxu0 }
 0x347   : > { %v12195_v32 = vpop.f32.mrf.mxu1  ;;  %v12207_v45 = vpop.f32.mrf.mxu0 }
 0x348   : > { %12398 = vst [vmem:[#allocation4_spill] sm:$0xff] %v12195_v32 }
 0x349   : > { %v12197_v42 = vpop.f32.mrf.mxu1  ;;  %v12211_v50 = vpop.f32.mrf.mxu0 }
 0x34b   : > { %v12201_v11 = vpop.f32.mrf.mxu1  ;;  %v12215_v27 = vpop.f32.mrf.mxu0 }
 0x34c   : > { %12400 = vst [vmem:[#allocation6_spill] sm:$0xff] %v12215_v27 }
 0x34d   : > { %v12205_v18 = vpop.f32.mrf.mxu1  ;;  %v12219_v53 = vpop.f32.mrf.mxu0 }
 0x34e   : > { %12402 = vst [vmem:[#allocation8_spill] sm:$0xff] %v12219_v53 }
 0x34f   : > { %v12209_v48 = vpop.f32.mrf.mxu1 }
 0x351   : > { %v12213_v26 = vpop.f32.mrf.mxu1 }
 0x352   : > { %12399 = vst [vmem:[#allocation5_spill] sm:$0xff] %v12213_v26 }
 0x353   : > { %v12217_v57 = vpop.f32.mrf.mxu1 }
 0x354   : > { %12401 = vst [vmem:[#allocation7_spill] sm:$0xff] %v12217_v57 }
 0x355   : > { %v12221_v0 = vpop.f32.mrf.mxu1 }
 0x356   : > { %12403 = vst [vmem:[#allocation9_spill] sm:$0xff] %v12221_v0 }
 0x357   : > { %v12223_v58 = vpop.f32.mrf.mxu1 }
 0x358   : > { %12404 = vst [vmem:[#allocation10_spill] sm:$0xff] %v12223_v58 }
 0x367   : > { %v8266_v41 = vpop.f32.mrf.mxu0 }
 0x368   : > { %v12225_v59 = vpop.f32.mrf.mxu1 }
 0x369   : > { %v12227_v4 = vpop.f32.mrf.mxu0 }
 0x36a   : > { %v12229_v5 = vpop.f32.mrf.mxu1 }
 0x36b   : > { %12405 = vst [vmem:[#allocation11_spill] sm:$0xff] %v12229_v5  ;;  %v12231_v46 = vpop.f32.mrf.mxu0 }
 0x36c   : > { %v12233_v47 = vpop.f32.mrf.mxu1 }
 0x36d   : > { %12406 = vst [vmem:[#allocation12_spill] sm:$0xff] %v12233_v47  ;;  %v12235_v54 = vpop.f32.mrf.mxu0 }
 0x36e   : > { %v12237_v62 = vpop.f32.mrf.mxu1 }
 0x36f   : > { %12407 = vst [vmem:[#allocation13_spill] sm:$0xff] %v12237_v62  ;;  %v12239_v53 = vpop.f32.mrf.mxu0  ;;  %v6589_v62 = vadd.f32 %v12137_v2, %v11862_v17 }
 0x370   : > { %12408 = vst [vmem:[#allocation14_spill] sm:$0xff] %v12239_v53  ;;  %v12241_v0 = vpop.f32.mrf.mxu1 }
 0x371   : > { %12409 = vst [vmem:[#allocation15_spill] sm:$0xff] %v12241_v0  ;;  %v12243_v57 = vpop.f32.mrf.mxu0  ;;  %v6591_v0 = vadd.f32 %v12139_v3, %v11875_v28  ;;  %v6599_v28 = vadd.f32 %v12149_v63, %v11897_v8 }
 0x372   : > { %12410 = vst [vmem:[#allocation16_spill] sm:$0xff] %v12243_v57  ;;  %v12245_v58 = vpop.f32.mrf.mxu1 }
 0x373   : > { %12411 = vst [vmem:[#allocation17_spill] sm:$0xff] %v12245_v58  ;;  %v12247_v26 = vpop.f32.mrf.mxu0  ;;  %v6642_v58 = vadd.f32 %v12143_v9, %v6589_v62  ;;  %v6601_v9 = vadd.f32 %v12153_v23, %v11902_v1  ;;  %v12419_v62 = vld [vmem:[#allocation5_spill] sm:$0xff] }
 0x374   : > { %12412 = vst [vmem:[#allocation18_spill] sm:$0xff] %v12247_v26  ;;  %v12249_v27 = vpop.f32.mrf.mxu1  ;;  %v6595_v26 = vadd.f32 %v12145_v61, %v11891_v14  ;;  %v6603_v61 = vadd.f32 %v12159_v6, %v11907_v52 }
 0x375   : > { %12413 = vst [vmem:[#allocation19_spill] sm:$0xff] %v12249_v27  ;;  %v12251_v5 = vpop.f32.mrf.mxu0  ;;  %v6593_v27 = vadd.f32 %v12141_v60, %v11880_v31  ;;  %v6695_v17 = vadd.f32 %v6694_v12, %v6642_v58  ;;  %v6654_v23 = vadd.f32 %v12161_v56, %v6601_v9 }
 0x376   : > { %12414 = vst [vmem:[#allocation20_spill] sm:$0xff] %v12251_v5  ;;  %v12253_v32 = vpop.f32.mrf.mxu1  ;;  %v6648_v60 = vadd.f32 %v12155_v36, %v6595_v26  ;;  %v6605_v36 = vadd.f32 %v12163_v7, %v11909_v19 }
 0x377   : > { %12415 = vst [vmem:[#allocation21_spill] sm:$0xff] %v12253_v32  ;;  %v6644_v32 = vadd.f32 %v12147_v35, %v6591_v0  ;;  %v6748_v35 = vadd.f32 %v12169_v13, %v6695_v17  ;;  %v12418_v0 = vld [vmem:[#allocation6_spill] sm:$0xff]  ;;  %v12420_v17 = vld [vmem:[#allocation11_spill] sm:$0xff] }
 0x378   : > { %v6701_v63 = vadd.f32 %v12175_v25, %v6648_v60  ;;  %v6658_v7 = vadd.f32 %v12167_v44, %v6605_v36  ;;  %v12424_v60 = vld [vmem:[#allocation14_spill] sm:$0xff] }
 0x379   : > { %v6697_v3 = vadd.f32 %v6696_v21, %v6644_v32  ;;  %v8161_v1 = vadd.f32 %v8160_v10, %v6748_v35 }
 0x37a   : > { %v6754_v25 = vadd.f32 %v12181_v49, %v6701_v63  ;;  %v6711_v26 = vadd.f32 %v12191_v39, %v6658_v7 }
 0x37b   : > { %v6750_v8 = vadd.f32 %v12173_v24, %v6697_v3  ;;  %v8214_v56 = vadd.f32 %v12197_v42, %v8161_v1  ;;  %v12422_v3 = vld [vmem:[#allocation8_spill] sm:$0xff] }
 0x37d   : > { %v8163_v6 = vadd.f32 %v8162_v33, %v6750_v8  ;;  %v12426_v8 = vld [vmem:[#allocation16_spill] sm:$0xff] }
 0x37f   : > { %v8216_v10 = vadd.f32 %v12201_v11, %v8163_v6  ;;  %v12429_v6 = vld [vmem:[#allocation10_spill] sm:$0xff] }
 0x381   : > { %v8269_v44 = vadd.f32 %v12227_v4, %v8216_v10 }
 0x383   : > { %v8322_v4 = vadd.f32 %v12420_v17, %v8269_v44 }
 0x3a7   : > { %v12255_v47 = vpop.f32.mrf.mxu0 }
 0x3a8   : > { %v12259_v53 = vpop.f32.mrf.mxu1 }
 0x3a9   : > { %12416 = vst [vmem:[#allocation22_spill] sm:$0xff] %v12259_v53  ;;  %v12263_v57 = vpop.f32.mrf.mxu0  ;;  %v6646_v53 = vadd.f32 %v12151_v22, %v6593_v27  ;;  %v6652_v22 = vadd.f32 %v12157_v37, %v6599_v28  ;;  %v6707_v37 = vadd.f32 %v12183_v51, %v6654_v23  ;;  %v8267_v51 = vadd.f32 %v8266_v41, %v8214_v56  ;;  %v12421_v28 = vld [vmem:[#allocation7_spill] sm:$0xff] }
 0x3aa   : > { %v12268_v5 = vpop.f32.mrf.mxu1 }
 0x3ab   : > { %v12273_v2 = vpop.f32.mrf.mxu0  ;;  %v6699_v14 = vadd.f32 %v12171_v16, %v6646_v53  ;;  %v6705_v52 = vadd.f32 %v12179_v30, %v6652_v22  ;;  %v6656_v16 = vadd.f32 %v12165_v20, %v6603_v61  ;;  %v8167_v20 = vadd.f32 %v12203_v15, %v6754_v25  ;;  %v12417_v53 = vld [vmem:[#allocation4_spill] sm:$0xff]  ;;  %v12425_v61 = vld [vmem:[#allocation9_spill] sm:$0xff] }
 0x3ac   : > { %v12280_v31 = vpop.f32.mrf.mxu1  ;;  %v6760_v33 = vadd.f32 %v12189_v38, %v6707_v37  ;;  %v8320_v15 = vadd.f32 %v12225_v59, %v8267_v51  ;;  %v6764_v39 = vadd.f32 %v12417_v53, %v6711_v26  ;;  %v12430_v37 = vld [vmem:[#allocation18_spill] sm:$0xff] }
 0x3ad   : > { %v12287_v12 = vpop.f32.mrf.mxu0  ;;  %v6752_v13 = vadd.f32 %v12177_v29, %v6699_v14  ;;  %v6709_v29 = vadd.f32 %v12187_v34, %v6656_v16  ;;  %v6758_v30 = vadd.f32 %v12185_v55, %v6705_v52  ;;  %v8220_v11 = vadd.f32 %v12209_v48, %v8167_v20  ;;  %v12432_v20 = vld [vmem:[#allocation17_spill] sm:$0xff] }
 0x3ae   : > { %v12295_v21 = vpop.f32.mrf.mxu1  ;;  %v8173_v55 = vadd.f32 %v12211_v50, %v6760_v33  ;;  %v8373_v50 = vadd.f32 %v12255_v47, %v8320_v15  ;;  %v8177_v59 = vadd.f32 %v12422_v3, %v6764_v39  ;;  %v8375_v14 = vadd.f32 %v12263_v57, %v8322_v4  ;;  %v12431_v57 = vld [vmem:[#allocation15_spill] sm:$0xff]  ;;  %v12433_v33 = vld [vmem:[#allocation20_spill] sm:$0xff] }
 0x3af   : > { %v8382_v24 = vpop.f32.mrf.mxu0  ;;  %v8165_v19 = vadd.f32 %v12199_v43, %v6752_v13  ;;  %v8171_v43 = vadd.f32 %v12207_v45, %v6758_v30  ;;  %v6762_v34 = vadd.f32 %v12193_v40, %v6709_v29  ;;  %v8273_v40 = vadd.f32 %v12235_v54, %v8220_v11  ;;  %v12427_v54 = vld [vmem:[#allocation13_spill] sm:$0xff] }
 0x3b0   : > { %v12301_v32 = vpop.f32.mrf.mxu1  ;;  %v8226_v48 = vadd.f32 %v12421_v28, %v8173_v55  ;;  %v12428_v47 = vld [vmem:[#allocation22_spill] sm:$0xff]  ;;  %v8230_v16 = vadd.f32 %v12429_v6, %v8177_v59  ;;  %v8428_v29 = vadd.f32 %v12268_v5, %v8375_v14  ;;  %v12434_v55 = vld [vmem:[#allocation19_spill] sm:$0xff] }
 0x3b1   : > { %v8384_v49 = vpop.f32.mrf.mxu0  ;;  %v8218_v42 = vadd.f32 %v12205_v18, %v8165_v19  ;;  %v8175_v41 = vadd.f32 %v12418_v0, %v6762_v34  ;;  %v8224_v45 = vadd.f32 %v12419_v62, %v8171_v43  ;;  %v8326_v36 = vadd.f32 %v12427_v54, %v8273_v40 }
 0x3b2   : > { %v8437_v27 = vpop.f32.mrf.mxu1  ;;  %v8279_v63 = vadd.f32 %v12426_v8, %v8226_v48  ;;  %v8426_v13 = vadd.f32 %v12428_v47, %v8373_v50  ;;  %v8283_v26 = vadd.f32 %v12433_v33, %v8230_v16 }
 0x3b3   : > { %v8271_v38 = vadd.f32 %v12231_v46, %v8218_v42  ;;  %v8386_v58 = vpop.f32.mrf.mxu0  ;;  %v12423_v46 = vld [vmem:[#allocation12_spill] sm:$0xff]  ;;  %v8277_v35 = vadd.f32 %v12424_v60, %v8224_v45  ;;  %v8228_v22 = vadd.f32 %v12425_v61, %v8175_v41  ;;  %v8379_v30 = vadd.f32 %v12287_v12, %v8326_v36  ;;  %v12435_v41 = vld [vmem:[#allocation21_spill] sm:$0xff] }
 0x3b4   : > { %v8439_v18 = vpop.f32.mrf.mxu1  ;;  %v8332_v51 = vadd.f32 %v12432_v20, %v8279_v63  ;;  %v8336_v62 = vadd.f32 %v12435_v41, %v8283_v26 }
 0x3b5   : > { %v8324_v9 = vadd.f32 %v12423_v46, %v8271_v38  ;;  %v8388_v1 = vpop.f32.mrf.mxu0  ;;  %v8281_v25 = vadd.f32 %v12430_v37, %v8228_v22  ;;  %v8330_v7 = vadd.f32 %v12431_v57, %v8277_v35  ;;  %v8432_v5 = vadd.f32 %v12295_v21, %v8379_v30 }
 0x3b6   : > { %v8441_v23 = vpop.f32.mrf.mxu1  ;;  %v8385_v15 = vadd.f32 %v8384_v49, %v8332_v51  ;;  %v8389_v49 = vadd.f32 %v8388_v1, %v8336_v62 }
 0x3b7   : > { %v8377_v52 = vadd.f32 %v12273_v2, %v8324_v9  ;;  %v8383_v44 = vadd.f32 %v8382_v24, %v8330_v7  ;;  %v8334_v11 = vadd.f32 %v12434_v55, %v8281_v25 }
 0x3b8   : > { %v8438_v50 = vadd.f32 %v8437_v27, %v8385_v15  ;;  %v8442_v14 = vadd.f32 %v8441_v23, %v8389_v49 }
 0x3b9   : > { %v8430_v43 = vadd.f32 %v12280_v31, %v8377_v52  ;;  %v8436_v4 = vadd.f32 %v12301_v32, %v8383_v44  ;;  %v8387_v31 = vadd.f32 %v8386_v58, %v8334_v11 }
 0x3bb   : > { %v8440_v60 = vadd.f32 %v8439_v18, %v8387_v31 }
 0x3e7   : > { %v8478_v56 = vpop.f32.mrf.mxu0 }
 0x3e8   : > { %v8531_v19 = vpop.f32.mrf.mxu1  ;;  %v8479_v10 = vadd.f32 %v8478_v56, %v8426_v13 }
 0x3e9   : > { %v8480_v42 = vpop.f32.mrf.mxu0 }
 0x3ea   : > { %v8533_v2 = vpop.f32.mrf.mxu1  ;;  %v8481_v34 = vadd.f32 %v8480_v42, %v8428_v29  ;;  %v8532_v12 = vadd.f32 %v8531_v19, %v8479_v10 }
 0x3eb   : > { %v8482_v38 = vpop.f32.mrf.mxu0 }
 0x3ec   : > { %v8535_v53 = vpop.f32.mrf.mxu1  ;;  %v8534_v39 = vadd.f32 %v8533_v2, %v8481_v34  ;;  %v8483_v0 = vadd.f32 %v8482_v38, %v8430_v43 }
 0x3ed   : > { %v8484_v45 = vpop.f32.mrf.mxu0 }
 0x3ee   : > { %v8537_v17 = vpop.f32.mrf.mxu1  ;;  %v9309_v24 = vpack.c.bf16 %v8534_v39, %v8532_v12  ;;  %v8485_v40 = vadd.f32 %v8484_v45, %v8432_v5  ;;  %v8536_v21 = vadd.f32 %v8535_v53, %v8483_v0 }
 0x3ef   : > { %v8488_v28 = vpop.f32.mrf.mxu0 }
 0x3f0   : > { %v8541_v48 = vpop.f32.mrf.mxu1  ;;  %8574 = vst [vmem:[%s12350_s9] sm:$0xff] %v9309_v24  ;;  %v8538_v3 = vadd.f32 %v8537_v17, %v8485_v40  ;;  %v8489_v59 = vadd.f32 %v8488_v28, %v8436_v4 }
 0x3f1   : > { %v8490_v46 = vpop.f32.mrf.mxu0 }
 0x3f2   : > { %v8543_v9 = vpop.f32.mrf.mxu1  ;;  %v9310_v32 = vpack.c.bf16 %v8538_v3, %v8536_v21  ;;  %v8491_v58 = vadd.f32 %v8490_v46, %v8438_v50  ;;  %v8542_v61 = vadd.f32 %v8541_v48, %v8489_v59 }
 0x3f3   : > { %v8492_v35 = vpop.f32.mrf.mxu0 }
 0x3f4   : > { %v8545_v27 = vpop.f32.mrf.mxu1  ;;  %8575 = vst [vmem:[%s12350_s9 + $0x8] sm:$0xff] %v9310_v32  ;;  %v8544_v22 = vadd.f32 %v8543_v9, %v8491_v58  ;;  %v8493_v8 = vadd.f32 %v8492_v35, %v8440_v60 }
 0x3f5   : > { %v8494_v63 = vpop.f32.mrf.mxu0 }
 0x3f6   : > { %v9311_v1 = vpack.c.bf16 %v8544_v22, %v8542_v61  ;;  %v8495_v54 = vadd.f32 %v8494_v63, %v8442_v14  ;;  %v8547_v36 = vpop.f32.mrf.mxu1  ;;  %v8546_v47 = vadd.f32 %v8545_v27, %v8493_v8 }
 0x3f7   : > { %v8624_v18 = vld [vmem:[%s12350_s9] sm:$0xff] (%p10308_p9) }
 0x3f8   : > { %8576 = vst [vmem:[%s12350_s9 + $0x10] sm:$0xff] %v9311_v1  ;;  %v8548_v13 = vadd.f32 %v8547_v36, %v8495_v54  ;;  %8584 = sbr.rel (!%p10308_p9) target bundleno = 1029 (0x405), region = 84  ;;  %8625 = vst [vmem:[%s8589_s18] sm:$0xff] (%p10308_p9), %v8624_v18 }
 0x3fa   : > { %v9312_v52 = vpack.c.bf16 %v8548_v13, %v8546_v47 }
 0x3fb   : > { %v8626_v23 = vld [vmem:[%s12350_s9 + $0x8] sm:$0xff] (%p10308_p9) }
 0x3fc   : > { %8577 = vst [vmem:[%s12350_s9 + $0x18] sm:$0xff] %v9312_v52  ;;  %8627 = vst [vmem:[%s8589_s18 + $0x10] sm:$0xff] (%p10308_p9), %v8626_v23 }
 0x3ff   : > { %v8628_v6 = vld [vmem:[%s12350_s9 + $0x10] sm:$0xff] }
 0x400   : > { %8629 = vst [vmem:[%s8589_s18 + $0x20] sm:$0xff] %v8628_v6 }
 0x403   : > { %v8630_v16 = vld [vmem:[%s12350_s9 + $0x18] sm:$0xff] }
 0x404   : > { %8631 = vst [vmem:[%s8589_s18 + $0x30] sm:$0xff] %v8630_v16 }
 0x405 PF: > { %s12_s17 = sadd.s32 1, %s10224_s17   ;;  %s12436_s9 = smov %s10196_s10 }
 0x406   : > { %p9_p1 = scmp.ge.s32.totalorder %s12_s17, 6   ;;  %s12437_s10 = smov %s10313_s28 }
 0x407   : > { %s12438_s11 = smov %s10204_s12  ;;  %s12439_s12 = smov %s10302_s24 }
 0x408   : > { %s12440_s13 = smov %s10216_s15  ;;  %s12441_s14 = smov %s10220_s16 }
 0x409   : > { %s12442_s15 = smov %s12445_s19  ;;  %s12443_s16 = smov %s12449_s20 }
 0x40a   :  { %11 = sbr.rel (!%p9_p1) target bundleno = 5 (0x5), region = 162 }

// kernel: discriminator_forward.15
= control target key start
LH: loop header
LB: loop body
LE: loop exit
PB: predicated region body
PF: predicated region fallthrough
CT: control target
= control target key end

     0   :  { %s8578_s12 = smov 0   ;;  %s8580_s13 = smov 0   ;;  %s10549_s0 = inlined_call_operand.vmem [shape: bf16[2,80,2048], index: 0, kind: input, shape index: {}]   ;;  %s10550_s1 = inlined_call_operand.vmem [shape: bf16[4,2048,128], index: 1, kind: input, shape index: {}]   ;;  %s10551_s2 = inlined_call_operand.vmem [shape: f32[1,128], index: 2, kind: input, shape index: {}]   ;;  %s10552_s3 = inlined_call_operand.vmem [shape: f32[2,32,128], index: 3, kind: output, shape index: {}]  }
   0x1   :  { %s8582_s14 = smov 0  }
   0x2 LB: > { %s25_s15 = sadd.s32 1, %s8552_s13  ;;  %p6501_p0 = scmp.ge.s32.totalorder %s8556_s14, 1  ;;  %s8556_s14 = sphi %s8582_s14, %s13_s14   ;;  %s8552_s13 = sphi %s8580_s13, %s10556_s13   ;;  %s8548_s12 = sphi %s8578_s12, %s10555_s12  }
   0x3   : > { %p27_p1 = scmp.ge.s32.totalorder %s25_s15, 2  ;;  %p168_p2 = scmp.lt.s32.totalorder %s8556_s14, 3 }
   0x5   : > { %s10558_s15 = smov (%p27_p1, %s25_s15), 0  ;;  %p169_p3 = pnand %p6501_p0, %p168_p2 }
   0x7   : > { %172 = sbr.rel (%p169_p3) target bundleno = 751 (0x2ef), region = 32 }
   0xc   : > { %v8022_v0 = vld [vmem:[%s10550_s1 + $0x478] sm:$0xff]   ;;  %v8026_v4 = vld [vmem:[%s10550_s1 + $0x470] sm:$0xff]   ;;  %v8030_v8 = vld [vmem:[%s10550_s1 + $0x468] sm:$0xff]   ;;  %p202_p4 = scmp.lt.s32.totalorder %s8548_s12, 1 }
   0xd   : > { %v8023_v1 = vld [vmem:[%s10550_s1 + $0x4f8] sm:$0xff]   ;;  %7101 = vmatprep.subr.bf16.mxu0 %v8022_v0  ;;  %v8027_v5 = vld [vmem:[%s10550_s1 + $0x4f0] sm:$0xff]   ;;  %v8031_v9 = vld [vmem:[%s10550_s1 + $0x4e8] sm:$0xff]  }
   0xe   : > { %v8024_v2 = vld [vmem:[%s10550_s1 + $0x438] sm:$0xff]   ;;  %7129 = vmatprep.subr.bf16.mxu1 %v8023_v1  ;;  %v8028_v6 = vld [vmem:[%s10550_s1 + $0x430] sm:$0xff]   ;;  %v8032_v10 = vld [vmem:[%s10550_s1 + $0x428] sm:$0xff]   ;;  %s10560_s12 = smov (!%p202_p4, %s8548_s12), 1 }
   0xf   : > { %v8025_v3 = vld [vmem:[%s10550_s1 + $0x4b8] sm:$0xff]   ;;  %7102 = vmatpush3.bf16.msra.mxu0 %v8024_v2  ;;  %v8029_v7 = vld [vmem:[%s10550_s1 + $0x4b0] sm:$0xff]   ;;  %v8033_v11 = vld [vmem:[%s10550_s1 + $0x4a8] sm:$0xff]   ;;  %s7997_s22 = smul.u32 640, %s10560_s12 }
  0x10   : > { %7130 = vmatpush3.bf16.msra.mxu1 %v8025_v3  ;;  %7103 = vmatprep.subr.bf16.mxu0 %v8026_v4  ;;  %v8034_v12 = vld [vmem:[%s10550_s1 + $0x460] sm:$0xff]   ;;  %v8038_v16 = vld [vmem:[%s10550_s1 + $0x458] sm:$0xff]   ;;  %v8042_v20 = vld [vmem:[%s10550_s1 + $0x450] sm:$0xff]  }
  0x11   : > { %7131 = vmatprep.subr.bf16.mxu1 %v8027_v5  ;;  %v8035_v13 = vld [vmem:[%s10550_s1 + $0x4e0] sm:$0xff]   ;;  %v8039_v17 = vld [vmem:[%s10550_s1 + $0x4d8] sm:$0xff]   ;;  %v8043_v21 = vld [vmem:[%s10550_s1 + $0x4d0] sm:$0xff]   ;;  %s8696_s6 = scalar_lea.vmem %s10549_s0, %s7997_s22 }
  0x12   : > { %v8036_v14 = vld [vmem:[%s10550_s1 + $0x420] sm:$0xff]   ;;  %v8040_v18 = vld [vmem:[%s10550_s1 + $0x418] sm:$0xff]   ;;  %v8044_v22 = vld [vmem:[%s10550_s1 + $0x410] sm:$0xff]  }
  0x13   : > { %7104 = vmatpush3.bf16.msra.mxu0 %v8028_v6  ;;  %v8037_v15 = vld [vmem:[%s10550_s1 + $0x4a0] sm:$0xff]   ;;  %v8041_v19 = vld [vmem:[%s10550_s1 + $0x498] sm:$0xff]   ;;  %v8045_v23 = vld [vmem:[%s10550_s1 + $0x490] sm:$0xff]  }
  0x14   : > { %7132 = vmatpush3.bf16.msra.mxu1 %v8029_v7  ;;  %7105 = vmatprep.subr.bf16.mxu0 %v8030_v8  ;;  %v8046_v24 = vld [vmem:[%s10550_s1 + $0x448] sm:$0xff]   ;;  %v8050_v28 = vld [vmem:[%s10550_s1 + $0x440] sm:$0xff]   ;;  %v8054_v40 = vld [vmem:[%s10550_s1 + $0x578] sm:$0xff]  }
  0x15   : > { %7133 = vmatprep.subr.bf16.mxu1 %v8031_v9  ;;  %v8047_v25 = vld [vmem:[%s10550_s1 + $0x4c8] sm:$0xff]   ;;  %v8051_v29 = vld [vmem:[%s10550_s1 + $0x4c0] sm:$0xff]   ;;  %v8055_v41 = vld [vmem:[%s10550_s1 + $0x5f8] sm:$0xff]  }
  0x16   : > { %v8048_v26 = vld [vmem:[%s10550_s1 + $0x408] sm:$0xff]   ;;  %v8052_v30 = vld [vmem:[%s10550_s1 + $0x400] sm:$0xff]   ;;  %v8056_v42 = vld [vmem:[%s10550_s1 + $0x538] sm:$0xff]  }
  0x17   : > { %7106 = vmatpush3.bf16.msra.mxu0 %v8032_v10  ;;  %v8049_v27 = vld [vmem:[%s10550_s1 + $0x488] sm:$0xff]   ;;  %v8053_v31 = vld [vmem:[%s10550_s1 + $0x480] sm:$0xff]   ;;  %v8057_v43 = vld [vmem:[%s10550_s1 + $0x5b8] sm:$0xff]  }
  0x18   : > { %7134 = vmatpush3.bf16.msra.mxu1 %v8033_v11  ;;  %7107 = vmatprep.subr.bf16.mxu0 %v8034_v12  ;;  %v239_v32 = vld [vmem:[%s8696_s6 + $0x80] sm:$0xff]  ;;  %v240_v34 = vld [vmem:[%s8696_s6 + $0x88] sm:$0xff]  ;;  %v8058_v44 = vld [vmem:[%s10550_s1 + $0x570] sm:$0xff]  }
  0x19   : > { %7135 = vmatprep.subr.bf16.mxu1 %v8035_v13  ;;  %v247_v33 = vld [vmem:[%s8696_s6 + $0xc0] sm:$0xff]  ;;  %v248_v37 = vld [vmem:[%s8696_s6 + $0xc8] sm:$0xff]  ;;  %v8059_v45 = vld [vmem:[%s10550_s1 + $0x5f0] sm:$0xff]  }
  0x1a   : > { %v8707_v35 = vcombine.low %v239_v32, %v247_v33  ;;  %v8709_v36 = vcombine.high %v239_v32, %v247_v33  ;;  %v8712_v38 = vcombine.low %v240_v34, %v248_v37  ;;  %v8714_v39 = vcombine.high %v240_v34, %v248_v37  ;;  %v8060_v46 = vld [vmem:[%s10550_s1 + $0x530] sm:$0xff]   ;;  %v8062_v48 = vld [vmem:[%s10550_s1 + $0x568] sm:$0xff]   ;;  %v8066_v52 = vld [vmem:[%s10550_s1 + $0x560] sm:$0xff]  }
  0x1b   : > { %7108 = vmatpush3.bf16.msra.mxu0 %v8036_v14  ;;  %v8061_v47 = vld [vmem:[%s10550_s1 + $0x5b0] sm:$0xff]   ;;  %v8063_v49 = vld [vmem:[%s10550_s1 + $0x5e8] sm:$0xff]   ;;  %v8067_v53 = vld [vmem:[%s10550_s1 + $0x5e0] sm:$0xff]  }
  0x1c   : > { %7136 = vmatpush3.bf16.msra.mxu1 %v8037_v15  ;;  %7109 = vmatprep.subr.bf16.mxu0 %v8038_v16  ;;  %v8064_v50 = vld [vmem:[%s10550_s1 + $0x528] sm:$0xff]   ;;  %v8068_v54 = vld [vmem:[%s10550_s1 + $0x520] sm:$0xff]   ;;  %v8070_v56 = vld [vmem:[%s10550_s1 + $0x558] sm:$0xff]  }
  0x1d   : > { %7137 = vmatprep.subr.bf16.mxu1 %v8039_v17  ;;  %2287 = vmatprep.mubr.bf16.mxu0 %v8709_v36  ;;  %v8065_v51 = vld [vmem:[%s10550_s1 + $0x5a8] sm:$0xff]   ;;  %v8069_v55 = vld [vmem:[%s10550_s1 + $0x5a0] sm:$0xff]   ;;  %v8071_v57 = vld [vmem:[%s10550_s1 + $0x5d8] sm:$0xff]  }
  0x1e   : > { %2336 = vmatprep.mubr.bf16.mxu1 %v8714_v39  ;;  %v8072_v58 = vld [vmem:[%s10550_s1 + $0x518] sm:$0xff]   ;;  %v255_v60 = vld [vmem:[%s8696_s6 + $0x100] sm:$0xff]  ;;  %v256_v63 = vld [vmem:[%s8696_s6 + $0x108] sm:$0xff] }
  0x1f   : > { %7110 = vmatpush3.bf16.msra.mxu0 %v8040_v18  ;;  %v8073_v59 = vld [vmem:[%s10550_s1 + $0x598] sm:$0xff]   ;;  %v263_v61 = vld [vmem:[%s8696_s6 + $0x140] sm:$0xff]  ;;  %v264_v0 = vld [vmem:[%s8696_s6 + $0x148] sm:$0xff] }
  0x20   : > { %7138 = vmatpush3.bf16.msra.mxu1 %v8041_v19  ;;  %7111 = vmatprep.subr.bf16.mxu0 %v8042_v20  ;;  %v8782_v62 = vcombine.high %v255_v60, %v263_v61  ;;  %v8786_v1 = vcombine.low %v255_v60, %v263_v61  ;;  %v8788_v2 = vcombine.high %v256_v63, %v264_v0  ;;  %v8074_v4 = vld [vmem:[%s10550_s1 + $0x550] sm:$0xff]   ;;  %v8078_v8 = vld [vmem:[%s10550_s1 + $0x548] sm:$0xff]   ;;  %v8082_v12 = vld [vmem:[%s10550_s1 + $0x540] sm:$0xff]  }
  0x21   : > { %7139 = vmatprep.subr.bf16.mxu1 %v8043_v21  ;;  %v8790_v3 = vcombine.low %v256_v63, %v264_v0  ;;  %v8075_v5 = vld [vmem:[%s10550_s1 + $0x5d0] sm:$0xff]   ;;  %v8079_v9 = vld [vmem:[%s10550_s1 + $0x5c8] sm:$0xff]   ;;  %v8083_v13 = vld [vmem:[%s10550_s1 + $0x5c0] sm:$0xff]  }
  0x22   : > { %v8076_v6 = vld [vmem:[%s10550_s1 + $0x510] sm:$0xff]   ;;  %v8080_v10 = vld [vmem:[%s10550_s1 + $0x508] sm:$0xff]   ;;  %v8084_v14 = vld [vmem:[%s10550_s1 + $0x500] sm:$0xff]  }
  0x23   : > { %7112 = vmatpush3.bf16.msra.mxu0 %v8044_v22  ;;  %v8077_v7 = vld [vmem:[%s10550_s1 + $0x590] sm:$0xff]   ;;  %v8081_v11 = vld [vmem:[%s10550_s1 + $0x588] sm:$0xff]   ;;  %v8085_v15 = vld [vmem:[%s10550_s1 + $0x580] sm:$0xff]  }
  0x24   : > { %7140 = vmatpush3.bf16.msra.mxu1 %v8045_v23  ;;  %7113 = vmatprep.subr.bf16.mxu0 %v8046_v24  ;;  %v241_v16 = vld [vmem:[%s8696_s6 + $0x90] sm:$0xff]  ;;  %v242_v18 = vld [vmem:[%s8696_s6 + $0x98] sm:$0xff]  ;;  %v8110_v60 = vld [vmem:[%s10550_s1 + $0x648] sm:$0xff]  }
  0x25   : > { %7141 = vmatprep.subr.bf16.mxu1 %v8047_v25  ;;  %v249_v17 = vld [vmem:[%s8696_s6 + $0xd0] sm:$0xff]  ;;  %v250_v19 = vld [vmem:[%s8696_s6 + $0xd8] sm:$0xff]  ;;  %v8111_v61 = vld [vmem:[%s10550_s1 + $0x6c8] sm:$0xff]  }
  0x26   : > { %v8836_v20 = vcombine.low %v241_v16, %v249_v17  ;;  %v8838_v21 = vcombine.high %v241_v16, %v249_v17  ;;  %v8840_v22 = vcombine.low %v242_v18, %v250_v19  ;;  %v8842_v23 = vcombine.high %v242_v18, %v250_v19  ;;  %v8086_v24 = vld [vmem:[%s10550_s1 + $0x678] sm:$0xff]   ;;  %v257_v32 = vld [vmem:[%s8696_s6 + $0x110] sm:$0xff]  ;;  %v8112_v63 = vld [vmem:[%s10550_s1 + $0x608] sm:$0xff]  }
  0x27   : > { %7114 = vmatpush3.bf16.msra.mxu0 %v8048_v26  ;;  %v8087_v25 = vld [vmem:[%s10550_s1 + $0x6f8] sm:$0xff]   ;;  %v265_v33 = vld [vmem:[%s8696_s6 + $0x150] sm:$0xff]  ;;  %v8113_v0 = vld [vmem:[%s10550_s1 + $0x688] sm:$0xff]  }
  0x28   : > { %7142 = vmatpush3.bf16.msra.mxu1 %v8049_v27  ;;  %7115 = vmatprep.subr.bf16.mxu0 %v8050_v28  ;;  %v8088_v26 = vld [vmem:[%s10550_s1 + $0x638] sm:$0xff]   ;;  %v8090_v28 = vld [vmem:[%s10550_s1 + $0x670] sm:$0xff]   ;;  %v8874_v34 = vcombine.high %v257_v32, %v265_v33  ;;  %v8876_v37 = vcombine.low %v257_v32, %v265_v33  ;;  %v8126_v32 = vld [vmem:[%s10550_s1 + $0x768] sm:$0xff]  }
  0x29   : > { %7143 = vmatprep.subr.bf16.mxu1 %v8051_v29  ;;  %v8089_v27 = vld [vmem:[%s10550_s1 + $0x6b8] sm:$0xff]   ;;  %v8091_v29 = vld [vmem:[%s10550_s1 + $0x6f0] sm:$0xff]   ;;  %v8127_v33 = vld [vmem:[%s10550_s1 + $0x7e8] sm:$0xff]  }
  0x2a   : > { %v8118_v16 = vld [vmem:[%s10550_s1 + $0x778] sm:$0xff]  }
  0x2b   : > { %7116 = vmatpush3.bf16.msra.mxu0 %v8052_v30  ;;  %v8092_v30 = vld [vmem:[%s10550_s1 + $0x630] sm:$0xff]   ;;  %v8119_v17 = vld [vmem:[%s10550_s1 + $0x7f8] sm:$0xff]  }
  0x2c   : > { %7144 = vmatpush3.bf16.msra.mxu1 %v8053_v31  ;;  %7157 = vmatprep.subr.bf16.mxu0 %v8054_v40  ;;  %v8093_v31 = vld [vmem:[%s10550_s1 + $0x6b0] sm:$0xff]   ;;  %v8094_v40 = vld [vmem:[%s10550_s1 + $0x668] sm:$0xff]   ;;  %v8120_v18 = vld [vmem:[%s10550_s1 + $0x738] sm:$0xff]  }
  0x2d   : > { %7185 = vmatprep.subr.bf16.mxu1 %v8055_v41  ;;  %v8095_v41 = vld [vmem:[%s10550_s1 + $0x6e8] sm:$0xff]   ;;  %v8121_v19 = vld [vmem:[%s10550_s1 + $0x7b8] sm:$0xff]  }
  0x2e   : > { %2288 = vmatmul.mubr.bf16.vlgmr.msra.gmra.mxu0 %v8707_v35 }
  0x2f   : > { %2337 = vmatmul.mubr.bf16.vlgmr.msra.gmra.mxu1 %v8712_v38  ;;  %7158 = vmatpush3.bf16.msra.mxu0 %v8056_v42  ;;  %v258_v42 = vld [vmem:[%s8696_s6 + $0x118] sm:$0xff] }
  0x30   : > { %7186 = vmatpush3.bf16.msra.mxu1 %v8057_v43  ;;  %7159 = vmatprep.subr.bf16.mxu0 %v8058_v44  ;;  %v266_v43 = vld [vmem:[%s8696_s6 + $0x158] sm:$0xff] }
  0x31   : > { %7187 = vmatprep.subr.bf16.mxu1 %v8059_v45  ;;  %2295 = vmatprep.mubr.bf16.mxu0 %v8782_v62  ;;  %v8888_v44 = vcombine.high %v258_v42, %v266_v43  ;;  %v8096_v45 = vld [vmem:[%s10550_s1 + $0x628] sm:$0xff]  }
  0x32   : > { %2344 = vmatprep.mubr.bf16.mxu1 %v8788_v2 }
  0x33   : > { %7160 = vmatpush3.bf16.msra.mxu0 %v8060_v46  ;;  %v8893_v46 = vcombine.low %v258_v42, %v266_v43  ;;  %v8128_v43 = vld [vmem:[%s10550_s1 + $0x728] sm:$0xff]  }
  0x34   : > { %7188 = vmatpush3.bf16.msra.mxu1 %v8061_v47  ;;  %7161 = vmatprep.subr.bf16.mxu0 %v8062_v48  ;;  %v8097_v47 = vld [vmem:[%s10550_s1 + $0x6a8] sm:$0xff]   ;;  %v8098_v48 = vld [vmem:[%s10550_s1 + $0x660] sm:$0xff]  }
  0x35   : > { %7189 = vmatprep.subr.bf16.mxu1 %v8063_v49  ;;  %v8099_v49 = vld [vmem:[%s10550_s1 + $0x6e0] sm:$0xff]  }
  0x36   : > { %2296 = vmatmul.mubr.bf16.gmra.mxu0 %v8786_v1 }
  0x37   : > { %7162 = vmatpush3.bf16.msra.mxu0 %v8064_v50  ;;  %2345 = vmatmul.mubr.bf16.gmra.mxu1 %v8790_v3  ;;  %v8100_v50 = vld [vmem:[%s10550_s1 + $0x620] sm:$0xff]  }
  0x38   : > { %7190 = vmatpush3.bf16.msra.mxu1 %v8065_v51  ;;  %7163 = vmatprep.subr.bf16.mxu0 %v8066_v52  ;;  %v8101_v51 = vld [vmem:[%s10550_s1 + $0x6a0] sm:$0xff]   ;;  %v8102_v52 = vld [vmem:[%s10550_s1 + $0x658] sm:$0xff]  }
  0x39   : > { %7191 = vmatprep.subr.bf16.mxu1 %v8067_v53  ;;  %2385 = vmatprep.mubr.bf16.mxu0 %v8838_v21  ;;  %v8103_v53 = vld [vmem:[%s10550_s1 + $0x6d8] sm:$0xff]  }
  0x3a   : > { %2434 = vmatprep.mubr.bf16.mxu1 %v8842_v23 }
  0x3b   : > { %7164 = vmatpush3.bf16.msra.mxu0 %v8068_v54  ;;  %v8104_v54 = vld [vmem:[%s10550_s1 + $0x618] sm:$0xff]  }
  0x3c   : > { %7192 = vmatpush3.bf16.msra.mxu1 %v8069_v55  ;;  %7165 = vmatprep.subr.bf16.mxu0 %v8070_v56  ;;  %v8105_v55 = vld [vmem:[%s10550_s1 + $0x698] sm:$0xff]   ;;  %v8106_v56 = vld [vmem:[%s10550_s1 + $0x650] sm:$0xff]  }
  0x3d   : > { %7193 = vmatprep.subr.bf16.mxu1 %v8071_v57  ;;  %v8107_v57 = vld [vmem:[%s10550_s1 + $0x6d0] sm:$0xff]  }
  0x3f   : > { %7166 = vmatpush3.bf16.msra.mxu0 %v8072_v58  ;;  %v8108_v58 = vld [vmem:[%s10550_s1 + $0x610] sm:$0xff]  }
  0x40   : > { %7194 = vmatpush3.bf16.msra.mxu1 %v8073_v59  ;;  %7167 = vmatprep.subr.bf16.mxu0 %v8074_v4  ;;  %v8109_v59 = vld [vmem:[%s10550_s1 + $0x690] sm:$0xff]   ;;  %v8114_v4 = vld [vmem:[%s10550_s1 + $0x640] sm:$0xff]  }
  0x41   : > { %7195 = vmatprep.subr.bf16.mxu1 %v8075_v5  ;;  %v8115_v5 = vld [vmem:[%s10550_s1 + $0x6c0] sm:$0xff]  }
  0x43   : > { %7168 = vmatpush3.bf16.msra.mxu0 %v8076_v6  ;;  %v8116_v6 = vld [vmem:[%s10550_s1 + $0x600] sm:$0xff]  }
  0x44   : > { %7196 = vmatpush3.bf16.msra.mxu1 %v8077_v7  ;;  %7169 = vmatprep.subr.bf16.mxu0 %v8078_v8  ;;  %v8117_v7 = vld [vmem:[%s10550_s1 + $0x680] sm:$0xff]  }
  0x45   : > { %7197 = vmatprep.subr.bf16.mxu1 %v8079_v9  ;;  %v243_v8 = vld [vmem:[%s8696_s6 + $0xa0] sm:$0xff] }
  0x46   : > { %v251_v9 = vld [vmem:[%s8696_s6 + $0xe0] sm:$0xff] }
  0x47   : > { %7170 = vmatpush3.bf16.msra.mxu0 %v8080_v10  ;;  %v8962_v10 = vcombine.low %v243_v8, %v251_v9 }
  0x48   : > { %7198 = vmatpush3.bf16.msra.mxu1 %v8081_v11  ;;  %7171 = vmatprep.subr.bf16.mxu0 %v8082_v12  ;;  %v8964_v11 = vcombine.high %v243_v8, %v251_v9  ;;  %v244_v12 = vld [vmem:[%s8696_s6 + $0xa8] sm:$0xff]  ;;  %v245_v8 = vld [vmem:[%s8696_s6 + $0xb0] sm:$0xff] }
  0x49   : > { %7199 = vmatprep.subr.bf16.mxu1 %v8083_v13  ;;  %v252_v13 = vld [vmem:[%s8696_s6 + $0xe8] sm:$0xff]  ;;  %v253_v9 = vld [vmem:[%s8696_s6 + $0xf0] sm:$0xff] }
  0x4b   : > { %7172 = vmatpush3.bf16.msra.mxu0 %v8084_v14  ;;  %v8968_v14 = vcombine.low %v244_v12, %v252_v13 }
  0x4c   : > { %7200 = vmatpush3.bf16.msra.mxu1 %v8085_v15  ;;  %7213 = vmatprep.subr.bf16.mxu0 %v8086_v24  ;;  %v8970_v15 = vcombine.high %v244_v12, %v252_v13  ;;  %v8122_v24 = vld [vmem:[%s10550_s1 + $0x770] sm:$0xff]   ;;  %v246_v12 = vld [vmem:[%s8696_s6 + $0xb8] sm:$0xff]  ;;  %v9091_v13 = vcombine.low %v245_v8, %v253_v9 }
  0x4d   : > { %7241 = vmatprep.subr.bf16.mxu1 %v8087_v25  ;;  %v8123_v25 = vld [vmem:[%s10550_s1 + $0x7f0] sm:$0xff]  }
  0x4e   : > { %2386 = vmatmul.mubr.bf16.vlgmr.msra.gmra.mxu0 %v8836_v20 }
  0x4f   : > { %2435 = vmatmul.mubr.bf16.vlgmr.msra.gmra.mxu1 %v8840_v22  ;;  %7214 = vmatpush3.bf16.msra.mxu0 %v8088_v26  ;;  %v8124_v26 = vld [vmem:[%s10550_s1 + $0x730] sm:$0xff]  }
  0x50   : > { %7242 = vmatpush3.bf16.msra.mxu1 %v8089_v27  ;;  %7215 = vmatprep.subr.bf16.mxu0 %v8090_v28  ;;  %v8125_v27 = vld [vmem:[%s10550_s1 + $0x7b0] sm:$0xff]   ;;  %v259_v28 = vld [vmem:[%s8696_s6 + $0x120] sm:$0xff] }
  0x51   : > { %7243 = vmatprep.subr.bf16.mxu1 %v8091_v29  ;;  %2393 = vmatprep.mubr.bf16.mxu0 %v8874_v34  ;;  %v267_v29 = vld [vmem:[%s8696_s6 + $0x160] sm:$0xff] }
  0x52   : > { %2442 = vmatprep.mubr.bf16.mxu1 %v8888_v44 }
  0x53   : > { %7216 = vmatpush3.bf16.msra.mxu0 %v8092_v30  ;;  %v9002_v30 = vcombine.high %v259_v28, %v267_v29 }
  0x54   : > { %7244 = vmatpush3.bf16.msra.mxu1 %v8093_v31  ;;  %7217 = vmatprep.subr.bf16.mxu0 %v8094_v40  ;;  %v9004_v31 = vcombine.low %v259_v28, %v267_v29  ;;  %v260_v40 = vld [vmem:[%s8696_s6 + $0x128] sm:$0xff]  ;;  %v8154_v28 = vld [vmem:[%s10550_s1 + $0x70] sm:$0xff]  }
  0x55   : > { %7245 = vmatprep.subr.bf16.mxu1 %v8095_v41  ;;  %v268_v41 = vld [vmem:[%s8696_s6 + $0x168] sm:$0xff]  ;;  %v8155_v29 = vld [vmem:[%s10550_s1 + $0xf0] sm:$0xff]  }
  0x56   : > { %2394 = vmatmul.mubr.bf16.gmra.mxu0 %v8876_v37  ;;  %v9015_v42 = vcombine.high %v260_v40, %v268_v41 }
  0x57   : > { %7218 = vmatpush3.bf16.msra.mxu0 %v8096_v45  ;;  %2443 = vmatmul.mubr.bf16.gmra.mxu1 %v8893_v46  ;;  %v9020_v45 = vcombine.low %v260_v40, %v268_v41  ;;  %v261_v40 = vld [vmem:[%s8696_s6 + $0x130] sm:$0xff] }
  0x58   : > { %7246 = vmatpush3.bf16.msra.mxu1 %v8097_v47  ;;  %7219 = vmatprep.subr.bf16.mxu0 %v8098_v48  ;;  %v8129_v47 = vld [vmem:[%s10550_s1 + $0x7a8] sm:$0xff]   ;;  %v8130_v48 = vld [vmem:[%s10550_s1 + $0x760] sm:$0xff]   ;;  %v269_v41 = vld [vmem:[%s8696_s6 + $0x170] sm:$0xff] }
  0x59   : > { %7247 = vmatprep.subr.bf16.mxu1 %v8099_v49  ;;  %2483 = vmatprep.mubr.bf16.mxu0 %v8964_v11  ;;  %v8131_v49 = vld [vmem:[%s10550_s1 + $0x7e0] sm:$0xff]  }
  0x5a   : > { %2532 = vmatprep.mubr.bf16.mxu1 %v8970_v15 }
  0x5b   : > { %7220 = vmatpush3.bf16.msra.mxu0 %v8100_v50  ;;  %v8132_v50 = vld [vmem:[%s10550_s1 + $0x720] sm:$0xff]  }
  0x5c   : > { %7248 = vmatpush3.bf16.msra.mxu1 %v8101_v51  ;;  %7221 = vmatprep.subr.bf16.mxu0 %v8102_v52  ;;  %v8133_v51 = vld [vmem:[%s10550_s1 + $0x7a0] sm:$0xff]   ;;  %v8134_v52 = vld [vmem:[%s10550_s1 + $0x758] sm:$0xff]  }
  0x5d   : > { %7249 = vmatprep.subr.bf16.mxu1 %v8103_v53  ;;  %v8135_v53 = vld [vmem:[%s10550_s1 + $0x7d8] sm:$0xff]  }
  0x5f   : > { %7222 = vmatpush3.bf16.msra.mxu0 %v8104_v54  ;;  %v8136_v54 = vld [vmem:[%s10550_s1 + $0x718] sm:$0xff]  }
  0x60   : > { %7250 = vmatpush3.bf16.msra.mxu1 %v8105_v55  ;;  %7223 = vmatprep.subr.bf16.mxu0 %v8106_v56  ;;  %v8137_v55 = vld [vmem:[%s10550_s1 + $0x798] sm:$0xff]   ;;  %v8138_v56 = vld [vmem:[%s10550_s1 + $0x750] sm:$0xff]  }
  0x61   : > { %7251 = vmatprep.subr.bf16.mxu1 %v8107_v57  ;;  %v8139_v57 = vld [vmem:[%s10550_s1 + $0x7d0] sm:$0xff]  }
  0x63   : > { %7224 = vmatpush3.bf16.msra.mxu0 %v8108_v58  ;;  %v8140_v58 = vld [vmem:[%s10550_s1 + $0x710] sm:$0xff]  }
  0x64   : > { %7252 = vmatpush3.bf16.msra.mxu1 %v8109_v59  ;;  %7225 = vmatprep.subr.bf16.mxu0 %v8110_v60  ;;  %v8141_v59 = vld [vmem:[%s10550_s1 + $0x790] sm:$0xff]   ;;  %v8142_v60 = vld [vmem:[%s10550_s1 + $0x748] sm:$0xff]  }
  0x65   : > { %7253 = vmatprep.subr.bf16.mxu1 %v8111_v61  ;;  %v8143_v61 = vld [vmem:[%s10550_s1 + $0x7c8] sm:$0xff]  }
  0x67   : > { %7226 = vmatpush3.bf16.msra.mxu0 %v8112_v63  ;;  %v8144_v63 = vld [vmem:[%s10550_s1 + $0x708] sm:$0xff]  }
  0x68   : > { %7254 = vmatpush3.bf16.msra.mxu1 %v8113_v0  ;;  %7227 = vmatprep.subr.bf16.mxu0 %v8114_v4  ;;  %v8145_v0 = vld [vmem:[%s10550_s1 + $0x788] sm:$0xff]   ;;  %v8146_v4 = vld [vmem:[%s10550_s1 + $0x740] sm:$0xff]  }
  0x69   : > { %7255 = vmatprep.subr.bf16.mxu1 %v8115_v5  ;;  %v8147_v5 = vld [vmem:[%s10550_s1 + $0x7c0] sm:$0xff]  }
  0x6b   : > { %7228 = vmatpush3.bf16.msra.mxu0 %v8116_v6  ;;  %v8148_v6 = vld [vmem:[%s10550_s1 + $0x700] sm:$0xff]  }
  0x6c   : > { %7256 = vmatpush3.bf16.msra.mxu1 %v8117_v7  ;;  %7269 = vmatprep.subr.bf16.mxu0 %v8118_v16  ;;  %v8149_v7 = vld [vmem:[%s10550_s1 + $0x780] sm:$0xff]   ;;  %v9093_v16 = vcombine.high %v245_v8, %v253_v9  ;;  %v8174_v8 = vld [vmem:[%s10550_s1 + $0x48] sm:$0xff]  }
  0x6d   : > { %7297 = vmatprep.subr.bf16.mxu1 %v8119_v17  ;;  %v254_v17 = vld [vmem:[%s8696_s6 + $0xf8] sm:$0xff]  ;;  %v8175_v9 = vld [vmem:[%s10550_s1 + $0xc8] sm:$0xff]  }
  0x6e   : > { %2484 = vmatmul.mubr.bf16.vlgmr.msra.gmra.mxu0 %v8962_v10 }
  0x6f   : > { %2533 = vmatmul.mubr.bf16.vlgmr.msra.gmra.mxu1 %v8968_v14  ;;  %7270 = vmatpush3.bf16.msra.mxu0 %v8120_v18  ;;  %v9096_v18 = vcombine.low %v246_v12, %v254_v17 }
  0x70   : > { %7298 = vmatpush3.bf16.msra.mxu1 %v8121_v19  ;;  %7271 = vmatprep.subr.bf16.mxu0 %v8122_v24  ;;  %v9098_v19 = vcombine.high %v246_v12, %v254_v17  ;;  %v8150_v24 = vld [vmem:[%s10550_s1 + $0x78] sm:$0xff]   ;;  %v8176_v12 = vld [vmem:[%s10550_s1 + $0x8] sm:$0xff]  }
  0x71   : > { %7299 = vmatprep.subr.bf16.mxu1 %v8123_v25  ;;  %2491 = vmatprep.mubr.bf16.mxu0 %v9002_v30  ;;  %v8151_v25 = vld [vmem:[%s10550_s1 + $0xf8] sm:$0xff]   ;;  %v8177_v17 = vld [vmem:[%s10550_s1 + $0x88] sm:$0xff]  }
  0x72   : > { %2540 = vmatprep.mubr.bf16.mxu1 %v9015_v42 }
  0x73   : > { %7272 = vmatpush3.bf16.msra.mxu0 %v8124_v26  ;;  %v8152_v26 = vld [vmem:[%s10550_s1 + $0x38] sm:$0xff]  }
  0x74   : > { %7300 = vmatpush3.bf16.msra.mxu1 %v8125_v27  ;;  %7273 = vmatprep.subr.bf16.mxu0 %v8126_v32  ;;  %v8153_v27 = vld [vmem:[%s10550_s1 + $0xb8] sm:$0xff]   ;;  %v8156_v32 = vld [vmem:[%s10550_s1 + $0x30] sm:$0xff]  }
  0x75   : > { %7301 = vmatprep.subr.bf16.mxu1 %v8127_v33  ;;  %v8157_v33 = vld [vmem:[%s10550_s1 + $0xb0] sm:$0xff]  }
  0x76   : > { %2492 = vmatmul.mubr.bf16.gmra.mxu0 %v9004_v31 }
  0x77   : > { %7274 = vmatpush3.bf16.msra.mxu0 %v8128_v43  ;;  %2541 = vmatmul.mubr.bf16.gmra.mxu1 %v9020_v45  ;;  %v9130_v43 = vcombine.high %v261_v40, %v269_v41 }
  0x78   : > { %7302 = vmatpush3.bf16.msra.mxu1 %v8129_v47  ;;  %7275 = vmatprep.subr.bf16.mxu0 %v8130_v48  ;;  %v9132_v47 = vcombine.low %v261_v40, %v269_v41  ;;  %v8158_v48 = vld [vmem:[%s10550_s1 + $0x68] sm:$0xff]  }
  0x79   : > { %7303 = vmatprep.subr.bf16.mxu1 %v8131_v49  ;;  %2581 = vmatprep.mubr.bf16.mxu0 %v9093_v16  ;;  %v8159_v49 = vld [vmem:[%s10550_s1 + $0xe8] sm:$0xff]  }
  0x7a   : > { %2630 = vmatprep.mubr.bf16.mxu1 %v9098_v19 }
  0x7b   : > { %7276 = vmatpush3.bf16.msra.mxu0 %v8132_v50  ;;  %v262_v50 = vld [vmem:[%s8696_s6 + $0x138] sm:$0xff] }
  0x7c   : > { %7304 = vmatpush3.bf16.msra.mxu1 %v8133_v51  ;;  %7277 = vmatprep.subr.bf16.mxu0 %v8134_v52  ;;  %v270_v51 = vld [vmem:[%s8696_s6 + $0x178] sm:$0xff] }
  0x7d   : > { %7305 = vmatprep.subr.bf16.mxu1 %v8135_v53  ;;  %v9144_v52 = vcombine.high %v262_v50, %v270_v51  ;;  %v8160_v53 = vld [vmem:[%s10550_s1 + $0x28] sm:$0xff]  }
  0x7f   : > { %7278 = vmatpush3.bf16.msra.mxu0 %v8136_v54  ;;  %v9149_v54 = vcombine.low %v262_v50, %v270_v51  ;;  %v8182_v50 = vld [vmem:[%s10550_s1 + $0x178] sm:$0xff]  }
  0x80   : > { %7306 = vmatpush3.bf16.msra.mxu1 %v8137_v55  ;;  %7279 = vmatprep.subr.bf16.mxu0 %v8138_v56  ;;  %v8161_v55 = vld [vmem:[%s10550_s1 + $0xa8] sm:$0xff]   ;;  %v8162_v56 = vld [vmem:[%s10550_s1 + $0x60] sm:$0xff]   ;;  %v8183_v51 = vld [vmem:[%s10550_s1 + $0x1f8] sm:$0xff]  }
  0x81   : > { %7307 = vmatprep.subr.bf16.mxu1 %v8139_v57  ;;  %v8163_v57 = vld [vmem:[%s10550_s1 + $0xe0] sm:$0xff]  }
  0x83   : > { %7280 = vmatpush3.bf16.msra.mxu0 %v8140_v58  ;;  %v8164_v58 = vld [vmem:[%s10550_s1 + $0x20] sm:$0xff]  }
  0x84   : > { %7308 = vmatpush3.bf16.msra.mxu1 %v8141_v59  ;;  %7281 = vmatprep.subr.bf16.mxu0 %v8142_v60  ;;  %v8165_v59 = vld [vmem:[%s10550_s1 + $0xa0] sm:$0xff]   ;;  %v8166_v60 = vld [vmem:[%s10550_s1 + $0x58] sm:$0xff]  }
  0x85   : > { %7309 = vmatprep.subr.bf16.mxu1 %v8143_v61  ;;  %v8167_v61 = vld [vmem:[%s10550_s1 + $0xd8] sm:$0xff]  }
  0x87   : > { %7282 = vmatpush3.bf16.msra.mxu0 %v8144_v63  ;;  %v8168_v63 = vld [vmem:[%s10550_s1 + $0x18] sm:$0xff]  }
  0x88   : > { %7310 = vmatpush3.bf16.msra.mxu1 %v8145_v0  ;;  %7283 = vmatprep.subr.bf16.mxu0 %v8146_v4  ;;  %v8169_v0 = vld [vmem:[%s10550_s1 + $0x98] sm:$0xff]   ;;  %v8170_v4 = vld [vmem:[%s10550_s1 + $0x50] sm:$0xff]  }
  0x89   : > { %7311 = vmatprep.subr.bf16.mxu1 %v8147_v5  ;;  %v8171_v5 = vld [vmem:[%s10550_s1 + $0xd0] sm:$0xff]  }
  0x8b   : > { %7284 = vmatpush3.bf16.msra.mxu0 %v8148_v6  ;;  %v8172_v6 = vld [vmem:[%s10550_s1 + $0x10] sm:$0xff]  }
  0x8c   : > { %7312 = vmatpush3.bf16.msra.mxu1 %v8149_v7  ;;  %7325 = vmatprep.subr.bf16.mxu0 %v8150_v24  ;;  %v8173_v7 = vld [vmem:[%s10550_s1 + $0x90] sm:$0xff]   ;;  %v8178_v24 = vld [vmem:[%s10550_s1 + $0x40] sm:$0xff]  }
  0x8d   : > { %7353 = vmatprep.subr.bf16.mxu1 %v8151_v25  ;;  %v8179_v25 = vld [vmem:[%s10550_s1 + $0xc0] sm:$0xff]  }
  0x8e   : > { %2582 = vmatmul.mubr.bf16.vlgmr.msra.gmra.mxu0 %v9091_v13 }
  0x8f   : > { %2631 = vmatmul.mubr.bf16.vlgmr.msra.gmra.mxu1 %v9096_v18  ;;  %7326 = vmatpush3.bf16.msra.mxu0 %v8152_v26  ;;  %v8180_v26 = vld [vmem:[%s10550_s1] sm:$0xff]  }
  0x90   : > { %7354 = vmatpush3.bf16.msra.mxu1 %v8153_v27  ;;  %7327 = vmatprep.subr.bf16.mxu0 %v8154_v28  ;;  %v8181_v27 = vld [vmem:[%s10550_s1 + $0x80] sm:$0xff]  }
  0x91   : > { %7355 = vmatprep.subr.bf16.mxu1 %v8155_v29  ;;  %2589 = vmatprep.mubr.bf16.mxu0 %v9130_v43  ;;  %v223_v28 = vld [vmem:[%s8696_s6] sm:$0xff] }
  0x92   : > { %2638 = vmatprep.mubr.bf16.mxu1 %v9144_v52  ;;  %v231_v29 = vld [vmem:[%s8696_s6 + $0x40] sm:$0xff] }
  0x93   : > { %7328 = vmatpush3.bf16.msra.mxu0 %v8156_v32  ;;  %v224_v32 = vld [vmem:[%s8696_s6 + $0x8] sm:$0xff]  ;;  %v6665_v40 = vcombine.low %v223_v28, %v231_v29  ;;  %v6666_v41 = vcombine.high %v223_v28, %v231_v29  ;;  %v8210_v28 = vld [vmem:[%s10550_s1 + $0x140] sm:$0xff]  }
  0x94   : > { %7356 = vmatpush3.bf16.msra.mxu1 %v8157_v33  ;;  %7329 = vmatprep.subr.bf16.mxu0 %v8158_v48  ;;  %v232_v33 = vld [vmem:[%s8696_s6 + $0x48] sm:$0xff]  ;;  %v8211_v29 = vld [vmem:[%s10550_s1 + $0x1c0] sm:$0xff]  }
  0x95   : > { %7357 = vmatprep.subr.bf16.mxu1 %v8159_v49  ;;  %v6667_v48 = vcombine.low %v224_v32, %v232_v33  ;;  %v6668_v49 = vcombine.high %v224_v32, %v232_v33  ;;  %v8212_v32 = vld [vmem:[%s10550_s1 + $0x100] sm:$0xff]  }
  0x96   : > { %2590 = vmatmul.mubr.bf16.gmra.mxu0 %v9132_v47  ;;  %v8213_v33 = vld [vmem:[%s10550_s1 + $0x180] sm:$0xff]  }
  0x97   : > { %7330 = vmatpush3.bf16.msra.mxu0 %v8160_v53  ;;  %2639 = vmatmul.mubr.bf16.gmra.mxu1 %v9149_v54  ;;  %v8184_v53 = vld [vmem:[%s10550_s1 + $0x138] sm:$0xff]  }
  0x98   : > { %7358 = vmatpush3.bf16.msra.mxu1 %v8161_v55  ;;  %7331 = vmatprep.subr.bf16.mxu0 %v8162_v56  ;;  %v8185_v55 = vld [vmem:[%s10550_s1 + $0x1b8] sm:$0xff]   ;;  %v8186_v56 = vld [vmem:[%s10550_s1 + $0x170] sm:$0xff]  }
  0x99   : > { %7359 = vmatprep.subr.bf16.mxu1 %v8163_v57  ;;  %3527 = vmatprep.mubr.bf16.mxu0 %v6666_v41  ;;  %v8187_v57 = vld [vmem:[%s10550_s1 + $0x1f0] sm:$0xff]  }
  0x9a   : > { %3576 = vmatprep.mubr.bf16.mxu1 %v6668_v49  ;;  %v233_v41 = vld [vmem:[%s8696_s6 + $0x50] sm:$0xff] }
  0x9b   : > { %7332 = vmatpush3.bf16.msra.mxu0 %v8164_v58  ;;  %v8188_v58 = vld [vmem:[%s10550_s1 + $0x130] sm:$0xff]  }
  0x9c   : > { %7360 = vmatpush3.bf16.msra.mxu1 %v8165_v59  ;;  %7333 = vmatprep.subr.bf16.mxu0 %v8166_v60  ;;  %v8189_v59 = vld [vmem:[%s10550_s1 + $0x1b0] sm:$0xff]   ;;  %v8190_v60 = vld [vmem:[%s10550_s1 + $0x168] sm:$0xff]  }
  0x9d   : > { %7361 = vmatprep.subr.bf16.mxu1 %v8167_v61  ;;  %v8191_v61 = vld [vmem:[%s10550_s1 + $0x1e8] sm:$0xff]  }
  0x9f   : > { %7334 = vmatpush3.bf16.msra.mxu0 %v8168_v63  ;;  %v8194_v63 = vld [vmem:[%s10550_s1 + $0x160] sm:$0xff]  }
  0xa0   : > { %7362 = vmatpush3.bf16.msra.mxu1 %v8169_v0  ;;  %7335 = vmatprep.subr.bf16.mxu0 %v8170_v4  ;;  %v8195_v0 = vld [vmem:[%s10550_s1 + $0x1e0] sm:$0xff]   ;;  %v8198_v4 = vld [vmem:[%s10550_s1 + $0x158] sm:$0xff]  }
  0xa1   : > { %7363 = vmatprep.subr.bf16.mxu1 %v8171_v5  ;;  %v8199_v5 = vld [vmem:[%s10550_s1 + $0x1d8] sm:$0xff]  }
  0xa3   : > { %7336 = vmatpush3.bf16.msra.mxu0 %v8172_v6  ;;  %v8200_v6 = vld [vmem:[%s10550_s1 + $0x118] sm:$0xff]  }
  0xa4   : > { %7364 = vmatpush3.bf16.msra.mxu1 %v8173_v7  ;;  %7337 = vmatprep.subr.bf16.mxu0 %v8174_v8  ;;  %v8201_v7 = vld [vmem:[%s10550_s1 + $0x198] sm:$0xff]   ;;  %v8202_v8 = vld [vmem:[%s10550_s1 + $0x150] sm:$0xff]  }
  0xa5   : > { %7365 = vmatprep.subr.bf16.mxu1 %v8175_v9  ;;  %v8203_v9 = vld [vmem:[%s10550_s1 + $0x1d0] sm:$0xff]  }
  0xa7   : > { %7338 = vmatpush3.bf16.msra.mxu0 %v8176_v12  ;;  %v8204_v12 = vld [vmem:[%s10550_s1 + $0x110] sm:$0xff]  }
  0xa8   : > { %7366 = vmatpush3.bf16.msra.mxu1 %v8177_v17  ;;  %7339 = vmatprep.subr.bf16.mxu0 %v8178_v24  ;;  %v8205_v17 = vld [vmem:[%s10550_s1 + $0x190] sm:$0xff]   ;;  %v8206_v24 = vld [vmem:[%s10550_s1 + $0x148] sm:$0xff]  }
  0xa9   : > { %7367 = vmatprep.subr.bf16.mxu1 %v8179_v25  ;;  %v8207_v25 = vld [vmem:[%s10550_s1 + $0x1c8] sm:$0xff]  }
  0xab   : > { %7340 = vmatpush3.bf16.msra.mxu0 %v8180_v26  ;;  %v8208_v26 = vld [vmem:[%s10550_s1 + $0x108] sm:$0xff]  }
  0xac   : > { %7368 = vmatpush3.bf16.msra.mxu1 %v8181_v27  ;;  %7381 = vmatprep.subr.bf16.mxu0 %v8182_v50  ;;  %v8209_v27 = vld [vmem:[%s10550_s1 + $0x188] sm:$0xff]  }
  0xad   : > { %7409 = vmatprep.subr.bf16.mxu1 %v8183_v51  ;;  %v234_v51 = vld [vmem:[%s8696_s6 + $0x58] sm:$0xff] }
  0xae   : > { %3528 = vmatmul.mubr.bf16.vlgmr.msra.gmra.mxu0 %v6665_v40  ;;  %v225_v40 = vld [vmem:[%s8696_s6 + $0x10] sm:$0xff] }
  0xaf   : > { %3577 = vmatmul.mubr.bf16.vlgmr.msra.gmra.mxu1 %v6667_v48  ;;  %7382 = vmatpush3.bf16.msra.mxu0 %v8184_v53  ;;  %v226_v48 = vld [vmem:[%s8696_s6 + $0x18] sm:$0xff]  ;;  %v6669_v49 = vcombine.low %v225_v40, %v233_v41  ;;  %v6670_v50 = vcombine.high %v225_v40, %v233_v41 }
  0xb0   : > { %7410 = vmatpush3.bf16.msra.mxu1 %v8185_v55  ;;  %7383 = vmatprep.subr.bf16.mxu0 %v8186_v56  ;;  %v6671_v53 = vcombine.low %v226_v48, %v234_v51  ;;  %v6672_v55 = vcombine.high %v226_v48, %v234_v51  ;;  %v8214_v56 = vld [vmem:[%s10550_s1 + $0x278] sm:$0xff]   ;;  %v8241_v48 = vld [vmem:[%s10550_s1 + $0x288] sm:$0xff]  }
  0xb1   : > { %3535 = vmatprep.mubr.bf16.mxu0 %v8709_v36  ;;  %7411 = vmatprep.subr.bf16.mxu1 %v8187_v57  ;;  %v8192_v36 = vld [vmem:[%s10550_s1 + $0x128] sm:$0xff]   ;;  %v8215_v57 = vld [vmem:[%s10550_s1 + $0x2f8] sm:$0xff]  }
  0xb2   : > { %3584 = vmatprep.mubr.bf16.mxu1 %v8714_v39  ;;  %v8193_v39 = vld [vmem:[%s10550_s1 + $0x1a8] sm:$0xff]  }
  0xb3   : > { %7384 = vmatpush3.bf16.msra.mxu0 %v8188_v58  ;;  %v8216_v58 = vld [vmem:[%s10550_s1 + $0x238] sm:$0xff]  }
  0xb4   : > { %7412 = vmatpush3.bf16.msra.mxu1 %v8189_v59  ;;  %7385 = vmatprep.subr.bf16.mxu0 %v8190_v60  ;;  %v8217_v59 = vld [vmem:[%s10550_s1 + $0x2b8] sm:$0xff]   ;;  %v8218_v60 = vld [vmem:[%s10550_s1 + $0x270] sm:$0xff]  }
  0xb5   : > { %7413 = vmatprep.subr.bf16.mxu1 %v8191_v61  ;;  %v8219_v61 = vld [vmem:[%s10550_s1 + $0x2f0] sm:$0xff]  }
  0xb6   : > { %3536 = vmatmul.mubr.bf16.gmra.mxu0 %v8707_v35  ;;  %v8196_v35 = vld [vmem:[%s10550_s1 + $0x120] sm:$0xff]  }
  0xb7   : > { %3585 = vmatmul.mubr.bf16.gmra.mxu1 %v8712_v38  ;;  %7386 = vmatpush3.bf16.msra.mxu0 %v8192_v36  ;;  %v8197_v38 = vld [vmem:[%s10550_s1 + $0x1a0] sm:$0xff]   ;;  %v8220_v36 = vld [vmem:[%s10550_s1 + $0x230] sm:$0xff]  }
  0xb8   : > { %7414 = vmatpush3.bf16.msra.mxu1 %v8193_v39  ;;  %7387 = vmatprep.subr.bf16.mxu0 %v8194_v63  ;;  %v8221_v39 = vld [vmem:[%s10550_s1 + $0x2b0] sm:$0xff]   ;;  %v8222_v63 = vld [vmem:[%s10550_s1 + $0x268] sm:$0xff]  }
  0xb9   : > { %7415 = vmatprep.subr.bf16.mxu1 %v8195_v0  ;;  %3625 = vmatprep.mubr.bf16.mxu0 %v6670_v50  ;;  %v8225_v0 = vld [vmem:[%s10550_s1 + $0x2a8] sm:$0xff]   ;;  %v8242_v50 = vld [vmem:[%s10550_s1 + $0x240] sm:$0xff]  }
  0xba   : > { %3674 = vmatprep.mubr.bf16.mxu1 %v6672_v55  ;;  %v8243_v55 = vld [vmem:[%s10550_s1 + $0x2c0] sm:$0xff]  }
  0xbb   : > { %7388 = vmatpush3.bf16.msra.mxu0 %v8196_v35  ;;  %v8226_v35 = vld [vmem:[%s10550_s1 + $0x260] sm:$0xff]  }
  0xbc   : > { %7416 = vmatpush3.bf16.msra.mxu1 %v8197_v38  ;;  %7389 = vmatprep.subr.bf16.mxu0 %v8198_v4  ;;  %v8228_v38 = vld [vmem:[%s10550_s1 + $0x220] sm:$0xff]   ;;  %v8230_v4 = vld [vmem:[%s10550_s1 + $0x258] sm:$0xff]  }
  0xbd   : > { %7417 = vmatprep.subr.bf16.mxu1 %v8199_v5  ;;  %v8231_v5 = vld [vmem:[%s10550_s1 + $0x2d8] sm:$0xff]  }
  0xbf   : > { %7390 = vmatpush3.bf16.msra.mxu0 %v8200_v6  ;;  %v8232_v6 = vld [vmem:[%s10550_s1 + $0x218] sm:$0xff]  }
  0xc0   : > { %7418 = vmatpush3.bf16.msra.mxu1 %v8201_v7  ;;  %7391 = vmatprep.subr.bf16.mxu0 %v8202_v8  ;;  %v8233_v7 = vld [vmem:[%s10550_s1 + $0x298] sm:$0xff]   ;;  %v8234_v8 = vld [vmem:[%s10550_s1 + $0x250] sm:$0xff]  }
  0xc1   : > { %7419 = vmatprep.subr.bf16.mxu1 %v8203_v9  ;;  %v8235_v9 = vld [vmem:[%s10550_s1 + $0x2d0] sm:$0xff]  }
  0xc3   : > { %7392 = vmatpush3.bf16.msra.mxu0 %v8204_v12  ;;  %v8236_v12 = vld [vmem:[%s10550_s1 + $0x210] sm:$0xff]  }
  0xc4   : > { %7420 = vmatpush3.bf16.msra.mxu1 %v8205_v17  ;;  %7393 = vmatprep.subr.bf16.mxu0 %v8206_v24  ;;  %v8237_v24 = vld [vmem:[%s10550_s1 + $0x290] sm:$0xff]  }
  0xc5   : > { %7421 = vmatprep.subr.bf16.mxu1 %v8207_v25 }
  0xc7   : > { %7394 = vmatpush3.bf16.msra.mxu0 %v8208_v26  ;;  %v8238_v26 = vld [vmem:[%s10550_s1 + $0x248] sm:$0xff]  }
  0xc8   : > { %7422 = vmatpush3.bf16.msra.mxu1 %v8209_v27  ;;  %7395 = vmatprep.subr.bf16.mxu0 %v8210_v28  ;;  %v8239_v28 = vld [vmem:[%s10550_s1 + $0x2c8] sm:$0xff]  }
  0xc9   : > { %7423 = vmatprep.subr.bf16.mxu1 %v8211_v29 }
  0xcb   : > { %7396 = vmatpush3.bf16.msra.mxu0 %v8212_v32 }
  0xcc   : > { %7424 = vmatpush3.bf16.msra.mxu1 %v8213_v33  ;;  %7437 = vmatprep.subr.bf16.mxu0 %v8214_v56  ;;  %v8240_v33 = vld [vmem:[%s10550_s1 + $0x208] sm:$0xff]  }
  0xcd   : > { %7465 = vmatprep.subr.bf16.mxu1 %v8215_v57 }
  0xce   : > { %3626 = vmatmul.mubr.bf16.vlgmr.msra.gmra.mxu0 %v6669_v49 }
  0xcf   : > { %3675 = vmatmul.mubr.bf16.vlgmr.msra.gmra.mxu1 %v6671_v53  ;;  %7438 = vmatpush3.bf16.msra.mxu0 %v8216_v58  ;;  %v8244_v58 = vld [vmem:[%s10550_s1 + $0x200] sm:$0xff]  }
  0xd0   : > { %7466 = vmatpush3.bf16.msra.mxu1 %v8217_v59  ;;  %3633 = vmatprep.mubr.bf16.mxu0 %v8838_v21  ;;  %v8223_v21 = vld [vmem:[%s10550_s1 + $0x2e8] sm:$0xff]  }
  0xd1   : > { %7439 = vmatprep.subr.bf16.mxu0 %v8218_v60  ;;  %3682 = vmatprep.mubr.bf16.mxu1 %v8842_v23  ;;  %v8224_v23 = vld [vmem:[%s10550_s1 + $0x228] sm:$0xff]   ;;  %v8245_v60 = vld [vmem:[%s10550_s1 + $0x280] sm:$0xff]  }
  0xd2   : > { %7467 = vmatprep.subr.bf16.mxu1 %v8219_v61  ;;  %v227_v61 = vld [vmem:[%s8696_s6 + $0x20] sm:$0xff] }
  0xd3   : > { %7440 = vmatpush3.bf16.msra.mxu0 %v8220_v36  ;;  %v235_v36 = vld [vmem:[%s8696_s6 + $0x60] sm:$0xff] }
  0xd4   : > { %7468 = vmatpush3.bf16.msra.mxu1 %v8221_v39  ;;  %7441 = vmatprep.subr.bf16.mxu0 %v8222_v63  ;;  %v6673_v39 = vcombine.low %v227_v61, %v235_v36  ;;  %v6674_v63 = vcombine.high %v227_v61, %v235_v36  ;;  %v8267_v36 = vld [vmem:[%s10550_s1 + $0x3d0] sm:$0xff]  }
  0xd5   : > { %7469 = vmatprep.subr.bf16.mxu1 %v8223_v21  ;;  %v228_v21 = vld [vmem:[%s8696_s6 + $0x28] sm:$0xff] }
  0xd6   : > { %3634 = vmatmul.mubr.bf16.gmra.mxu0 %v8836_v20  ;;  %v8227_v20 = vld [vmem:[%s10550_s1 + $0x2e0] sm:$0xff]  }
  0xd7   : > { %3683 = vmatmul.mubr.bf16.gmra.mxu1 %v8840_v22  ;;  %7442 = vmatpush3.bf16.msra.mxu0 %v8224_v23  ;;  %v8229_v22 = vld [vmem:[%s10550_s1 + $0x2a0] sm:$0xff]   ;;  %v236_v23 = vld [vmem:[%s8696_s6 + $0x68] sm:$0xff] }
  0xd8   : > { %7470 = vmatpush3.bf16.msra.mxu1 %v8225_v0  ;;  %7443 = vmatprep.subr.bf16.mxu0 %v8226_v35  ;;  %v6675_v35 = vcombine.low %v228_v21, %v236_v23 }
  0xd9   : > { %7471 = vmatprep.subr.bf16.mxu1 %v8227_v20  ;;  %v6676_v20 = vcombine.high %v228_v21, %v236_v23  ;;  %3723 = vmatprep.mubr.bf16.mxu0 %v6674_v63  ;;  %v8269_v63 = vld [vmem:[%s10550_s1 + $0x390] sm:$0xff]   ;;  %v8270_v21 = vld [vmem:[%s10550_s1 + $0x348] sm:$0xff]  }
  0xdb   : > { %7444 = vmatpush3.bf16.msra.mxu0 %v8228_v38  ;;  %v8246_v38 = vld [vmem:[%s10550_s1 + $0x378] sm:$0xff]   ;;  %3772 = vmatprep.mubr.bf16.mxu1 %v6676_v20  ;;  %v8271_v20 = vld [vmem:[%s10550_s1 + $0x3c8] sm:$0xff]  }
  0xdc   : > { %7472 = vmatpush3.bf16.msra.mxu1 %v8229_v22  ;;  %7445 = vmatprep.subr.bf16.mxu0 %v8230_v4  ;;  %v8247_v22 = vld [vmem:[%s10550_s1 + $0x3f8] sm:$0xff]  }
  0xdd   : > { %7473 = vmatprep.subr.bf16.mxu1 %v8231_v5  ;;  %v8248_v4 = vld [vmem:[%s10550_s1 + $0x338] sm:$0xff]  }
  0xde   : > { %v8249_v5 = vld [vmem:[%s10550_s1 + $0x3b8] sm:$0xff]  }
  0xdf   : > { %7446 = vmatpush3.bf16.msra.mxu0 %v8232_v6  ;;  %v8250_v6 = vld [vmem:[%s10550_s1 + $0x370] sm:$0xff]  }
  0xe0   : > { %7474 = vmatpush3.bf16.msra.mxu1 %v8233_v7  ;;  %7447 = vmatprep.subr.bf16.mxu0 %v8234_v8  ;;  %v8251_v7 = vld [vmem:[%s10550_s1 + $0x3f0] sm:$0xff]  }
  0xe1   : > { %7475 = vmatprep.subr.bf16.mxu1 %v8235_v9  ;;  %v8252_v8 = vld [vmem:[%s10550_s1 + $0x330] sm:$0xff]  }
  0xe2   : > { %v8253_v9 = vld [vmem:[%s10550_s1 + $0x3b0] sm:$0xff]  }
  0xe3   : > { %7448 = vmatpush3.bf16.msra.mxu0 %v8236_v12  ;;  %v8254_v12 = vld [vmem:[%s10550_s1 + $0x368] sm:$0xff]  }
  0xe4   : > { %7476 = vmatpush3.bf16.msra.mxu1 %v8237_v24  ;;  %7449 = vmatprep.subr.bf16.mxu0 %v8238_v26  ;;  %v8257_v24 = vld [vmem:[%s10550_s1 + $0x3a8] sm:$0xff]   ;;  %v8258_v26 = vld [vmem:[%s10550_s1 + $0x360] sm:$0xff]  }
  0xe5   : > { %7477 = vmatprep.subr.bf16.mxu1 %v8239_v28 }
  0xe7   : > { %7450 = vmatpush3.bf16.msra.mxu0 %v8240_v33 }
  0xe8   : > { %7478 = vmatpush3.bf16.msra.mxu1 %v8241_v48  ;;  %7451 = vmatprep.subr.bf16.mxu0 %v8242_v50  ;;  %v8262_v48 = vld [vmem:[%s10550_s1 + $0x358] sm:$0xff]  }
  0xe9   : > { %7479 = vmatprep.subr.bf16.mxu1 %v8243_v55 }
  0xeb   : > { %7452 = vmatpush3.bf16.msra.mxu0 %v8244_v58 }
  0xec   : > { %7480 = vmatpush3.bf16.msra.mxu1 %v8245_v60  ;;  %7493 = vmatprep.subr.bf16.mxu0 %v8246_v38  ;;  %v8266_v60 = vld [vmem:[%s10550_s1 + $0x350] sm:$0xff]   ;;  %v8272_v38 = vld [vmem:[%s10550_s1 + $0x308] sm:$0xff]  }
  0xed   : > { %7521 = vmatprep.subr.bf16.mxu1 %v8247_v22 }
  0xee   : > { %v7117_v17 = vpop.f32.mrf.mxu0  ;;  %3724 = vmatmul.mubr.bf16.vlgmr.msra.gmra.mxu0 %v6673_v39  ;;  %v8268_v39 = vld [vmem:[%s10550_s1 + $0x310] sm:$0xff]  }
  0xef   : > { %v7145_v25 = vpop.f32.mrf.mxu1  ;;  %3773 = vmatmul.mubr.bf16.vlgmr.msra.gmra.mxu1 %v6675_v35  ;;  %7494 = vmatpush3.bf16.msra.mxu0 %v8248_v4 }
  0xf0   : > { %v7118_v27 = vpop.f32.mrf.mxu0  ;;  %7522 = vmatpush3.bf16.msra.mxu1 %v8249_v5  ;;  %3731 = vmatprep.mubr.bf16.mxu0 %v8964_v11  ;;  %v8255_v11 = vld [vmem:[%s10550_s1 + $0x3e8] sm:$0xff]  }
  0xf1   : > { %v7119_v29 = vadd.f32 %v7118_v27, %v7117_v17  ;;  %v7146_v32 = vpop.f32.mrf.mxu1  ;;  %7495 = vmatprep.subr.bf16.mxu0 %v8250_v6  ;;  %3780 = vmatprep.mubr.bf16.mxu1 %v8970_v15  ;;  %v8256_v15 = vld [vmem:[%s10550_s1 + $0x328] sm:$0xff]   ;;  %v8259_v27 = vld [vmem:[%s10550_s1 + $0x3e0] sm:$0xff]  }
  0xf2   : > { %v7147_v40 = vadd.f32 %v7146_v32, %v7145_v25  ;;  %v7120_v41 = vpop.f32.mrf.mxu0  ;;  %7523 = vmatprep.subr.bf16.mxu1 %v8251_v7  ;;  %v8260_v32 = vld [vmem:[%s10550_s1 + $0x320] sm:$0xff]   ;;  %v8273_v5 = vld [vmem:[%s10550_s1 + $0x388] sm:$0xff]  }
  0xf3   : > { %v7148_v49 = vpop.f32.mrf.mxu1  ;;  %7496 = vmatpush3.bf16.msra.mxu0 %v8252_v8  ;;  %v8274_v8 = vld [vmem:[%s10550_s1 + $0x340] sm:$0xff]  }
  0xf4   : > { %v9415_v51 = vadd.f32 %v7147_v40, %v7119_v29  ;;  %v7121_v53 = vpop.f32.mrf.mxu0  ;;  %7524 = vmatpush3.bf16.msra.mxu1 %v8253_v9  ;;  %7497 = vmatprep.subr.bf16.mxu0 %v8254_v12  ;;  %v8261_v40 = vld [vmem:[%s10550_s1 + $0x3a0] sm:$0xff]  }
  0xf5   : > { %v7122_v56 = vadd.f32 %v7121_v53, %v7120_v41  ;;  %v7149_v57 = vpop.f32.mrf.mxu1  ;;  %7525 = vmatprep.subr.bf16.mxu1 %v8255_v11  ;;  %v8263_v53 = vld [vmem:[%s10550_s1 + $0x3d8] sm:$0xff]   ;;  %v8275_v11 = vld [vmem:[%s10550_s1 + $0x3c0] sm:$0xff]  }
  0xf6   : > { %v7150_v59 = vadd.f32 %v7149_v57, %v7148_v49  ;;  %3732 = vmatmul.mubr.bf16.gmra.mxu0 %v8962_v10  ;;  %v7123_v17 = vpop.f32.mrf.mxu0  ;;  %v8264_v57 = vld [vmem:[%s10550_s1 + $0x318] sm:$0xff]  }
  0xf7   : > { %3781 = vmatmul.mubr.bf16.gmra.mxu1 %v8968_v14  ;;  %v7151_v25 = vpop.f32.mrf.mxu1  ;;  %7498 = vmatpush3.bf16.msra.mxu0 %v8256_v15 }
  0xf8   : > { %v9430_v0 = vadd.f32 %v7150_v59, %v7122_v56  ;;  %v7124_v10 = vpop.f32.mrf.mxu0  ;;  %7526 = vmatpush3.bf16.msra.mxu1 %v8257_v24  ;;  %7499 = vmatprep.subr.bf16.mxu0 %v8258_v26  ;;  %v8265_v59 = vld [vmem:[%s10550_s1 + $0x398] sm:$0xff]   ;;  %v229_v26 = vld [vmem:[%s8696_s6 + $0x30] sm:$0xff] }
  0xf9   : > { %v7125_v28 = vadd.f32 %v7124_v10, %v7123_v17  ;;  %v7152_v29 = vpop.f32.mrf.mxu1  ;;  %7527 = vmatprep.subr.bf16.mxu1 %v8259_v27  ;;  %v8276_v17 = vld [vmem:[%s10550_s1 + $0x300] sm:$0xff]  }
  0xfa   : > { %v7153_v14 = vadd.f32 %v7152_v29, %v7151_v25  ;;  %v7126_v33 = vpop.f32.mrf.mxu0  ;;  %v8277_v25 = vld [vmem:[%s10550_s1 + $0x380] sm:$0xff]   ;;  %v237_v29 = vld [vmem:[%s8696_s6 + $0x70] sm:$0xff] }
  0xfb   : > { %v7154_v41 = vpop.f32.mrf.mxu1  ;;  %7500 = vmatpush3.bf16.msra.mxu0 %v8260_v32  ;;  %v230_v32 = vld [vmem:[%s8696_s6 + $0x38] sm:$0xff] }
  0xfc   : > { %v9487_v49 = vadd.f32 %v7153_v14, %v7125_v28  ;;  %v7127_v50 = vpop.f32.mrf.mxu0  ;;  %7528 = vmatpush3.bf16.msra.mxu1 %v8261_v40  ;;  %7501 = vmatprep.subr.bf16.mxu0 %v8262_v48  ;;  %v6677_v14 = vcombine.low %v229_v26, %v237_v29  ;;  %v8278_v48 = vld [vmem:[%s10550_s1 + $0x878] sm:$0xff]  }
  0xfd   : > { %v7128_v55 = vadd.f32 %v7127_v50, %v7126_v33  ;;  %v7155_v56 = vpop.f32.mrf.mxu1  ;;  %7529 = vmatprep.subr.bf16.mxu1 %v8263_v53  ;;  %v6678_v33 = vcombine.high %v229_v26, %v237_v29  ;;  %v8279_v53 = vld [vmem:[%s10550_s1 + $0x8f8] sm:$0xff]   ;;  %v8298_v26 = vld [vmem:[%s10550_s1 + $0x850] sm:$0xff]  }
  0xfe   : > { %v7156_v58 = vadd.f32 %v7155_v56, %v7154_v41  ;;  %v8301_v29 = vld [vmem:[%s10550_s1 + $0x890] sm:$0xff]  }
  0xff   : > { %7502 = vmatpush3.bf16.msra.mxu0 %v8264_v57  ;;  %3821 = vmatprep.mubr.bf16.mxu0 %v6678_v33  ;;  %v8280_v57 = vld [vmem:[%s10550_s1 + $0x838] sm:$0xff]   ;;  %v8304_v33 = vld [vmem:[%s10550_s1 + $0x808] sm:$0xff]  }
 0x100   : > { %v9501_v61 = vadd.f32 %v7156_v58, %v7128_v55  ;;  %7530 = vmatpush3.bf16.msra.mxu1 %v8265_v59  ;;  %7503 = vmatprep.subr.bf16.mxu0 %v8266_v60  ;;  %v8281_v59 = vld [vmem:[%s10550_s1 + $0x8b8] sm:$0xff]  }
 0x101   : > { %7531 = vmatprep.subr.bf16.mxu1 %v8267_v36 }
 0x103   : > { %7504 = vmatpush3.bf16.msra.mxu0 %v8268_v39 }
 0x104   : > { %7532 = vmatpush3.bf16.msra.mxu1 %v8269_v63  ;;  %7505 = vmatprep.subr.bf16.mxu0 %v8270_v21  ;;  %v8283_v21 = vld [vmem:[%s10550_s1 + $0x8f0] sm:$0xff]  }
 0x105   : > { %7533 = vmatprep.subr.bf16.mxu1 %v8271_v20 }
 0x107   : > { %7506 = vmatpush3.bf16.msra.mxu0 %v8272_v38 }
 0x108   : > { %7534 = vmatpush3.bf16.msra.mxu1 %v8273_v5  ;;  %7507 = vmatprep.subr.bf16.mxu0 %v8274_v8 }
 0x109   : > { %7535 = vmatprep.subr.bf16.mxu1 %v8275_v11 }
 0x10b   : > { %7508 = vmatpush3.bf16.msra.mxu0 %v8276_v17  ;;  %v8292_v17 = vld [vmem:[%s10550_s1 + $0x820] sm:$0xff]  }
 0x10c   : > { %7536 = vmatpush3.bf16.msra.mxu1 %v8277_v25  ;;  %7549 = vmatprep.subr.bf16.mxu0 %v8278_v48  ;;  %v8297_v25 = vld [vmem:[%s10550_s1 + $0x898] sm:$0xff]  }
 0x10d   : > { %7577 = vmatprep.subr.bf16.mxu1 %v8279_v53 }
 0x10e   : > { %v7173_v23 = vpop.f32.mrf.mxu0  ;;  %3822 = vmatmul.mubr.bf16.vlgmr.msra.gmra.mxu0 %v6677_v14 }
 0x10f   : > { %v7201_v35 = vpop.f32.mrf.mxu1  ;;  %7550 = vmatpush3.bf16.msra.mxu0 %v8280_v57  ;;  %3829 = vmatprep.mubr.bf16.mxu0 %v9093_v16  ;;  %v8287_v16 = vld [vmem:[%s10550_s1 + $0x8e8] sm:$0xff]  }
 0x110   : > { %v7174_v22 = vpop.f32.mrf.mxu0 }
 0x111   : > { %v7202_v4 = vpop.f32.mrf.mxu1  ;;  %v7175_v6 = vadd.f32 %v7174_v22, %v7173_v23  ;;  %v8285_v22 = vld [vmem:[%s10550_s1 + $0x8b0] sm:$0xff]  }
 0x112   : > { %v7203_v7 = vadd.f32 %v7202_v4, %v7201_v35  ;;  %v7176_v9 = vpop.f32.mrf.mxu0  ;;  %v8284_v35 = vld [vmem:[%s10550_s1 + $0x830] sm:$0xff]  }
 0x113   : > { %v7204_v12 = vpop.f32.mrf.mxu1  ;;  %v2388_v15 = vadd.f32 %v7175_v6, %v9415_v51  ;;  %v238_v51 = vld [vmem:[%s8696_s6 + $0x78] sm:$0xff] }
 0x114   : > { %v7177_v24 = vpop.f32.mrf.mxu0  ;;  %v6679_v40 = vcombine.low %v230_v32, %v238_v51  ;;  %v6680_v41 = vcombine.high %v230_v32, %v238_v51  ;;  %v8302_v32 = vld [vmem:[%s10550_s1 + $0x848] sm:$0xff]  }
 0x115   : > { %v9538_v10 = vadd.f32 %v7203_v7, %v2388_v15  ;;  %v7178_v27 = vadd.f32 %v7177_v24, %v7176_v9  ;;  %v7205_v28 = vpop.f32.mrf.mxu1  ;;  %v8295_v24 = vld [vmem:[%s10550_s1 + $0x8d8] sm:$0xff]   ;;  %v8303_v51 = vld [vmem:[%s10550_s1 + $0x8c8] sm:$0xff]  }
 0x116   : > { %v7179_v50 = vpop.f32.mrf.mxu0  ;;  %v7206_v56 = vadd.f32 %v7205_v28, %v7204_v12  ;;  %3870 = vmatprep.mubr.bf16.mxu1 %v6680_v41  ;;  %3830 = vmatmul.mubr.bf16.gmra.mxu0 %v9091_v13  ;;  %v8289_v12 = vld [vmem:[%s10550_s1 + $0x8a8] sm:$0xff]   ;;  %v8291_v13 = vld [vmem:[%s10550_s1 + $0x8e0] sm:$0xff]   ;;  %v8300_v28 = vld [vmem:[%s10550_s1 + $0x810] sm:$0xff]  }
 0x117   : > { %v2391_v55 = vadd.f32 %v7178_v27, %v9430_v0  ;;  %3871 = vmatmul.mubr.bf16.vlgmr.msra.gmra.mxu1 %v6679_v40  ;;  %v8282_v0 = vld [vmem:[%s10550_s1 + $0x870] sm:$0xff]   ;;  %v7207_v39 = vpop.f32.mrf.mxu1  ;;  %4767 = vmatprep.mubr.bf16.mxu0 %v8782_v62  ;;  %v8293_v62 = vld [vmem:[%s10550_s1 + $0x8a0] sm:$0xff]   ;;  %v8305_v41 = vld [vmem:[%s10550_s1 + $0x888] sm:$0xff]  }
 0x118   : > { %v7180_v58 = vpop.f32.mrf.mxu0  ;;  %7578 = vmatpush3.bf16.msra.mxu1 %v8281_v59  ;;  %7551 = vmatprep.subr.bf16.mxu0 %v8282_v0  ;;  %v8299_v27 = vld [vmem:[%s10550_s1 + $0x8d0] sm:$0xff]   ;;  %v8308_v59 = vld [vmem:[%s10550_s1 + $0x800] sm:$0xff]  }
 0x119   : > { %v9556_v60 = vadd.f32 %v7206_v56, %v2391_v55  ;;  %v7181_v36 = vadd.f32 %v7180_v58, %v7179_v50  ;;  %v7208_v20 = vpop.f32.mrf.mxu1  ;;  %7579 = vmatprep.subr.bf16.mxu1 %v8283_v21  ;;  %3878 = vmatprep.mubr.bf16.mxu1 %v9098_v19  ;;  %v8288_v19 = vld [vmem:[%s10550_s1 + $0x828] sm:$0xff]   ;;  %v8306_v50 = vld [vmem:[%s10550_s1 + $0x840] sm:$0xff]   ;;  %v8310_v21 = vld [vmem:[%s10550_s1 + $0x978] sm:$0xff]  }
 0x11a   : > { %v7182_v63 = vpop.f32.mrf.mxu0  ;;  %v7209_v4 = vadd.f32 %v7208_v20, %v7207_v39  ;;  %7552 = vmatpush3.bf16.msra.mxu0 %v8284_v35  ;;  %v8307_v56 = vld [vmem:[%s10550_s1 + $0x8c0] sm:$0xff]  }
 0x11b   : > { %v2396_v23 = vadd.f32 %v7181_v36, %v9487_v49  ;;  %v8286_v49 = vld [vmem:[%s10550_s1 + $0x868] sm:$0xff]   ;;  %v7210_v6 = vpop.f32.mrf.mxu1  ;;  %v8309_v39 = vld [vmem:[%s10550_s1 + $0x880] sm:$0xff]  }
 0x11c   : > { %v7183_v38 = vpop.f32.mrf.mxu0  ;;  %7580 = vmatpush3.bf16.msra.mxu1 %v8285_v22  ;;  %7553 = vmatprep.subr.bf16.mxu0 %v8286_v49  ;;  %v8312_v22 = vld [vmem:[%s10550_s1 + $0x938] sm:$0xff]  }
 0x11d   : > { %v7184_v5 = vadd.f32 %v7183_v38, %v7182_v63  ;;  %v9579_v7 = vadd.f32 %v7209_v4, %v2396_v23  ;;  %v7211_v9 = vpop.f32.mrf.mxu1  ;;  %7581 = vmatprep.subr.bf16.mxu1 %v8287_v16 }
 0x11e   : > { %v7212_v11 = vadd.f32 %v7211_v9, %v7210_v6  ;;  %7554 = vmatpush3.bf16.msra.mxu0 %v8288_v19  ;;  %v8314_v6 = vld [vmem:[%s10550_s1 + $0x970] sm:$0xff]  }
 0x11f   : > { %v2399_v8 = vadd.f32 %v7184_v5, %v9501_v61  ;;  %3879 = vmatmul.mubr.bf16.gmra.mxu1 %v9096_v18  ;;  %v8290_v61 = vld [vmem:[%s10550_s1 + $0x860] sm:$0xff]   ;;  %v8294_v18 = vld [vmem:[%s10550_s1 + $0x858] sm:$0xff]   ;;  %v8317_v9 = vld [vmem:[%s10550_s1 + $0x9b0] sm:$0xff]  }
 0x120   : > { %7582 = vmatpush3.bf16.msra.mxu1 %v8289_v12  ;;  %7555 = vmatprep.subr.bf16.mxu0 %v8290_v61  ;;  %v8313_v5 = vld [vmem:[%s10550_s1 + $0x9b8] sm:$0xff]  }
 0x121   : > { %v9597_v15 = vadd.f32 %v7212_v11, %v2399_v8  ;;  %4816 = vmatprep.mubr.bf16.mxu1 %v8788_v2  ;;  %7583 = vmatprep.subr.bf16.mxu1 %v8291_v13  ;;  %v8296_v2 = vld [vmem:[%s10550_s1 + $0x818] sm:$0xff]   ;;  %v8318_v11 = vld [vmem:[%s10550_s1 + $0x968] sm:$0xff]  }
 0x122   : > { %7556 = vmatpush3.bf16.msra.mxu0 %v8292_v17  ;;  %v8319_v17 = vld [vmem:[%s10550_s1 + $0x9e8] sm:$0xff]  }
 0x123   : > { %7557 = vmatprep.subr.bf16.mxu0 %v8294_v18 }
 0x124   : > { %7584 = vmatpush3.bf16.msra.mxu1 %v8293_v62 }
 0x125   : > { %7585 = vmatprep.subr.bf16.mxu1 %v8295_v24  ;;  %v8320_v24 = vld [vmem:[%s10550_s1 + $0x928] sm:$0xff]  }
 0x126   : > { %7558 = vmatpush3.bf16.msra.mxu0 %v8296_v2 }
 0x127   : > { %7559 = vmatprep.subr.bf16.mxu0 %v8298_v26 }
 0x128   : > { %7586 = vmatpush3.bf16.msra.mxu1 %v8297_v25 }
 0x129   : > { %7587 = vmatprep.subr.bf16.mxu1 %v8299_v27  ;;  %v8322_v27 = vld [vmem:[%s10550_s1 + $0x960] sm:$0xff]  }
 0x12a   : > { %7560 = vmatpush3.bf16.msra.mxu0 %v8300_v28 }
 0x12b   : > { %7561 = vmatprep.subr.bf16.mxu0 %v8302_v32  ;;  %v8323_v32 = vld [vmem:[%s10550_s1 + $0x9e0] sm:$0xff]  }
 0x12c   : > { %7588 = vmatpush3.bf16.msra.mxu1 %v8301_v29 }
 0x12d   : > { %7589 = vmatprep.subr.bf16.mxu1 %v8303_v51 }
 0x12e   : > { %v7229_v14 = vpop.f32.mrf.mxu0  ;;  %7562 = vmatpush3.bf16.msra.mxu0 %v8304_v33 }
 0x12f   : > { %v7257_v40 = vpop.f32.mrf.mxu1  ;;  %7563 = vmatprep.subr.bf16.mxu0 %v8306_v50  ;;  %v8329_v50 = vld [vmem:[%s10550_s1 + $0x998] sm:$0xff]  }
 0x130   : > { %v7230_v48 = vpop.f32.mrf.mxu0  ;;  %7590 = vmatpush3.bf16.msra.mxu1 %v8305_v41  ;;  %v8327_v41 = vld [vmem:[%s10550_s1 + $0x9d8] sm:$0xff]  }
 0x131   : > { %v7231_v53 = vadd.f32 %v7230_v48, %v7229_v14  ;;  %v7258_v55 = vpop.f32.mrf.mxu1  ;;  %7591 = vmatprep.subr.bf16.mxu1 %v8307_v56  ;;  %v8324_v14 = vld [vmem:[%s10550_s1 + $0x920] sm:$0xff]   ;;  %v8328_v48 = vld [vmem:[%s10550_s1 + $0x918] sm:$0xff]   ;;  %v272_v56 = vld [vmem:[%s8696_s6 + $0x188] sm:$0xff] }
 0x132   : > { %v7259_v57 = vadd.f32 %v7258_v55, %v7257_v40  ;;  %v7232_v58 = vpop.f32.mrf.mxu0  ;;  %7564 = vmatpush3.bf16.msra.mxu0 %v8308_v59  ;;  %v8326_v40 = vld [vmem:[%s10550_s1 + $0x958] sm:$0xff]   ;;  %v279_v55 = vld [vmem:[%s8696_s6 + $0x1c0] sm:$0xff] }
 0x133   : > { %v2486_v36 = vadd.f32 %v7231_v53, %v9538_v10  ;;  %v7260_v0 = vpop.f32.mrf.mxu1  ;;  %v8311_v10 = vld [vmem:[%s10550_s1 + $0x9f8] sm:$0xff]   ;;  %7605 = vmatprep.subr.bf16.mxu0 %v8310_v21  ;;  %v271_v53 = vld [vmem:[%s8696_s6 + $0x180] sm:$0xff]  ;;  %v8332_v21 = vld [vmem:[%s10550_s1 + $0x910] sm:$0xff]  }
 0x134   : > { %v7233_v63 = vpop.f32.mrf.mxu0  ;;  %7592 = vmatpush3.bf16.msra.mxu1 %v8309_v39  ;;  %v9734_v59 = vcombine.low %v271_v53, %v279_v55  ;;  %v8330_v39 = vld [vmem:[%s10550_s1 + $0x950] sm:$0xff]  }
 0x135   : > { %v9658_v23 = vadd.f32 %v7259_v57, %v2486_v36  ;;  %v7234_v35 = vadd.f32 %v7233_v63, %v7232_v58  ;;  %v7261_v20 = vpop.f32.mrf.mxu1  ;;  %7633 = vmatprep.subr.bf16.mxu1 %v8311_v10  ;;  %4768 = vmatmul.mubr.bf16.vlgmr.msra.gmra.mxu0 %v8786_v1  ;;  %v8316_v1 = vld [vmem:[%s10550_s1 + $0x930] sm:$0xff]   ;;  %v9731_v57 = vcombine.high %v271_v53, %v279_v55  ;;  %v280_v58 = vld [vmem:[%s8696_s6 + $0x1c8] sm:$0xff] }
 0x136   : > { %v7262_v38 = vadd.f32 %v7261_v20, %v7260_v0  ;;  %v7235_v49 = vpop.f32.mrf.mxu0  ;;  %7606 = vmatpush3.bf16.msra.mxu0 %v8312_v22  ;;  %v9736_v36 = vcombine.high %v272_v56, %v280_v58  ;;  %v9738_v0 = vcombine.low %v272_v56, %v280_v58  ;;  %v8331_v63 = vld [vmem:[%s10550_s1 + $0x9d0] sm:$0xff]   ;;  %v8334_v20 = vld [vmem:[%s10550_s1 + $0x948] sm:$0xff]  }
 0x137   : > { %v2489_v4 = vadd.f32 %v7234_v35, %v9556_v60  ;;  %4817 = vmatmul.mubr.bf16.vlgmr.msra.gmra.mxu1 %v8790_v3  ;;  %v8315_v60 = vld [vmem:[%s10550_s1 + $0x9f0] sm:$0xff]   ;;  %7607 = vmatprep.subr.bf16.mxu0 %v8314_v6  ;;  %v7263_v3 = vpop.f32.mrf.mxu1  ;;  %v8335_v10 = vld [vmem:[%s10550_s1 + $0x9c8] sm:$0xff]   ;;  %v8339_v6 = vld [vmem:[%s10550_s1 + $0x9c0] sm:$0xff]  }
 0x138   : > { %7634 = vmatpush3.bf16.msra.mxu1 %v8313_v5  ;;  %v7236_v8 = vpop.f32.mrf.mxu0  ;;  %4775 = vmatprep.mubr.bf16.mxu0 %v9731_v57  ;;  %v8333_v35 = vld [vmem:[%s10550_s1 + $0x990] sm:$0xff]   ;;  %v8351_v55 = vld [vmem:[%s10550_s1 + $0xae8] sm:$0xff]  }
 0x139   : > { %v9675_v16 = vadd.f32 %v7262_v38, %v2489_v4  ;;  %v7237_v19 = vadd.f32 %v7236_v8, %v7235_v49  ;;  %7635 = vmatprep.subr.bf16.mxu1 %v8315_v60  ;;  %v7264_v13 = vpop.f32.mrf.mxu1  ;;  %4824 = vmatprep.mubr.bf16.mxu1 %v9736_v36  ;;  %v8336_v38 = vld [vmem:[%s10550_s1 + $0x908] sm:$0xff]   ;;  %v8338_v49 = vld [vmem:[%s10550_s1 + $0x940] sm:$0xff]  }
 0x13a   : > { %v7238_v12 = vpop.f32.mrf.mxu0  ;;  %7608 = vmatpush3.bf16.msra.mxu0 %v8316_v1  ;;  %v7265_v62 = vadd.f32 %v7264_v13, %v7263_v3  ;;  %v8337_v4 = vld [vmem:[%s10550_s1 + $0x988] sm:$0xff]   ;;  %v8340_v8 = vld [vmem:[%s10550_s1 + $0x900] sm:$0xff]   ;;  %v8343_v13 = vld [vmem:[%s10550_s1 + $0xaf8] sm:$0xff]  }
 0x13b   : > { %v2494_v61 = vadd.f32 %v7237_v19, %v9579_v7  ;;  %7609 = vmatprep.subr.bf16.mxu0 %v8318_v11  ;;  %v7266_v25 = vpop.f32.mrf.mxu1  ;;  %v8321_v7 = vld [vmem:[%s10550_s1 + $0x9a8] sm:$0xff]   ;;  %v8341_v3 = vld [vmem:[%s10550_s1 + $0x980] sm:$0xff]   ;;  %v8342_v11 = vld [vmem:[%s10550_s1 + $0xa78] sm:$0xff]  }
 0x13c   : > { %7636 = vmatpush3.bf16.msra.mxu1 %v8317_v9  ;;  %v7239_v18 = vpop.f32.mrf.mxu0 }
 0x13d   : > { %v7240_v2 = vadd.f32 %v7239_v18, %v7238_v12  ;;  %7637 = vmatprep.subr.bf16.mxu1 %v8319_v17  ;;  %v9699_v26 = vadd.f32 %v7265_v62, %v2494_v61  ;;  %v7267_v29 = vpop.f32.mrf.mxu1  ;;  %4776 = vmatmul.mubr.bf16.gmra.mxu0 %v9734_v59 }
 0x13e   : > { %7610 = vmatpush3.bf16.msra.mxu0 %v8320_v24  ;;  %v7268_v51 = vadd.f32 %v7267_v29, %v7266_v25  ;;  %4865 = vmatprep.mubr.bf16.mxu0 %v8874_v34 }
 0x13f   : > { %v2497_v28 = vadd.f32 %v7240_v2, %v9597_v15  ;;  %7611 = vmatprep.subr.bf16.mxu0 %v8322_v27  ;;  %v8325_v15 = vld [vmem:[%s10550_s1 + $0x9a0] sm:$0xff]   ;;  %4825 = vmatmul.mubr.bf16.gmra.mxu1 %v9738_v0  ;;  %v8345_v2 = vld [vmem:[%s10550_s1 + $0xab8] sm:$0xff]   ;;  %v8346_v27 = vld [vmem:[%s10550_s1 + $0xa70] sm:$0xff]  }
 0x140   : > { %7638 = vmatpush3.bf16.msra.mxu1 %v8321_v7  ;;  %4914 = vmatprep.mubr.bf16.mxu1 %v8888_v44 }
 0x141   : > { %7639 = vmatprep.subr.bf16.mxu1 %v8323_v32  ;;  %v9714_v33 = vadd.f32 %v7268_v51, %v2497_v28  ;;  %v273_v51 = vld [vmem:[%s8696_s6 + $0x190] sm:$0xff] }
 0x142   : > { %7612 = vmatpush3.bf16.msra.mxu0 %v8324_v14  ;;  %v281_v14 = vld [vmem:[%s8696_s6 + $0x1d0] sm:$0xff] }
 0x143   : > { %7613 = vmatprep.subr.bf16.mxu0 %v8326_v40 }
 0x144   : > { %7640 = vmatpush3.bf16.msra.mxu1 %v8325_v15 }
 0x145   : > { %7641 = vmatprep.subr.bf16.mxu1 %v8327_v41  ;;  %v9816_v41 = vcombine.high %v273_v51, %v281_v14 }
 0x146   : > { %7614 = vmatpush3.bf16.msra.mxu0 %v8328_v48  ;;  %v9818_v48 = vcombine.low %v273_v51, %v281_v14 }
 0x147   : > { %7615 = vmatprep.subr.bf16.mxu0 %v8330_v39  ;;  %v274_v39 = vld [vmem:[%s8696_s6 + $0x198] sm:$0xff] }
 0x148   : > { %7642 = vmatpush3.bf16.msra.mxu1 %v8329_v50  ;;  %v8350_v50 = vld [vmem:[%s10550_s1 + $0xa68] sm:$0xff]  }
 0x149   : > { %7643 = vmatprep.subr.bf16.mxu1 %v8331_v63  ;;  %v282_v63 = vld [vmem:[%s8696_s6 + $0x1d8] sm:$0xff] }
 0x14a   : > { %7616 = vmatpush3.bf16.msra.mxu0 %v8332_v21 }
 0x14b   : > { %7617 = vmatprep.subr.bf16.mxu0 %v8334_v20  ;;  %v9831_v20 = vcombine.high %v274_v39, %v282_v63 }
 0x14c   : > { %7644 = vmatpush3.bf16.msra.mxu1 %v8333_v35 }
 0x14d   : > { %7645 = vmatprep.subr.bf16.mxu1 %v8335_v10  ;;  %v9836_v10 = vcombine.low %v274_v39, %v282_v63 }
 0x14e   : > { %v7285_v22 = vpop.f32.mrf.mxu0  ;;  %7618 = vmatpush3.bf16.msra.mxu0 %v8336_v38 }
 0x14f   : > { %v7313_v5 = vpop.f32.mrf.mxu1  ;;  %7619 = vmatprep.subr.bf16.mxu0 %v8338_v49  ;;  %v8354_v49 = vld [vmem:[%s10550_s1 + $0xa60] sm:$0xff]  }
 0x150   : > { %v7286_v34 = vpop.f32.mrf.mxu0  ;;  %7646 = vmatpush3.bf16.msra.mxu1 %v8337_v4 }
 0x151   : > { %v7287_v60 = vadd.f32 %v7286_v34, %v7285_v22  ;;  %v7314_v44 = vpop.f32.mrf.mxu1  ;;  %7647 = vmatprep.subr.bf16.mxu1 %v8339_v6  ;;  %v8353_v22 = vld [vmem:[%s10550_s1 + $0xaa8] sm:$0xff]   ;;  %v8355_v6 = vld [vmem:[%s10550_s1 + $0xae0] sm:$0xff]  }
 0x152   : > { %v7315_v1 = vadd.f32 %v7314_v44, %v7313_v5  ;;  %v7288_v19 = vpop.f32.mrf.mxu0  ;;  %7620 = vmatpush3.bf16.msra.mxu0 %v8340_v8  ;;  %v8358_v8 = vld [vmem:[%s10550_s1 + $0xa58] sm:$0xff]  }
 0x153   : > { %v2584_v9 = vadd.f32 %v7287_v60, %v9658_v23  ;;  %v7316_v12 = vpop.f32.mrf.mxu1  ;;  %7661 = vmatprep.subr.bf16.mxu0 %v8342_v11  ;;  %v8344_v23 = vld [vmem:[%s10550_s1 + $0xa38] sm:$0xff]   ;;  %v8365_v11 = vld [vmem:[%s10550_s1 + $0xa90] sm:$0xff]  }
 0x154   : > { %v7289_v61 = vpop.f32.mrf.mxu0  ;;  %7648 = vmatpush3.bf16.msra.mxu1 %v8341_v3  ;;  %v8362_v3 = vld [vmem:[%s10550_s1 + $0xa50] sm:$0xff]  }
 0x155   : > { %v9789_v17 = vadd.f32 %v7315_v1, %v2584_v9  ;;  %v7290_v62 = vadd.f32 %v7289_v61, %v7288_v19  ;;  %v7317_v18 = vpop.f32.mrf.mxu1  ;;  %4866 = vmatmul.mubr.bf16.vlgmr.msra.gmra.mxu0 %v8876_v37  ;;  %7689 = vmatprep.subr.bf16.mxu1 %v8343_v13  ;;  %v8347_v37 = vld [vmem:[%s10550_s1 + $0xaf0] sm:$0xff]   ;;  %v8359_v1 = vld [vmem:[%s10550_s1 + $0xad8] sm:$0xff]   ;;  %v8366_v61 = vld [vmem:[%s10550_s1 + $0xa48] sm:$0xff]  }
 0x156   : > { %v7318_v24 = vadd.f32 %v7317_v18, %v7316_v12  ;;  %v7291_v7 = vpop.f32.mrf.mxu0  ;;  %7662 = vmatpush3.bf16.msra.mxu0 %v8344_v23  ;;  %4873 = vmatprep.mubr.bf16.mxu0 %v9816_v41  ;;  %v8360_v19 = vld [vmem:[%s10550_s1 + $0xa18] sm:$0xff]   ;;  %v8363_v9 = vld [vmem:[%s10550_s1 + $0xad0] sm:$0xff]   ;;  %v8367_v13 = vld [vmem:[%s10550_s1 + $0xac8] sm:$0xff]  }
 0x157   : > { %v2587_v25 = vadd.f32 %v7290_v62, %v9675_v16  ;;  %4915 = vmatmul.mubr.bf16.vlgmr.msra.gmra.mxu1 %v8893_v46  ;;  %7663 = vmatprep.subr.bf16.mxu0 %v8346_v27  ;;  %v8348_v16 = vld [vmem:[%s10550_s1 + $0xa30] sm:$0xff]   ;;  %v7319_v15 = vpop.f32.mrf.mxu1  ;;  %v8368_v62 = vld [vmem:[%s10550_s1 + $0xa08] sm:$0xff]   ;;  %v8370_v23 = vld [vmem:[%s10550_s1 + $0xa40] sm:$0xff]  }
 0x158   : > { %7690 = vmatpush3.bf16.msra.mxu1 %v8345_v2  ;;  %v7292_v29 = vpop.f32.mrf.mxu0  ;;  %v8349_v46 = vld [vmem:[%s10550_s1 + $0xab0] sm:$0xff]   ;;  %4922 = vmatprep.mubr.bf16.mxu1 %v9831_v20  ;;  %v8369_v18 = vld [vmem:[%s10550_s1 + $0xa88] sm:$0xff]  }
 0x159   : > { %v9806_v28 = vadd.f32 %v7318_v24, %v2587_v25  ;;  %v7293_v32 = vadd.f32 %v7292_v29, %v7291_v7  ;;  %7691 = vmatprep.subr.bf16.mxu1 %v8347_v37  ;;  %v7320_v56 = vpop.f32.mrf.mxu1  ;;  %v8364_v12 = vld [vmem:[%s10550_s1 + $0xa10] sm:$0xff]   ;;  %v8371_v25 = vld [vmem:[%s10550_s1 + $0xac0] sm:$0xff]  }
 0x15a   : > { %v7294_v40 = vpop.f32.mrf.mxu0  ;;  %7664 = vmatpush3.bf16.msra.mxu0 %v8348_v16  ;;  %v7321_v21 = vadd.f32 %v7320_v56, %v7319_v15  ;;  %v8372_v7 = vld [vmem:[%s10550_s1 + $0xa00] sm:$0xff]   ;;  %v8375_v15 = vld [vmem:[%s10550_s1 + $0xbf8] sm:$0xff]  }
 0x15b   : > { %v2592_v53 = vadd.f32 %v7293_v32, %v9699_v26  ;;  %7665 = vmatprep.subr.bf16.mxu0 %v8350_v50  ;;  %v8352_v26 = vld [vmem:[%s10550_s1 + $0xa28] sm:$0xff]   ;;  %v7322_v38 = vpop.f32.mrf.mxu1  ;;  %v8373_v29 = vld [vmem:[%s10550_s1 + $0xa80] sm:$0xff]   ;;  %v8376_v50 = vld [vmem:[%s10550_s1 + $0xb38] sm:$0xff]  }
 0x15c   : > { %7692 = vmatpush3.bf16.msra.mxu1 %v8349_v46  ;;  %v7295_v58 = vpop.f32.mrf.mxu0  ;;  %v8374_v46 = vld [vmem:[%s10550_s1 + $0xb78] sm:$0xff]  }
 0x15d   : > { %v7296_v35 = vadd.f32 %v7295_v58, %v7294_v40  ;;  %4874 = vmatmul.mubr.bf16.gmra.mxu0 %v9818_v48  ;;  %7693 = vmatprep.subr.bf16.mxu1 %v8351_v55  ;;  %v9841_v4 = vadd.f32 %v7321_v21, %v2592_v53  ;;  %v7323_v34 = vpop.f32.mrf.mxu1  ;;  %v8377_v56 = vld [vmem:[%s10550_s1 + $0xbb8] sm:$0xff]  }
 0x15e   : > { %4963 = vmatprep.mubr.bf16.mxu0 %v9002_v30  ;;  %7666 = vmatpush3.bf16.msra.mxu0 %v8352_v26  ;;  %v7324_v60 = vadd.f32 %v7323_v34, %v7322_v38  ;;  %v8356_v30 = vld [vmem:[%s10550_s1 + $0xa20] sm:$0xff]  }
 0x15f   : > { %v2595_v5 = vadd.f32 %v7296_v35, %v9714_v33  ;;  %4923 = vmatmul.mubr.bf16.gmra.mxu1 %v9836_v10  ;;  %7667 = vmatprep.subr.bf16.mxu0 %v8354_v49  ;;  %v8357_v33 = vld [vmem:[%s10550_s1 + $0xaa0] sm:$0xff]  }
 0x160   : > { %7694 = vmatpush3.bf16.msra.mxu1 %v8353_v22  ;;  %5012 = vmatprep.mubr.bf16.mxu1 %v9015_v42  ;;  %v8361_v42 = vld [vmem:[%s10550_s1 + $0xa98] sm:$0xff]   ;;  %v8381_v22 = vld [vmem:[%s10550_s1 + $0xbb0] sm:$0xff]   ;;  %v275_v49 = vld [vmem:[%s8696_s6 + $0x1a0] sm:$0xff] }
 0x161   : > { %7695 = vmatprep.subr.bf16.mxu1 %v8355_v6  ;;  %v9859_v44 = vadd.f32 %v7324_v60, %v2595_v5 }
 0x162   : > { %7668 = vmatpush3.bf16.msra.mxu0 %v8356_v30 }
 0x163   : > { %7669 = vmatprep.subr.bf16.mxu0 %v8358_v8 }
 0x164   : > { %7696 = vmatpush3.bf16.msra.mxu1 %v8357_v33 }
 0x165   : > { %7697 = vmatprep.subr.bf16.mxu1 %v8359_v1  ;;  %v8382_v1 = vld [vmem:[%s10550_s1 + $0xb68] sm:$0xff]  }
 0x166   : > { %7670 = vmatpush3.bf16.msra.mxu0 %v8360_v19 }
 0x167   : > { %7671 = vmatprep.subr.bf16.mxu0 %v8362_v3  ;;  %v8383_v3 = vld [vmem:[%s10550_s1 + $0xbe8] sm:$0xff]  }
 0x168   : > { %7698 = vmatpush3.bf16.msra.mxu1 %v8361_v42 }
 0x169   : > { %7699 = vmatprep.subr.bf16.mxu1 %v8363_v9  ;;  %v276_v9 = vld [vmem:[%s8696_s6 + $0x1a8] sm:$0xff] }
 0x16a   : > { %7672 = vmatpush3.bf16.msra.mxu0 %v8364_v12  ;;  %v284_v12 = vld [vmem:[%s8696_s6 + $0x1e8] sm:$0xff] }
 0x16b   : > { %7673 = vmatprep.subr.bf16.mxu0 %v8366_v61  ;;  %v9958_v61 = vcombine.high %v276_v9, %v284_v12 }
 0x16c   : > { %7700 = vmatpush3.bf16.msra.mxu1 %v8365_v11 }
 0x16d   : > { %7701 = vmatprep.subr.bf16.mxu1 %v8367_v13  ;;  %v8384_v13 = vld [vmem:[%s10550_s1 + $0xb28] sm:$0xff]  }
 0x16e   : > { %7674 = vmatpush3.bf16.msra.mxu0 %v8368_v62  ;;  %v7341_v24 = vpop.f32.mrf.mxu0  ;;  %v9963_v62 = vcombine.low %v276_v9, %v284_v12  ;;  %v8411_v12 = vld [vmem:[%s10550_s1 + $0xcf0] sm:$0xff]  }
 0x16f   : > { %v7369_v2 = vpop.f32.mrf.mxu1  ;;  %7675 = vmatprep.subr.bf16.mxu0 %v8370_v23  ;;  %v8385_v23 = vld [vmem:[%s10550_s1 + $0xba8] sm:$0xff]  }
 0x170   : > { %7702 = vmatpush3.bf16.msra.mxu1 %v8369_v18  ;;  %v7342_v27 = vpop.f32.mrf.mxu0 }
 0x171   : > { %v7370_v37 = vpop.f32.mrf.mxu1  ;;  %7703 = vmatprep.subr.bf16.mxu1 %v8371_v25  ;;  %v7343_v16 = vadd.f32 %v7342_v27, %v7341_v24  ;;  %v8386_v25 = vld [vmem:[%s10550_s1 + $0xb60] sm:$0xff]  }
 0x172   : > { %v7371_v32 = vadd.f32 %v7370_v37, %v7369_v2  ;;  %7676 = vmatpush3.bf16.msra.mxu0 %v8372_v7  ;;  %v7344_v51 = vpop.f32.mrf.mxu0  ;;  %v8387_v7 = vld [vmem:[%s10550_s1 + $0xbe0] sm:$0xff]  }
 0x173   : > { %v7372_v14 = vpop.f32.mrf.mxu1  ;;  %v3530_v40 = vadd.f32 %v7343_v16, %v9789_v17  ;;  %7717 = vmatprep.subr.bf16.mxu0 %v8374_v46  ;;  %v8378_v17 = vld [vmem:[%s10550_s1 + $0xb70] sm:$0xff]   ;;  %v8388_v37 = vld [vmem:[%s10550_s1 + $0xb20] sm:$0xff]  }
 0x174   : > { %7704 = vmatpush3.bf16.msra.mxu1 %v8373_v29  ;;  %v7345_v53 = vpop.f32.mrf.mxu0  ;;  %v8389_v29 = vld [vmem:[%s10550_s1 + $0xba0] sm:$0xff]   ;;  %v8394_v46 = vld [vmem:[%s10550_s1 + $0xb50] sm:$0xff]  }
 0x175   : > { %v7373_v55 = vpop.f32.mrf.mxu1  ;;  %4964 = vmatmul.mubr.bf16.vlgmr.msra.gmra.mxu0 %v9004_v31  ;;  %7745 = vmatprep.subr.bf16.mxu1 %v8375_v15  ;;  %v9924_v58 = vadd.f32 %v7371_v32, %v3530_v40  ;;  %v7346_v39 = vadd.f32 %v7345_v53, %v7344_v51  ;;  %v8379_v31 = vld [vmem:[%s10550_s1 + $0xbf0] sm:$0xff]   ;;  %v8392_v32 = vld [vmem:[%s10550_s1 + $0xb18] sm:$0xff]   ;;  %v8398_v40 = vld [vmem:[%s10550_s1 + $0xb48] sm:$0xff]  }
 0x176   : > { %v7374_v63 = vadd.f32 %v7373_v55, %v7372_v14  ;;  %7718 = vmatpush3.bf16.msra.mxu0 %v8376_v50  ;;  %v7347_v21 = vpop.f32.mrf.mxu0  ;;  %v8395_v51 = vld [vmem:[%s10550_s1 + $0xbd0] sm:$0xff]   ;;  %v8399_v50 = vld [vmem:[%s10550_s1 + $0xbc8] sm:$0xff]  }
 0x177   : > { %5013 = vmatmul.mubr.bf16.vlgmr.msra.gmra.mxu1 %v9020_v45  ;;  %v3533_v35 = vadd.f32 %v7346_v39, %v9806_v28  ;;  %v7375_v26 = vpop.f32.mrf.mxu1  ;;  %7719 = vmatprep.subr.bf16.mxu0 %v8378_v17  ;;  %v8380_v45 = vld [vmem:[%s10550_s1 + $0xb30] sm:$0xff]   ;;  %v283_v28 = vld [vmem:[%s8696_s6 + $0x1e0] sm:$0xff]  ;;  %v8400_v53 = vld [vmem:[%s10550_s1 + $0xb08] sm:$0xff]  }
 0x178   : > { %7746 = vmatpush3.bf16.msra.mxu1 %v8377_v56  ;;  %v7348_v38 = vpop.f32.mrf.mxu0  ;;  %v9944_v33 = vcombine.high %v275_v49, %v283_v28  ;;  %v9946_v8 = vcombine.low %v275_v49, %v283_v28  ;;  %5020 = vmatprep.mubr.bf16.mxu1 %v9958_v61  ;;  %v8396_v14 = vld [vmem:[%s10550_s1 + $0xb10] sm:$0xff]   ;;  %v8401_v55 = vld [vmem:[%s10550_s1 + $0xb88] sm:$0xff]   ;;  %v8402_v56 = vld [vmem:[%s10550_s1 + $0xb40] sm:$0xff]  }
 0x179   : > { %7747 = vmatprep.subr.bf16.mxu1 %v8379_v31  ;;  %v9940_v5 = vadd.f32 %v7374_v63, %v3533_v35  ;;  %v7349_v34 = vadd.f32 %v7348_v38, %v7347_v21  ;;  %v7376_v6 = vpop.f32.mrf.mxu1  ;;  %v8397_v15 = vld [vmem:[%s10550_s1 + $0xb90] sm:$0xff]   ;;  %v8403_v63 = vld [vmem:[%s10550_s1 + $0xbc0] sm:$0xff]   ;;  %v8406_v38 = vld [vmem:[%s10550_s1 + $0xc78] sm:$0xff]  }
 0x17a   : > { %7720 = vmatpush3.bf16.msra.mxu0 %v8380_v45  ;;  %v7350_v60 = vpop.f32.mrf.mxu0  ;;  %v7377_v30 = vadd.f32 %v7376_v6, %v7375_v26  ;;  %4971 = vmatprep.mubr.bf16.mxu0 %v9944_v33  ;;  %v8404_v21 = vld [vmem:[%s10550_s1 + $0xb00] sm:$0xff]  }
 0x17b   : > { %v3538_v19 = vadd.f32 %v7349_v34, %v9841_v4  ;;  %v7378_v42 = vpop.f32.mrf.mxu1  ;;  %7721 = vmatprep.subr.bf16.mxu0 %v8382_v1  ;;  %v8405_v35 = vld [vmem:[%s10550_s1 + $0xb80] sm:$0xff]   ;;  %v8407_v34 = vld [vmem:[%s10550_s1 + $0xcf8] sm:$0xff]  }
 0x17c   : > { %7748 = vmatpush3.bf16.msra.mxu1 %v8381_v22  ;;  %v7351_v11 = vpop.f32.mrf.mxu0  ;;  %v8409_v1 = vld [vmem:[%s10550_s1 + $0xcb8] sm:$0xff]  }
 0x17d   : > { %v9965_v4 = vadd.f32 %v7377_v30, %v3538_v19  ;;  %v7379_v18 = vpop.f32.mrf.mxu1  ;;  %4972 = vmatmul.mubr.bf16.gmra.mxu0 %v9946_v8  ;;  %7749 = vmatprep.subr.bf16.mxu1 %v8383_v3  ;;  %v7352_v24 = vadd.f32 %v7351_v11, %v7350_v60  ;;  %v8408_v60 = vld [vmem:[%s10550_s1 + $0xc38] sm:$0xff]  }
 0x17e   : > { %v7380_v2 = vadd.f32 %v7379_v18, %v7378_v42  ;;  %7722 = vmatpush3.bf16.msra.mxu0 %v8384_v13  ;;  %5061 = vmatprep.mubr.bf16.mxu0 %v9130_v43  ;;  %v8390_v43 = vld [vmem:[%s10550_s1 + $0xb58] sm:$0xff]  }
 0x17f   : > { %v3541_v27 = vadd.f32 %v7352_v24, %v9859_v44  ;;  %5021 = vmatmul.mubr.bf16.gmra.mxu1 %v9963_v62  ;;  %7723 = vmatprep.subr.bf16.mxu0 %v8386_v25  ;;  %v8391_v44 = vld [vmem:[%s10550_s1 + $0xbd8] sm:$0xff]  }
 0x180   : > { %7750 = vmatpush3.bf16.msra.mxu1 %v8385_v23  ;;  %5110 = vmatprep.mubr.bf16.mxu1 %v9144_v52  ;;  %v8393_v52 = vld [vmem:[%s10550_s1 + $0xb98] sm:$0xff]   ;;  %v8413_v23 = vld [vmem:[%s10550_s1 + $0xcb0] sm:$0xff]  }
 0x181   : > { %7751 = vmatprep.subr.bf16.mxu1 %v8387_v7  ;;  %v9987_v16 = vadd.f32 %v7380_v2, %v3541_v27  ;;  %v285_v7 = vld [vmem:[%s8696_s6 + $0x1f0] sm:$0xff] }
 0x182   : > { %7724 = vmatpush3.bf16.msra.mxu0 %v8388_v37 }
 0x183   : > { %7725 = vmatprep.subr.bf16.mxu0 %v8390_v43 }
 0x184   : > { %7752 = vmatpush3.bf16.msra.mxu1 %v8389_v29 }
 0x185   : > { %7753 = vmatprep.subr.bf16.mxu1 %v8391_v44  ;;  %v8414_v44 = vld [vmem:[%s10550_s1 + $0xc68] sm:$0xff]  }
 0x186   : > { %7726 = vmatpush3.bf16.msra.mxu0 %v8392_v32 }
 0x187   : > { %7727 = vmatprep.subr.bf16.mxu0 %v8394_v46  ;;  %v8415_v46 = vld [vmem:[%s10550_s1 + $0xce8] sm:$0xff]  }
 0x188   : > { %7754 = vmatpush3.bf16.msra.mxu1 %v8393_v52 }
 0x189   : > { %7755 = vmatprep.subr.bf16.mxu1 %v8395_v51  ;;  %v278_v51 = vld [vmem:[%s8696_s6 + $0x1b8] sm:$0xff] }
 0x18a   : > { %7728 = vmatpush3.bf16.msra.mxu0 %v8396_v14 }
 0x18b   : > { %7729 = vmatprep.subr.bf16.mxu0 %v8398_v40 }
 0x18c   : > { %7756 = vmatpush3.bf16.msra.mxu1 %v8397_v15  ;;  %v286_v15 = vld [vmem:[%s8696_s6 + $0x1f8] sm:$0xff] }
 0x18d   : > { %7757 = vmatprep.subr.bf16.mxu1 %v8399_v50 }
 0x18e   : > { %7730 = vmatpush3.bf16.msra.mxu0 %v8400_v53  ;;  %v7397_v39 = vpop.f32.mrf.mxu0 }
 0x18f   : > { %v7425_v17 = vpop.f32.mrf.mxu1  ;;  %7731 = vmatprep.subr.bf16.mxu0 %v8402_v56  ;;  %v10094_v56 = vcombine.low %v278_v51, %v286_v15 }
 0x190   : > { %7758 = vmatpush3.bf16.msra.mxu1 %v8401_v55  ;;  %v7398_v31 = vpop.f32.mrf.mxu0  ;;  %v10089_v55 = vcombine.high %v278_v51, %v286_v15 }
 0x191   : > { %7759 = vmatprep.subr.bf16.mxu1 %v8403_v63  ;;  %v7399_v26 = vadd.f32 %v7398_v31, %v7397_v39  ;;  %v7426_v45 = vpop.f32.mrf.mxu1  ;;  %v8417_v63 = vld [vmem:[%s10550_s1 + $0xca8] sm:$0xff]   ;;  %v8419_v31 = vld [vmem:[%s10550_s1 + $0xce0] sm:$0xff]  }
 0x192   : > { %7732 = vmatpush3.bf16.msra.mxu0 %v8404_v21  ;;  %v7427_v22 = vadd.f32 %v7426_v45, %v7425_v17  ;;  %v7400_v49 = vpop.f32.mrf.mxu0  ;;  %v8418_v21 = vld [vmem:[%s10550_s1 + $0xc60] sm:$0xff]   ;;  %v8423_v45 = vld [vmem:[%s10550_s1 + $0xcd8] sm:$0xff]  }
 0x193   : > { %v3628_v6 = vadd.f32 %v7399_v26, %v9924_v58  ;;  %v7428_v28 = vpop.f32.mrf.mxu1  ;;  %7773 = vmatprep.subr.bf16.mxu0 %v8406_v38  ;;  %v8410_v58 = vld [vmem:[%s10550_s1 + $0xc70] sm:$0xff]   ;;  %v8422_v26 = vld [vmem:[%s10550_s1 + $0xc58] sm:$0xff]  }
 0x194   : > { %7760 = vmatpush3.bf16.msra.mxu1 %v8405_v35  ;;  %v7401_v30 = vpop.f32.mrf.mxu0  ;;  %v8424_v38 = vld [vmem:[%s10550_s1 + $0xc18] sm:$0xff]  }
 0x195   : > { %5062 = vmatmul.mubr.bf16.vlgmr.msra.gmra.mxu0 %v9132_v47  ;;  %7801 = vmatprep.subr.bf16.mxu1 %v8407_v34  ;;  %v10052_v19 = vadd.f32 %v7427_v22, %v3628_v6  ;;  %v7402_v42 = vadd.f32 %v7401_v30, %v7400_v49  ;;  %v7429_v3 = vpop.f32.mrf.mxu1  ;;  %v8426_v22 = vld [vmem:[%s10550_s1 + $0xc50] sm:$0xff]   ;;  %v8432_v30 = vld [vmem:[%s10550_s1 + $0xc08] sm:$0xff]  }
 0x196   : > { %7774 = vmatpush3.bf16.msra.mxu0 %v8408_v60  ;;  %v7430_v9 = vadd.f32 %v7429_v3, %v7428_v28  ;;  %v7403_v47 = vpop.f32.mrf.mxu0  ;;  %v8427_v49 = vld [vmem:[%s10550_s1 + $0xcd0] sm:$0xff]   ;;  %v8430_v28 = vld [vmem:[%s10550_s1 + $0xc48] sm:$0xff]   ;;  %v8434_v3 = vld [vmem:[%s10550_s1 + $0xc40] sm:$0xff]  }
 0x197   : > { %5111 = vmatmul.mubr.bf16.vlgmr.msra.gmra.mxu1 %v9149_v54  ;;  %v3631_v11 = vadd.f32 %v7402_v42, %v9940_v5  ;;  %v7431_v13 = vpop.f32.mrf.mxu1  ;;  %7775 = vmatprep.subr.bf16.mxu0 %v8410_v58  ;;  %v8412_v54 = vld [vmem:[%s10550_s1 + $0xc30] sm:$0xff]   ;;  %v8431_v60 = vld [vmem:[%s10550_s1 + $0xcc8] sm:$0xff]  }
 0x198   : > { %7802 = vmatpush3.bf16.msra.mxu1 %v8409_v1  ;;  %v7404_v18 = vpop.f32.mrf.mxu0  ;;  %v277_v5 = vld [vmem:[%s8696_s6 + $0x1b0] sm:$0xff]  ;;  %5118 = vmatprep.mubr.bf16.mxu1 %v10089_v55  ;;  %v8433_v1 = vld [vmem:[%s10550_s1 + $0xc88] sm:$0xff]  }
 0x199   : > { %7803 = vmatprep.subr.bf16.mxu1 %v8411_v12  ;;  %v10068_v24 = vadd.f32 %v7430_v9, %v3631_v11  ;;  %v7405_v2 = vadd.f32 %v7404_v18, %v7403_v47  ;;  %v7432_v25 = vpop.f32.mrf.mxu1  ;;  %v10072_v29 = vcombine.high %v277_v5, %v285_v7  ;;  %v10074_v43 = vcombine.low %v277_v5, %v285_v7  ;;  %v8428_v34 = vld [vmem:[%s10550_s1 + $0xc10] sm:$0xff]   ;;  %v8435_v9 = vld [vmem:[%s10550_s1 + $0xcc0] sm:$0xff]   ;;  %v8439_v7 = vld [vmem:[%s10550_s1 + $0xdf8] sm:$0xff]  }
 0x19a   : > { %7776 = vmatpush3.bf16.msra.mxu0 %v8412_v54  ;;  %v7406_v27 = vpop.f32.mrf.mxu0  ;;  %v7433_v37 = vadd.f32 %v7432_v25, %v7431_v13  ;;  %v8429_v6 = vld [vmem:[%s10550_s1 + $0xc90] sm:$0xff]   ;;  %v8436_v12 = vld [vmem:[%s10550_s1 + $0xc00] sm:$0xff]  }
 0x19b   : > { %v3636_v32 = vadd.f32 %v7405_v2, %v9965_v4  ;;  %v7434_v52 = vpop.f32.mrf.mxu1  ;;  %5069 = vmatprep.mubr.bf16.mxu0 %v10072_v29  ;;  %7777 = vmatprep.subr.bf16.mxu0 %v8414_v44  ;;  %v8416_v4 = vld [vmem:[%s10550_s1 + $0xc28] sm:$0xff]   ;;  %v8437_v54 = vld [vmem:[%s10550_s1 + $0xc80] sm:$0xff]   ;;  %v8438_v2 = vld [vmem:[%s10550_s1 + $0xd78] sm:$0xff]  }
 0x19c   : > { %7804 = vmatpush3.bf16.msra.mxu1 %v8413_v23  ;;  %v7407_v14 = vpop.f32.mrf.mxu0 }
 0x19d   : > { %v10086_v40 = vadd.f32 %v7433_v37, %v3636_v32  ;;  %v7408_v50 = vadd.f32 %v7407_v14, %v7406_v27  ;;  %v7435_v53 = vpop.f32.mrf.mxu1  ;;  %5070 = vmatmul.mubr.bf16.gmra.mxu0 %v10074_v43  ;;  %7805 = vmatprep.subr.bf16.mxu1 %v8415_v46  ;;  %v8440_v37 = vld [vmem:[%s10550_s1 + $0xd38] sm:$0xff]   ;;  %v8442_v14 = vld [vmem:[%s10550_s1 + $0xd70] sm:$0xff]  }
 0x19e   : > { %v7436_v39 = vadd.f32 %v7435_v53, %v7434_v52  ;;  %6011 = vmatprep.mubr.bf16.mxu0 %v9731_v57  ;;  %7778 = vmatpush3.bf16.msra.mxu0 %v8416_v4  ;;  %v8420_v57 = vld [vmem:[%s10550_s1 + $0xc20] sm:$0xff]   ;;  %v8444_v4 = vld [vmem:[%s10550_s1 + $0xd30] sm:$0xff]  }
 0x19f   : > { %v3639_v17 = vadd.f32 %v7408_v50, %v9987_v16  ;;  %5119 = vmatmul.mubr.bf16.gmra.mxu1 %v10094_v56  ;;  %7779 = vmatprep.subr.bf16.mxu0 %v8418_v21  ;;  %v8421_v16 = vld [vmem:[%s10550_s1 + $0xca0] sm:$0xff]  }
 0x1a0   : > { %7806 = vmatpush3.bf16.msra.mxu1 %v8417_v63  ;;  %6060 = vmatprep.mubr.bf16.mxu1 %v9736_v36  ;;  %v8425_v36 = vld [vmem:[%s10550_s1 + $0xc98] sm:$0xff]  }
 0x1a1   : > { %v10108_v35 = vadd.f32 %v7436_v39, %v3639_v17  ;;  %7807 = vmatprep.subr.bf16.mxu1 %v8419_v31  ;;  %v8446_v31 = vld [vmem:[%s10550_s1 + $0xd68] sm:$0xff]  }
 0x1a2   : > { %7780 = vmatpush3.bf16.msra.mxu0 %v8420_v57 }
 0x1a3   : > { %7781 = vmatprep.subr.bf16.mxu0 %v8422_v26  ;;  %v8447_v26 = vld [vmem:[%s10550_s1 + $0xde8] sm:$0xff]  }
 0x1a4   : > { %7808 = vmatpush3.bf16.msra.mxu1 %v8421_v16 }
 0x1a5   : > { %7809 = vmatprep.subr.bf16.mxu1 %v8423_v45 }
 0x1a6   : > { %7782 = vmatpush3.bf16.msra.mxu0 %v8424_v38  ;;  %v8448_v38 = vld [vmem:[%s10550_s1 + $0xd28] sm:$0xff]  }
 0x1a7   : > { %7783 = vmatprep.subr.bf16.mxu0 %v8426_v22 }
 0x1a8   : > { %7810 = vmatpush3.bf16.msra.mxu1 %v8425_v36 }
 0x1a9   : > { %7811 = vmatprep.subr.bf16.mxu1 %v8427_v49 }
 0x1aa   : > { %7784 = vmatpush3.bf16.msra.mxu0 %v8428_v34 }
 0x1ab   : > { %7785 = vmatprep.subr.bf16.mxu0 %v8430_v28 }
 0x1ac   : > { %7812 = vmatpush3.bf16.msra.mxu1 %v8429_v6  ;;  %v8450_v6 = vld [vmem:[%s10550_s1 + $0xd60] sm:$0xff]  }
 0x1ad   : > { %7813 = vmatprep.subr.bf16.mxu1 %v8431_v60  ;;  %v8451_v60 = vld [vmem:[%s10550_s1 + $0xde0] sm:$0xff]  }
 0x1ae   : > { %v7453_v42 = vpop.f32.mrf.mxu0  ;;  %7786 = vmatpush3.bf16.msra.mxu0 %v8432_v30  ;;  %v8452_v30 = vld [vmem:[%s10550_s1 + $0xd20] sm:$0xff]  }
 0x1af   : > { %v7481_v58 = vpop.f32.mrf.mxu1  ;;  %7787 = vmatprep.subr.bf16.mxu0 %v8434_v3  ;;  %v8455_v3 = vld [vmem:[%s10550_s1 + $0xdd8] sm:$0xff]  }
 0x1b0   : > { %7814 = vmatpush3.bf16.msra.mxu1 %v8433_v1  ;;  %v7454_v47 = vpop.f32.mrf.mxu0 }
 0x1b1   : > { %v7455_v11 = vadd.f32 %v7454_v47, %v7453_v42  ;;  %v7482_v13 = vpop.f32.mrf.mxu1  ;;  %7815 = vmatprep.subr.bf16.mxu1 %v8435_v9  ;;  %v8454_v42 = vld [vmem:[%s10550_s1 + $0xd58] sm:$0xff]   ;;  %v287_v47 = vld [vmem:[%s8696_s6 + $0x200] sm:$0xff] }
 0x1b2   : > { %v7483_v18 = vadd.f32 %v7482_v13, %v7481_v58  ;;  %v7456_v23 = vpop.f32.mrf.mxu0  ;;  %7788 = vmatpush3.bf16.msra.mxu0 %v8436_v12  ;;  %v8456_v58 = vld [vmem:[%s10550_s1 + $0xd18] sm:$0xff]   ;;  %v295_v12 = vld [vmem:[%s8696_s6 + $0x240] sm:$0xff]  ;;  %v288_v13 = vld [vmem:[%s8696_s6 + $0x208] sm:$0xff] }
 0x1b3   : > { %v3726_v25 = vadd.f32 %v7455_v11, %v10052_v19  ;;  %v7484_v5 = vpop.f32.mrf.mxu1  ;;  %7829 = vmatprep.subr.bf16.mxu0 %v8438_v2  ;;  %v8441_v19 = vld [vmem:[%s10550_s1 + $0xdb8] sm:$0xff]   ;;  %v6954_v11 = vcombine.high %v287_v47, %v295_v12 }
 0x1b4   : > { %7816 = vmatpush3.bf16.msra.mxu1 %v8437_v54  ;;  %v7457_v27 = vpop.f32.mrf.mxu0  ;;  %v8457_v9 = vld [vmem:[%s10550_s1 + $0xd98] sm:$0xff]   ;;  %v296_v54 = vld [vmem:[%s8696_s6 + $0x248] sm:$0xff] }
 0x1b5   : > { %v10176_v44 = vadd.f32 %v7483_v18, %v3726_v25  ;;  %v7458_v32 = vadd.f32 %v7457_v27, %v7456_v23  ;;  %v7485_v52 = vpop.f32.mrf.mxu1  ;;  %6012 = vmatmul.mubr.bf16.vlgmr.msra.gmra.mxu0 %v9734_v59  ;;  %7857 = vmatprep.subr.bf16.mxu1 %v8439_v7  ;;  %v8443_v59 = vld [vmem:[%s10550_s1 + $0xdf0] sm:$0xff]   ;;  %v6953_v18 = vcombine.low %v287_v47, %v295_v12  ;;  %v8478_v12 = vld [vmem:[%s10550_s1 + $0xe68] sm:$0xff]  }
 0x1b6   : > { %v7486_v46 = vadd.f32 %v7485_v52, %v7484_v5  ;;  %v7459_v51 = vpop.f32.mrf.mxu0  ;;  %7830 = vmatpush3.bf16.msra.mxu0 %v8440_v37  ;;  %v6956_v23 = vcombine.high %v288_v13, %v296_v54  ;;  %v6955_v2 = vcombine.low %v288_v13, %v296_v54  ;;  %v8458_v25 = vld [vmem:[%s10550_s1 + $0xd50] sm:$0xff]   ;;  %6019 = vmatprep.mubr.bf16.mxu0 %v6954_v11  ;;  %v8462_v37 = vld [vmem:[%s10550_s1 + $0xd48] sm:$0xff]  }
 0x1b7   : > { %6061 = vmatmul.mubr.bf16.vlgmr.msra.gmra.mxu1 %v9738_v0  ;;  %v3729_v15 = vadd.f32 %v7458_v32, %v10068_v24  ;;  %v7487_v50 = vpop.f32.mrf.mxu1  ;;  %7831 = vmatprep.subr.bf16.mxu0 %v8442_v14  ;;  %v8445_v24 = vld [vmem:[%s10550_s1 + $0xdb0] sm:$0xff]   ;;  %v8463_v32 = vld [vmem:[%s10550_s1 + $0xdc8] sm:$0xff]  }
 0x1b8   : > { %7858 = vmatpush3.bf16.msra.mxu1 %v8441_v19  ;;  %v7460_v53 = vpop.f32.mrf.mxu0  ;;  %v8459_v5 = vld [vmem:[%s10550_s1 + $0xdd0] sm:$0xff]   ;;  %6068 = vmatprep.mubr.bf16.mxu1 %v6956_v23  ;;  %v8464_v52 = vld [vmem:[%s10550_s1 + $0xd08] sm:$0xff]   ;;  %v298_v23 = vld [vmem:[%s8696_s6 + $0x258] sm:$0xff] }
 0x1b9   : > { %v10193_v0 = vadd.f32 %v7486_v46, %v3729_v15  ;;  %v7461_v39 = vadd.f32 %v7460_v53, %v7459_v51  ;;  %v7488_v63 = vpop.f32.mrf.mxu1  ;;  %7859 = vmatprep.subr.bf16.mxu1 %v8443_v59  ;;  %v8460_v7 = vld [vmem:[%s10550_s1 + $0xd10] sm:$0xff]   ;;  %v8465_v19 = vld [vmem:[%s10550_s1 + $0xd88] sm:$0xff]   ;;  %v8466_v46 = vld [vmem:[%s10550_s1 + $0xd40] sm:$0xff]  }
 0x1ba   : > { %v7462_v17 = vpop.f32.mrf.mxu0  ;;  %v7489_v21 = vadd.f32 %v7488_v63, %v7487_v50  ;;  %7832 = vmatpush3.bf16.msra.mxu0 %v8444_v4  ;;  %v8461_v27 = vld [vmem:[%s10550_s1 + $0xd90] sm:$0xff]   ;;  %v8469_v59 = vld [vmem:[%s10550_s1 + $0xd80] sm:$0xff]   ;;  %v8479_v54 = vld [vmem:[%s10550_s1 + $0xee8] sm:$0xff]  }
 0x1bb   : > { %v3734_v57 = vadd.f32 %v7461_v39, %v10086_v40  ;;  %v7490_v16 = vpop.f32.mrf.mxu1  ;;  %7833 = vmatprep.subr.bf16.mxu0 %v8446_v31  ;;  %v8449_v40 = vld [vmem:[%s10550_s1 + $0xda8] sm:$0xff]   ;;  %v8470_v39 = vld [vmem:[%s10550_s1 + $0xe78] sm:$0xff]  }
 0x1bc   : > { %7860 = vmatpush3.bf16.msra.mxu1 %v8445_v24  ;;  %v7463_v45 = vpop.f32.mrf.mxu0  ;;  %v8472_v31 = vld [vmem:[%s10550_s1 + $0xe38] sm:$0xff]  }
 0x1bd   : > { %v10208_v36 = vadd.f32 %v7489_v21, %v3734_v57  ;;  %v7464_v22 = vadd.f32 %v7463_v45, %v7462_v17  ;;  %v7491_v49 = vpop.f32.mrf.mxu1  ;;  %7861 = vmatprep.subr.bf16.mxu1 %v8447_v26  ;;  %6020 = vmatmul.mubr.bf16.gmra.mxu0 %v6953_v18  ;;  %v8471_v17 = vld [vmem:[%s10550_s1 + $0xef8] sm:$0xff]  }
 0x1be   : > { %v7492_v34 = vadd.f32 %v7491_v49, %v7490_v16  ;;  %7834 = vmatpush3.bf16.msra.mxu0 %v8448_v38  ;;  %6109 = vmatprep.mubr.bf16.mxu0 %v9816_v41  ;;  %v8467_v41 = vld [vmem:[%s10550_s1 + $0xdc0] sm:$0xff]   ;;  %v8473_v26 = vld [vmem:[%s10550_s1 + $0xeb8] sm:$0xff]  }
 0x1bf   : > { %v3737_v28 = vadd.f32 %v7464_v22, %v10108_v35  ;;  %7835 = vmatprep.subr.bf16.mxu0 %v8450_v6  ;;  %v8453_v35 = vld [vmem:[%s10550_s1 + $0xda0] sm:$0xff]   ;;  %6069 = vmatmul.mubr.bf16.gmra.mxu1 %v6955_v2  ;;  %v290_v18 = vld [vmem:[%s8696_s6 + $0x218] sm:$0xff] }
 0x1c0   : > { %7862 = vmatpush3.bf16.msra.mxu1 %v8449_v40  ;;  %6158 = vmatprep.mubr.bf16.mxu1 %v9831_v20  ;;  %v8468_v20 = vld [vmem:[%s10550_s1 + $0xd00] sm:$0xff]  }
 0x1c1   : > { %v10223_v1 = vadd.f32 %v7492_v34, %v3737_v28  ;;  %7863 = vmatprep.subr.bf16.mxu1 %v8451_v60  ;;  %v8477_v28 = vld [vmem:[%s10550_s1 + $0xeb0] sm:$0xff]  }
 0x1c2   : > { %7836 = vmatpush3.bf16.msra.mxu0 %v8452_v30  ;;  %v289_v30 = vld [vmem:[%s8696_s6 + $0x210] sm:$0xff] }
 0x1c3   : > { %7837 = vmatprep.subr.bf16.mxu0 %v8454_v42 }
 0x1c4   : > { %7864 = vmatpush3.bf16.msra.mxu1 %v8453_v35 }
 0x1c5   : > { %7865 = vmatprep.subr.bf16.mxu1 %v8455_v3 }
 0x1c6   : > { %7838 = vmatpush3.bf16.msra.mxu0 %v8456_v58 }
 0x1c7   : > { %7839 = vmatprep.subr.bf16.mxu0 %v8458_v25  ;;  %v6960_v25 = vcombine.high %v290_v18, %v298_v23 }
 0x1c8   : > { %7866 = vmatpush3.bf16.msra.mxu1 %v8457_v9 }
 0x1c9   : > { %7867 = vmatprep.subr.bf16.mxu1 %v8459_v5  ;;  %v8480_v5 = vld [vmem:[%s10550_s1 + $0xe28] sm:$0xff]  }
 0x1ca   : > { %7840 = vmatpush3.bf16.msra.mxu0 %v8460_v7  ;;  %v6959_v7 = vcombine.low %v290_v18, %v298_v23  ;;  %v8510_v23 = vld [vmem:[%s10550_s1 + $0xf68] sm:$0xff]  }
 0x1cb   : > { %7841 = vmatprep.subr.bf16.mxu0 %v8462_v37 }
 0x1cc   : > { %7868 = vmatpush3.bf16.msra.mxu1 %v8461_v27 }
 0x1cd   : > { %7869 = vmatprep.subr.bf16.mxu1 %v8463_v32 }
 0x1ce   : > { %7842 = vmatpush3.bf16.msra.mxu0 %v8464_v52  ;;  %v7509_v51 = vpop.f32.mrf.mxu0 }
 0x1cf   : > { %7843 = vmatprep.subr.bf16.mxu0 %v8466_v46  ;;  %v8483_v46 = vld [vmem:[%s10550_s1 + $0xee0] sm:$0xff]  }
 0x1d0   : > { %7870 = vmatpush3.bf16.msra.mxu1 %v8465_v19  ;;  %v7510_v15 = vpop.f32.mrf.mxu0  ;;  %v8482_v19 = vld [vmem:[%s10550_s1 + $0xe60] sm:$0xff]  }
 0x1d1   : > { %7871 = vmatprep.subr.bf16.mxu1 %v8467_v41  ;;  %v7511_v53 = vadd.f32 %v7510_v15, %v7509_v51  ;;  %v8485_v41 = vld [vmem:[%s10550_s1 + $0xea0] sm:$0xff]   ;;  %v8488_v15 = vld [vmem:[%s10550_s1 + $0xe18] sm:$0xff]  }
 0x1d2   : > { %7844 = vmatpush3.bf16.msra.mxu0 %v8468_v20  ;;  %v7512_v63 = vpop.f32.mrf.mxu0 }
 0x1d3   : > { %v3824_v21 = vadd.f32 %v7511_v53, %v10176_v44  ;;  %7885 = vmatprep.subr.bf16.mxu0 %v8470_v39  ;;  %v8474_v44 = vld [vmem:[%s10550_s1 + $0xe70] sm:$0xff]   ;;  %v8494_v39 = vld [vmem:[%s10550_s1 + $0xe48] sm:$0xff]  }
 0x1d4   : > { %7872 = vmatpush3.bf16.msra.mxu1 %v8469_v59  ;;  %v7513_v57 = vpop.f32.mrf.mxu0  ;;  %v8491_v59 = vld [vmem:[%s10550_s1 + $0xed0] sm:$0xff]  }
 0x1d5   : > { %6110 = vmatmul.mubr.bf16.vlgmr.msra.gmra.mxu0 %v9818_v48  ;;  %7913 = vmatprep.subr.bf16.mxu1 %v8471_v17  ;;  %v7514_v38 = vadd.f32 %v7513_v57, %v7512_v63  ;;  %v8475_v48 = vld [vmem:[%s10550_s1 + $0xef0] sm:$0xff]   ;;  %v8495_v63 = vld [vmem:[%s10550_s1 + $0xec8] sm:$0xff]  }
 0x1d6   : > { %7886 = vmatpush3.bf16.msra.mxu0 %v8472_v31  ;;  %v7515_v49 = vpop.f32.mrf.mxu0  ;;  %v8492_v53 = vld [vmem:[%s10550_s1 + $0xe10] sm:$0xff]   ;;  %v8497_v17 = vld [vmem:[%s10550_s1 + $0xe88] sm:$0xff]  }
 0x1d7   : > { %v7537_v14 = vpop.f32.mrf.mxu1  ;;  %6159 = vmatmul.mubr.bf16.vlgmr.msra.gmra.mxu1 %v9836_v10  ;;  %v3827_v40 = vadd.f32 %v7514_v38, %v10193_v0  ;;  %7887 = vmatprep.subr.bf16.mxu0 %v8474_v44  ;;  %v8476_v10 = vld [vmem:[%s10550_s1 + $0xe30] sm:$0xff]   ;;  %v8501_v44 = vld [vmem:[%s10550_s1 + $0xe80] sm:$0xff]  }
 0x1d8   : > { %7914 = vmatpush3.bf16.msra.mxu1 %v8473_v26  ;;  %v7516_v6 = vpop.f32.mrf.mxu0  ;;  %v297_v0 = vld [vmem:[%s8696_s6 + $0x250] sm:$0xff]  ;;  %6166 = vmatprep.mubr.bf16.mxu1 %v6960_v25  ;;  %v8500_v26 = vld [vmem:[%s10550_s1 + $0xe00] sm:$0xff]   ;;  %v292_v25 = vld [vmem:[%s8696_s6 + $0x228] sm:$0xff] }
 0x1d9   : > { %v7538_v50 = vpop.f32.mrf.mxu1  ;;  %7915 = vmatprep.subr.bf16.mxu1 %v8475_v48  ;;  %v7517_v35 = vadd.f32 %v7516_v6, %v7515_v49  ;;  %v6958_v9 = vcombine.high %v289_v30, %v297_v0  ;;  %v6957_v47 = vcombine.low %v289_v30, %v297_v0  ;;  %v8503_v6 = vld [vmem:[%s10550_s1 + $0xff8] sm:$0xff]  }
 0x1da   : > { %v7539_v4 = vadd.f32 %v7538_v50, %v7537_v14  ;;  %7888 = vmatpush3.bf16.msra.mxu0 %v8476_v10  ;;  %v7518_v3 = vpop.f32.mrf.mxu0  ;;  %v8484_v14 = vld [vmem:[%s10550_s1 + $0xe20] sm:$0xff]   ;;  %v8490_v50 = vld [vmem:[%s10550_s1 + $0xe50] sm:$0xff]   ;;  %v8504_v30 = vld [vmem:[%s10550_s1 + $0xf38] sm:$0xff]  }
 0x1db   : > { %v7540_v24 = vpop.f32.mrf.mxu1  ;;  %v3832_v11 = vadd.f32 %v7517_v35, %v10208_v36  ;;  %6117 = vmatprep.mubr.bf16.mxu0 %v6958_v9  ;;  %7889 = vmatprep.subr.bf16.mxu0 %v8478_v12  ;;  %v8481_v36 = vld [vmem:[%s10550_s1 + $0xea8] sm:$0xff]   ;;  %v8505_v0 = vld [vmem:[%s10550_s1 + $0xfb8] sm:$0xff]   ;;  %v8506_v9 = vld [vmem:[%s10550_s1 + $0xf70] sm:$0xff]  }
 0x1dc   : > { %v10296_v45 = vadd.f32 %v7539_v4, %v3824_v21  ;;  %7916 = vmatpush3.bf16.msra.mxu1 %v8477_v28  ;;  %v7519_v2 = vpop.f32.mrf.mxu0  ;;  %v8493_v4 = vld [vmem:[%s10550_s1 + $0xe90] sm:$0xff]   ;;  %v8498_v21 = vld [vmem:[%s10550_s1 + $0xe40] sm:$0xff]  }
 0x1dd   : > { %v7541_v16 = vpop.f32.mrf.mxu1  ;;  %6118 = vmatmul.mubr.bf16.gmra.mxu0 %v6957_v47  ;;  %7917 = vmatprep.subr.bf16.mxu1 %v8479_v54  ;;  %v7520_v32 = vadd.f32 %v7519_v2, %v7518_v3  ;;  %v8508_v12 = vld [vmem:[%s10550_s1 + $0xf30] sm:$0xff]   ;;  %v8511_v2 = vld [vmem:[%s10550_s1 + $0xfe8] sm:$0xff]  }
 0x1de   : > { %v7542_v22 = vadd.f32 %v7541_v16, %v7540_v24  ;;  %7890 = vmatpush3.bf16.msra.mxu0 %v8480_v5  ;;  %6207 = vmatprep.mubr.bf16.mxu0 %v9944_v33  ;;  %v8486_v33 = vld [vmem:[%s10550_s1 + $0xe58] sm:$0xff]   ;;  %v8496_v24 = vld [vmem:[%s10550_s1 + $0xe08] sm:$0xff]   ;;  %v8499_v16 = vld [vmem:[%s10550_s1 + $0xec0] sm:$0xff]  }
 0x1df   : > { %v7543_v34 = vpop.f32.mrf.mxu1  ;;  %v3835_v51 = vadd.f32 %v7520_v32, %v10223_v1  ;;  %6167 = vmatmul.mubr.bf16.gmra.mxu1 %v6959_v7  ;;  %7891 = vmatprep.subr.bf16.mxu0 %v8482_v19  ;;  %v8487_v1 = vld [vmem:[%s10550_s1 + $0xed8] sm:$0xff]   ;;  %v300_v5 = vld [vmem:[%s8696_s6 + $0x268] sm:$0xff]  ;;  %v8515_v19 = vld [vmem:[%s10550_s1 + $0xfe0] sm:$0xff]  }
 0x1e0   : > { %v10312_v60 = vadd.f32 %v7542_v22, %v3827_v40  ;;  %7918 = vmatpush3.bf16.msra.mxu1 %v8481_v36  ;;  %6256 = vmatprep.mubr.bf16.mxu1 %v9958_v61  ;;  %v8489_v61 = vld [vmem:[%s10550_s1 + $0xe98] sm:$0xff]   ;;  %v6963_v7 = vcombine.low %v292_v25, %v300_v5  ;;  %v8512_v36 = vld [vmem:[%s10550_s1 + $0xf28] sm:$0xff]  }
 0x1e1   : > { %v7544_v42 = vpop.f32.mrf.mxu1  ;;  %7919 = vmatprep.subr.bf16.mxu1 %v8483_v46  ;;  %v8502_v40 = vld [vmem:[%s10550_s1 + $0xf78] sm:$0xff]   ;;  %v8513_v32 = vld [vmem:[%s10550_s1 + $0xfa8] sm:$0xff]   ;;  %v8516_v46 = vld [vmem:[%s10550_s1 + $0xf20] sm:$0xff]  }
 0x1e2   : > { %v7545_v58 = vadd.f32 %v7544_v42, %v7543_v34  ;;  %7892 = vmatpush3.bf16.msra.mxu0 %v8484_v14 }
 0x1e3   : > { %v7546_v13 = vpop.f32.mrf.mxu1  ;;  %7893 = vmatprep.subr.bf16.mxu0 %v8486_v33 }
 0x1e4   : > { %v10328_v27 = vadd.f32 %v7545_v58, %v3832_v11  ;;  %7920 = vmatpush3.bf16.msra.mxu1 %v8485_v41  ;;  %v291_v11 = vld [vmem:[%s8696_s6 + $0x220] sm:$0xff]  ;;  %v8518_v41 = vld [vmem:[%s10550_s1 + $0xf58] sm:$0xff]  }
 0x1e5   : > { %v7547_v37 = vpop.f32.mrf.mxu1  ;;  %7921 = vmatprep.subr.bf16.mxu1 %v8487_v1  ;;  %v8519_v1 = vld [vmem:[%s10550_s1 + $0xfd8] sm:$0xff]  }
 0x1e6   : > { %v7548_v52 = vadd.f32 %v7547_v37, %v7546_v13  ;;  %7894 = vmatpush3.bf16.msra.mxu0 %v8488_v15  ;;  %v299_v13 = vld [vmem:[%s8696_s6 + $0x260] sm:$0xff]  ;;  %v6964_v37 = vcombine.high %v292_v25, %v300_v5 }
 0x1e7   : > { %7895 = vmatprep.subr.bf16.mxu0 %v8490_v50  ;;  %v6961_v54 = vcombine.low %v291_v11, %v299_v13  ;;  %v6962_v18 = vcombine.high %v291_v11, %v299_v13  ;;  %v8520_v50 = vld [vmem:[%s10550_s1 + $0xf18] sm:$0xff]  }
 0x1e8   : > { %v10347_v20 = vadd.f32 %v7548_v52, %v3835_v51  ;;  %7922 = vmatpush3.bf16.msra.mxu1 %v8489_v61  ;;  %v8514_v52 = vld [vmem:[%s10550_s1 + $0xf60] sm:$0xff]  }
 0x1e9   : > { %7923 = vmatprep.subr.bf16.mxu1 %v8491_v59 }
 0x1ea   : > { %7896 = vmatpush3.bf16.msra.mxu0 %v8492_v53  ;;  %v8521_v53 = vld [vmem:[%s10550_s1 + $0xf98] sm:$0xff]  }
 0x1eb   : > { %7897 = vmatprep.subr.bf16.mxu0 %v8494_v39  ;;  %v8522_v39 = vld [vmem:[%s10550_s1 + $0xf50] sm:$0xff]  }
 0x1ec   : > { %7924 = vmatpush3.bf16.msra.mxu1 %v8493_v4 }
 0x1ed   : > { %7925 = vmatprep.subr.bf16.mxu1 %v8495_v63 }
 0x1ee   : > { %7898 = vmatpush3.bf16.msra.mxu0 %v8496_v24 }
 0x1ef   : > { %7899 = vmatprep.subr.bf16.mxu0 %v8498_v21 }
 0x1f0   : > { %7926 = vmatpush3.bf16.msra.mxu1 %v8497_v17  ;;  %v8523_v17 = vld [vmem:[%s10550_s1 + $0xfd0] sm:$0xff]  }
 0x1f1   : > { %7927 = vmatprep.subr.bf16.mxu1 %v8499_v16 }
 0x1f2   : > { %7900 = vmatpush3.bf16.msra.mxu0 %v8500_v26  ;;  %v8525_v26 = vld [vmem:[%s10550_s1 + $0xf90] sm:$0xff]  }
 0x1f3   : > { %7941 = vmatprep.subr.bf16.mxu0 %v8502_v40 }
 0x1f4   : > { %7928 = vmatpush3.bf16.msra.mxu1 %v8501_v44  ;;  %v8527_v44 = vld [vmem:[%s10550_s1 + $0xfc8] sm:$0xff]  }
 0x1f5   : > { %v7565_v31 = vpop.f32.mrf.mxu0  ;;  %6208 = vmatmul.mubr.bf16.vlgmr.msra.gmra.mxu0 %v9946_v8  ;;  %7969 = vmatprep.subr.bf16.mxu1 %v8503_v6  ;;  %v8507_v8 = vld [vmem:[%s10550_s1 + $0xff0] sm:$0xff]   ;;  %v8531_v6 = vld [vmem:[%s10550_s1 + $0xfc0] sm:$0xff]  }
 0x1f6   : > { %7942 = vmatpush3.bf16.msra.mxu0 %v8504_v30  ;;  %6215 = vmatprep.mubr.bf16.mxu0 %v6962_v18  ;;  %v302_v18 = vld [vmem:[%s8696_s6 + $0x278] sm:$0xff] }
 0x1f7   : > { %v7593_v57 = vpop.f32.mrf.mxu1  ;;  %v7566_v38 = vpop.f32.mrf.mxu0  ;;  %6257 = vmatmul.mubr.bf16.vlgmr.msra.gmra.mxu1 %v9963_v62  ;;  %7943 = vmatprep.subr.bf16.mxu0 %v8506_v9  ;;  %v8509_v62 = vld [vmem:[%s10550_s1 + $0xfb0] sm:$0xff]  }
 0x1f8   : > { %v7567_v49 = vadd.f32 %v7566_v38, %v7565_v31  ;;  %7970 = vmatpush3.bf16.msra.mxu1 %v8505_v0  ;;  %6264 = vmatprep.mubr.bf16.mxu1 %v6964_v37  ;;  %v8526_v38 = vld [vmem:[%s10550_s1 + $0xf48] sm:$0xff]  }
 0x1f9   : > { %v7594_v22 = vpop.f32.mrf.mxu1  ;;  %v7568_v34 = vpop.f32.mrf.mxu0  ;;  %7971 = vmatprep.subr.bf16.mxu1 %v8507_v8  ;;  %v293_v8 = vld [vmem:[%s8696_s6 + $0x230] sm:$0xff] }
 0x1fa   : > { %v7595_v48 = vadd.f32 %v7594_v22, %v7593_v57  ;;  %7944 = vmatpush3.bf16.msra.mxu0 %v8508_v12  ;;  %v8524_v57 = vld [vmem:[%s10550_s1 + $0xf10] sm:$0xff]  }
 0x1fb   : > { %v7596_v10 = vpop.f32.mrf.mxu1  ;;  %v7569_v35 = vpop.f32.mrf.mxu0  ;;  %7945 = vmatprep.subr.bf16.mxu0 %v8510_v23  ;;  %v301_v12 = vld [vmem:[%s8696_s6 + $0x270] sm:$0xff] }
 0x1fc   : > { %v10404_v28 = vadd.f32 %v7595_v48, %v7567_v49  ;;  %v7570_v3 = vadd.f32 %v7569_v35, %v7568_v34  ;;  %7972 = vmatpush3.bf16.msra.mxu1 %v8509_v62  ;;  %v8528_v49 = vld [vmem:[%s10550_s1 + $0xf08] sm:$0xff]   ;;  %v8530_v34 = vld [vmem:[%s10550_s1 + $0xf40] sm:$0xff]   ;;  %v6966_v13 = vcombine.high %v293_v8, %v301_v12 }
 0x1fd   : > { %v7597_v42 = vpop.f32.mrf.mxu1  ;;  %6216 = vmatmul.mubr.bf16.gmra.mxu0 %v6961_v54  ;;  %7973 = vmatprep.subr.bf16.mxu1 %v8511_v2  ;;  %v7571_v51 = vpop.f32.mrf.mxu0  ;;  %v8529_v48 = vld [vmem:[%s10550_s1 + $0xf88] sm:$0xff]   ;;  %v8532_v35 = vld [vmem:[%s10550_s1 + $0xf00] sm:$0xff]   ;;  %v294_v54 = vld [vmem:[%s8696_s6 + $0x238] sm:$0xff]  ;;  %s7100_s6 = sshll.u32 %s10560_s12, 5 }
 0x1fe   : > { %v7598_v58 = vadd.f32 %v7597_v42, %v7596_v10  ;;  %6305 = vmatprep.mubr.bf16.mxu0 %v10072_v29  ;;  %7946 = vmatpush3.bf16.msra.mxu0 %v8512_v36  ;;  %v8517_v29 = vld [vmem:[%s10550_s1 + $0xfa0] sm:$0xff]   ;;  %v6968_v2 = vcombine.high %v294_v54, %v302_v18  ;;  %s221_s12 = scalar_lea.vmem %s10552_s3, %s7100_s6 }
 0x1ff   : > { %6265 = vmatmul.mubr.bf16.gmra.mxu1 %v6963_v7  ;;  %7947 = vmatprep.subr.bf16.mxu0 %v8514_v52  ;;  %v7599_v14 = vpop.f32.mrf.mxu1  ;;  %v7572_v33 = vpop.f32.mrf.mxu0 }
 0x200   : > { %v10420_v47 = vadd.f32 %v7598_v58, %v7570_v3  ;;  %7974 = vmatpush3.bf16.msra.mxu1 %v8513_v32  ;;  %6354 = vmatprep.mubr.bf16.mxu1 %v10089_v55  ;;  %v7573_v15 = vadd.f32 %v7572_v33, %v7571_v51  ;;  %v8533_v3 = vld [vmem:[%s10550_s1 + $0xf80] sm:$0xff]  }
 0x201   : > { %7975 = vmatprep.subr.bf16.mxu1 %v8515_v19  ;;  %v7600_v61 = vpop.f32.mrf.mxu1  ;;  %v7574_v55 = vpop.f32.mrf.mxu0 }
 0x202   : > { %7948 = vmatpush3.bf16.msra.mxu0 %v8516_v46  ;;  %v7601_v59 = vadd.f32 %v7600_v61, %v7599_v14  ;;  %v6965_v46 = vcombine.low %v293_v8, %v301_v12  ;;  %v6967_v14 = vcombine.low %v294_v54, %v302_v18 }
 0x203   : > { %7949 = vmatprep.subr.bf16.mxu0 %v8518_v41  ;;  %v7602_v4 = vpop.f32.mrf.mxu1  ;;  %v7575_v24 = vpop.f32.mrf.mxu0 }
 0x204   : > { %7976 = vmatpush3.bf16.msra.mxu1 %v8517_v29  ;;  %v10473_v63 = vadd.f32 %v7601_v59, %v7573_v15  ;;  %v7576_v21 = vadd.f32 %v7575_v24, %v7574_v55 }
 0x205   : > { %7977 = vmatprep.subr.bf16.mxu1 %v8519_v1  ;;  %v7603_v31 = vpop.f32.mrf.mxu1 }
 0x206   : > { %7950 = vmatpush3.bf16.msra.mxu0 %v8520_v50  ;;  %v7604_v16 = vadd.f32 %v7603_v31, %v7602_v4 }
 0x207   : > { %7951 = vmatprep.subr.bf16.mxu0 %v8522_v39 }
 0x208   : > { %7978 = vmatpush3.bf16.msra.mxu1 %v8521_v53  ;;  %v4830_v22 = vadd.f32 %v7604_v16, %v7576_v21 }
 0x209   : > { %7979 = vmatprep.subr.bf16.mxu1 %v8523_v17 }
 0x20a   : > { %7952 = vmatpush3.bf16.msra.mxu0 %v8524_v57 }
 0x20b   : > { %7953 = vmatprep.subr.bf16.mxu0 %v8526_v38 }
 0x20c   : > { %7980 = vmatpush3.bf16.msra.mxu1 %v8525_v26 }
 0x20d   : > { %7981 = vmatprep.subr.bf16.mxu1 %v8527_v44 }
 0x20e   : > { %7954 = vmatpush3.bf16.msra.mxu0 %v8528_v49 }
 0x20f   : > { %7955 = vmatprep.subr.bf16.mxu0 %v8530_v34 }
 0x210   : > { %7982 = vmatpush3.bf16.msra.mxu1 %v8529_v48 }
 0x211   : > { %7983 = vmatprep.subr.bf16.mxu1 %v8531_v6 }
 0x212   : > { %7956 = vmatpush3.bf16.msra.mxu0 %v8532_v35 }
 0x214   : > { %7984 = vmatpush3.bf16.msra.mxu1 %v8533_v3 }
 0x215   : > { %v7621_v40 = vpop.f32.mrf.mxu0  ;;  %6306 = vmatmul.mubr.bf16.vlgmr.msra.gmra.mxu0 %v10074_v43 }
 0x216   : > { %6313 = vmatprep.mubr.bf16.mxu0 %v6966_v13 }
 0x217   : > { %v7649_v10 = vpop.f32.mrf.mxu1  ;;  %v7622_v30 = vpop.f32.mrf.mxu0  ;;  %6355 = vmatmul.mubr.bf16.vlgmr.msra.gmra.mxu1 %v10094_v56 }
 0x218   : > { %v7623_v42 = vadd.f32 %v7622_v30, %v7621_v40  ;;  %6362 = vmatprep.mubr.bf16.mxu1 %v6968_v2 }
 0x219   : > { %v7650_v0 = vpop.f32.mrf.mxu1  ;;  %v7624_v9 = vpop.f32.mrf.mxu0 }
 0x21a   : > { %v7651_v58 = vadd.f32 %v7650_v0, %v7649_v10  ;;  %v4868_v62 = vadd.f32 %v7623_v42, %v10404_v28 }
 0x21b   : > { %v7652_v11 = vpop.f32.mrf.mxu1  ;;  %v7625_v23 = vpop.f32.mrf.mxu0 }
 0x21c   : > { %v4917_v25 = vadd.f32 %v7651_v58, %v4868_v62  ;;  %v7626_v5 = vadd.f32 %v7625_v23, %v7624_v9 }
 0x21d   : > { %v7653_v7 = vpop.f32.mrf.mxu1  ;;  %v7627_v36 = vpop.f32.mrf.mxu0  ;;  %6314 = vmatmul.mubr.bf16.gmra.mxu0 %v6965_v46 }
 0x21e   : > { %v7654_v37 = vadd.f32 %v7653_v7, %v7652_v11  ;;  %v4871_v32 = vadd.f32 %v7626_v5, %v10420_v47 }
 0x21f   : > { %v7628_v28 = vpop.f32.mrf.mxu0  ;;  %v7655_v51 = vpop.f32.mrf.mxu1  ;;  %6363 = vmatmul.mubr.bf16.gmra.mxu1 %v6967_v14 }
 0x220   : > { %v4920_v52 = vadd.f32 %v7654_v37, %v4871_v32  ;;  %v7629_v19 = vadd.f32 %v7628_v28, %v7627_v36 }
 0x221   : > { %v7630_v29 = vpop.f32.mrf.mxu0  ;;  %v7656_v33 = vpop.f32.mrf.mxu1 }
 0x222   : > { %v4876_v41 = vadd.f32 %v7629_v19, %v10473_v63  ;;  %v7657_v43 = vadd.f32 %v7656_v33, %v7655_v51 }
 0x223   : > { %v7631_v1 = vpop.f32.mrf.mxu0  ;;  %v7658_v61 = vpop.f32.mrf.mxu1 }
 0x224   : > { %v7632_v15 = vadd.f32 %v7631_v1, %v7630_v29  ;;  %v4925_v56 = vadd.f32 %v7657_v43, %v4876_v41 }
 0x225   : > { %v7659_v50 = vpop.f32.mrf.mxu1 }
 0x226   : > { %v4879_v47 = vadd.f32 %v7632_v15, %v4830_v22  ;;  %v7660_v59 = vadd.f32 %v7659_v50, %v7658_v61 }
 0x228   : > { %v4928_v55 = vadd.f32 %v7660_v59, %v4879_v47 }
 0x235   : > { %v7677_v53 = vpop.f32.mrf.mxu0 }
 0x237   : > { %v7705_v4 = vpop.f32.mrf.mxu1  ;;  %v7678_v39 = vpop.f32.mrf.mxu0 }
 0x238   : > { %v7679_v24 = vadd.f32 %v7678_v39, %v7677_v53 }
 0x239   : > { %v7706_v17 = vpop.f32.mrf.mxu1  ;;  %v7680_v31 = vpop.f32.mrf.mxu0 }
 0x23a   : > { %v7707_v21 = vadd.f32 %v7706_v17, %v7705_v4  ;;  %v4966_v63 = vadd.f32 %v7679_v24, %v4917_v25 }
 0x23b   : > { %v7708_v57 = vpop.f32.mrf.mxu1  ;;  %v7681_v16 = vpop.f32.mrf.mxu0 }
 0x23c   : > { %v5015_v26 = vadd.f32 %v7707_v21, %v4966_v63  ;;  %v7682_v38 = vadd.f32 %v7681_v16, %v7680_v31 }
 0x23d   : > { %v7709_v44 = vpop.f32.mrf.mxu1  ;;  %v7683_v40 = vpop.f32.mrf.mxu0 }
 0x23e   : > { %v7710_v49 = vadd.f32 %v7709_v44, %v7708_v57  ;;  %v4969_v48 = vadd.f32 %v7682_v38, %v4920_v52 }
 0x23f   : > { %v7684_v34 = vpop.f32.mrf.mxu0  ;;  %v7711_v6 = vpop.f32.mrf.mxu1 }
 0x240   : > { %v5018_v22 = vadd.f32 %v7710_v49, %v4969_v48  ;;  %v7685_v10 = vadd.f32 %v7684_v34, %v7683_v40 }
 0x241   : > { %v7686_v30 = vpop.f32.mrf.mxu0  ;;  %v7712_v42 = vpop.f32.mrf.mxu1 }
 0x242   : > { %v4974_v35 = vadd.f32 %v7685_v10, %v4925_v56  ;;  %v7713_v0 = vadd.f32 %v7712_v42, %v7711_v6 }
 0x243   : > { %v7687_v3 = vpop.f32.mrf.mxu0  ;;  %v7714_v9 = vpop.f32.mrf.mxu1 }
 0x244   : > { %v7688_v58 = vadd.f32 %v7687_v3, %v7686_v30  ;;  %v5023_v8 = vadd.f32 %v7713_v0, %v4974_v35 }
 0x245   : > { %v7715_v62 = vpop.f32.mrf.mxu1 }
 0x246   : > { %v4977_v12 = vadd.f32 %v7688_v58, %v4928_v55  ;;  %v7716_v11 = vadd.f32 %v7715_v62, %v7714_v9 }
 0x248   : > { %v5026_v13 = vadd.f32 %v7716_v11, %v4977_v12 }
 0x255   : > { %v7733_v54 = vpop.f32.mrf.mxu0 }
 0x257   : > { %v7761_v18 = vpop.f32.mrf.mxu1  ;;  %v7734_v23 = vpop.f32.mrf.mxu0 }
 0x258   : > { %v7735_v2 = vadd.f32 %v7734_v23, %v7733_v54 }
 0x259   : > { %v7762_v25 = vpop.f32.mrf.mxu1  ;;  %v7736_v7 = vpop.f32.mrf.mxu0 }
 0x25a   : > { %v7763_v5 = vadd.f32 %v7762_v25, %v7761_v18  ;;  %v5064_v37 = vadd.f32 %v7735_v2, %v5015_v26 }
 0x25b   : > { %v7764_v36 = vpop.f32.mrf.mxu1  ;;  %v7737_v32 = vpop.f32.mrf.mxu0 }
 0x25c   : > { %v5113_v28 = vadd.f32 %v7763_v5, %v5064_v37  ;;  %v7738_v52 = vadd.f32 %v7737_v32, %v7736_v7 }
 0x25d   : > { %v7765_v19 = vpop.f32.mrf.mxu1  ;;  %v7739_v14 = vpop.f32.mrf.mxu0 }
 0x25e   : > { %v10518_v46 = vadd.f32 %v5113_v28, %v10296_v45  ;;  %v5067_v51 = vadd.f32 %v7738_v52, %v5018_v22  ;;  %v7766_v29 = vadd.f32 %v7765_v19, %v7764_v36 }
 0x25f   : > { %v7740_v33 = vpop.f32.mrf.mxu0  ;;  %v7767_v15 = vpop.f32.mrf.mxu1 }
 0x260   : > { %v5116_v41 = vadd.f32 %v7766_v29, %v5067_v51  ;;  %v7741_v1 = vadd.f32 %v7740_v33, %v7739_v14 }
 0x261   : > { %v7742_v61 = vpop.f32.mrf.mxu0  ;;  %v7768_v47 = vpop.f32.mrf.mxu1 }
 0x262   : > { %v10521_v43 = vadd.f32 %v5116_v41, %v10312_v60  ;;  %v5072_v56 = vadd.f32 %v7741_v1, %v5023_v8  ;;  %v7769_v59 = vadd.f32 %v7768_v47, %v7767_v15 }
 0x263   : > { %v7743_v50 = vpop.f32.mrf.mxu0  ;;  %v7770_v53 = vpop.f32.mrf.mxu1 }
 0x264   : > { %v7744_v55 = vadd.f32 %v7743_v50, %v7742_v61  ;;  %v5121_v4 = vadd.f32 %v7769_v59, %v5072_v56 }
 0x265   : > { %v7771_v39 = vpop.f32.mrf.mxu1 }
 0x266   : > { %v5075_v45 = vadd.f32 %v7744_v55, %v5026_v13  ;;  %v10524_v24 = vadd.f32 %v5121_v4, %v10328_v27  ;;  %v7772_v17 = vadd.f32 %v7771_v39, %v7770_v53 }
 0x268   : > { %v5124_v21 = vadd.f32 %v7772_v17, %v5075_v45 }
 0x26a   : > { %v10527_v31 = vadd.f32 %v5124_v21, %v10347_v20 }
 0x26c   : > { %10553 = vst [vmem:[#allocation2_spill] sm:$0xff] %v10527_v31 }
 0x275   : > { %v7789_v60 = vpop.f32.mrf.mxu0 }
 0x277   : > { %v7790_v63 = vpop.f32.mrf.mxu0  ;;  %v7817_v57 = vpop.f32.mrf.mxu1 }
 0x278   : > { %v7791_v51 = vadd.f32 %v7790_v63, %v7789_v60 }
 0x279   : > { %v7792_v16 = vpop.f32.mrf.mxu0  ;;  %v7818_v26 = vpop.f32.mrf.mxu1 }
 0x27a   : > { %v7819_v29 = vadd.f32 %v7818_v26, %v7817_v57 }
 0x27b   : > { %v7793_v38 = vpop.f32.mrf.mxu0  ;;  %v7820_v44 = vpop.f32.mrf.mxu1 }
 0x27c   : > { %v6063_v1 = vadd.f32 %v7819_v29, %v7791_v51  ;;  %v7794_v15 = vadd.f32 %v7793_v38, %v7792_v16 }
 0x27d   : > { %v7795_v49 = vpop.f32.mrf.mxu0  ;;  %v7821_v48 = vpop.f32.mrf.mxu1 }
 0x27e   : > { %v7822_v61 = vadd.f32 %v7821_v48, %v7820_v44 }
 0x27f   : > { %v7796_v40 = vpop.f32.mrf.mxu0  ;;  %v7823_v22 = vpop.f32.mrf.mxu1 }
 0x280   : > { %v7797_v55 = vadd.f32 %v7796_v40, %v7795_v49  ;;  %v6066_v45 = vadd.f32 %v7822_v61, %v7794_v15 }
 0x281   : > { %v7798_v34 = vpop.f32.mrf.mxu0  ;;  %v7824_v10 = vpop.f32.mrf.mxu1 }
 0x282   : > { %v7825_v53 = vadd.f32 %v7824_v10, %v7823_v22 }
 0x283   : > { %v7799_v27 = vpop.f32.mrf.mxu0  ;;  %v7826_v6 = vpop.f32.mrf.mxu1 }
 0x284   : > { %v6071_v63 = vadd.f32 %v7825_v53, %v7797_v55  ;;  %v7800_v57 = vadd.f32 %v7799_v27, %v7798_v34 }
 0x285   : > { %v7827_v35 = vpop.f32.mrf.mxu1 }
 0x286   : > { %v7828_v26 = vadd.f32 %v7827_v35, %v7826_v6 }
 0x295   : > { %v7845_v30 = vpop.f32.mrf.mxu0 }
 0x297   : > { %v7846_v42 = vpop.f32.mrf.mxu0  ;;  %v7873_v20 = vpop.f32.mrf.mxu1 }
 0x298   : > { %v7847_v41 = vadd.f32 %v7846_v42, %v7845_v30 }
 0x299   : > { %v7848_v0 = vpop.f32.mrf.mxu0  ;;  %v7874_v3 = vpop.f32.mrf.mxu1 }
 0x29a   : > { %v6112_v47 = vadd.f32 %v7847_v41, %v6063_v1  ;;  %v7875_v50 = vadd.f32 %v7874_v3, %v7873_v20  ;;  %v6074_v3 = vadd.f32 %v7828_v26, %v7800_v57  ;;  %v7097_v41 = vld [vmem:[%s10551_s2] ss:$0 sm:$0xff] }
 0x29b   : > { %v7849_v58 = vpop.f32.mrf.mxu0  ;;  %v7876_v9 = vpop.f32.mrf.mxu1 }
 0x29c   : > { %v7850_v59 = vadd.f32 %v7849_v58, %v7848_v0  ;;  %v6161_v31 = vadd.f32 %v7875_v50, %v6112_v47 }
 0x29d   : > { %v7851_v8 = vpop.f32.mrf.mxu0  ;;  %v7877_v12 = vpop.f32.mrf.mxu1 }
 0x29e   : > { %v6115_v60 = vadd.f32 %v7850_v59, %v6066_v45  ;;  %v7878_v42 = vadd.f32 %v7877_v12, %v7876_v9 }
 0x29f   : > { %v7879_v62 = vpop.f32.mrf.mxu1  ;;  %v7852_v11 = vpop.f32.mrf.mxu0 }
 0x2a0   : > { %v7853_v21 = vadd.f32 %v7852_v11, %v7851_v8  ;;  %v6164_v22 = vadd.f32 %v7878_v42, %v6115_v60 }
 0x2a1   : > { %v7880_v13 = vpop.f32.mrf.mxu1  ;;  %v7854_v54 = vpop.f32.mrf.mxu0 }
 0x2a2   : > { %v6120_v20 = vadd.f32 %v7853_v21, %v6071_v63  ;;  %v7881_v0 = vadd.f32 %v7880_v13, %v7879_v62 }
 0x2a3   : > { %v7882_v18 = vpop.f32.mrf.mxu1  ;;  %v7855_v23 = vpop.f32.mrf.mxu0 }
 0x2a4   : > { %v7856_v49 = vadd.f32 %v7855_v23, %v7854_v54  ;;  %v6169_v6 = vadd.f32 %v7881_v0, %v6120_v20 }
 0x2a5   : > { %v7883_v25 = vpop.f32.mrf.mxu1 }
 0x2a6   : > { %v6123_v35 = vadd.f32 %v7856_v49, %v6074_v3 }
 0x2b5   : > { %v7901_v2 = vpop.f32.mrf.mxu0 }
 0x2b7   : > { %v7929_v5 = vpop.f32.mrf.mxu1  ;;  %v7902_v7 = vpop.f32.mrf.mxu0 }
 0x2b8   : > { %v7903_v39 = vadd.f32 %v7902_v7, %v7901_v2 }
 0x2b9   : > { %v7930_v37 = vpop.f32.mrf.mxu1  ;;  %v7904_v36 = vpop.f32.mrf.mxu0 }
 0x2ba   : > { %v6210_v16 = vadd.f32 %v7903_v39, %v6161_v31  ;;  %v7931_v38 = vadd.f32 %v7930_v37, %v7929_v5  ;;  %v7884_v31 = vadd.f32 %v7883_v25, %v7882_v18 }
 0x2bb   : > { %v7932_v32 = vpop.f32.mrf.mxu1  ;;  %v7905_v28 = vpop.f32.mrf.mxu0 }
 0x2bc   : > { %v7906_v44 = vadd.f32 %v7905_v28, %v7904_v36  ;;  %v6259_v11 = vadd.f32 %v7931_v38, %v6210_v16  ;;  %v6172_v29 = vadd.f32 %v7884_v31, %v6123_v35 }
 0x2bd   : > { %v7933_v52 = vpop.f32.mrf.mxu1  ;;  %v7907_v19 = vpop.f32.mrf.mxu0 }
 0x2be   : > { %v6213_v2 = vadd.f32 %v7906_v44, %v6164_v22  ;;  %v7934_v12 = vadd.f32 %v7933_v52, %v7932_v32  ;;  %v10554_v44 = vld [vmem:[#allocation2_spill] sm:$0xff] }
 0x2bf   : > { %v7935_v14 = vpop.f32.mrf.mxu1  ;;  %v7908_v33 = vpop.f32.mrf.mxu0 }
 0x2c0   : > { %v7909_v58 = vadd.f32 %v7908_v33, %v7907_v19  ;;  %v6262_v36 = vadd.f32 %v7934_v12, %v6213_v2 }
 0x2c1   : > { %v7936_v56 = vpop.f32.mrf.mxu1  ;;  %v7910_v4 = vpop.f32.mrf.mxu0 }
 0x2c2   : > { %v6218_v13 = vadd.f32 %v7909_v58, %v6169_v6  ;;  %v7937_v54 = vadd.f32 %v7936_v56, %v7935_v14 }
 0x2c3   : > { %v7938_v17 = vpop.f32.mrf.mxu1  ;;  %v7911_v30 = vpop.f32.mrf.mxu0 }
 0x2c4   : > { %v7912_v23 = vadd.f32 %v7911_v30, %v7910_v4  ;;  %v6267_v1 = vadd.f32 %v7937_v54, %v6218_v13 }
 0x2c5   : > { %v7939_v48 = vpop.f32.mrf.mxu1 }
 0x2c6   : > { %v6221_v14 = vadd.f32 %v7912_v23, %v6172_v29  ;;  %v7940_v61 = vadd.f32 %v7939_v48, %v7938_v17 }
 0x2c8   : > { %v6270_v21 = vadd.f32 %v7940_v61, %v6221_v14 }
 0x2d5   : > { %v7957_v40 = vpop.f32.mrf.mxu0 }
 0x2d7   : > { %v7985_v10 = vpop.f32.mrf.mxu1  ;;  %v7958_v8 = vpop.f32.mrf.mxu0 }
 0x2d8   : > { %v7959_v34 = vadd.f32 %v7958_v8, %v7957_v40 }
 0x2d9   : > { %v7986_v27 = vpop.f32.mrf.mxu1  ;;  %v7960_v9 = vpop.f32.mrf.mxu0 }
 0x2da   : > { %v6308_v5 = vadd.f32 %v7959_v34, %v6259_v11  ;;  %v7987_v7 = vadd.f32 %v7986_v27, %v7985_v10 }
 0x2db   : > { %v7988_v62 = vpop.f32.mrf.mxu1  ;;  %v7961_v37 = vpop.f32.mrf.mxu0 }
 0x2dc   : > { %v6357_v28 = vadd.f32 %v7987_v7, %v6308_v5  ;;  %v7962_v19 = vadd.f32 %v7961_v37, %v7960_v9 }
 0x2dd   : > { %v7989_v51 = vpop.f32.mrf.mxu1  ;;  %v7963_v18 = vpop.f32.mrf.mxu0 }
 0x2de   : > { %v6371_v25 = vadd.f32 %v6357_v28, %v10518_v46  ;;  %v6311_v32 = vadd.f32 %v7962_v19, %v6262_v36  ;;  %v7990_v52 = vadd.f32 %v7989_v51, %v7988_v62 }
 0x2df   : > { %v7991_v33 = vpop.f32.mrf.mxu1  ;;  %v7964_v15 = vpop.f32.mrf.mxu0 }
 0x2e0   : > { %v6382_v56 = vadd.f32 %v7097_v41, %v6371_v25  ;;  %v6360_v47 = vadd.f32 %v7990_v52, %v6311_v32  ;;  %v7965_v50 = vadd.f32 %v7964_v15, %v7963_v18 }
 0x2e1   : > { %v7992_v59 = vpop.f32.mrf.mxu1  ;;  %v7966_v55 = vpop.f32.mrf.mxu0 }
 0x2e2   : > { %6386 = vst [vmem:[%s221_s12] sm:$0xff] %v6382_v56  ;;  %v6372_v53 = vadd.f32 %v6360_v47, %v10521_v43  ;;  %v6316_v46 = vadd.f32 %v7965_v50, %v6267_v1  ;;  %v7993_v4 = vadd.f32 %v7992_v59, %v7991_v33 }
 0x2e3   : > { %v7994_v45 = vpop.f32.mrf.mxu1  ;;  %v7967_v39 = vpop.f32.mrf.mxu0 }
 0x2e4   : > { %v6383_v60 = vadd.f32 %v7097_v41, %v6372_v53  ;;  %v6365_v63 = vadd.f32 %v7993_v4, %v6316_v46  ;;  %v7968_v57 = vadd.f32 %v7967_v39, %v7966_v55 }
 0x2e5   : > { %v7995_v26 = vpop.f32.mrf.mxu1 }
 0x2e6   : > { %6387 = vst [vmem:[%s221_s12 + $0x8] sm:$0xff] %v6383_v60  ;;  %v6373_v17 = vadd.f32 %v6365_v63, %v10524_v24  ;;  %v6319_v30 = vadd.f32 %v7968_v57, %v6270_v21  ;;  %v7996_v42 = vadd.f32 %v7995_v26, %v7994_v45 }
 0x2e8   : > { %v6384_v16 = vadd.f32 %v7097_v41, %v6373_v17  ;;  %v6368_v38 = vadd.f32 %v7996_v42, %v6319_v30 }
 0x2ea   : > { %6388 = vst [vmem:[%s221_s12 + $0x10] sm:$0xff] %v6384_v16  ;;  %v6374_v48 = vadd.f32 %v6368_v38, %v10554_v44 }
 0x2ec   : > { %v6385_v43 = vadd.f32 %v7097_v41, %v6374_v48 }
 0x2ee   : > { %6389 = vst [vmem:[%s221_s12 + $0x18] sm:$0xff] %v6385_v43 }
 0x2ef PF: > { %s13_s14 = sadd.s32 1, %s8556_s14   ;;  %s10555_s12 = smov %s8552_s13 }
 0x2f0   : > { %p10_p5 = scmp.ge.s32.totalorder %s13_s14, 4   ;;  %s10556_s13 = smov %s10558_s15 }
 0x2f2   :  { %12 = sbr.rel (!%p10_p5) target bundleno = 2 (0x2), region = 68 }

</bundles_post_ra>
